<compile_context>
chip_gen: v5e
topology: v5e:2x2
jax: 0.10.0
libtpu: 0.0.40
codegen_flags: <defaults>
</compile_context>

<pallas_src>
import functools

import jax
import jax.numpy as jnp
from jax.experimental import pallas as pl
from jax.experimental.pallas import tpu as pltpu

HIGH = jax.lax.Precision.HIGHEST


# ----------------------------------------------------------------- kernel ---

def deam_kernel(x_ref, w1_ref, w2_ref, wd_ref, bd_ref, wu_ref, bu_ref,
                wf_ref, alpha_ref, o_ref, pad_ref, res_ref, *, H, W, num_cab):
    """Fused DEAM forward for one image of the batch.

    x_ref  : (1, H*W, C) f32 input image (channels-last, spatially flattened)
    w1/w2  : (num_cab, 9*C, C) bf16 RCAB conv weights (tap-major im2col layout)
    wd/bd  : (num_cab, C, C//r) / (num_cab, 1, C//r) f32 CA squeeze 1x1 conv
    wu/bu  : (num_cab, C//r, C) / (num_cab, 1, C)    f32 CA excite 1x1 conv
    wf_ref : (9*C, C) bf16 final conv weight
    alpha  : (1,) f32 PReLU scalar (SMEM)
    pad_ref: VMEM (H+2, W+2, C) bf16 zero-bordered halo scratch
    res_ref: VMEM (H*W, C) f32 running residual
    """
    HW = H * W
    C = o_ref.shape[-1]
    alpha = alpha_ref[0]

    # Zero the halo scratch once; every conv only rewrites the interior, so the
    # 1-pixel zero border persists for the whole chain.
    pad_ref[...] = jnp.zeros_like(pad_ref)

    def conv3x3(img2d_f32, w_bf16):
        # halo write (interior only), then im2col + single MXU matmul.
        pad_ref[1:H + 1, 1:W + 1, :] = (
            img2d_f32.reshape(H, W, C).astype(jnp.bfloat16))
        p = pad_ref[...]                                       # (H+2, W+2, C)
        cols = jnp.concatenate(
            [p[ky:ky + H, kx:kx + W, :] for ky in range(3) for kx in range(3)],
            axis=2)                                            # (H, W, 9C)
        return jnp.dot(cols.reshape(HW, 9 * C), w_bf16,
                       preferred_element_type=jnp.float32)     # (HW, C) f32

    res_ref[...] = x_ref[0].astype(jnp.float32)

    @pl.loop(0, num_cab)
    def _(b):
        res = res_ref[...]
        # conv3x3 -> PReLU (single shared alpha)
        a1 = conv3x3(res, w1_ref[b])
        h = jnp.where(a1 >= 0, a1, alpha * a1)
        # conv3x3
        a2 = conv3x3(h, w2_ref[b])
        # channel attention: global avg pool -> 1x1 -> ReLU -> 1x1 -> sigmoid
        pooled = jnp.mean(a2, axis=0, keepdims=True)           # (1, C)
        d = jnp.maximum(
            jnp.dot(pooled, wd_ref[b],
                    preferred_element_type=jnp.float32) + bd_ref[b], 0.0)
        u = jax.nn.sigmoid(
            jnp.dot(d, wu_ref[b],
                    preferred_element_type=jnp.float32) + bu_ref[b])
        # scale + block residual
        res_ref[...] = a2 * u + res

    # final DEAM conv3x3 + outer residual (res += x)
    acc = conv3x3(res_ref[...], wf_ref[...])
    o_ref[0] = (acc + x_ref[0].astype(jnp.float32)).astype(o_ref.dtype)


# ---------------------------------------------------------------- wrapper ---

def _full_spec(shape):
    nd = len(shape)
    return pl.BlockSpec(shape, lambda n, _nd=nd: (0,) * _nd)


def deam_forward(x, params):
    N, H, W, C = x.shape
    num_cab = params["w1"].shape[0]
    Cr = params["wd"].shape[-1]
    HW = H * W

    w1 = params["w1"].reshape(num_cab, 9 * C, C).astype(jnp.bfloat16)
    w2 = params["w2"].reshape(num_cab, 9 * C, C).astype(jnp.bfloat16)
    wf = params["w_final"].reshape(9 * C, C).astype(jnp.bfloat16)

    kernel = functools.partial(deam_kernel, H=H, W=W, num_cab=num_cab)
    out = pl.pallas_call(
        kernel,
        out_shape=jax.ShapeDtypeStruct((N, HW, C), x.dtype),
        grid=(N,),
        in_specs=[
            pl.BlockSpec((1, HW, C), lambda n: (n, 0, 0)),     # x (flattened)
            _full_spec((num_cab, 9 * C, C)),                   # w1
            _full_spec((num_cab, 9 * C, C)),                   # w2
            _full_spec((num_cab, C, Cr)),                      # wd
            _full_spec((num_cab, 1, Cr)),                      # bd
            _full_spec((num_cab, Cr, C)),                      # wu
            _full_spec((num_cab, 1, C)),                       # bu
            _full_spec((9 * C, C)),                            # w_final
            pl.BlockSpec(memory_space=pltpu.MemorySpace.SMEM),  # alpha
        ],
        out_specs=pl.BlockSpec((1, HW, C), lambda n: (n, 0, 0)),
        scratch_shapes=[
            pltpu.VMEM((H + 2, W + 2, C), jnp.bfloat16),       # halo pad
            pltpu.VMEM((HW, C), jnp.float32),                  # residual
        ],
        compiler_params=pltpu.CompilerParams(
            dimension_semantics=("parallel",)),
    )(x.reshape(N, HW, C), w1, w2, params["wd"], params["bd"],
      params["wu"], params["bu"], wf, params["alpha"])
    return out.reshape(N, H, W, C)


# ------------------------------------------------------ pure-JAX reference ---

def _conv3x3_ref(x, w):
    w4 = w.reshape(3, 3, x.shape[-1], -1)                      # HWIO
    return jax.lax.conv_general_dilated(
        x, w4, (1, 1), "SAME",
        dimension_numbers=("NHWC", "HWIO", "NHWC"), precision=HIGH)


def deam_ref(x, params):
    alpha = params["alpha"][0]
    res = x
    for b in range(params["w1"].shape[0]):
        h = _conv3x3_ref(res, params["w1"][b])
        h = jnp.where(h >= 0, h, alpha * h)
        h2 = _conv3x3_ref(h, params["w2"][b])
        pooled = jnp.mean(h2, axis=(1, 2), keepdims=True)
        d = jax.nn.relu(jnp.einsum("nijc,cr->nijr", pooled, params["wd"][b],
                                   precision=HIGH) + params["bd"][b, 0])
        u = jax.nn.sigmoid(jnp.einsum("nijr,rc->nijc", d, params["wu"][b],
                                      precision=HIGH) + params["bu"][b, 0])
        res = h2 * u + res
    return _conv3x3_ref(res, params["w_final"]) + x


# -------------------------------------------------------------------- main ---

if __name__ == "__main__":
    N, H, W, C = 2, 16, 16, 32          # small shapes (module default C=64)
    reduction, num_cab = 4, 2           # module defaults: reduction=4, num_cab=8
    Cr = C // reduction

    keys = iter(jax.random.split(jax.random.PRNGKey(0), 16))

    def nrm(shape, scale):
        return jax.random.normal(next(keys), shape, jnp.float32) * scale

    params = dict(
        w1=nrm((num_cab, 9, C, C), (9 * C) ** -0.5),
        w2=nrm((num_cab, 9, C, C), (9 * C) ** -0.5),
        wd=nrm((num_cab, C, Cr), C ** -0.5),
        bd=nrm((num_cab, 1, Cr), 0.1),
        wu=nrm((num_cab, Cr, C), Cr ** -0.5),
        bu=nrm((num_cab, 1, C), 0.1),
        w_final=nrm((9, C, C), (9 * C) ** -0.5),
        alpha=jnp.array([0.25], jnp.float32),   # PReLU init (shared scalar)
    )

    x = jax.random.normal(next(keys), (N, H, W, C), jnp.float32)

    out = jax.block_until_ready(jax.jit(deam_forward)(x, params))
    ref = deam_ref(x, params)

    assert out.shape == x.shape and out.dtype == x.dtype
    err = float(jnp.max(jnp.abs(out - ref)))
    # bf16 matmul operands vs. f32 HIGHEST reference -> loose tolerance.
    assert jnp.allclose(out, ref, atol=1e-1, rtol=1e-1), f"max abs err {err}"
    print("KERNEL_OK")
</pallas_src>

<mosaic_0001>
module attributes {stable_mosaic.version = 11 : i64} {
  func.func @deam_kernel(%arg0: i32, %arg1: memref<1x256x32xf32, #tpu.memory_space<vmem>>, %arg2: memref<2x288x32xbf16, #tpu.memory_space<vmem>>, %arg3: memref<2x288x32xbf16, #tpu.memory_space<vmem>>, %arg4: memref<2x32x8xf32, #tpu.memory_space<vmem>>, %arg5: memref<2x1x8xf32, #tpu.memory_space<vmem>>, %arg6: memref<2x8x32xf32, #tpu.memory_space<vmem>>, %arg7: memref<2x1x32xf32, #tpu.memory_space<vmem>>, %arg8: memref<288x32xbf16, #tpu.memory_space<vmem>>, %arg9: memref<1xf32, #tpu.memory_space<smem>>, %arg10: memref<1x256x32xf32, #tpu.memory_space<vmem>>, %arg11: memref<18x18x32xbf16, #tpu.memory_space<vmem>>, %arg12: memref<256x32xf32, #tpu.memory_space<vmem>>) attributes {dimension_semantics = [#tpu.dimension_semantics<parallel>], iteration_bounds = array<i64: 2>, scalar_prefetch = 0 : i64, scratch_operands = 2 : i64, tpu.core_type = #tpu.core_type<tc>, window_params = [{transform_indices = @transform_0, window_bounds = array<i64: 1, 256, 32>}, {pipeline_mode = #tpu.pipeline_mode<synchronous>, transform_indices = @transform_1, window_bounds = array<i64: 2, 288, 32>}, {pipeline_mode = #tpu.pipeline_mode<synchronous>, transform_indices = @transform_2, window_bounds = array<i64: 2, 288, 32>}, {pipeline_mode = #tpu.pipeline_mode<synchronous>, transform_indices = @transform_3, window_bounds = array<i64: 2, 32, 8>}, {pipeline_mode = #tpu.pipeline_mode<synchronous>, transform_indices = @transform_4, window_bounds = array<i64: 2, 1, 8>}, {pipeline_mode = #tpu.pipeline_mode<synchronous>, transform_indices = @transform_5, window_bounds = array<i64: 2, 8, 32>}, {pipeline_mode = #tpu.pipeline_mode<synchronous>, transform_indices = @transform_6, window_bounds = array<i64: 2, 1, 32>}, {pipeline_mode = #tpu.pipeline_mode<synchronous>, transform_indices = @transform_7, window_bounds = array<i64: 288, 32>}, {transform_indices = @transform_8, window_bounds = array<i64: 1>}, {transform_indices = @transform_9, window_bounds = array<i64: 1, 256, 32>}]} {
    %c0 = arith.constant 0 : index
    %0 = memref.load %arg9[%c0] : memref<1xf32, #tpu.memory_space<smem>>
    %cst = arith.constant 0.000000e+00 : bf16
    %1 = vector.broadcast %cst : bf16 to vector<18x18x32xbf16>
    %c0_0 = arith.constant 0 : index
    %c0_1 = arith.constant 0 : index
    %c0_2 = arith.constant 0 : index
    %2 = vector.load %arg11[%c0_0, %c0_1, %c0_2] : memref<18x18x32xbf16, #tpu.memory_space<vmem>>, vector<18x18x32xbf16>
    tpu.vector_store %arg11[%c0_0, %c0_1, %c0_2], %1 {strides = array<i32>} : memref<18x18x32xbf16, #tpu.memory_space<vmem>>, vector<18x18x32xbf16>,
    %c0_3 = arith.constant 0 : index
    %c0_4 = arith.constant 0 : index
    %c0_5 = arith.constant 0 : index
    %3 = vector.load %arg1[%c0_3, %c0_4, %c0_5] : memref<1x256x32xf32, #tpu.memory_space<vmem>>, vector<1x256x32xf32>
    %4 = vector.shape_cast %3 : vector<1x256x32xf32> to vector<256x32xf32>
    %c0_6 = arith.constant 0 : index
    %c0_7 = arith.constant 0 : index
    %5 = vector.load %arg12[%c0_6, %c0_7] : memref<256x32xf32, #tpu.memory_space<vmem>>, vector<256x32xf32>
    tpu.vector_store %arg12[%c0_6, %c0_7], %4 {strides = array<i32>} : memref<256x32xf32, #tpu.memory_space<vmem>>, vector<256x32xf32>,
    %c0_i32 = arith.constant 0 : i32
    %c2_i32 = arith.constant 2 : i32
    %6 = arith.addi %c0_i32, %c2_i32 : i32
    %c1_i32 = arith.constant 1 : i32
    scf.for %arg13 = %c0_i32 to %6 step %c1_i32  : i32 {
      %c1_i32_25 = arith.constant 1 : i32
      %31 = arith.muli %arg13, %c1_i32_25 : i32
      %c0_i32_26 = arith.constant 0 : i32
      %32 = arith.addi %c0_i32_26, %31 : i32
      %c0_27 = arith.constant 0 : index
      %c0_28 = arith.constant 0 : index
      %33 = vector.load %arg12[%c0_27, %c0_28] : memref<256x32xf32, #tpu.memory_space<vmem>>, vector<256x32xf32>
      %34 = arith.index_cast %32 : i32 to index
      %c0_29 = arith.constant 0 : index
      %c0_30 = arith.constant 0 : index
      %35 = vector.load %arg2[%34, %c0_29, %c0_30] : memref<2x288x32xbf16, #tpu.memory_space<vmem>>, vector<1x288x32xbf16>
      %36 = vector.shape_cast %35 : vector<1x288x32xbf16> to vector<288x32xbf16>
      %37 = vector.shape_cast %33 : vector<256x32xf32> to vector<16x16x32xf32>
      %38 = arith.truncf %37 : vector<16x16x32xf32> to vector<16x16x32xbf16>
      %c1_31 = arith.constant 1 : index
      %c1_32 = arith.constant 1 : index
      %c0_33 = arith.constant 0 : index
      %39 = vector.load %arg11[%c1_31, %c1_32, %c0_33] : memref<18x18x32xbf16, #tpu.memory_space<vmem>>, vector<16x16x32xbf16>
      tpu.vector_store %arg11[%c1_31, %c1_32, %c0_33], %38 {strides = array<i32>} : memref<18x18x32xbf16, #tpu.memory_space<vmem>>, vector<16x16x32xbf16>,
      %c0_34 = arith.constant 0 : index
      %c0_35 = arith.constant 0 : index
      %c0_36 = arith.constant 0 : index
      %40 = vector.load %arg11[%c0_34, %c0_35, %c0_36] : memref<18x18x32xbf16, #tpu.memory_space<vmem>>, vector<18x18x32xbf16>
      %41 = vector.extract_strided_slice %40 {offsets = [0, 0, 0], sizes = [16, 16, 32], strides = [1, 1, 1]} : vector<18x18x32xbf16> to vector<16x16x32xbf16>
      %42 = vector.extract_strided_slice %40 {offsets = [0, 1, 0], sizes = [16, 16, 32], strides = [1, 1, 1]} : vector<18x18x32xbf16> to vector<16x16x32xbf16>
      %43 = vector.extract_strided_slice %40 {offsets = [0, 2, 0], sizes = [16, 16, 32], strides = [1, 1, 1]} : vector<18x18x32xbf16> to vector<16x16x32xbf16>
      %44 = vector.extract_strided_slice %40 {offsets = [1, 0, 0], sizes = [16, 16, 32], strides = [1, 1, 1]} : vector<18x18x32xbf16> to vector<16x16x32xbf16>
      %45 = vector.extract_strided_slice %40 {offsets = [1, 1, 0], sizes = [16, 16, 32], strides = [1, 1, 1]} : vector<18x18x32xbf16> to vector<16x16x32xbf16>
      %46 = vector.extract_strided_slice %40 {offsets = [1, 2, 0], sizes = [16, 16, 32], strides = [1, 1, 1]} : vector<18x18x32xbf16> to vector<16x16x32xbf16>
      %47 = vector.extract_strided_slice %40 {offsets = [2, 0, 0], sizes = [16, 16, 32], strides = [1, 1, 1]} : vector<18x18x32xbf16> to vector<16x16x32xbf16>
      %48 = vector.extract_strided_slice %40 {offsets = [2, 1, 0], sizes = [16, 16, 32], strides = [1, 1, 1]} : vector<18x18x32xbf16> to vector<16x16x32xbf16>
      %49 = vector.extract_strided_slice %40 {offsets = [2, 2, 0], sizes = [16, 16, 32], strides = [1, 1, 1]} : vector<18x18x32xbf16> to vector<16x16x32xbf16>
      %50 = tpu.concatenate %41, %42, %43, %44, %45, %46, %47, %48, %49 in 2 : vector<16x16x32xbf16>, vector<16x16x32xbf16>, vector<16x16x32xbf16>, vector<16x16x32xbf16>, vector<16x16x32xbf16>, vector<16x16x32xbf16>, vector<16x16x32xbf16>, vector<16x16x32xbf16>, vector<16x16x32xbf16> -> vector<16x16x288xbf16>
      %51 = vector.shape_cast %50 : vector<16x16x288xbf16> to vector<256x288xbf16>
      %cst_37 = arith.constant dense<0.000000e+00> : vector<256x32xf32>
      %52 = tpu.matmul %51, %36, %cst_37 {dimension_numbers = #tpu.dot_dimension_numbers<[1], [0], [0], [1], [0, 0, 1, 1], [], []>} : vector<256x288xbf16>, vector<288x32xbf16>, vector<256x32xf32> -> vector<256x32xf32>
      %cst_38 = arith.constant 0.000000e+00 : f32
      %53 = vector.broadcast %cst_38 : f32 to vector<256x32xf32>
      %54 = arith.cmpf oge, %52, %53 : vector<256x32xf32>
      %55 = vector.broadcast %0 : f32 to vector<256x32xf32>
      %56 = arith.mulf %55, %52 : vector<256x32xf32>
      %57 = arith.select %54, %52, %56 : vector<256x32xi1>, vector<256x32xf32>
      %58 = arith.index_cast %32 : i32 to index
      %c0_39 = arith.constant 0 : index
      %c0_40 = arith.constant 0 : index
      %59 = vector.load %arg3[%58, %c0_39, %c0_40] : memref<2x288x32xbf16, #tpu.memory_space<vmem>>, vector<1x288x32xbf16>
      %60 = vector.shape_cast %59 : vector<1x288x32xbf16> to vector<288x32xbf16>
      %61 = vector.shape_cast %57 : vector<256x32xf32> to vector<16x16x32xf32>
      %62 = arith.truncf %61 : vector<16x16x32xf32> to vector<16x16x32xbf16>
      %c1_41 = arith.constant 1 : index
      %c1_42 = arith.constant 1 : index
      %c0_43 = arith.constant 0 : index
      %63 = vector.load %arg11[%c1_41, %c1_42, %c0_43] : memref<18x18x32xbf16, #tpu.memory_space<vmem>>, vector<16x16x32xbf16>
      tpu.vector_store %arg11[%c1_41, %c1_42, %c0_43], %62 {strides = array<i32>} : memref<18x18x32xbf16, #tpu.memory_space<vmem>>, vector<16x16x32xbf16>,
      %c0_44 = arith.constant 0 : index
      %c0_45 = arith.constant 0 : index
      %c0_46 = arith.constant 0 : index
      %64 = vector.load %arg11[%c0_44, %c0_45, %c0_46] : memref<18x18x32xbf16, #tpu.memory_space<vmem>>, vector<18x18x32xbf16>
      %65 = vector.extract_strided_slice %64 {offsets = [0, 0, 0], sizes = [16, 16, 32], strides = [1, 1, 1]} : vector<18x18x32xbf16> to vector<16x16x32xbf16>
      %66 = vector.extract_strided_slice %64 {offsets = [0, 1, 0], sizes = [16, 16, 32], strides = [1, 1, 1]} : vector<18x18x32xbf16> to vector<16x16x32xbf16>
      %67 = vector.extract_strided_slice %64 {offsets = [0, 2, 0], sizes = [16, 16, 32], strides = [1, 1, 1]} : vector<18x18x32xbf16> to vector<16x16x32xbf16>
      %68 = vector.extract_strided_slice %64 {offsets = [1, 0, 0], sizes = [16, 16, 32], strides = [1, 1, 1]} : vector<18x18x32xbf16> to vector<16x16x32xbf16>
      %69 = vector.extract_strided_slice %64 {offsets = [1, 1, 0], sizes = [16, 16, 32], strides = [1, 1, 1]} : vector<18x18x32xbf16> to vector<16x16x32xbf16>
      %70 = vector.extract_strided_slice %64 {offsets = [1, 2, 0], sizes = [16, 16, 32], strides = [1, 1, 1]} : vector<18x18x32xbf16> to vector<16x16x32xbf16>
      %71 = vector.extract_strided_slice %64 {offsets = [2, 0, 0], sizes = [16, 16, 32], strides = [1, 1, 1]} : vector<18x18x32xbf16> to vector<16x16x32xbf16>
      %72 = vector.extract_strided_slice %64 {offsets = [2, 1, 0], sizes = [16, 16, 32], strides = [1, 1, 1]} : vector<18x18x32xbf16> to vector<16x16x32xbf16>
      %73 = vector.extract_strided_slice %64 {offsets = [2, 2, 0], sizes = [16, 16, 32], strides = [1, 1, 1]} : vector<18x18x32xbf16> to vector<16x16x32xbf16>
      %74 = tpu.concatenate %65, %66, %67, %68, %69, %70, %71, %72, %73 in 2 : vector<16x16x32xbf16>, vector<16x16x32xbf16>, vector<16x16x32xbf16>, vector<16x16x32xbf16>, vector<16x16x32xbf16>, vector<16x16x32xbf16>, vector<16x16x32xbf16>, vector<16x16x32xbf16>, vector<16x16x32xbf16> -> vector<16x16x288xbf16>
      %75 = vector.shape_cast %74 : vector<16x16x288xbf16> to vector<256x288xbf16>
      %cst_47 = arith.constant dense<0.000000e+00> : vector<256x32xf32>
      %76 = tpu.matmul %75, %60, %cst_47 {dimension_numbers = #tpu.dot_dimension_numbers<[1], [0], [0], [1], [0, 0, 1, 1], [], []>} : vector<256x288xbf16>, vector<288x32xbf16>, vector<256x32xf32> -> vector<256x32xf32>
      %cst_48 = arith.constant dense<0.000000e+00> : vector<32xf32>
      %77 = vector.multi_reduction <add>, %76, %cst_48 [0] : vector<256x32xf32> to vector<32xf32>
      %78 = vector.shape_cast %77 : vector<32xf32> to vector<1x32xf32>
      %cst_49 = arith.constant 2.560000e+02 : f32
      %79 = vector.broadcast %cst_49 : f32 to vector<1x32xf32>
      %80 = arith.divf %78, %79 : vector<1x32xf32>
      %81 = arith.index_cast %32 : i32 to index
      %c0_50 = arith.constant 0 : index
      %c0_51 = arith.constant 0 : index
      %82 = vector.load %arg4[%81, %c0_50, %c0_51] : memref<2x32x8xf32, #tpu.memory_space<vmem>>, vector<1x32x8xf32>
      %83 = vector.shape_cast %82 : vector<1x32x8xf32> to vector<32x8xf32>
      %cst_52 = arith.constant dense<0.000000e+00> : vector<1x8xf32>
      %84 = tpu.matmul %80, %83, %cst_52 {dimension_numbers = #tpu.dot_dimension_numbers<[1], [0], [0], [1], [0, 0, 1, 1], [], []>} : vector<1x32xf32>, vector<32x8xf32>, vector<1x8xf32> -> vector<1x8xf32>
      %85 = arith.index_cast %32 : i32 to index
      %c0_53 = arith.constant 0 : index
      %c0_54 = arith.constant 0 : index
      %86 = vector.load %arg5[%85, %c0_53, %c0_54] : memref<2x1x8xf32, #tpu.memory_space<vmem>>, vector<1x1x8xf32>
      %87 = vector.shape_cast %86 : vector<1x1x8xf32> to vector<1x8xf32>
      %88 = arith.addf %84, %87 : vector<1x8xf32>
      %cst_55 = arith.constant 0.000000e+00 : f32
      %89 = vector.broadcast %cst_55 : f32 to vector<1x8xf32>
      %90 = arith.maximumf %88, %89 : vector<1x8xf32>
      %91 = arith.index_cast %32 : i32 to index
      %c0_56 = arith.constant 0 : index
      %c0_57 = arith.constant 0 : index
      %92 = vector.load %arg6[%91, %c0_56, %c0_57] : memref<2x8x32xf32, #tpu.memory_space<vmem>>, vector<1x8x32xf32>
      %93 = vector.shape_cast %92 : vector<1x8x32xf32> to vector<8x32xf32>
      %cst_58 = arith.constant dense<0.000000e+00> : vector<1x32xf32>
      %94 = tpu.matmul %90, %93, %cst_58 {dimension_numbers = #tpu.dot_dimension_numbers<[1], [0], [0], [1], [0, 0, 1, 1], [], []>} : vector<1x8xf32>, vector<8x32xf32>, vector<1x32xf32> -> vector<1x32xf32>
      %95 = arith.index_cast %32 : i32 to index
      %c0_59 = arith.constant 0 : index
      %c0_60 = arith.constant 0 : index
      %96 = vector.load %arg7[%95, %c0_59, %c0_60] : memref<2x1x32xf32, #tpu.memory_space<vmem>>, vector<1x1x32xf32>
      %97 = vector.shape_cast %96 : vector<1x1x32xf32> to vector<1x32xf32>
      %98 = arith.addf %94, %97 : vector<1x32xf32>
      %99 = arith.negf %98 : vector<1x32xf32>
      %100 = math.exp %99 : vector<1x32xf32>
      %cst_61 = arith.constant 1.000000e+00 : f32
      %101 = vector.broadcast %cst_61 : f32 to vector<1x32xf32>
      %102 = arith.addf %101, %100 : vector<1x32xf32>
      %103 = arith.divf %101, %102 : vector<1x32xf32>
      %104 = vector.broadcast %103 : vector<1x32xf32> to vector<256x32xf32>
      %105 = arith.mulf %76, %104 : vector<256x32xf32>
      %106 = arith.addf %105, %33 : vector<256x32xf32>
      %c0_62 = arith.constant 0 : index
      %c0_63 = arith.constant 0 : index
      %107 = vector.load %arg12[%c0_62, %c0_63] : memref<256x32xf32, #tpu.memory_space<vmem>>, vector<256x32xf32>
      tpu.vector_store %arg12[%c0_62, %c0_63], %106 {strides = array<i32>} : memref<256x32xf32, #tpu.memory_space<vmem>>, vector<256x32xf32>,
    }
    %c2_i32_8 = arith.constant 2 : i32
    %c0_9 = arith.constant 0 : index
    %c0_10 = arith.constant 0 : index
    %7 = vector.load %arg12[%c0_9, %c0_10] : memref<256x32xf32, #tpu.memory_space<vmem>>, vector<256x32xf32>
    %c0_11 = arith.constant 0 : index
    %c0_12 = arith.constant 0 : index
    %8 = vector.load %arg8[%c0_11, %c0_12] : memref<288x32xbf16, #tpu.memory_space<vmem>>, vector<288x32xbf16>
    %9 = vector.shape_cast %7 : vector<256x32xf32> to vector<16x16x32xf32>
    %10 = arith.truncf %9 : vector<16x16x32xf32> to vector<16x16x32xbf16>
    %c1 = arith.constant 1 : index
    %c1_13 = arith.constant 1 : index
    %c0_14 = arith.constant 0 : index
    %11 = vector.load %arg11[%c1, %c1_13, %c0_14] : memref<18x18x32xbf16, #tpu.memory_space<vmem>>, vector<16x16x32xbf16>
    tpu.vector_store %arg11[%c1, %c1_13, %c0_14], %10 {strides = array<i32>} : memref<18x18x32xbf16, #tpu.memory_space<vmem>>, vector<16x16x32xbf16>,
    %c0_15 = arith.constant 0 : index
    %c0_16 = arith.constant 0 : index
    %c0_17 = arith.constant 0 : index
    %12 = vector.load %arg11[%c0_15, %c0_16, %c0_17] : memref<18x18x32xbf16, #tpu.memory_space<vmem>>, vector<18x18x32xbf16>
    %13 = vector.extract_strided_slice %12 {offsets = [0, 0, 0], sizes = [16, 16, 32], strides = [1, 1, 1]} : vector<18x18x32xbf16> to vector<16x16x32xbf16>
    %14 = vector.extract_strided_slice %12 {offsets = [0, 1, 0], sizes = [16, 16, 32], strides = [1, 1, 1]} : vector<18x18x32xbf16> to vector<16x16x32xbf16>
    %15 = vector.extract_strided_slice %12 {offsets = [0, 2, 0], sizes = [16, 16, 32], strides = [1, 1, 1]} : vector<18x18x32xbf16> to vector<16x16x32xbf16>
    %16 = vector.extract_strided_slice %12 {offsets = [1, 0, 0], sizes = [16, 16, 32], strides = [1, 1, 1]} : vector<18x18x32xbf16> to vector<16x16x32xbf16>
    %17 = vector.extract_strided_slice %12 {offsets = [1, 1, 0], sizes = [16, 16, 32], strides = [1, 1, 1]} : vector<18x18x32xbf16> to vector<16x16x32xbf16>
    %18 = vector.extract_strided_slice %12 {offsets = [1, 2, 0], sizes = [16, 16, 32], strides = [1, 1, 1]} : vector<18x18x32xbf16> to vector<16x16x32xbf16>
    %19 = vector.extract_strided_slice %12 {offsets = [2, 0, 0], sizes = [16, 16, 32], strides = [1, 1, 1]} : vector<18x18x32xbf16> to vector<16x16x32xbf16>
    %20 = vector.extract_strided_slice %12 {offsets = [2, 1, 0], sizes = [16, 16, 32], strides = [1, 1, 1]} : vector<18x18x32xbf16> to vector<16x16x32xbf16>
    %21 = vector.extract_strided_slice %12 {offsets = [2, 2, 0], sizes = [16, 16, 32], strides = [1, 1, 1]} : vector<18x18x32xbf16> to vector<16x16x32xbf16>
    %22 = tpu.concatenate %13, %14, %15, %16, %17, %18, %19, %20, %21 in 2 : vector<16x16x32xbf16>, vector<16x16x32xbf16>, vector<16x16x32xbf16>, vector<16x16x32xbf16>, vector<16x16x32xbf16>, vector<16x16x32xbf16>, vector<16x16x32xbf16>, vector<16x16x32xbf16>, vector<16x16x32xbf16> -> vector<16x16x288xbf16>
    %23 = vector.shape_cast %22 : vector<16x16x288xbf16> to vector<256x288xbf16>
    %cst_18 = arith.constant dense<0.000000e+00> : vector<256x32xf32>
    %24 = tpu.matmul %23, %8, %cst_18 {dimension_numbers = #tpu.dot_dimension_numbers<[1], [0], [0], [1], [0, 0, 1, 1], [], []>} : vector<256x288xbf16>, vector<288x32xbf16>, vector<256x32xf32> -> vector<256x32xf32>
    %c0_19 = arith.constant 0 : index
    %c0_20 = arith.constant 0 : index
    %c0_21 = arith.constant 0 : index
    %25 = vector.load %arg1[%c0_19, %c0_20, %c0_21] : memref<1x256x32xf32, #tpu.memory_space<vmem>>, vector<1x256x32xf32>
    %26 = vector.shape_cast %25 : vector<1x256x32xf32> to vector<256x32xf32>
    %27 = arith.addf %24, %26 : vector<256x32xf32>
    %c0_22 = arith.constant 0 : index
    %c0_23 = arith.constant 0 : index
    %c0_24 = arith.constant 0 : index
    %28 = vector.load %arg10[%c0_22, %c0_23, %c0_24] : memref<1x256x32xf32, #tpu.memory_space<vmem>>, vector<1x256x32xf32>
    %29 = vector.shape_cast %28 : vector<1x256x32xf32> to vector<256x32xf32>
    %30 = vector.shape_cast %27 : vector<256x32xf32> to vector<1x256x32xf32>
    tpu.vector_store %arg10[%c0_22, %c0_23, %c0_24], %30 {strides = array<i32>} : memref<1x256x32xf32, #tpu.memory_space<vmem>>, vector<1x256x32xf32>,
    return
  }
  func.func @transform_0(%arg0: i32) -> (i32, i32, i32) {
    %c0_i32 = arith.constant 0 : i32
    %c0_i32_0 = arith.constant 0 : i32
    %c0_i32_1 = arith.constant 0 : i32
    return %arg0, %c0_i32, %c0_i32_0 : i32, i32, i32
  }
  func.func @transform_1(%arg0: i32) -> (i32, i32, i32) {
    %c0_i32 = arith.constant 0 : i32
    %c0_i32_0 = arith.constant 0 : i32
    %c0_i32_1 = arith.constant 0 : i32
    %c0_i32_2 = arith.constant 0 : i32
    return %c0_i32, %c0_i32_0, %c0_i32_1 : i32, i32, i32
  }
  func.func @transform_2(%arg0: i32) -> (i32, i32, i32) {
    %c0_i32 = arith.constant 0 : i32
    %c0_i32_0 = arith.constant 0 : i32
    %c0_i32_1 = arith.constant 0 : i32
    %c0_i32_2 = arith.constant 0 : i32
    return %c0_i32, %c0_i32_0, %c0_i32_1 : i32, i32, i32
  }
  func.func @transform_3(%arg0: i32) -> (i32, i32, i32) {
    %c0_i32 = arith.constant 0 : i32
    %c0_i32_0 = arith.constant 0 : i32
    %c0_i32_1 = arith.constant 0 : i32
    %c0_i32_2 = arith.constant 0 : i32
    return %c0_i32, %c0_i32_0, %c0_i32_1 : i32, i32, i32
  }
  func.func @transform_4(%arg0: i32) -> (i32, i32, i32) {
    %c0_i32 = arith.constant 0 : i32
    %c0_i32_0 = arith.constant 0 : i32
    %c0_i32_1 = arith.constant 0 : i32
    %c0_i32_2 = arith.constant 0 : i32
    return %c0_i32, %c0_i32_0, %c0_i32_1 : i32, i32, i32
  }
  func.func @transform_5(%arg0: i32) -> (i32, i32, i32) {
    %c0_i32 = arith.constant 0 : i32
    %c0_i32_0 = arith.constant 0 : i32
    %c0_i32_1 = arith.constant 0 : i32
    %c0_i32_2 = arith.constant 0 : i32
    return %c0_i32, %c0_i32_0, %c0_i32_1 : i32, i32, i32
  }
  func.func @transform_6(%arg0: i32) -> (i32, i32, i32) {
    %c0_i32 = arith.constant 0 : i32
    %c0_i32_0 = arith.constant 0 : i32
    %c0_i32_1 = arith.constant 0 : i32
    %c0_i32_2 = arith.constant 0 : i32
    return %c0_i32, %c0_i32_0, %c0_i32_1 : i32, i32, i32
  }
  func.func @transform_7(%arg0: i32) -> (i32, i32) {
    %c0_i32 = arith.constant 0 : i32
    %c0_i32_0 = arith.constant 0 : i32
    %c0_i32_1 = arith.constant 0 : i32
    return %c0_i32, %c0_i32_0 : i32, i32
  }
  func.func @transform_8(%arg0: i32) -> i32 {
    %c0_i32 = arith.constant 0 : i32
    %c0_i32_0 = arith.constant 0 : i32
    return %c0_i32 : i32
  }
  func.func @transform_9(%arg0: i32) -> (i32, i32, i32) {
    %c0_i32 = arith.constant 0 : i32
    %c0_i32_0 = arith.constant 0 : i32
    %c0_i32_1 = arith.constant 0 : i32
    return %arg0, %c0_i32, %c0_i32_0 : i32, i32, i32
  }
}

</mosaic_0001>

<bundles_post_ra>
// kernel: deam_forward.1
= control target key start
LH: loop header
LB: loop body
LE: loop exit
PB: predicated region body
PF: predicated region fallthrough
CT: control target
= control target key end

     0   :  { %s10641_s0 = inlined_call_operand.vmem [shape: f32[2,256,32], index: 0, kind: input, shape index: {}]   ;;  %s10642_s1 = inlined_call_operand.vmem [shape: bf16[2,288,32], index: 1, kind: input, shape index: {}]   ;;  %s10643_s2 = inlined_call_operand.vmem [shape: bf16[2,288,32], index: 2, kind: input, shape index: {}]   ;;  %s10644_s3 = inlined_call_operand.vmem [shape: f32[2,32,8], index: 3, kind: input, shape index: {}]   ;;  %s10645_s4 = inlined_call_operand.vmem [shape: f32[2,1,8], index: 4, kind: input, shape index: {}]   ;;  %s10646_s5 = inlined_call_operand.vmem [shape: f32[2,8,32], index: 5, kind: input, shape index: {}]   ;;  %s10647_s6 = inlined_call_operand.vmem [shape: f32[2,1,32], index: 6, kind: input, shape index: {}]   ;;  %s10648_s7 = inlined_call_operand.vmem [shape: bf16[288,32], index: 7, kind: input, shape index: {}]   ;;  %s10649_s8 = inlined_call_operand.<no memory space> [shape: f32[1], index: 8, kind: input, shape index: {}]   ;;  %s10650_s9 = inlined_call_operand.hbm [shape: f32[2,256,32], index: 9, kind: output, shape index: {}]  }
   0x1   :  { %14 = sst [smem:[#allocation4]] %s10649_s8 }
   0x2   :  { %15 = vsyncpa [#allocation6], 0 }
   0x3   :  { %17 = vsyncpa [#allocation6 + $0x1], 0  ;;  %s7429_s11 = smov 0   ;;  %s7431_s12 = smov 0  }
   0x4   :  { %s7433_s13 = smov 0   ;;  %s7435_s14 = smov 0  }
   0x5 LB: > { %s7450_s8 = sadd.s32 4294967295, %s7360_s14   ;;  %s6533_s15 = sadd.s32 4294967294, %s7360_s14   ;;  %s7360_s14 = sphi %s7435_s14, %s10684_s14   ;;  %s7356_s13 = sphi %s7433_s13, %s10683_s13   ;;  %s7352_s12 = sphi %s7431_s12, %s10682_s12   ;;  %s7348_s11 = sphi %s7429_s11, %s10681_s11  }
   0x6   : > { %s7454_s16 = sadd.s32 1, %s7360_s14   ;;  %s224_s17 = sadd.s32 1, %s7356_s13 }
   0x7   : > { %s221_s18 = ssub.s32 %s7360_s14, %s7454_s16  ;;  %p234_p0 = scmp.ne.s32.totalorder %s7356_s13, %s7352_s12 }
   0x8   : > { %p222_p1 = scmp.eq.s32.totalorder %s221_s18, 0  ;;  %p235_p2 = scmp.eq.s32.totalorder %s7450_s8, 1 }
   0x9   : > { %p240_p3 = scmp.ne.s32.totalorder %s7352_s12, %s7348_s11  ;;  %p241_p4 = scmp.eq.s32.totalorder %s6533_s15, 1 }
   0xa   : > { %s7465_s19 = scalar_select %p222_p1, %s7356_s13, %s224_s17  }
   0xb   : > { %p7467_p5 = por %p235_p2, %p234_p0  ;;  %p7471_p6 = por %p241_p4, %p240_p3 }
   0xc   : > { %p6536_p7 = scmp.ge.s32.totalorder %s7360_s14, 1  ;;  %p291_p8 = scmp.lt.s32.totalorder %s7360_s14, 3 }
   0xe   : > { %p292_p9 = pnand %p6536_p7, %p291_p8 }
  0x10   : > { %295 = sbr.rel (%p292_p9) target bundleno = 1950 (0x79e), region = 56 }
  0x15   : > { %s324_s22 = sand.u32 1, %s7352_s12   ;;  %s7478_s23 = sld [smem:[#allocation4]]  ;;  %vm334_vm0 = vcmask 257024   ;;  %v7366_v0 = vmov 0   ;;  %vm337_vm1 = vcmask 253952   ;;  %vm422_vm2 = vcmask 261120  }
  0x16   : > { %s7482_s24 = sshll.u32 %s324_s22, 8  ;;  %335 = vst.msk [vmem:[#allocation2] sm:$0xf] %vm334_vm0, %v7366_v0  ;;  %p327_p10 = scmp.lt.s32.totalorder %s7450_s8, 1 }
  0x17   : > { %336 = vst.msk [vmem:[#allocation2 + $0x4] sm:$0xf] %vm334_vm0, %v7366_v0  ;;  %s7610_s30 = scalar_lea.vmem [#allocation5], %s7482_s24  ;;  %s7612_s10 = smov 0  }
  0x18   : > { %339 = vst.msk [vmem:[#allocation2 + $0xc] sm:$0xf] %vm334_vm0, %v7366_v0  ;;  %s328_s25 = scalar_select %p327_p10, %s7450_s8, 1 }
  0x19   : > { %340 = vst.msk [vmem:[#allocation2 + $0x10] sm:$0xf] %vm334_vm0, %v7366_v0 }
  0x1a   : > { %342 = vst.msk [vmem:[#allocation2 + $0x18] sm:$0xf] %vm334_vm0, %v7366_v0  ;;  %s7032_s26 = sshll.u32 %s328_s25, 8 }
  0x1b   : > { %343 = vst.msk [vmem:[#allocation2 + $0x1c] sm:$0xf] %vm334_vm0, %v7366_v0  ;;  %s7538_s29 = scalar_lea.vmem %s10641_s0, %s7032_s26 }
  0x1c   : > { %345 = vst.msk [vmem:[#allocation2 + $0x24] sm:$0xf] %vm334_vm0, %v7366_v0  ;;  %v390_v1 = vld [vmem:[%s7538_s29] sm:$0xff]  ;;  %v391_v2 = vld [vmem:[%s7538_s29 + $0x8] sm:$0xff]  ;;  %v392_v3 = vld [vmem:[%s7538_s29 + $0x10] sm:$0xff] }
  0x1d   : > { %346 = vst.msk [vmem:[#allocation2 + $0x28] sm:$0xf] %vm334_vm0, %v7366_v0  ;;  %v393_v4 = vld [vmem:[%s7538_s29 + $0x18] sm:$0xff]  ;;  %v394_v5 = vld [vmem:[%s7538_s29 + $0x20] sm:$0xff]  ;;  %v395_v6 = vld [vmem:[%s7538_s29 + $0x28] sm:$0xff] }
  0x1e   : > { %348 = vst.msk [vmem:[#allocation2 + $0x30] sm:$0xf] %vm334_vm0, %v7366_v0  ;;  %v396_v7 = vld [vmem:[%s7538_s29 + $0x30] sm:$0xff]  ;;  %v397_v8 = vld [vmem:[%s7538_s29 + $0x38] sm:$0xff]  ;;  %v398_v9 = vld [vmem:[%s7538_s29 + $0x40] sm:$0xff] }
  0x1f   : > { %349 = vst.msk [vmem:[#allocation2 + $0x34] sm:$0xf] %vm334_vm0, %v7366_v0  ;;  %v399_v10 = vld [vmem:[%s7538_s29 + $0x48] sm:$0xff]  ;;  %v400_v11 = vld [vmem:[%s7538_s29 + $0x50] sm:$0xff]  ;;  %v401_v12 = vld [vmem:[%s7538_s29 + $0x58] sm:$0xff] }
  0x20   : > { %351 = vst.msk [vmem:[#allocation2 + $0x3c] sm:$0xf] %vm334_vm0, %v7366_v0  ;;  %v402_v13 = vld [vmem:[%s7538_s29 + $0x60] sm:$0xff]  ;;  %v403_v14 = vld [vmem:[%s7538_s29 + $0x68] sm:$0xff]  ;;  %v404_v15 = vld [vmem:[%s7538_s29 + $0x70] sm:$0xff] }
  0x21   : > { %352 = vst.msk [vmem:[#allocation2 + $0x40] sm:$0xf] %vm334_vm0, %v7366_v0  ;;  %v405_v16 = vld [vmem:[%s7538_s29 + $0x78] sm:$0xff]  ;;  %v406_v17 = vld [vmem:[%s7538_s29 + $0x80] sm:$0xff]  ;;  %v407_v18 = vld [vmem:[%s7538_s29 + $0x88] sm:$0xff] }
  0x22   : > { %354 = vst.msk [vmem:[#allocation2 + $0x48] sm:$0xf] %vm334_vm0, %v7366_v0  ;;  %v408_v19 = vld [vmem:[%s7538_s29 + $0x90] sm:$0xff]  ;;  %v409_v20 = vld [vmem:[%s7538_s29 + $0x98] sm:$0xff]  ;;  %v410_v21 = vld [vmem:[%s7538_s29 + $0xa0] sm:$0xff] }
  0x23   : > { %355 = vst.msk [vmem:[#allocation2 + $0x4c] sm:$0xf] %vm334_vm0, %v7366_v0  ;;  %v411_v22 = vld [vmem:[%s7538_s29 + $0xa8] sm:$0xff]  ;;  %v412_v23 = vld [vmem:[%s7538_s29 + $0xb0] sm:$0xff]  ;;  %v413_v24 = vld [vmem:[%s7538_s29 + $0xb8] sm:$0xff] }
  0x24   : > { %357 = vst.msk [vmem:[#allocation2 + $0x54] sm:$0xf] %vm334_vm0, %v7366_v0  ;;  %v414_v25 = vld [vmem:[%s7538_s29 + $0xc0] sm:$0xff]  ;;  %v415_v26 = vld [vmem:[%s7538_s29 + $0xc8] sm:$0xff]  ;;  %v416_v27 = vld [vmem:[%s7538_s29 + $0xd0] sm:$0xff] }
  0x25   : > { %358 = vst.msk [vmem:[#allocation2 + $0x58] sm:$0xf] %vm334_vm0, %v7366_v0  ;;  %v417_v28 = vld [vmem:[%s7538_s29 + $0xd8] sm:$0xff]  ;;  %v418_v29 = vld [vmem:[%s7538_s29 + $0xe0] sm:$0xff]  ;;  %v419_v30 = vld [vmem:[%s7538_s29 + $0xe8] sm:$0xff] }
  0x26   : > { %360 = vst.msk [vmem:[#allocation2 + $0x60] sm:$0xf] %vm334_vm0, %v7366_v0  ;;  %v420_v31 = vld [vmem:[%s7538_s29 + $0xf0] sm:$0xff]  ;;  %v421_v32 = vld [vmem:[%s7538_s29 + $0xf8] sm:$0xff] }
  0x27   : > { %361 = vst.msk [vmem:[#allocation2 + $0x64] sm:$0xf] %vm334_vm0, %v7366_v0 }
  0x28   : > { %363 = vst.msk [vmem:[#allocation2 + $0x6c] sm:$0xf] %vm334_vm0, %v7366_v0 }
  0x29   : > { %364 = vst.msk [vmem:[#allocation2 + $0x70] sm:$0xf] %vm334_vm0, %v7366_v0 }
  0x2a   : > { %366 = vst.msk [vmem:[#allocation2 + $0x78] sm:$0xf] %vm334_vm0, %v7366_v0 }
  0x2b   : > { %367 = vst.msk [vmem:[#allocation2 + $0x7c] sm:$0xf] %vm334_vm0, %v7366_v0 }
  0x2c   : > { %369 = vst.msk [vmem:[#allocation2 + $0x84] sm:$0xf] %vm334_vm0, %v7366_v0 }
  0x2d   : > { %370 = vst.msk [vmem:[#allocation2 + $0x88] sm:$0xf] %vm334_vm0, %v7366_v0 }
  0x2e   : > { %372 = vst.msk [vmem:[#allocation2 + $0x90] sm:$0xf] %vm334_vm0, %v7366_v0 }
  0x2f   : > { %373 = vst.msk [vmem:[#allocation2 + $0x94] sm:$0xf] %vm334_vm0, %v7366_v0 }
  0x30   : > { %375 = vst.msk [vmem:[#allocation2 + $0x9c] sm:$0xf] %vm334_vm0, %v7366_v0 }
  0x31   : > { %376 = vst.msk [vmem:[#allocation2 + $0xa0] sm:$0xf] %vm334_vm0, %v7366_v0 }
  0x32   : > { %378 = vst.msk [vmem:[#allocation2 + $0xa8] sm:$0xf] %vm334_vm0, %v7366_v0 }
  0x33   : > { %379 = vst.msk [vmem:[#allocation2 + $0xac] sm:$0xf] %vm334_vm0, %v7366_v0 }
  0x34   : > { %381 = vst.msk [vmem:[#allocation2 + $0xb4] sm:$0xf] %vm334_vm0, %v7366_v0 }
  0x35   : > { %382 = vst.msk [vmem:[#allocation2 + $0xb8] sm:$0xf] %vm334_vm0, %v7366_v0 }
  0x36   : > { %384 = vst.msk [vmem:[#allocation2 + $0xc0] sm:$0xf] %vm334_vm0, %v7366_v0 }
  0x37   : > { %385 = vst.msk [vmem:[#allocation2 + $0xc4] sm:$0xf] %vm334_vm0, %v7366_v0 }
  0x38   : > { %387 = vst.msk [vmem:[#allocation2 + $0xcc] sm:$0xf] %vm334_vm0, %v7366_v0 }
  0x39   : > { %388 = vst.msk [vmem:[#allocation2 + $0xd0] sm:$0xf] %vm334_vm0, %v7366_v0 }
  0x3a   : > { %338 = vst.msk [vmem:[#allocation2 + $0x8] sm:$0x1] %vm337_vm1, %v7366_v0 }
  0x3b   : > { %341 = vst.msk [vmem:[#allocation2 + $0x14] sm:$0x1] %vm337_vm1, %v7366_v0 }
  0x3c   : > { %344 = vst.msk [vmem:[#allocation2 + $0x20] sm:$0x1] %vm337_vm1, %v7366_v0 }
  0x3d   : > { %347 = vst.msk [vmem:[#allocation2 + $0x2c] sm:$0x1] %vm337_vm1, %v7366_v0 }
  0x3e   : > { %350 = vst.msk [vmem:[#allocation2 + $0x38] sm:$0x1] %vm337_vm1, %v7366_v0 }
  0x3f   : > { %353 = vst.msk [vmem:[#allocation2 + $0x44] sm:$0x1] %vm337_vm1, %v7366_v0 }
  0x40   : > { %356 = vst.msk [vmem:[#allocation2 + $0x50] sm:$0x1] %vm337_vm1, %v7366_v0 }
  0x41   : > { %359 = vst.msk [vmem:[#allocation2 + $0x5c] sm:$0x1] %vm337_vm1, %v7366_v0 }
  0x42   : > { %362 = vst.msk [vmem:[#allocation2 + $0x68] sm:$0x1] %vm337_vm1, %v7366_v0 }
  0x43   : > { %365 = vst.msk [vmem:[#allocation2 + $0x74] sm:$0x1] %vm337_vm1, %v7366_v0 }
  0x44   : > { %368 = vst.msk [vmem:[#allocation2 + $0x80] sm:$0x1] %vm337_vm1, %v7366_v0 }
  0x45   : > { %371 = vst.msk [vmem:[#allocation2 + $0x8c] sm:$0x1] %vm337_vm1, %v7366_v0 }
  0x46   : > { %374 = vst.msk [vmem:[#allocation2 + $0x98] sm:$0x1] %vm337_vm1, %v7366_v0 }
  0x47   : > { %377 = vst.msk [vmem:[#allocation2 + $0xa4] sm:$0x1] %vm337_vm1, %v7366_v0 }
  0x48   : > { %380 = vst.msk [vmem:[#allocation2 + $0xb0] sm:$0x1] %vm337_vm1, %v7366_v0 }
  0x49   : > { %383 = vst.msk [vmem:[#allocation2 + $0xbc] sm:$0x1] %vm337_vm1, %v7366_v0 }
  0x4a   : > { %386 = vst.msk [vmem:[#allocation2 + $0xc8] sm:$0x1] %vm337_vm1, %v7366_v0 }
  0x4b   : > { %389 = vst.msk [vmem:[#allocation2 + $0xd4] sm:$0x1] %vm337_vm1, %v7366_v0 }
  0x4c   : > { %423 = vst.msk [vmem:[#allocation3] sm:$0xff] %vm422_vm2, %v390_v1 }
  0x4d   : > { %424 = vst.msk [vmem:[#allocation3 + $0x8] sm:$0xff] %vm422_vm2, %v391_v2 }
  0x4e   : > { %425 = vst.msk [vmem:[#allocation3 + $0x10] sm:$0xff] %vm422_vm2, %v392_v3 }
  0x4f   : > { %426 = vst.msk [vmem:[#allocation3 + $0x18] sm:$0xff] %vm422_vm2, %v393_v4 }
  0x50   : > { %427 = vst.msk [vmem:[#allocation3 + $0x20] sm:$0xff] %vm422_vm2, %v394_v5 }
  0x51   : > { %428 = vst.msk [vmem:[#allocation3 + $0x28] sm:$0xff] %vm422_vm2, %v395_v6 }
  0x52   : > { %429 = vst.msk [vmem:[#allocation3 + $0x30] sm:$0xff] %vm422_vm2, %v396_v7 }
  0x53   : > { %430 = vst.msk [vmem:[#allocation3 + $0x38] sm:$0xff] %vm422_vm2, %v397_v8 }
  0x54   : > { %431 = vst.msk [vmem:[#allocation3 + $0x40] sm:$0xff] %vm422_vm2, %v398_v9 }
  0x55   : > { %432 = vst.msk [vmem:[#allocation3 + $0x48] sm:$0xff] %vm422_vm2, %v399_v10 }
  0x56   : > { %433 = vst.msk [vmem:[#allocation3 + $0x50] sm:$0xff] %vm422_vm2, %v400_v11 }
  0x57   : > { %434 = vst.msk [vmem:[#allocation3 + $0x58] sm:$0xff] %vm422_vm2, %v401_v12 }
  0x58   : > { %435 = vst.msk [vmem:[#allocation3 + $0x60] sm:$0xff] %vm422_vm2, %v402_v13 }
  0x59   : > { %436 = vst.msk [vmem:[#allocation3 + $0x68] sm:$0xff] %vm422_vm2, %v403_v14 }
  0x5a   : > { %437 = vst.msk [vmem:[#allocation3 + $0x70] sm:$0xff] %vm422_vm2, %v404_v15 }
  0x5b   : > { %438 = vst.msk [vmem:[#allocation3 + $0x78] sm:$0xff] %vm422_vm2, %v405_v16 }
  0x5c   : > { %439 = vst.msk [vmem:[#allocation3 + $0x80] sm:$0xff] %vm422_vm2, %v406_v17 }
  0x5d   : > { %440 = vst.msk [vmem:[#allocation3 + $0x88] sm:$0xff] %vm422_vm2, %v407_v18 }
  0x5e   : > { %441 = vst.msk [vmem:[#allocation3 + $0x90] sm:$0xff] %vm422_vm2, %v408_v19 }
  0x5f   : > { %442 = vst.msk [vmem:[#allocation3 + $0x98] sm:$0xff] %vm422_vm2, %v409_v20 }
  0x60   : > { %443 = vst.msk [vmem:[#allocation3 + $0xa0] sm:$0xff] %vm422_vm2, %v410_v21 }
  0x61   : > { %444 = vst.msk [vmem:[#allocation3 + $0xa8] sm:$0xff] %vm422_vm2, %v411_v22 }
  0x62   : > { %445 = vst.msk [vmem:[#allocation3 + $0xb0] sm:$0xff] %vm422_vm2, %v412_v23 }
  0x63   : > { %446 = vst.msk [vmem:[#allocation3 + $0xb8] sm:$0xff] %vm422_vm2, %v413_v24 }
  0x64   : > { %447 = vst.msk [vmem:[#allocation3 + $0xc0] sm:$0xff] %vm422_vm2, %v414_v25 }
  0x65   : > { %448 = vst.msk [vmem:[#allocation3 + $0xc8] sm:$0xff] %vm422_vm2, %v415_v26 }
  0x66   : > { %449 = vst.msk [vmem:[#allocation3 + $0xd0] sm:$0xff] %vm422_vm2, %v416_v27 }
  0x67   : > { %450 = vst.msk [vmem:[#allocation3 + $0xd8] sm:$0xff] %vm422_vm2, %v417_v28 }
  0x68   : > { %451 = vst.msk [vmem:[#allocation3 + $0xe0] sm:$0xff] %vm422_vm2, %v418_v29 }
  0x69   : > { %452 = vst.msk [vmem:[#allocation3 + $0xe8] sm:$0xff] %vm422_vm2, %v419_v30 }
  0x6a   : > { %453 = vst.msk [vmem:[#allocation3 + $0xf0] sm:$0xff] %vm422_vm2, %v420_v31 }
  0x6b   : > { %454 = vst.msk [vmem:[#allocation3 + $0xf8] sm:$0xff] %vm422_vm2, %v421_v32 }
  0x6c LB: >> { %v475_v33 = vld [vmem:[#allocation3 + $0x70] sm:$0xff]  ;;  %v476_v34 = vld [vmem:[#allocation3 + $0x78] sm:$0xff]  ;;  %vm564_vm3 = vsmask.f32 256  ;;  %vm565_vm4 = vsmask.f32 4368  ;;  %s4337_s28 = scalar_lea.vmem %s10645_s4, %s7364_s10  ;;  %s7364_s10 = sphi %s7612_s10, %s460_s10  }
  0x6d   : >> { %v546_v35 = vpack.c.bf16 %v475_v33, %v475_v33  ;;  %v547_v36 = vpack.c.bf16 %v476_v34, %v476_v34  ;;  %vm889_vm5 = vsmask.f32 7938  ;;  %v477_v37 = vld [vmem:[#allocation3 + $0x80] sm:$0xff]  ;;  %v478_v38 = vld [vmem:[#allocation3 + $0x88] sm:$0xff]  ;;  %vm7618_vm6 = vmor %vm564_vm3, %vm565_vm4  ;;  %v10667_v52 = vmov 0  ;;  %s7367_s15 = smov 96  }
  0x6e   : >> { %v942_v44 = vld [vmem:[#allocation2 + $0x60] sm:$0xf]  ;;  %v548_v45 = vpack.c.bf16 %v477_v37, %v477_v37  ;;  %v549_v46 = vpack.c.bf16 %v478_v38, %v478_v38  ;;  %vm7623_vm7 = vmand %vm334_vm0, %vm889_vm5  ;;  %v479_v50 = vld [vmem:[#allocation3 + $0x90] sm:$0xff]  ;;  %vm1187_vm9 = vsmask.f32 7424  ;;  %vm1412_vm10 = vcmask 1046528  }
  0x6f   : >> { %v687_v39 = vshrl.u32 %v546_v35, 16  ;;  %v690_v40 = vshll.u32 %v546_v35, 16  ;;  %v695_v41 = vshrl.u32 %v547_v36, 16  ;;  %v698_v42 = vshll.u32 %v547_v36, 16  ;;  %v480_v51 = vld [vmem:[#allocation3 + $0x98] sm:$0xff]  ;;  %vm7629_vm8 = vmand %vm337_vm1, %vm564_vm3  ;;  %v481_v20 = vld [vmem:[#allocation3 + $0xa0] sm:$0xff] }
  0x70   : >> { %v10668_v52 = vsel %vm7629_vm8, 4294967295, %v10667_v52  ;;  %v946_v53 = vld [vmem:[#allocation2 + $0x68] sm:$0x1]  ;;  %v704_v54 = vshrl.u32 %v548_v45, 16  ;;  %v707_v55 = vshll.u32 %v548_v45, 16  ;;  %v712_v56 = vshrl.u32 %v549_v46, 16 }
  0x71   : >> { %v689_v47 = vrot.slane %v687_v39, 7  ;;  %v697_v48 = vrot.slane %v695_v41, 7  ;;  %10669 = vst [vmem:[#allocation8_spill] sm:$0xff] %v10668_v52  ;;  %v715_v57 = vshll.u32 %v549_v46, 16  ;;  %v550_v0 = vpack.c.bf16 %v479_v50, %v479_v50  ;;  %v949_v5 = vld [vmem:[#allocation2 + $0x6c] sm:$0xf] }
  0x72   : >> { %v706_v62 = vrot.slane %v704_v54, 7  ;;  %v714_v63 = vrot.slane %v712_v56, 7  ;;  %v551_v1 = vpack.c.bf16 %v480_v51, %v480_v51  ;;  %v953_v6 = vld [vmem:[#allocation2 + $0x74] sm:$0x1]  ;;  %v482_v21 = vld [vmem:[#allocation3 + $0xa8] sm:$0xff]  ;;  %v552_v24 = vpack.c.bf16 %v481_v20, %v481_v20  ;;  %s7368_s17 = smov 32  }
  0x73   : >> { %v692_v58 = vor.u32 %v690_v40, %v689_v47  ;;  %v693_v59 = vrot.slane %v689_v47, 4  ;;  %v700_v60 = vor.u32 %v698_v42, %v697_v48  ;;  %v702_v61 = vrot.slane %v697_v48, 4  ;;  %v956_v22 = vld [vmem:[#allocation2 + $0x78] sm:$0xf]  ;;  %v960_v23 = vld [vmem:[#allocation2 + $0x80] sm:$0x1] }
  0x74   : >> { %v709_v7 = vor.u32 %v707_v55, %v706_v62  ;;  %v710_v8 = vrot.slane %v706_v62, 4  ;;  %v717_v9 = vor.u32 %v715_v57, %v714_v63  ;;  %v719_v10 = vrot.slane %v714_v63, 4  ;;  %v963_v51 = vld [vmem:[#allocation2 + $0x84] sm:$0xf]  ;;  %v967_v57 = vld [vmem:[#allocation2 + $0x8c] sm:$0x1] }
  0x75   : >> { %v701_v2 = vsel %vm7618_vm6, %v693_v59, %v700_v60  ;;  %v943_v3 = vsel %vm7623_vm7, %v692_v58, %v942_v44  ;;  %v947_v4 = vsel %vm7629_vm8, %v702_v61, %v946_v53  ;;  %v721_v11 = vshrl.u32 %v550_v0, 16  ;;  %v483_v53 = vld [vmem:[#allocation3 + $0xb0] sm:$0xff]  ;;  %v484_v62 = vld [vmem:[#allocation3 + $0xb8] sm:$0xff]  ;;  %s7033_s18 = smul.u32 144, %s7364_s10  ;;  %s7369_s24 = smov 64  }
  0x76   : >> { %944 = vst [vmem:[#allocation2 + $0x60] sm:$0xf] %v943_v3  ;;  %v724_v12 = vshll.u32 %v550_v0, 16  ;;  %v729_v13 = vshrl.u32 %v551_v1, 16  ;;  %v732_v14 = vshll.u32 %v551_v1, 16  ;;  %v718_v15 = vsel %vm7618_vm6, %v710_v8, %v717_v9 }
  0x77   : >> { %945 = vst.msk [vmem:[#allocation2 + $0x64] sm:$0xf] %vm334_vm0, %v701_v2  ;;  %v950_v16 = vsel %vm7623_vm7, %v709_v7, %v949_v5  ;;  %v954_v17 = vsel %vm7629_vm8, %v719_v10, %v953_v6  ;;  %v723_v18 = vrot.slane %v721_v11, 7  ;;  %v553_v25 = vpack.c.bf16 %v482_v21, %v482_v21  ;;  %s7710_s27 = scalar_lea.vmem %s10642_s1, %s7033_s18  ;;  %s8372_s26 = scalar_lea.vmem %s10643_s2, %s7033_s18 }
  0x78   : >> { %948 = vst [vmem:[#allocation2 + $0x68] sm:$0x1] %v947_v4  ;;  %v731_v19 = vrot.slane %v729_v13, 7  ;;  %v738_v30 = vshrl.u32 %v552_v24, 16  ;;  %v741_v31 = vshll.u32 %v552_v24, 16  ;;  %v554_v58 = vpack.c.bf16 %v483_v53, %v483_v53  ;;  %v485_v24 = vld [vmem:[#allocation3 + $0xc0] sm:$0xff] }
  0x79   : >> { %951 = vst [vmem:[#allocation2 + $0x6c] sm:$0xf] %v950_v16  ;;  %v726_v26 = vor.u32 %v724_v12, %v723_v18  ;;  %v727_v27 = vrot.slane %v723_v18, 4  ;;  %v746_v32 = vshrl.u32 %v553_v25, 16  ;;  %v749_v36 = vshll.u32 %v553_v25, 16  ;;  %s6862_s18 = sshll.u32 %s7364_s10, 5 }
  0x7a   : >> { %952 = vst.msk [vmem:[#allocation2 + $0x70] sm:$0xf] %vm334_vm0, %v718_v15  ;;  %v734_v28 = vor.u32 %v732_v14, %v731_v19  ;;  %v736_v29 = vrot.slane %v731_v19, 4  ;;  %v740_v38 = vrot.slane %v738_v30, 7  ;;  %v555_v9 = vpack.c.bf16 %v484_v62, %v484_v62  ;;  %v486_v30 = vld [vmem:[#allocation3 + $0xc8] sm:$0xff]  ;;  %s9161_s25 = scalar_lea.vmem %s10644_s3, %s6862_s18 }
  0x7b   : >> { %955 = vst [vmem:[#allocation2 + $0x74] sm:$0x1] %v954_v17  ;;  %v957_v34 = vsel %vm7623_vm7, %v726_v26, %v956_v22  ;;  %v748_v39 = vrot.slane %v746_v32, 7  ;;  %v755_v10 = vshrl.u32 %v554_v58, 16  ;;  %v758_v11 = vshll.u32 %v554_v58, 16 }
  0x7c   : >> { %v735_v33 = vsel %vm7618_vm6, %v727_v27, %v734_v28  ;;  %v961_v35 = vsel %vm7629_vm8, %v736_v29, %v960_v23  ;;  %958 = vst [vmem:[#allocation2 + $0x78] sm:$0xf] %v957_v34  ;;  %v743_v46 = vor.u32 %v741_v31, %v740_v38  ;;  %v744_v47 = vrot.slane %v740_v38, 4  ;;  %v970_v29 = vld [vmem:[#allocation2 + $0x90] sm:$0xf] }
  0x7d   : >> { %959 = vst.msk [vmem:[#allocation2 + $0x7c] sm:$0xf] %vm334_vm0, %v735_v33  ;;  %v751_v48 = vor.u32 %v749_v36, %v748_v39  ;;  %v753_v50 = vrot.slane %v748_v39, 4  ;;  %v757_v23 = vrot.slane %v755_v10, 7  ;;  %v763_v27 = vshrl.u32 %v555_v9, 16 }
  0x7e   : >> { %v7653_v37 = vld [vmem:[#allocation2 + $0x60] sm:$0xff]  ;;  %962 = vst [vmem:[#allocation2 + $0x80] sm:$0x1] %v961_v35  ;;  %v964_v5 = vsel %vm7623_vm7, %v743_v46, %v963_v51  ;;  %v766_v28 = vshll.u32 %v555_v9, 16  ;;  %v556_v34 = vpack.c.bf16 %v485_v24, %v485_v24  ;;  %v557_v46 = vpack.c.bf16 %v486_v30, %v486_v30 }
  0x7f   : >> { %v1031_v40 = vld [vmem:[#allocation2 + $0x68] sm:$0x1]  ;;  %v1285_v42 = vshrl.u32 %v7653_v37, 16  ;;  %v1287_v44 = vshll.u32 %v7653_v37, 16  ;;  %v752_v2 = vsel %vm7618_vm6, %v744_v47, %v751_v48  ;;  %v968_v6 = vsel %vm7629_vm8, %v753_v50, %v967_v57  ;;  %965 = vst [vmem:[#allocation2 + $0x84] sm:$0xf] %v964_v5 }
  0x80   : >> { %v1163_v41 = vunpack.c.l.b16 %v1031_v40  ;;  %966 = vst.msk [vmem:[#allocation2 + $0x88] sm:$0xf] %vm334_vm0, %v752_v2  ;;  %v1437_v17 = vrot.slane %v7653_v37, 1  ;;  %v760_v33 = vor.u32 %v758_v11, %v757_v23  ;;  %v761_v38 = vrot.slane %v757_v23, 4  ;;  %v487_v5 = vld [vmem:[#allocation3 + $0xd0] sm:$0xff] }
  0x81   : >> { %v7658_v45 = vld [vmem:[#allocation2 + $0x6c] sm:$0xff]  ;;  %v1289_v55 = vrot.slane %v1287_v44, 1  ;;  %969 = vst [vmem:[#allocation2 + $0x8c] sm:$0x1] %v968_v6  ;;  %v765_v39 = vrot.slane %v763_v27, 7  ;;  %v772_v47 = vshrl.u32 %v556_v34, 16 }
  0x82   : >> { %v7660_v54 = vpack.c.b16 %v1163_v41, %v1163_v41  ;;  %v1034_v56 = vld [vmem:[#allocation2 + $0x74] sm:$0x1]  ;;  %1514 = vrot.lane.b32.xlu1 %v7658_v45, %s7367_s15  ;;  %v1297_v60 = vshrl.u32 %v7658_v45, 16  ;;  %v1299_v61 = vshll.u32 %v7658_v45, 16  ;;  %v1440_v1 = vrot.slane %v7658_v45, 1 }
  0x83   : >> { %v1164_v59 = vunpack.c.l.b16 %v1034_v56  ;;  %v1290_v63 = vor.u32 %v1289_v55, %v1285_v42  ;;  %v971_v42 = vsel %vm7623_vm7, %v760_v33, %v970_v29  ;;  %v974_v44 = vld [vmem:[#allocation2 + $0x98] sm:$0x1]  ;;  %v768_v51 = vor.u32 %v766_v28, %v765_v39  ;;  %v488_v6 = vld [vmem:[#allocation3 + $0xd8] sm:$0xff] }
  0x84   : >> { %v1292_v0 = vshll.u32 %v7660_v54, 16  ;;  %v1301_v4 = vrot.slane %v1299_v61, 1  ;;  %v7675_v8 = vld [vmem:[#allocation2 + $0x78] sm:$0xff]  ;;  %v1438_v20 = vrot.slane %v7660_v54, 1  ;;  %v770_v53 = vrot.slane %v765_v39, 4 }
  0x85   : >> { %v1180_v3 = vpack.c.b16 %v1164_v59, %v1164_v59  ;;  %v1037_v15 = vld [vmem:[#allocation2 + $0x80] sm:$0x1]  ;;  %v1311_v19 = vshll.u32 %v7675_v8, 16  ;;  %v1309_v26 = vshrl.u32 %v7675_v8, 16  ;;  %v1443_v32 = vrot.slane %v7675_v8, 1 }
  0x86   : >> { %v1294_v7 = vrot.slane %v1292_v0, 1  ;;  %v1302_v12 = vor.u32 %v1301_v4, %v1297_v60  ;;  %v1165_v18 = vunpack.c.l.b16 %v1037_v15  ;;  %v7703_v48 = vsel %vm1412_vm10, %v1437_v17, %v1438_v20  ;;  %972 = vst [vmem:[#allocation2 + $0x90] sm:$0xf] %v971_v42  ;;  %v977_v59 = vld [vmem:[#allocation2 + $0x9c] sm:$0xf]  ;;  %v7040_v17 = vld [vmem:[%s7710_s27 + $0x30] sm:$0xff] }
  0x87   : >> { %v1304_v13 = vshll.u32 %v1180_v3, 16  ;;  %v1441_v14 = vrot.slane %v1180_v3, 1  ;;  %v1313_v35 = vrot.slane %v1311_v19, 1  ;;  %v7698_v41 = vld [vmem:[#allocation2 + $0x84] sm:$0xff]  ;;  %v775_v54 = vshll.u32 %v556_v34, 16  ;;  %v7041_v0 = vld [vmem:[%s7710_s27 + $0x38] sm:$0xff] }
  0x88   : >> { %v7678_v16 = vsel %vm1187_vm9, %v1290_v63, %v1294_v7  ;;  %v1181_v25 = vpack.c.b16 %v1165_v18, %v1165_v18  ;;  %v1040_v50 = vld [vmem:[#allocation2 + $0x8c] sm:$0x1]  ;;  %v769_v56 = vsel %vm7618_vm6, %v761_v38, %v768_v51  ;;  %v975_v57 = vsel %vm7629_vm8, %v770_v53, %v974_v44  ;;  %7144 = vmatpush.bf16.msra.mxu1 %v7041_v0  ;;  %v489_v42 = vld [vmem:[#allocation3 + $0xe0] sm:$0xff]  ;;  %v490_v44 = vld [vmem:[#allocation3 + $0xe8] sm:$0xff] }
  0x89   : >> { %1396 = vrot.lane.b32.xlu0 %v7678_v16, %s7368_s17  ;;  %v1306_v21 = vrot.slane %v1304_v13, 1  ;;  %v7686_v22 = vsel %vm1412_vm10, %v1440_v1, %v1441_v14  ;;  %v1166_v55 = vunpack.c.l.b16 %v1040_v50  ;;  %v774_v58 = vrot.slane %v772_v47, 7  ;;  %973 = vst.msk [vmem:[#allocation2 + $0x94] sm:$0xf] %vm334_vm0, %v769_v56  ;;  %2065 = vmatpush.bf16.msra.mxu0 %v7041_v0  ;;  %v981_v13 = vld [vmem:[#allocation2 + $0xa4] sm:$0x1] }
  0x8a   : >> { %1479 = vrot.lane.b32.xlu2 %v7686_v22, %s7369_s24  ;;  %v1316_v36 = vshll.u32 %v1181_v25, 16  ;;  %v1444_v40 = vrot.slane %v1181_v25, 1  ;;  %v1323_v61 = vshll.u32 %v7698_v41, 16  ;;  %v780_v62 = vshrl.u32 %v557_v46, 16  ;;  %976 = vst [vmem:[#allocation2 + $0x98] sm:$0x1] %v975_v57 }
  0x8b   : >> { %v7693_v31 = vsel %vm1187_vm9, %v1302_v12, %v1306_v21  ;;  %v783_v63 = vshll.u32 %v557_v46, 16  ;;  %v1314_v1 = vor.u32 %v1313_v35, %v1309_v26  ;;  %v1182_v3 = vpack.c.b16 %v1166_v55, %v1166_v55  ;;  %v988_v53 = vld [vmem:[#allocation2 + $0xb0] sm:$0x1] }
  0x8c   : >> { %1398 = vrot.lane.b32.xlu1 %v7693_v31, %s7368_s17  ;;  %v7719_v60 = vsel %vm1412_vm10, %v1443_v32, %v1444_v40  ;;  %v1318_v2 = vrot.slane %v1316_v36, 1  ;;  %v777_v4 = vor.u32 %v775_v54, %v774_v58  ;;  %v1321_v7 = vshrl.u32 %v7698_v41, 16  ;;  %7145 = vmatpush.bf16.msra.mxu1 %v7040_v17  ;;  %v7039_v32 = vld [vmem:[%s7710_s27 + $0x28] sm:$0xff] }
  0x8d   : >> { %v778_v9 = vrot.slane %v774_v58, 4  ;;  %v782_v10 = vrot.slane %v780_v62, 7  ;;  %v1446_v11 = vrot.slane %v7698_v41, 1  ;;  %v558_v14 = vpack.c.bf16 %v487_v5, %v487_v5  ;;  %2066 = vmatpush.bf16.msra.mxu0 %v7040_v17  ;;  %v984_v36 = vld [vmem:[#allocation2 + $0xa8] sm:$0xf] }
  0x8e   : >> { %v978_v12 = vsel %vm7623_vm7, %v777_v4, %v977_v59  ;;  %v559_v15 = vpack.c.bf16 %v488_v6, %v488_v6  ;;  %v1325_v18 = vrot.slane %v1323_v61, 1  ;;  %v1447_v19 = vrot.slane %v1182_v3, 1 }
  0x8f   : >> { %v785_v20 = vor.u32 %v783_v63, %v782_v10  ;;  %v787_v21 = vrot.slane %v782_v10, 4  ;;  %979 = vst [vmem:[#allocation2 + $0x9c] sm:$0xf] %v978_v12  ;;  %v7734_v23 = vsel %vm1187_vm9, %v1314_v1, %v1318_v2  ;;  %v1328_v24 = vshll.u32 %v1182_v3, 16  ;;  %v7038_v63 = vld [vmem:[%s7710_s27 + $0x20] sm:$0xff]  ;;  %v7037_v12 = vld [vmem:[%s7710_s27 + $0x18] sm:$0xff] }
  0x90   : >> { %v789_v25 = vshrl.u32 %v558_v14, 16  ;;  %v797_v26 = vshrl.u32 %v559_v15, 16  ;;  %v792_v29 = vshll.u32 %v558_v14, 16  ;;  %v800_v30 = vshll.u32 %v559_v15, 16  ;;  %v7741_v33 = vld [vmem:[#allocation2 + $0x90] sm:$0xff]  ;;  %7146 = vmatpush.bf16.msra.mxu1 %v7039_v32 }
  0x91   : >> { %1477 = vrot.lane.b32.xlu0 %v7703_v48, %s7369_s24  ;;  %v786_v27 = vsel %vm7618_vm6, %v778_v9, %v785_v20  ;;  %v982_v28 = vsel %vm7629_vm8, %v787_v21, %v981_v13  ;;  %v1326_v38 = vor.u32 %v1325_v18, %v1321_v7  ;;  %v7747_v39 = vsel %vm1412_vm10, %v1446_v11, %v1447_v19  ;;  %v1043_v40 = vld [vmem:[#allocation2 + $0x98] sm:$0x1]  ;;  %v991_v21 = vld [vmem:[#allocation2 + $0xb4] sm:$0xf] }
  0x92   : >> { %1516 = vrot.lane.b32.xlu2 %v7675_v8, %s7367_s15  ;;  %980 = vst.msk [vmem:[#allocation2 + $0xa0] sm:$0xf] %vm334_vm0, %v786_v27  ;;  %v791_v34 = vrot.slane %v789_v25, 7  ;;  %v799_v35 = vrot.slane %v797_v26, 7  ;;  %v1330_v46 = vrot.slane %v1328_v24, 1  ;;  %v1167_v47 = vunpack.c.l.b16 %v1043_v40  ;;  %2067 = vmatpush.bf16.msra.mxu0 %v7039_v32 }
  0x93   : >> { %983 = vst [vmem:[#allocation2 + $0xa4] sm:$0x1] %v982_v28  ;;  %v1333_v50 = vshrl.u32 %v7741_v33, 16  ;;  %v1335_v51 = vshll.u32 %v7741_v33, 16  ;;  %v1449_v59 = vrot.slane %v7741_v33, 1  ;;  %v560_v61 = vpack.c.bf16 %v489_v42, %v489_v42 }
  0x94   : >> { %1481 = vrot.lane.b32.xlu1 %v7719_v60, %s7369_s24  ;;  %v794_v54 = vor.u32 %v792_v29, %v791_v34  ;;  %v795_v55 = vrot.slane %v791_v34, 4  ;;  %v802_v56 = vor.u32 %v800_v30, %v799_v35  ;;  %v804_v57 = vrot.slane %v799_v35, 4  ;;  %7147 = vmatpush.bf16.msra.mxu1 %v7038_v63  ;;  %v995_v29 = vld [vmem:[#allocation2 + $0xbc] sm:$0x1] }
  0x95   : >> { %v1183_v58 = vpack.c.b16 %v1167_v47, %v1167_v47  ;;  %v561_v62 = vpack.c.bf16 %v490_v44, %v490_v44  ;;  %v1337_v0 = vrot.slane %v1335_v51, 1  ;;  %v7764_v4 = vsel %vm1187_vm9, %v1326_v38, %v1330_v46 }
  0x96   : >> { %v803_v1 = vsel %vm7618_vm6, %v795_v55, %v802_v56  ;;  %v985_v2 = vsel %vm7623_vm7, %v794_v54, %v984_v36  ;;  %v989_v3 = vsel %vm7629_vm8, %v804_v57, %v988_v53  ;;  %v806_v7 = vshrl.u32 %v560_v61, 16  ;;  %2068 = vmatpush.bf16.msra.mxu0 %v7038_v63 }
  0x97   : >> { %v1340_v5 = vshll.u32 %v1183_v58, 16  ;;  %v1450_v6 = vrot.slane %v1183_v58, 1  ;;  %986 = vst [vmem:[#allocation2 + $0xa8] sm:$0xf] %v985_v2  ;;  %v809_v10 = vshll.u32 %v560_v61, 16  ;;  %v814_v11 = vshrl.u32 %v561_v62, 16 }
  0x98   : >> { %987 = vst.msk [vmem:[#allocation2 + $0xac] sm:$0xf] %vm334_vm0, %v803_v1  ;;  %v808_v14 = vrot.slane %v806_v7, 7  ;;  %v817_v15 = vshll.u32 %v561_v62, 16  ;;  %v1338_v17 = vor.u32 %v1337_v0, %v1333_v50  ;;  %7148 = vmatpush.bf16.msra.mxu1 %v7037_v12  ;;  %vm1699_vm11 = vcmask 523264  }
  0x99   : >> { %1400 = vrot.lane.b32.xlu0 %v7734_v23, %s7368_s17  ;;  %v7766_v9 = vld [vmem:[#allocation2 + $0x9c] sm:$0xff]  ;;  %990 = vst [vmem:[#allocation2 + $0xb0] sm:$0x1] %v989_v3  ;;  %v1342_v18 = vrot.slane %v1340_v5, 1  ;;  %v7773_v19 = vsel %vm1412_vm10, %v1449_v59, %v1450_v6  ;;  %v816_v27 = vrot.slane %v814_v11, 7  ;;  %vm1732_vm12 = vcmask 785408  }
  0x9a   : >> { %1518 = vrot.lane.b32.xlu2 %v7698_v41, %s7367_s15  ;;  %v1046_v13 = vld [vmem:[#allocation2 + $0xa4] sm:$0x1]  ;;  %v1347_v24 = vshll.u32 %v7766_v9, 16  ;;  %v811_v25 = vor.u32 %v809_v10, %v808_v14  ;;  %v812_v26 = vrot.slane %v808_v14, 4  ;;  %2069 = vmatpush.bf16.msra.mxu0 %v7037_v12  ;;  %v1345_v36 = vshrl.u32 %v7766_v9, 16 }
  0x9b   : >> { %v1168_v20 = vunpack.c.l.b16 %v1046_v13  ;;  %v819_v30 = vor.u32 %v817_v15, %v816_v27  ;;  %v821_v32 = vrot.slane %v816_v27, 4  ;;  %v7783_v35 = vsel %vm1187_vm9, %v1338_v17, %v1342_v18  ;;  %v462_v27 = vld [vmem:[#allocation3 + $0x8] sm:$0xff] }
  0x9c   : >> { %1483 = vrot.lane.b32.xlu1 %v7747_v39, %s7369_s24  ;;  %v992_v34 = vsel %vm7623_vm7, %v811_v25, %v991_v21  ;;  %v1452_v38 = vrot.slane %v7766_v9, 1  ;;  %v1349_v42 = vrot.slane %v1347_v24, 1 }
  0x9d   : >> { %v1184_v28 = vpack.c.b16 %v1168_v20, %v1168_v20  ;;  %993 = vst [vmem:[#allocation2 + $0xb4] sm:$0xf] %v992_v34  ;;  %v820_v47 = vsel %vm7618_vm6, %v812_v26, %v819_v30  ;;  %v996_v50 = vsel %vm7629_vm8, %v821_v32, %v995_v29  ;;  %v461_v29 = vld [vmem:[#allocation3] sm:$0xff] }
  0x9e   : >> { %994 = vst.msk [vmem:[#allocation2 + $0xb8] sm:$0xf] %vm334_vm0, %v820_v47  ;;  %v1350_v55 = vor.u32 %v1349_v42, %v1345_v36  ;;  %v532_v32 = vpack.c.bf16 %v461_v29, %v461_v29  ;;  %v897_v47 = vld [vmem:[#allocation2 + $0x14] sm:$0x1] }
  0x9f   : >> { %v1453_v40 = vrot.slane %v1184_v28, 1  ;;  %v1352_v44 = vshll.u32 %v1184_v28, 16  ;;  %v7787_v46 = vld [vmem:[#allocation2 + $0xa8] sm:$0xff]  ;;  %997 = vst [vmem:[#allocation2 + $0xbc] sm:$0x1] %v996_v50  ;;  %v533_v28 = vpack.c.bf16 %v462_v27, %v462_v27 }
  0xa0   : >> { %v1049_v51 = vld [vmem:[#allocation2 + $0xb0] sm:$0x1]  ;;  %v1359_v58 = vshll.u32 %v7787_v46, 16  ;;  %v1455_v59 = vrot.slane %v7787_v46, 1  ;;  %v1357_v63 = vshrl.u32 %v7787_v46, 16  ;;  %v568_v36 = vshrl.u32 %v532_v32, 16 }
  0xa1   : >> { %1402 = vrot.lane.b32.xlu0 %v7764_v4, %s7368_s17  ;;  %v1169_v53 = vunpack.c.l.b16 %v1049_v51  ;;  %v7797_v54 = vsel %vm1412_vm10, %v1452_v38, %v1453_v40  ;;  %v1354_v56 = vrot.slane %v1352_v44, 1  ;;  %v576_v30 = vshrl.u32 %v533_v28, 16 }
  0xa2   : >> { %1520 = vrot.lane.b32.xlu2 %v7741_v33, %s7367_s15  ;;  %v1361_v0 = vrot.slane %v1359_v58, 1  ;;  %v570_v40 = vrot.slane %v568_v36, 7  ;;  %v571_v42 = vshll.u32 %v532_v32, 16  ;;  %v579_v44 = vshll.u32 %v533_v28, 16  ;;  %v904_v32 = vld [vmem:[#allocation2 + $0x20] sm:$0x1] }
  0xa3   : >> { %v1185_v57 = vpack.c.b16 %v1169_v53, %v1169_v53  ;;  %v7806_v62 = vsel %vm1187_vm9, %v1350_v55, %v1354_v56  ;;  %v578_v34 = vrot.slane %v576_v30, 7  ;;  %v891_v56 = vld [vmem:[#allocation2 + $0xc] sm:$0xf] }
  0xa4   : >> { %1485 = vrot.lane.b32.xlu1 %v7773_v19, %s7369_s24  ;;  %v1362_v7 = vor.u32 %v1361_v0, %v1357_v63  ;;  %v573_v51 = vor.u32 %v571_v42, %v570_v40  ;;  %v574_v53 = vrot.slane %v570_v40, 4  ;;  %v7035_v40 = vld [vmem:[%s7710_s27 + $0x8] sm:$0xff] }
  0xa5   : >> { %v1456_v61 = vrot.slane %v1185_v57, 1  ;;  %v1364_v1 = vshll.u32 %v1185_v57, 16  ;;  %v7809_v3 = vld [vmem:[#allocation2 + $0xb4] sm:$0xff]  ;;  %v583_v38 = vrot.slane %v578_v34, 4  ;;  %v581_v55 = vor.u32 %v579_v44, %v578_v34 }
  0xa6   : >> { %v1052_v2 = vld [vmem:[#allocation2 + $0xbc] sm:$0x1]  ;;  %v1371_v12 = vshll.u32 %v7809_v3, 16  ;;  %v1458_v13 = vrot.slane %v7809_v3, 1  ;;  %v1369_v17 = vshrl.u32 %v7809_v3, 16  ;;  %v892_v58 = vsel %vm7623_vm7, %v573_v51, %v891_v56 }
  0xa7   : >> { %v1170_v5 = vunpack.c.l.b16 %v1052_v2  ;;  %v7814_v6 = vsel %vm1412_vm10, %v1455_v59, %v1456_v61  ;;  %v1366_v10 = vrot.slane %v1364_v1, 1  ;;  %v898_v50 = vsel %vm7629_vm8, %v583_v38, %v897_v47  ;;  %893 = vst [vmem:[#allocation2 + $0xc] sm:$0xf] %v892_v58  ;;  %v464_v59 = vld [vmem:[#allocation3 + $0x18] sm:$0xff]  ;;  %v463_v1 = vld [vmem:[#allocation3 + $0x10] sm:$0xff] }
  0xa8   : >> { %v1373_v18 = vrot.slane %v1371_v12, 1  ;;  %899 = vst [vmem:[#allocation2 + $0x14] sm:$0x1] %v898_v50  ;;  %v582_v57 = vsel %vm7618_vm6, %v574_v53, %v581_v55  ;;  %v535_v63 = vpack.c.bf16 %v464_v59, %v464_v59  ;;  %v900_v55 = vld [vmem:[#allocation2 + $0x18] sm:$0xf] }
  0xa9   : >> { %1404 = vrot.lane.b32.xlu0 %v7783_v35, %s7368_s17  ;;  %v1186_v11 = vpack.c.b16 %v1170_v5, %v1170_v5  ;;  %v7823_v15 = vsel %vm1187_vm9, %v1362_v7, %v1366_v10  ;;  %894 = vst.msk [vmem:[#allocation2 + $0x10] sm:$0xf] %vm334_vm0, %v582_v57  ;;  %v534_v7 = vpack.c.bf16 %v463_v1, %v463_v1 }
  0xaa   : >> { %1522 = vrot.lane.b32.xlu2 %v7766_v9, %s7367_s15  ;;  %10670 = vst [vmem:[#allocation9_spill] sm:$0xff] %v7823_v15  ;;  %v1374_v24 = vor.u32 %v1373_v18, %v1369_v17  ;;  %v593_v2 = vshrl.u32 %v535_v63, 16  ;;  %v596_v36 = vshll.u32 %v535_v63, 16  ;;  %v492_v63 = vld [vmem:[#allocation3 + $0xf8] sm:$0xff] }
  0xab   : >> { %v1459_v14 = vrot.slane %v1186_v11, 1  ;;  %v1376_v20 = vshll.u32 %v1186_v11, 16  ;;  %v1007_v11 = vld [vmem:[#allocation2 + $0x8] sm:$0x1]  ;;  %v585_v18 = vshrl.u32 %v534_v7, 16  ;;  %v588_v30 = vshll.u32 %v534_v7, 16 }
  0xac   : >> { %1487 = vrot.lane.b32.xlu1 %v7797_v54, %s7369_s24  ;;  %v595_v12 = vrot.slane %v593_v2, 7  ;;  %v1155_v17 = vunpack.c.l.b16 %v1007_v11  ;;  %v563_v2 = vpack.c.bf16 %v492_v63, %v492_v63  ;;  %v7034_v7 = vld [vmem:[%s7710_s27] sm:$0xff] }
  0xad   : >> { %v7829_v21 = vsel %vm1412_vm10, %v1458_v13, %v1459_v14  ;;  %v1378_v25 = vrot.slane %v1376_v20, 1  ;;  %v7852_v14 = vld [vmem:[#allocation2] sm:$0xff]  ;;  %v587_v29 = vrot.slane %v585_v18, 7 }
  0xae   : >> { %v7856_v27 = vpack.c.b16 %v1155_v17, %v1155_v17  ;;  %v1191_v28 = vshll.u32 %v7852_v14, 16  ;;  %v1189_v42 = vshrl.u32 %v7852_v14, 16  ;;  %v598_v53 = vor.u32 %v596_v36, %v595_v12  ;;  %v998_v36 = vld [vmem:[#allocation2 + $0xc0] sm:$0xf] }
  0xaf   : >> { %v7836_v26 = vsel %vm1187_vm9, %v1374_v24, %v1378_v25  ;;  %v1010_v61 = vld [vmem:[#allocation2 + $0x14] sm:$0x1]  ;;  %v600_v25 = vrot.slane %v595_v12, 4  ;;  %v590_v50 = vor.u32 %v588_v30, %v587_v29  ;;  %v591_v51 = vrot.slane %v587_v29, 4 }
  0xb0   : >> { %10671 = vst [vmem:[#allocation10_spill] sm:$0xff] %v7836_v26  ;;  %v1156_v0 = vunpack.c.l.b16 %v1010_v61  ;;  %v7849_v10 = vld [vmem:[#allocation2 + $0xc] sm:$0xff]  ;;  %v1193_v44 = vrot.slane %v1191_v28, 1  ;;  %v1196_v47 = vshll.u32 %v7856_v27, 16  ;;  %v831_v12 = vshrl.u32 %v563_v2, 16  ;;  %v7049_v28 = vld [vmem:[%s7710_s27 + $0x78] sm:$0xff] }
  0xb1   : >> { %1406 = vrot.lane.b32.xlu0 %v7806_v62, %s7368_s17  ;;  %v1416_v20 = vrot.slane %v7849_v10, 1  ;;  %v7036_v24 = vld [vmem:[%s7710_s27 + $0x10] sm:$0xff]  ;;  %v905_v38 = vsel %vm7629_vm8, %v600_v25, %v904_v32  ;;  %v599_v58 = vsel %vm7618_vm6, %v591_v51, %v598_v53  ;;  %v901_v59 = vsel %vm7623_vm7, %v590_v50, %v900_v55  ;;  %v491_v61 = vld [vmem:[#allocation3 + $0xf0] sm:$0xff]  ;;  %v465_v53 = vld [vmem:[#allocation3 + $0x20] sm:$0xff] }
  0xb2   : >> { %1524 = vrot.lane.b32.xlu2 %v7787_v46, %s7367_s15  ;;  %v7847_v5 = vpack.c.b16 %v1156_v0, %v1156_v0  ;;  %7149 = vmatpush.bf16.msra.mxu1 %v7036_v24  ;;  %906 = vst [vmem:[#allocation2 + $0x20] sm:$0x1] %v905_v38  ;;  %v1194_v56 = vor.u32 %v1193_v44, %v1189_v42  ;;  %v1198_v57 = vrot.slane %v1196_v47, 1  ;;  %v834_v25 = vshll.u32 %v563_v2, 16  ;;  %v466_v55 = vld [vmem:[#allocation3 + $0x28] sm:$0xff] }
  0xb3   : >> { %2070 = vmatpush.bf16.msra.mxu0 %v7036_v24  ;;  %902 = vst [vmem:[#allocation2 + $0x18] sm:$0xf] %v901_v59  ;;  %v562_v1 = vpack.c.bf16 %v491_v61, %v491_v61  ;;  %v1201_v29 = vshrl.u32 %v7849_v10, 16  ;;  %v1203_v30 = vshll.u32 %v7849_v10, 16  ;;  %v537_v59 = vpack.c.bf16 %v466_v55, %v466_v55 }
  0xb4   : >> { %1489 = vrot.lane.b32.xlu1 %v7814_v6, %s7369_s24  ;;  %v1417_v13 = vrot.slane %v7847_v5, 1  ;;  %v1199_v0 = vsel %vm1187_vm9, %v1194_v56, %v1198_v57  ;;  %903 = vst.msk [vmem:[#allocation2 + $0x1c] sm:$0xf] %vm334_vm0, %v599_v58  ;;  %v536_v58 = vpack.c.bf16 %v465_v53, %v465_v53 }
  0xb5   : >> { %v823_v11 = vshrl.u32 %v562_v1, 16  ;;  %v826_v18 = vshll.u32 %v562_v1, 16  ;;  %v1205_v50 = vrot.slane %v1203_v30, 1  ;;  %v610_v1 = vshrl.u32 %v537_v59, 16 }
  0xb6   : >> { %v7860_v34 = vsel %vm1412_vm10, %v1416_v20, %v1417_v13  ;;  %7150 = vmatpush.bf16.msra.mxu1 %v7035_v40  ;;  %v7879_v20 = vrot.slane %v831_v12, 7 }
  0xb7   : >> { %2071 = vmatpush.bf16.msra.mxu0 %v7035_v40  ;;  %v825_v17 = vrot.slane %v823_v11, 7  ;;  %v1208_v40 = vshll.u32 %v7847_v5, 16  ;;  %v1206_v61 = vor.u32 %v1205_v50, %v1201_v29  ;;  %v605_v11 = vshll.u32 %v536_v58, 16 }
  0xb8   : >> { %10672 = vst [vmem:[#allocation11_spill] sm:$0xff] %v7879_v20  ;;  %v836_v44 = vor.u32 %v834_v25, %v7879_v20  ;;  %v612_v12 = vrot.slane %v610_v1, 7  ;;  %v1413_v50 = vrot.slane %v7852_v14, 1 }
  0xb9   : >> { %1408 = vrot.lane.b32.xlu0 %v7823_v15, %s7368_s17  ;;  %v1013_v13 = vld [vmem:[#allocation2 + $0x20] sm:$0x1]  ;;  %v828_v32 = vor.u32 %v826_v18, %v825_v17  ;;  %v829_v42 = vrot.slane %v825_v17, 4  ;;  %v1210_v63 = vrot.slane %v1208_v40, 1  ;;  %v911_v40 = vld [vmem:[#allocation2 + $0x2c] sm:$0x1] }
  0xba   : >> { %1526 = vrot.lane.b32.xlu2 %v7809_v3, %s7367_s15  ;;  %7151 = vmatpush.bf16.msra.mxu1 %v7034_v7  ;;  %v1157_v24 = vunpack.c.l.b16 %v1013_v13  ;;  %v613_v13 = vshll.u32 %v537_v59, 16  ;;  %v935_v15 = vld [vmem:[#allocation2 + $0x54] sm:$0xf] }
  0xbb   : >> { %2072 = vmatpush.bf16.msra.mxu0 %v7034_v7  ;;  %v7886_v47 = vld [vmem:[#allocation2 + $0x18] sm:$0xff]  ;;  %v999_v51 = vsel %vm7623_vm7, %v828_v32, %v998_v36  ;;  %v837_v57 = vsel %vm7618_vm6, %v829_v42, %v836_v44  ;;  %v7902_v17 = vsel %vm1187_vm9, %v1206_v61, %v1210_v63  ;;  %v617_v36 = vrot.slane %v612_v12, 4  ;;  %v7048_v44 = vld [vmem:[%s7710_s27 + $0x70] sm:$0xff] }
  0xbc   : >> { %1491 = vrot.lane.b32.xlu1 %v7829_v21, %s7369_s24  ;;  %v1173_v38 = vpack.c.b16 %v1157_v24, %v1157_v24  ;;  %1000 = vst [vmem:[#allocation2 + $0xc0] sm:$0xf] %v999_v51  ;;  %v1419_v5 = vrot.slane %v7886_v47, 1  ;;  %v615_v25 = vor.u32 %v613_v13, %v612_v12  ;;  %v1414_v51 = vrot.slane %v7856_v27, 1  ;;  %v468_v12 = vld [vmem:[#allocation3 + $0x38] sm:$0xff] }
  0xbd   : >> { %1001 = vst.msk [vmem:[#allocation2 + $0xc4] sm:$0xf] %vm334_vm0, %v837_v57  ;;  %v912_v42 = vsel %vm7629_vm8, %v617_v36, %v911_v40  ;;  %v1215_v53 = vshll.u32 %v7886_v47, 16 }
  0xbe   : >> { %2154 = vmatpush.bf16.msrb.mxu1 %v7049_v28  ;;  %v1420_v56 = vrot.slane %v1173_v38, 1  ;;  %v907_v28 = vld [vmem:[#allocation2 + $0x24] sm:$0xf]  ;;  %913 = vst [vmem:[#allocation2 + $0x2c] sm:$0x1] %v912_v42  ;;  %v1415_v55 = vsel %vm1412_vm10, %v1413_v50, %v1414_v51 }
  0xbf   : >> { %v1217_v57 = vrot.slane %v1215_v53, 1 }
  0xc0   : >> { %v7897_v2 = vsel %vm1412_vm10, %v1419_v5, %v1420_v56  ;;  %v1213_v56 = vshrl.u32 %v7886_v47, 16 }
  0xc1   : >> { %1410 = vrot.lane.b32.xlu0 %v7836_v26, %s7368_s17 }
  0xc2   : >> { %2155 = vmatpush.bf16.msrb.mxu1 %v7048_v44  ;;  %v1218_v63 = vor.u32 %v1217_v57, %v1213_v56 }
  0xc4   : >> { %1548 = vrot.lane.b32.xlu1 %v7860_v34, %s7368_s17  ;;  %v7904_v29 = vld [vmem:[#allocation2 + $0xc0] sm:$0xff] }
  0xc5   : >> { %10673 = vst [vmem:[#allocation12_spill] sm:$0xff] %v7904_v29  ;;  %1528 = vrot.lane.b32.xlu2 %v7904_v29, %s7367_s15  ;;  %v1016_v61 = vld [vmem:[#allocation2 + $0x2c] sm:$0x1] }
  0xc9   : >> { %1380 = vrot.lane.b32.xlu0 %v1199_v0, %s7368_s17  ;;  %v602_v0 = vshrl.u32 %v536_v58, 16  ;;  %v1220_v58 = vshll.u32 %v1173_v38, 16 }
  0xcb   : >> { %v604_v7 = vrot.slane %v602_v0, 7  ;;  %v1222_v27 = vrot.slane %v1220_v58, 1  ;;  %v1158_v0 = vunpack.c.l.b16 %v1016_v61  ;;  %v7047_v58 = vld [vmem:[%s7710_s27 + $0x68] sm:$0xff] }
  0xcc   : >> { %1498 = vrot.lane.b32.xlu1 %v7849_v10, %s7367_s15  ;;  %2156 = vmatpush.bf16.msrb.mxu1 %v7047_v58 }
  0xcd   : >> { %v607_v18 = vor.u32 %v605_v11, %v604_v7  ;;  %v608_v24 = vrot.slane %v604_v7, 4  ;;  %1461 = vrot.lane.b32.xlu2 %v1415_v55, %s7369_s24  ;;  %v1174_v1 = vpack.c.b16 %v1158_v0, %v1158_v0  ;;  %v467_v11 = vld [vmem:[#allocation3 + $0x30] sm:$0xff]  ;;  %v7932_v38 = vsel %vm1187_vm9, %v1218_v63, %v1222_v27 }
  0xce   : >> { %v538_v13 = vpack.c.bf16 %v467_v11, %v467_v11 }
  0xcf   : >> { %v616_v30 = vsel %vm7618_vm6, %v608_v24, %v615_v25  ;;  %v908_v32 = vsel %vm7623_vm7, %v607_v18, %v907_v28  ;;  %v539_v18 = vpack.c.bf16 %v468_v12, %v468_v12  ;;  %v1423_v24 = vrot.slane %v1174_v1, 1 }
  0xd0   : >> { %909 = vst [vmem:[#allocation2 + $0x24] sm:$0xf] %v908_v32  ;;  %v619_v25 = vshrl.u32 %v538_v13, 16  ;;  %v622_v44 = vshll.u32 %v538_v13, 16  ;;  %v1232_v12 = vshll.u32 %v1174_v1, 16 }
  0xd1   : >> { %1585 = vrot.lane.b32.xlu0 %v7886_v47, %s7369_s24  ;;  %910 = vst.msk [vmem:[#allocation2 + $0x28] sm:$0xf] %vm334_vm0, %v616_v30  ;;  %v627_v28 = vshrl.u32 %v539_v18, 16  ;;  %v630_v51 = vshll.u32 %v539_v18, 16  ;;  %v918_v18 = vld [vmem:[#allocation2 + $0x38] sm:$0x1] }
  0xd2   : >> { %v621_v42 = vrot.slane %v619_v25, 7 }
  0xd3   : >> { %v629_v50 = vrot.slane %v627_v28, 7 }
  0xd4   : >> { %1550 = vrot.lane.b32.xlu1 %v7897_v2, %s7368_s17  ;;  %v624_v55 = vor.u32 %v622_v44, %v621_v42  ;;  %v625_v56 = vrot.slane %v621_v42, 4 }
  0xd5   : >> { %1632 = vrot.lane.b32.xlu2 %v7932_v38, %s7367_s15  ;;  %v632_v57 = vor.u32 %v630_v51, %v629_v50  ;;  %v634_v13 = vrot.slane %v629_v50, 4 }
  0xd7   : >> { %v633_v63 = vsel %vm7618_vm6, %v625_v56, %v632_v57 }
  0xd8   : >> { %v7925_v59 = vld [vmem:[#allocation2 + $0x24] sm:$0xff]  ;;  %917 = vst.msk [vmem:[#allocation2 + $0x34] sm:$0xf] %vm334_vm0, %v633_v63 }
  0xd9   : >> { %1382 = vrot.lane.b32.xlu0 %v7902_v17, %s7368_s17  ;;  %v1422_v7 = vrot.slane %v7925_v59, 1  ;;  %v1227_v61 = vshll.u32 %v7925_v59, 16 }
  0xdb   : >> { %v7937_v36 = vsel %vm1412_vm10, %v1422_v7, %v1423_v24  ;;  %v1225_v7 = vshrl.u32 %v7925_v59, 16  ;;  %v1229_v11 = vrot.slane %v1227_v61, 1  ;;  %v919_v24 = vsel %vm7629_vm8, %v634_v13, %v918_v18  ;;  %v921_v18 = vld [vmem:[#allocation2 + $0x3c] sm:$0xf] }
  0xdc   : >> { %1500 = vrot.lane.b32.xlu1 %v7886_v47, %s7367_s15  ;;  %920 = vst [vmem:[#allocation2 + $0x38] sm:$0x1] %v919_v24 }
  0xdd   : >> { %1463 = vrot.lane.b32.xlu2 %v7860_v34, %s7369_s24  ;;  %v1230_v28 = vor.u32 %v1229_v11, %v1225_v7 }
  0xe1   : >> { %1587 = vrot.lane.b32.xlu0 %v7925_v59, %s7369_s24 }
  0xe3   : >> { %v1019_v56 = vld [vmem:[#allocation2 + $0x38] sm:$0x1] }
  0xe4   : >> { %1552 = vrot.lane.b32.xlu1 %v7937_v36, %s7368_s17  ;;  %v1480_v0 = vpop.permute.xlu2 %1479 }
  0xe9   : >> { %1384 = vrot.lane.b32.xlu0 %v7932_v38, %s7368_s17 }
  0xec   : >> { %1502 = vrot.lane.b32.xlu1 %v7925_v59, %s7367_s15 }
  0xf4   : >> { %v1515_v32 = vpop.permute.xlu1 %1514 }
  0xfb   : >> { %v1397_v5 = vpop.permute.xlu0 %1396 }
  0xfc   : >> { %v1684_v30 = vsel %vm422_vm2, %v7653_v37, %v1397_v5  ;;  %v914_v5 = vld [vmem:[#allocation2 + $0x30] sm:$0xf] }
  0xfd   : >> { %v915_v27 = vsel %vm7623_vm7, %v624_v55, %v914_v5 }
  0xfe   : >> { %916 = vst [vmem:[#allocation2 + $0x30] sm:$0xf] %v915_v27  ;;  %v1399_v25 = vpop.permute.xlu1 %1398 }
  0xff   : >> { %v1686_v1 = vsel %vm422_vm2, %v7658_v45, %v1399_v25  ;;  %v1159_v45 = vunpack.c.l.b16 %v1019_v56 }
 0x100   : >> { %v1719_v55 = vsel %vm1699_vm11, %v1686_v1, %v1480_v0  ;;  %v925_v1 = vld [vmem:[#allocation2 + $0x44] sm:$0x1] }
 0x101   : >> { %v1175_v27 = vpack.c.b16 %v1159_v45, %v1159_v45 }
 0x103   : >> { %v1478_v40 = vpop.permute.xlu0 %1477  ;;  %v1426_v24 = vrot.slane %v1175_v27, 1 }
 0x104   : >> { %v1717_v53 = vsel %vm1699_vm11, %v1684_v30, %v1478_v40  ;;  %v1234_v30 = vrot.slane %v1232_v12, 1  ;;  %v470_v40 = vld [vmem:[#allocation3 + $0x48] sm:$0xff] }
 0x105   : >> { %v1758_v37 = vsel %vm1732_vm12, %v1717_v53, %v1515_v32  ;;  %v469_v32 = vld [vmem:[#allocation3 + $0x40] sm:$0xff]  ;;  %v541_v44 = vpack.c.bf16 %v470_v40, %v470_v40  ;;  %v7963_v50 = vld [vmem:[#allocation2 + $0x30] sm:$0xff]  ;;  %v7046_v12 = vld [vmem:[%s7710_s27 + $0x60] sm:$0xff] }
 0x106   : >> { %2113 = vmatmul.bf16.vlgmr.msra.gmra.mxu1 %v1758_v37  ;;  %v540_v42 = vpack.c.bf16 %v469_v32, %v469_v32  ;;  %v7966_v51 = vsel %vm1187_vm9, %v1230_v28, %v1234_v30  ;;  %v1517_v37 = vpop.permute.xlu2 %1516  ;;  %1589 = vrot.lane.b32.xlu0 %v7963_v50, %s7369_s24  ;;  %v1425_v0 = vrot.slane %v7963_v50, 1 }
 0x107   : >> { %v644_v53 = vshrl.u32 %v541_v44, 16  ;;  %1634 = vrot.lane.b32.xlu2 %v7966_v51, %s7367_s15  ;;  %v647_v61 = vshll.u32 %v541_v44, 16  ;;  %v1761_v63 = vsel %vm1732_vm12, %v1719_v55, %v1517_v37  ;;  %2157 = vmatpush.bf16.msrb.mxu1 %v7046_v12  ;;  %v472_v37 = vld [vmem:[#allocation3 + $0x58] sm:$0xff] }
 0x108   : >> { %v636_v34 = vshrl.u32 %v540_v42, 16  ;;  %v639_v58 = vshll.u32 %v540_v42, 16  ;;  %v7981_v40 = vsel %vm1412_vm10, %v1425_v0, %v1426_v24  ;;  %v1482_v42 = vpop.permute.xlu1 %1481  ;;  %v1237_v24 = vshrl.u32 %v7963_v50, 16 }
 0x109   : >> { %v646_v5 = vrot.slane %v644_v53, 7  ;;  %1554 = vrot.lane.b32.xlu1 %v7981_v40, %s7368_s17  ;;  %v471_v53 = vld [vmem:[#allocation3 + $0x50] sm:$0xff] }
 0x10a   : >> { %v638_v57 = vrot.slane %v636_v34, 7  ;;  %v542_v45 = vpack.c.bf16 %v471_v53, %v471_v53 }
 0x10b   : >> { %v649_v13 = vor.u32 %v647_v61, %v646_v5  ;;  %v651_v30 = vrot.slane %v646_v5, 4  ;;  %v1401_v32 = vpop.permute.xlu0 %1400 }
 0x10c   : >> { %v641_v7 = vor.u32 %v639_v58, %v638_v57  ;;  %v642_v11 = vrot.slane %v638_v57, 4  ;;  %v1688_v34 = vsel %vm422_vm2, %v7675_v8, %v1401_v32  ;;  %v543_v57 = vpack.c.bf16 %v472_v37, %v472_v37 }
 0x10d   : >> { %v926_v44 = vsel %vm7629_vm8, %v651_v30, %v925_v1  ;;  %v1721_v55 = vsel %vm1699_vm11, %v1688_v34, %v1482_v42  ;;  %v653_v5 = vshrl.u32 %v542_v45, 16  ;;  %v1239_v8 = vshll.u32 %v7963_v50, 16 }
 0x10e   : >> { %v922_v25 = vsel %vm7623_vm7, %v641_v7, %v921_v18  ;;  %v650_v28 = vsel %vm7618_vm6, %v642_v11, %v649_v13  ;;  %1386 = vrot.lane.b32.xlu0 %v7966_v51, %s7368_s17  ;;  %927 = vst [vmem:[#allocation2 + $0x44] sm:$0x1] %v926_v44  ;;  %v1519_v56 = vpop.permute.xlu2 %1518  ;;  %v661_v61 = vshrl.u32 %v543_v57, 16  ;;  %v656_v13 = vshll.u32 %v542_v45, 16  ;;  %v7045_v44 = vld [vmem:[%s7710_s27 + $0x58] sm:$0xff] }
 0x10f   : >> { %923 = vst [vmem:[#allocation2 + $0x3c] sm:$0xf] %v922_v25  ;;  %1465 = vrot.lane.b32.xlu2 %v7897_v2, %s7369_s24  ;;  %v655_v0 = vrot.slane %v653_v5, 7  ;;  %v1241_v25 = vrot.slane %v1239_v8, 1  ;;  %v664_v30 = vshll.u32 %v543_v57, 16  ;;  %2158 = vmatpush.bf16.msrb.mxu1 %v7045_v44 }
 0x110   : >> { %924 = vst.msk [vmem:[#allocation2 + $0x40] sm:$0xf] %vm334_vm0, %v650_v28  ;;  %v1484_v7 = vpop.permute.xlu1 %1483  ;;  %v663_v18 = vrot.slane %v661_v61, 7  ;;  %v1244_v28 = vshll.u32 %v1175_v27, 16  ;;  %v932_v8 = vld [vmem:[#allocation2 + $0x50] sm:$0x1] }
 0x111   : >> { %1504 = vrot.lane.b32.xlu1 %v7963_v50, %s7367_s15  ;;  %v658_v1 = vor.u32 %v656_v13, %v655_v0  ;;  %v659_v42 = vrot.slane %v655_v0, 4  ;;  %v1242_v34 = vor.u32 %v1241_v25, %v1237_v24  ;;  %v473_v24 = vld [vmem:[#allocation3 + $0x60] sm:$0xff]  ;;  %v474_v25 = vld [vmem:[#allocation3 + $0x68] sm:$0xff] }
 0x112   : >> { %v1246_v53 = vrot.slane %v1244_v28, 1  ;;  %v668_v61 = vrot.slane %v663_v18, 4 }
 0x114   : >> { %v8009_v27 = vsel %vm1187_vm9, %v1242_v34, %v1246_v53  ;;  %v933_v0 = vsel %vm7629_vm8, %v668_v61, %v932_v8 }
 0x115   : >> { %v1022_v11 = vld [vmem:[#allocation2 + $0x44] sm:$0x1]  ;;  %10674 = vst [vmem:[#allocation13_spill] sm:$0xff] %v8009_v27 }
 0x116   : >> { %2118 = vmatmul.bf16.gmra.mxu1 %v1761_v63  ;;  %v1764_v63 = vsel %vm1732_vm12, %v1721_v55, %v1519_v56  ;;  %v1160_v12 = vunpack.c.l.b16 %v1022_v11  ;;  %v666_v55 = vor.u32 %v664_v30, %v663_v18  ;;  %v928_v56 = vld [vmem:[#allocation2 + $0x48] sm:$0xf]  ;;  %v1403_v11 = vpop.permute.xlu0 %1402  ;;  %v1521_v13 = vpop.permute.xlu2 %1520  ;;  %934 = vst [vmem:[#allocation2 + $0x50] sm:$0x1] %v933_v0 }
 0x117   : >> { %v7995_v58 = vld [vmem:[#allocation2 + $0x3c] sm:$0xff]  ;;  %v929_v45 = vsel %vm7623_vm7, %v658_v1, %v928_v56  ;;  %1636 = vrot.lane.b32.xlu2 %v8009_v27, %s7367_s15  ;;  %v1690_v18 = vsel %vm422_vm2, %v7698_v41, %v1403_v11  ;;  %v544_v1 = vpack.c.bf16 %v473_v24, %v473_v24 }
 0x118   : >> { %1591 = vrot.lane.b32.xlu0 %v7995_v58, %s7369_s24  ;;  %v1176_v32 = vpack.c.b16 %v1160_v12, %v1160_v12  ;;  %v1428_v37 = vrot.slane %v7995_v58, 1  ;;  %v667_v57 = vsel %vm7618_vm6, %v659_v42, %v666_v55  ;;  %930 = vst [vmem:[#allocation2 + $0x48] sm:$0xf] %v929_v45  ;;  %v8019_v12 = vpop.permute.xlu1 %1485  ;;  %v1723_v28 = vsel %vm1699_vm11, %v1690_v18, %v1484_v7 }
 0x119   : >> { %931 = vst.msk [vmem:[#allocation2 + $0x4c] sm:$0xf] %vm334_vm0, %v667_v57  ;;  %v545_v42 = vpack.c.bf16 %v474_v25, %v474_v25  ;;  %v670_v34 = vshrl.u32 %v544_v1, 16  ;;  %v1251_v7 = vshll.u32 %v7995_v58, 16  ;;  %v673_v45 = vshll.u32 %v544_v1, 16 }
 0x11a   : >> { %v1429_v5 = vrot.slane %v1176_v32, 1  ;;  %v1249_v61 = vshrl.u32 %v7995_v58, 16  ;;  %v1256_v0 = vshll.u32 %v1176_v32, 16 }
 0x11b   : >> { %v678_v53 = vshrl.u32 %v545_v42, 16  ;;  %v1253_v8 = vrot.slane %v1251_v7, 1  ;;  %v939_v7 = vld [vmem:[#allocation2 + $0x5c] sm:$0x1] }
 0x11c   : >> { %v1258_v29 = vrot.slane %v1256_v0, 1 }
 0x11d   : >> { %v1025_v55 = vld [vmem:[#allocation2 + $0x50] sm:$0x1]  ;;  %v680_v57 = vrot.slane %v678_v53, 7  ;;  %v1254_v20 = vor.u32 %v1253_v8, %v1249_v61 }
 0x11e   : >> { %v1405_v30 = vpop.permute.xlu0 %1404  ;;  %v1523_v56 = vpop.permute.xlu2 %1522  ;;  %v1161_v11 = vunpack.c.l.b16 %v1025_v55 }
 0x11f   : >> { %1467 = vrot.lane.b32.xlu2 %v7937_v36, %s7369_s24  ;;  %v8048_v32 = vsel %vm1187_vm9, %v1254_v20, %v1258_v29  ;;  %v685_v53 = vrot.slane %v680_v57, 4  ;;  %v1692_v29 = vsel %vm422_vm2, %v7741_v33, %v1405_v30 }
 0x120   : >> { %1388 = vrot.lane.b32.xlu0 %v8009_v27, %s7368_s17  ;;  %v8030_v44 = vld [vmem:[#allocation2 + $0x48] sm:$0xff]  ;;  %v8039_v41 = vpop.permute.xlu1 %1487  ;;  %v1177_v18 = vpack.c.b16 %v1161_v11, %v1161_v11  ;;  %v1725_v11 = vsel %vm1699_vm11, %v1692_v29, %v8019_v12 }
 0x121   : >> { %v1431_v27 = vrot.slane %v8030_v44, 1  ;;  %v1263_v33 = vshll.u32 %v8030_v44, 16  ;;  %v1261_v8 = vshrl.u32 %v8030_v44, 16 }
 0x123   : >> { %v1265_v0 = vrot.slane %v1263_v33, 1 }
 0x126   : >> { %2123 = vmatmul.bf16.gmra.mxu1 %v1764_v63  ;;  %v8016_v63 = vsel %vm1412_vm10, %v1428_v37, %v1429_v5  ;;  %v1767_v37 = vsel %vm1732_vm12, %v1723_v28, %v1521_v13  ;;  %v672_v5 = vrot.slane %v670_v34, 7  ;;  %v681_v13 = vshll.u32 %v545_v42, 16  ;;  %v7044_v28 = vld [vmem:[%s7710_s27 + $0x50] sm:$0xff]  ;;  %v1407_v55 = vpop.permute.xlu0 %1406  ;;  %v1525_v20 = vpop.permute.xlu2 %1524 }
 0x127   : >> { %1556 = vrot.lane.b32.xlu1 %v8016_v63, %s7368_s17  ;;  %v1432_v34 = vrot.slane %v1177_v18, 1  ;;  %2159 = vmatpush.bf16.msrb.mxu1 %v7044_v28  ;;  %v1266_v28 = vor.u32 %v1265_v0, %v1261_v8 }
 0x128   : >> { %1593 = vrot.lane.b32.xlu0 %v8030_v44, %s7369_s24  ;;  %v675_v24 = vor.u32 %v673_v45, %v672_v5  ;;  %v676_v25 = vrot.slane %v672_v5, 4  ;;  %v683_v26 = vor.u32 %v681_v13, %v680_v57  ;;  %1638 = vrot.lane.b32.xlu2 %v8048_v32, %s7367_s15  ;;  %v1770_v45 = vsel %vm1732_vm12, %v1725_v11, %v1523_v56 }
 0x129   : >> { %v1268_v13 = vshll.u32 %v1177_v18, 16 }
 0x12a   : >> { %v936_v1 = vsel %vm7623_vm7, %v675_v24, %v935_v15  ;;  %v684_v42 = vsel %vm7618_vm6, %v676_v25, %v683_v26  ;;  %v8062_v15 = vpop.permute.xlu1 %1489  ;;  %v940_v26 = vsel %vm7629_vm8, %v685_v53, %v939_v7  ;;  %v7043_v25 = vld [vmem:[%s7710_s27 + $0x48] sm:$0xff] }
 0x12b   : >> { %937 = vst [vmem:[#allocation2 + $0x54] sm:$0xf] %v936_v1  ;;  %2160 = vmatpush.bf16.msrb.mxu1 %v7043_v25  ;;  %v7050_v25 = vld [vmem:[%s7710_s27 + $0x80] sm:$0xff] }
 0x12c   : >> { %938 = vst.msk [vmem:[#allocation2 + $0x58] sm:$0xf] %vm334_vm0, %v684_v42  ;;  %v7051_v42 = vld [vmem:[%s7710_s27 + $0x88] sm:$0xff] }
 0x12d   : >> { %941 = vst [vmem:[#allocation2 + $0x5c] sm:$0x1] %v940_v26  ;;  %2249 = vmatpush.bf16.msra.mxu2 %v7051_v42  ;;  %7152 = vmatpush.bf16.msra.mxu3 %v7051_v42  ;;  %v1694_v26 = vsel %vm422_vm2, %v7766_v9, %v1407_v55 }
 0x12e   : >> { %v8082_v57 = vpop.permute.xlu2 %1526  ;;  %v1727_v33 = vsel %vm1699_vm11, %v1694_v26, %v8039_v41 }
 0x12f   : >> { %1506 = vrot.lane.b32.xlu1 %v7995_v58, %s7367_s15  ;;  %v1773_v55 = vsel %vm1732_vm12, %v1727_v33, %v1525_v20 }
 0x130   : >> { %1390 = vrot.lane.b32.xlu0 %v8048_v32, %s7368_s17  ;;  %1469 = vrot.lane.b32.xlu2 %v7981_v40, %s7369_s24 }
 0x131   : >> { %2250 = vmatpush.bf16.msra.mxu2 %v7050_v25  ;;  %7153 = vmatpush.bf16.msra.mxu3 %v7050_v25 }
 0x132   : >> { %v8084_v61 = vpop.permute.xlu1 %1491 }
 0x133   : >> { %v8072_v5 = vld [vmem:[#allocation2 + $0x54] sm:$0xff] }
 0x134   : >> { %v1028_v30 = vld [vmem:[#allocation2 + $0x5c] sm:$0x1]  ;;  %v1434_v1 = vrot.slane %v8072_v5, 1  ;;  %v1275_v9 = vshll.u32 %v8072_v5, 16  ;;  %v1273_v41 = vshrl.u32 %v8072_v5, 16  ;;  %6685 = vmatmul.msk.bf16.vlgmr.msra.gmra.mxu2 %vm422_vm2, %v7897_v2  ;;  %6694 = vmatmul.msk.bf16.vlgmr.msra.gmra.mxu3 %vm422_vm2, %v7747_v39 }
 0x135   : >> { %v1162_v12 = vunpack.c.l.b16 %v1028_v30  ;;  %v7235_v30 = vld [vmem:[#allocation2 + $0x60] sm:$0xff] }
 0x136   : >> { %2128 = vmatmul.bf16.gmra.mxu1 %v1767_v37  ;;  %v8055_v37 = vsel %vm1412_vm10, %v1431_v27, %v1432_v34  ;;  %v8068_v27 = vpop.permute.xlu0 %1408  ;;  %v1270_v34 = vrot.slane %v1268_v13, 1  ;;  %v8106_v29 = vpop.permute.xlu2 %1528  ;;  %v1277_v8 = vrot.slane %v1275_v9, 1 }
 0x137   : >> { %1558 = vrot.lane.b32.xlu1 %v8055_v37, %s7368_s17  ;;  %v1178_v24 = vpack.c.b16 %v1162_v12, %v1162_v12 }
 0x138   : >> { %1595 = vrot.lane.b32.xlu0 %v8072_v5, %s7369_s24  ;;  %v8091_v56 = vsel %vm1187_vm9, %v1266_v28, %v1270_v34  ;;  %v1278_v42 = vor.u32 %v1277_v8, %v1273_v41 }
 0x139   : >> { %v1435_v53 = vrot.slane %v1178_v24, 1  ;;  %1640 = vrot.lane.b32.xlu2 %v8091_v56, %s7367_s15  ;;  %v1280_v0 = vshll.u32 %v1178_v24, 16  ;;  %v1696_v24 = vsel %vm422_vm2, %v7787_v46, %v8068_v27 }
 0x13a   : >> { %v8108_v11 = vpop.permute.xlu1 %1548 }
 0x13b   : >> { %v8096_v7 = vsel %vm1412_vm10, %v1434_v1, %v1435_v53  ;;  %v7042_v1 = vld [vmem:[%s7710_s27 + $0x40] sm:$0xff]  ;;  %v1282_v53 = vrot.slane %v1280_v0, 1 }
 0x13c   : >> { %2161 = vmatpush.bf16.msrb.mxu1 %v7042_v1 }
 0x13e   : >> { %v8098_v18 = vpop.permute.xlu0 %1410  ;;  %v1462_v13 = vpop.permute.xlu2 %1461 }
 0x13f   : >> { %1508 = vrot.lane.b32.xlu1 %v8030_v44, %s7367_s15 }
 0x140   : >> { %1392 = vrot.lane.b32.xlu0 %v8091_v56, %s7368_s17 }
 0x141   : >> { %1471 = vrot.lane.b32.xlu2 %v8016_v63, %s7369_s24 }
 0x142   : >> { %v1499_v34 = vpop.permute.xlu1 %1498 }
 0x144   : >> { %6686 = vmatmul.msk.bf16.gmra.mxu2 %vm422_vm2, %v7937_v36  ;;  %6695 = vmatmul.msk.bf16.gmra.mxu3 %vm422_vm2, %v7773_v19 }
 0x146   : >> { %2133 = vmatmul.bf16.gmra.mxu1 %v1770_v45  ;;  %v1381_v45 = vpop.permute.xlu0 %1380  ;;  %v1633_v33 = vpop.permute.xlu2 %1632 }
 0x147   : >> { %1560 = vrot.lane.b32.xlu1 %v8096_v7, %s7368_s17  ;;  %v1668_v12 = vsel %vm422_vm2, %v7852_v14, %v1381_v45  ;;  %v8127_v14 = vsel %vm1187_vm9, %v1278_v42, %v1282_v53  ;;  %v7236_v45 = vld [vmem:[#allocation2 + $0x6c] sm:$0xff] }
 0x148   : >> { %1597 = vrot.lane.b32.xlu0 %v7235_v30, %s7369_s24  ;;  %v1701_v28 = vsel %vm1699_vm11, %v1668_v12, %v1462_v13  ;;  %v7238_v13 = vld [vmem:[#allocation2 + $0x84] sm:$0xff] }
 0x149   : >> { %v1734_v26 = vsel %vm1732_vm12, %v1701_v28, %v1499_v34  ;;  %1642 = vrot.lane.b32.xlu2 %v8127_v14, %s7367_s15 }
 0x14a   : >> { %2073 = vmatmul.bf16.vlgmr.msra.gmra.mxu0 %v1734_v26  ;;  %v8142_v9 = vpop.permute.xlu1 %1550 }
 0x14e   : >> { %v1586_v20 = vpop.permute.xlu0 %1585  ;;  %v1464_v27 = vpop.permute.xlu2 %1463 }
 0x14f   : >> { %1510 = vrot.lane.b32.xlu1 %v8072_v5, %s7367_s15 }
 0x150   : >> { %1394 = vrot.lane.b32.xlu0 %v8127_v14, %s7368_s17 }
 0x151   : >> { %1473 = vrot.lane.b32.xlu2 %v8055_v37, %s7369_s24 }
 0x154   : >> { %6687 = vmatmul.msk.bf16.gmra.mxu2 %vm422_vm2, %v7981_v40  ;;  %6696 = vmatmul.msk.bf16.gmra.mxu3 %vm422_vm2, %v7797_v54  ;;  %v7240_v40 = vld [vmem:[#allocation2 + $0x9c] sm:$0xff] }
 0x156   : >> { %2138 = vmatmul.bf16.gmra.mxu1 %v1773_v55  ;;  %v1729_v55 = vsel %vm1699_vm11, %v1696_v24, %v8062_v15  ;;  %v1383_v12 = vpop.permute.xlu0 %1382  ;;  %v1501_v15 = vpop.permute.xlu1 %1500 }
 0x157   : >> { %1562 = vrot.lane.b32.xlu1 %v7703_v48, %s7368_s17  ;;  %v1776_v2 = vsel %vm1732_vm12, %v1729_v55, %v8082_v57  ;;  %v1670_v46 = vsel %vm422_vm2, %v7849_v10, %v1383_v12  ;;  %v1698_v10 = vsel %vm422_vm2, %v7809_v3, %v8098_v18  ;;  %v7239_v18 = vld [vmem:[#allocation2 + $0x90] sm:$0xff] }
 0x158   : >> { %1599 = vrot.lane.b32.xlu0 %v7236_v45, %s7369_s24  ;;  %v1703_v41 = vsel %vm1699_vm11, %v1670_v46, %v1464_v27  ;;  %v1731_v0 = vsel %vm1699_vm11, %v1698_v10, %v8084_v61  ;;  %v1786_v45 = vsel %vm422_vm2, %v7932_v38, %v8142_v9 }
 0x159   : >> { %v1737_v8 = vsel %vm1732_vm12, %v1703_v41, %v1501_v15  ;;  %1644 = vrot.lane.b32.xlu2 %v7678_v16, %s7367_s15  ;;  %v1779_v36 = vsel %vm1732_vm12, %v1731_v0, %v8106_v29 }
 0x15a   : >> { %2078 = vmatmul.bf16.gmra.mxu0 %v1737_v8 }
 0x15e   : >> { %v1588_v57 = vpop.permute.xlu0 %1587  ;;  %v1553_v28 = vpop.permute.xlu1 %1552 }
 0x15f   : >> { %1512 = vrot.lane.b32.xlu1 %v7235_v30, %s7367_s15  ;;  %v7237_v30 = vld [vmem:[#allocation2 + $0x78] sm:$0xff]  ;;  %v1789_v10 = vsel %vm422_vm2, %v7966_v51, %v1553_v28 }
 0x160   : >> { %1564 = vrot.lane.b32.xlu0 %v7686_v22, %s7368_s17 }
 0x161   : >> { %1475 = vrot.lane.b32.xlu2 %v8096_v7, %s7369_s24  ;;  %v1635_v25 = vpop.permute.xlu2 %1634 }
 0x164   : >> { %6688 = vmatmul.msk.bf16.gmra.mxu2 %vm422_vm2, %v8016_v63  ;;  %6697 = vmatmul.msk.bf16.gmra.mxu3 %vm422_vm2, %v7814_v6  ;;  %v7242_v63 = vld [vmem:[#allocation2 + $0xb4] sm:$0xff] }
 0x166   : >> { %2143 = vmatmul.bf16.gmra.mxu1 %v1776_v2  ;;  %v1385_v3 = vpop.permute.xlu0 %1384  ;;  %v1503_v1 = vpop.permute.xlu1 %1502  ;;  %v1832_v2 = vsel %vm1699_vm11, %v1786_v45, %v1588_v57 }
 0x167   : >> { %1601 = vrot.lane.b32.xlu1 %v7237_v30, %s7369_s24  ;;  %v1672_v61 = vsel %vm422_vm2, %v7886_v47, %v1385_v3  ;;  %v1783_v47 = vsel %vm422_vm2, %v7902_v17, %v8108_v11  ;;  %v7241_v17 = vld [vmem:[#allocation2 + $0xa8] sm:$0xff] }
 0x168   : >> { %1566 = vrot.lane.b32.xlu0 %v7719_v60, %s7368_s17 }
 0x169   : >> { %1646 = vrot.lane.b32.xlu2 %v7693_v31, %s7367_s15  ;;  %v1466_v34 = vpop.permute.xlu2 %1465 }
 0x16a   : >> { %v1705_v29 = vsel %vm1699_vm11, %v1672_v61, %v1466_v34 }
 0x16b   : >> { %v1740_v42 = vsel %vm1732_vm12, %v1705_v29, %v1503_v1 }
 0x16c   : >> { %2083 = vmatmul.bf16.gmra.mxu0 %v1740_v42  ;;  %v10677_v42 = vld [vmem:[#allocation13_spill] sm:$0xff] }
 0x16f   : >> { %1603 = vrot.lane.b32.xlu1 %v7238_v13, %s7369_s24  ;;  %v10675_v13 = vld [vmem:[#allocation9_spill] sm:$0xff] }
 0x170   : >> { %1568 = vrot.lane.b32.xlu0 %v7747_v39, %s7368_s17  ;;  %v1830_v39 = vsel %vm1699_vm11, %v1783_v47, %v1586_v20 }
 0x171   : >> { %1648 = vrot.lane.b32.xlu2 %v7734_v23, %s7367_s15  ;;  %v1637_v26 = vpop.permute.xlu2 %1636  ;;  %v1862_v55 = vsel %vm1732_vm12, %v1830_v39, %v1633_v33 }
 0x174   : >> { %6689 = vmatmul.msk.bf16.gmra.mxu2 %vm422_vm2, %v8055_v37  ;;  %6698 = vmatmul.msk.bf16.gmra.mxu3 %vm422_vm2, %v7829_v21 }
 0x176   : >> { %2148 = vmatmul.bf16.gmra.mxu1 %v1779_v36 }
 0x177   : >> { %1605 = vrot.lane.b32.xlu1 %v7239_v18, %s7369_s24 }
 0x178   : >> { %1570 = vrot.lane.b32.xlu0 %v7773_v19, %s7368_s17  ;;  %v1590_v24 = vpop.permute.xlu0 %1589 }
 0x179   : >> { %1650 = vrot.lane.b32.xlu2 %v7764_v4, %s7367_s15  ;;  %v1468_v11 = vpop.permute.xlu2 %1467  ;;  %v1834_v0 = vsel %vm1699_vm11, %v1789_v10, %v1590_v24  ;;  %v10679_v10 = vld [vmem:[#allocation11_spill] sm:$0xff] }
 0x17a   : >> { %v1868_v37 = vsel %vm1732_vm12, %v1834_v0, %v1637_v26 }
 0x17b   : >> { %v1555_v33 = vpop.permute.xlu1 %1554 }
 0x17c   : >> { %v1792_v47 = vsel %vm422_vm2, %v10677_v42, %v1555_v33 }
 0x17f   : >> { %1607 = vrot.lane.b32.xlu1 %v7240_v40, %s7369_s24 }
 0x180   : >> { %1572 = vrot.lane.b32.xlu0 %v7797_v54, %s7368_s17  ;;  %v1387_v20 = vpop.permute.xlu0 %1386 }
 0x181   : >> { %v1674_v54 = vsel %vm422_vm2, %v7925_v59, %v1387_v20  ;;  %1652 = vrot.lane.b32.xlu2 %v7783_v35, %s7367_s15  ;;  %v1865_v59 = vsel %vm1732_vm12, %v1832_v2, %v1635_v25 }
 0x182   : >> { %v1707_v12 = vsel %vm1699_vm11, %v1674_v54, %v1468_v11  ;;  %v1639_v27 = vpop.permute.xlu2 %1638 }
 0x183   : >> { %v8199_v53 = vpop.f32.mrf.mxu1  ;;  %v1505_v9 = vpop.permute.xlu1 %1504 }
 0x184   : >> { %v1743_v41 = vsel %vm1732_vm12, %v1707_v12, %v1505_v9  ;;  %6690 = vmatmul.msk.bf16.gmra.mxu2 %vm422_vm2, %v8096_v7 }
 0x185   : >> { %2088 = vmatmul.bf16.gmra.mxu0 %v1743_v41 }
 0x186   : >> { %2162 = vmatmul.bf16.vlgmr.msrb.gmra.mxu1 %v1862_v55 }
 0x187   : >> { %1609 = vrot.lane.b32.xlu1 %v7241_v17, %s7369_s24 }
 0x188   : >> { %1574 = vrot.lane.b32.xlu0 %v7814_v6, %s7368_s17 }
 0x189   : >> { %1654 = vrot.lane.b32.xlu2 %v7806_v62, %s7367_s15 }
 0x18a   : >> { %v1592_v38 = vpop.permute.xlu0 %1591  ;;  %v1470_v6 = vpop.permute.xlu2 %1469 }
 0x18b   : >> { %v8207_v19 = vpop.f32.mrf.mxu1  ;;  %v1836_v40 = vsel %vm1699_vm11, %v1792_v47, %v1592_v38 }
 0x18c   : >> { %v1871_v55 = vsel %vm1732_vm12, %v1836_v40, %v1639_v27 }
 0x18f   : >> { %1611 = vrot.lane.b32.xlu1 %v7242_v63, %s7369_s24 }
 0x191   : >> { %1656 = vrot.lane.b32.xlu2 %v10675_v13, %s7367_s15 }
 0x192   : >> { %v1389_v8 = vpop.permute.xlu0 %1388 }
 0x193   : >> { %v8225_v46 = vpop.f32.mrf.mxu1  ;;  %v1676_v57 = vsel %vm422_vm2, %v7963_v50, %v1389_v8  ;;  %v1641_v3 = vpop.permute.xlu2 %1640  ;;  %v10676_v50 = vld [vmem:[#allocation10_spill] sm:$0xff] }
 0x194   : >> { %v1709_v36 = vsel %vm1699_vm11, %v1676_v57, %v1470_v6  ;;  %6691 = vmatmul.msk.bf16.gmra.mxu2 %vm422_vm2, %v7703_v48  ;;  %v838_v57 = vrot.slane %v10679_v10, 4 }
 0x196   : >> { %2167 = vmatmul.bf16.gmra.mxu1 %v1865_v59 }
 0x199   : >> { %v1557_v30 = vpop.permute.xlu1 %1556  ;;  %1658 = vrot.lane.b32.xlu2 %v10676_v50, %s7367_s15 }
 0x19a   : >> { %v1594_v61 = vpop.permute.xlu0 %1593  ;;  %v1795_v54 = vsel %vm422_vm2, %v8048_v32, %v1557_v30 }
 0x19b   : >> { %v8231_v15 = vpop.f32.mrf.mxu1  ;;  %v1472_v28 = vpop.permute.xlu2 %1471  ;;  %v1838_v63 = vsel %vm1699_vm11, %v1795_v54, %v1594_v61 }
 0x19c   : >> { %v1874_v9 = vsel %vm1732_vm12, %v1838_v63, %v1641_v3 }
 0x1a1   : >> { %v1507_v18 = vpop.permute.xlu1 %1506  ;;  %1576 = vrot.lane.b32.xlu2 %v7829_v21, %s7368_s17 }
 0x1a2   : >> { %v1746_v34 = vsel %vm1732_vm12, %v1709_v36, %v1507_v18  ;;  %v1391_v29 = vpop.permute.xlu0 %1390  ;;  %v1002_v36 = vld [vmem:[#allocation2 + $0xc8] sm:$0x1] }
 0x1a3   : >> { %v8245_v25 = vpop.f32.mrf.mxu1  ;;  %2093 = vmatmul.bf16.gmra.mxu0 %v1746_v34  ;;  %v1678_v39 = vsel %vm422_vm2, %v7995_v58, %v1391_v29  ;;  %v1643_v7 = vpop.permute.xlu2 %1642  ;;  %v10678_v58 = vld [vmem:[#allocation12_spill] sm:$0xff]  ;;  %v1003_v3 = vsel %vm7629_vm8, %v838_v57, %v1002_v36 }
 0x1a4   : >> { %v1711_v26 = vsel %vm1699_vm11, %v1678_v39, %v1472_v28  ;;  %6692 = vmatmul.msk.bf16.gmra.mxu2 %vm422_vm2, %v7686_v22  ;;  %1004 = vst [vmem:[#allocation2 + $0xc8] sm:$0x1] %v1003_v3  ;;  %v1534_v47 = vshrl.u32 %v10678_v58, 16  ;;  %v1536_v39 = vshll.u32 %v10678_v58, 16 }
 0x1a6   : >> { %2172 = vmatmul.bf16.gmra.mxu1 %v1868_v37 }
 0x1a9   : >> { %v1559_v1 = vpop.permute.xlu1 %1558  ;;  %1613 = vrot.lane.b32.xlu2 %v10678_v58, %s7369_s24 }
 0x1aa   : >> { %v1596_v17 = vpop.permute.xlu0 %1595  ;;  %v1798_v8 = vsel %vm422_vm2, %v8091_v56, %v1559_v1 }
 0x1ab   : >> { %v8251_v51 = vpop.f32.mrf.mxu1  ;;  %v1474_v2 = vpop.permute.xlu2 %1473  ;;  %v1840_v37 = vsel %vm1699_vm11, %v1798_v8, %v1596_v17 }
 0x1ac   : >> { %v1877_v56 = vsel %vm1732_vm12, %v1840_v37, %v1643_v7 }
 0x1b1   : >> { %v1509_v11 = vpop.permute.xlu1 %1508 }
 0x1b2   : >> { %v1749_v20 = vsel %vm1732_vm12, %v1711_v26, %v1509_v11  ;;  %v1393_v21 = vpop.permute.xlu0 %1392  ;;  %v1538_v26 = vrot.slane %v1536_v39, 1 }
 0x1b3   : >> { %v8263_v24 = vpop.f32.mrf.mxu1  ;;  %2098 = vmatmul.bf16.gmra.mxu0 %v1749_v20  ;;  %v1680_v12 = vsel %vm422_vm2, %v8030_v44, %v1393_v21  ;;  %v1645_v6 = vpop.permute.xlu2 %1644 }
 0x1b4   : >> { %v1713_v27 = vsel %vm1699_vm11, %v1680_v12, %v1474_v2  ;;  %6693 = vmatmul.msk.bf16.gmra.mxu2 %vm422_vm2, %v7719_v60  ;;  %v1539_v7 = vor.u32 %v1538_v26, %v1534_v47 }
 0x1b6   : >> { %2177 = vmatmul.bf16.gmra.mxu1 %v1871_v55 }
 0x1b7   : >> { %v2252_v60 = vpop.f32.mrf.mxu2 }
 0x1b9   : >> { %v1561_v45 = vpop.permute.xlu1 %1560 }
 0x1ba   : >> { %v1598_v59 = vpop.permute.xlu0 %1597  ;;  %v1801_v40 = vsel %vm422_vm2, %v8127_v14, %v1561_v45  ;;  %v1545_v14 = vrot.slane %v10678_v58, 1 }
 0x1bb   : >> { %v8269_v33 = vpop.f32.mrf.mxu1  ;;  %v1476_v61 = vpop.permute.xlu2 %1475  ;;  %v1842_v11 = vsel %vm1699_vm11, %v1801_v40, %v1598_v59 }
 0x1bc   : >> { %v1880_v54 = vsel %vm1732_vm12, %v1842_v11, %v1645_v6 }
 0x1c1   : >> { %v1511_v41 = vpop.permute.xlu1 %1510 }
 0x1c2   : >> { %v1752_v48 = vsel %vm1732_vm12, %v1713_v27, %v1511_v41  ;;  %v1395_v30 = vpop.permute.xlu0 %1394  ;;  %v2933_v27 = vld [vmem:[#allocation2 + $0x8] sm:$0x1]  ;;  %v8325_v41 = vpop.f32.mrf.mxu2 }
 0x1c3   : >> { %v8279_v38 = vpop.f32.mrf.mxu1  ;;  %2103 = vmatmul.bf16.gmra.mxu0 %v1752_v48  ;;  %v1682_v0 = vsel %vm422_vm2, %v8072_v5, %v1395_v30  ;;  %v1055_v5 = vld [vmem:[#allocation2 + $0xc8] sm:$0x1]  ;;  %v7089_v48 = vld [vmem:[#allocation2] sm:$0xff]  ;;  %v3081_v6 = vunpack.c.l.b16 %v2933_v27  ;;  %v1647_v10 = vpop.permute.xlu2 %1646 }
 0x1c4   : >> { %v1715_v22 = vsel %vm1699_vm11, %v1682_v0, %v1476_v61  ;;  %v1531_v29 = vunpack.c.l.b16 %v1055_v5  ;;  %v3116_v58 = vshll.u32 %v7089_v48, 16  ;;  %v8328_v0 = vld [vmem:[#allocation2 + $0xcc] sm:$0xff]  ;;  %v3114_v36 = vshrl.u32 %v7089_v48, 16  ;;  %v1058_v61 = vld [vmem:[#allocation2 + $0xd4] sm:$0x1] }
 0x1c5   : >> { %v3097_v8 = vpack.c.b16 %v3081_v6, %v3081_v6 }
 0x1c6   : >> { %2182 = vmatmul.bf16.gmra.mxu1 %v1874_v9  ;;  %v1532_v42 = vpack.c.b16 %v1531_v29, %v1531_v29  ;;  %v3118_v37 = vrot.slane %v3116_v58, 1 }
 0x1c7   : >> { %v2074_v2 = vpop.f32.mrf.mxu0  ;;  %v3121_v3 = vshll.u32 %v3097_v8, 16 }
 0x1c8   : >> { %v1541_v55 = vshll.u32 %v1532_v42, 16  ;;  %v1546_v45 = vrot.slane %v1532_v42, 1  ;;  %v1621_v42 = vshrl.u32 %v8328_v0, 16 }
 0x1c9   : >> { %v1563_v44 = vpop.permute.xlu1 %1562 }
 0x1ca   : >> { %v1543_v17 = vrot.slane %v1541_v55, 1  ;;  %v1547_v12 = vsel %vm1412_vm10, %v1545_v14, %v1546_v45  ;;  %v1804_v9 = vsel %vm422_vm2, %v7678_v16, %v1563_v44  ;;  %v1600_v59 = vpop.permute.xlu0 %1599  ;;  %v3119_v44 = vor.u32 %v3118_v37, %v3114_v36  ;;  %v2257_v39 = vpop.f32.mrf.mxu2 }
 0x1cb   : >> { %v8283_v32 = vpop.f32.mrf.mxu1  ;;  %6699 = vmatmul.msk.bf16.gmra.mxu3 %vm422_vm2, %v1547_v12  ;;  %v1844_v30 = vsel %vm1699_vm11, %v1804_v9, %v1600_v59  ;;  %v3337_v14 = vrot.slane %v7089_v48, 1  ;;  %v3338_v45 = vrot.slane %v3097_v8, 1  ;;  %v1649_v6 = vpop.permute.xlu2 %1648  ;;  %v8355_v8 = vstv %s7478_s23 }
 0x1cc   : >> { %v8310_v20 = vsel %vm1187_vm9, %v1539_v7, %v1543_v17  ;;  %v1883_v16 = vsel %vm1732_vm12, %v1844_v30, %v1647_v10 }
 0x1cd   : >> { %1660 = vrot.lane.b32.xlu2 %v8310_v20, %s7367_s15  ;;  %v3339_v9 = vsel %vm1412_vm10, %v3337_v14, %v3338_v45 }
 0x1cf   : >> { %v2076_v57 = vpop.f32.mrf.mxu0 }
 0x1d1   : >> { %v1513_v34 = vpop.permute.xlu1 %1512 }
 0x1d2   : >> { %v1755_v28 = vsel %vm1732_vm12, %v1715_v22, %v1513_v34  ;;  %v1618_v34 = vunpack.c.l.b16 %v1058_v61  ;;  %v1565_v7 = vpop.permute.xlu0 %1564  ;;  %v8351_v58 = vpop.f32.mrf.mxu2 }
 0x1d3   : >> { %v8296_v18 = vpop.f32.mrf.mxu1  ;;  %2108 = vmatmul.bf16.gmra.mxu0 %v1755_v28  ;;  %v1623_v28 = vshll.u32 %v8328_v0, 16 }
 0x1d4   : >> { %v8337_v29 = vpack.c.b16 %v1618_v34, %v1618_v34 }
 0x1d5   : >> { %1578 = vrot.lane.b32.xlu2 %v1547_v12, %s7368_s17  ;;  %v1625_v47 = vrot.slane %v1623_v28, 1  ;;  %v1807_v12 = vsel %vm422_vm2, %v7693_v31, %v1565_v7 }
 0x1d6   : >> { %2187 = vmatmul.bf16.gmra.mxu1 %v1877_v56  ;;  %v3123_v56 = vrot.slane %v3121_v3, 1  ;;  %v1628_v40 = vshll.u32 %v8337_v29, 16 }
 0x1d7   : >> { %v1626_v26 = vor.u32 %v1625_v47, %v1621_v42  ;;  %v2079_v11 = vpop.f32.mrf.mxu0 }
 0x1d8   : >> { %v3124_v5 = vsel %vm1187_vm9, %v3119_v44, %v3123_v56  ;;  %v1630_v55 = vrot.slane %v1628_v40, 1 }
 0x1d9   : >> { %3305 = vrot.lane.b32.xlu0 %v3124_v5, %s7368_s17  ;;  %v1602_v27 = vpop.permute.xlu1 %1601 }
 0x1da   : >> { %v1846_v59 = vsel %vm1699_vm11, %v1807_v12, %v1602_v27  ;;  %v8358_v3 = vpop.f32.mrf.mxu2 }
 0x1db   : >> { %v8300_v1 = vpop.f32.mrf.mxu1  ;;  %v1886_v10 = vsel %vm1732_vm12, %v1846_v59, %v1649_v6  ;;  %v7086_v6 = vld [vmem:[%s8372_s26 + $0x78] sm:$0xff] }
 0x1dc   : >> { %4076 = vmatpush.bf16.msrb.mxu2 %v7086_v6 }
 0x1dd   : >> { %1615 = vrot.lane.b32.xlu2 %v8328_v0, %s7369_s24 }
 0x1df   : >> { %v2081_v36 = vpop.f32.mrf.mxu0 }
 0x1e1   : >> { %3385 = vrot.lane.b32.xlu0 %v3339_v9, %s7369_s24  ;;  %v1604_v5 = vpop.permute.xlu1 %1603  ;;  %v7088_v9 = vld [vmem:[%s8372_s26 + $0x88] sm:$0xff] }
 0x1e2   : >> { %v8377_v27 = vpop.f32.mrf.mxu2  ;;  %4171 = vmatpush.bf16.msrb.mxu0 %v7088_v9 }
 0x1e3   : >> { %v8314_v21 = vpop.f32.mrf.mxu1 }
 0x1e6   : >> { %2192 = vmatmul.bf16.gmra.mxu1 %v1880_v54  ;;  %v1631_v54 = vsel %vm1187_vm9, %v1626_v26, %v1630_v55  ;;  %v2819_v26 = vld [vmem:[#allocation2 + $0xc] sm:$0xf] }
 0x1e7   : >> { %1662 = vrot.lane.b32.xlu2 %v1631_v54, %s7367_s15  ;;  %v1651_v54 = vpop.permute.xlu2 %1650 }
 0x1e9   : >> { %v8362_v42 = vpop.f32.mrf.mxu0 }
 0x1eb   : >> { %v8321_v63 = vpop.f32.mrf.mxu1 }
 0x1f3   : >> { %v8330_v22 = vpop.f32.mrf.mxu1 }
 0x1f6   : >> { %2197 = vmatmul.bf16.gmra.mxu1 %v1883_v16  ;;  %v1567_v16 = vpop.permute.xlu0 %1566 }
 0x1fb   : >> { %v8342_v17 = vpop.f32.mrf.mxu1 }
 0x203   : >> { %v2163_v30 = vpop.f32.mrf.mxu1 }
 0x204   : >> { %v2164_v48 = vadd.f32 %v2163_v30, %v2074_v2  ;;  %v1810_v2 = vsel %vm422_vm2, %v7734_v23, %v1567_v16 }
 0x205   : >> { %v1848_v7 = vsel %vm1699_vm11, %v1810_v2, %v1604_v5  ;;  %v1569_v5 = vpop.permute.xlu0 %1568 }
 0x206   : >> { %v2253_v37 = vadd.f32 %v2252_v60, %v2164_v48  ;;  %2202 = vmatmul.bf16.gmra.mxu1 %v1886_v10  ;;  %v1889_v12 = vsel %vm1732_vm12, %v1848_v7, %v1651_v54  ;;  %v1606_v54 = vpop.permute.xlu1 %1605 }
 0x208   : >> { %vm2332_vm13 = vcmp.ge.f32.partialorder %v2253_v37, 0.0  ;;  %v2365_v31 = vmul.f32 %v8355_v8, %v2253_v37 }
 0x20a   : >> { %v2397_v61 = vsel %vm2332_vm13, %v2253_v37, %v2365_v31  ;;  %v8381_v31 = vpop.f32.mrf.mxu0 }
 0x20b   : >> { %v2467_v44 = vpack.c.bf16 %v2397_v61, %v2397_v61  ;;  %v2165_v56 = vpop.f32.mrf.mxu1  ;;  %v2823_v61 = vld [vmem:[#allocation2 + $0x14] sm:$0x1] }
 0x20c   : >> { %v2166_v34 = vadd.f32 %v2165_v56, %v2076_v57  ;;  %v7087_v56 = vld [vmem:[%s8372_s26 + $0x80] sm:$0xff] }
 0x20d   : >> { %v2500_v28 = vshrl.u32 %v2467_v44, 16  ;;  %v2503_v40 = vshll.u32 %v2467_v44, 16  ;;  %v1653_v44 = vpop.permute.xlu2 %1652  ;;  %4172 = vmatpush.bf16.msrb.mxu0 %v7087_v56  ;;  %v7085_v56 = vld [vmem:[%s8372_s26 + $0x70] sm:$0xff] }
 0x20e   : >> { %v2255_v60 = vadd.f32 %v8325_v41, %v2166_v34  ;;  %4077 = vmatpush.bf16.msrb.mxu2 %v7085_v56 }
 0x20f   : >> { %v2502_v47 = vrot.slane %v2500_v28, 7 }
 0x210   : >> { %vm2333_vm14 = vcmp.ge.f32.partialorder %v2255_v60, 0.0  ;;  %v2366_v55 = vmul.f32 %v8355_v8, %v2255_v60 }
 0x211   : >> { %v2505_v23 = vor.u32 %v2503_v40, %v2502_v47  ;;  %v2506_v34 = vrot.slane %v2502_v47, 4  ;;  %v1813_v47 = vsel %vm422_vm2, %v7764_v4, %v1569_v5 }
 0x212   : >> { %v2398_v57 = vsel %vm2333_vm14, %v2255_v60, %v2366_v55 }
 0x213   : >> { %v2820_v41 = vsel %vm7623_vm7, %v2505_v23, %v2819_v26  ;;  %v2468_v14 = vpack.c.bf16 %v2398_v57, %v2398_v57  ;;  %v2168_v45 = vpop.f32.mrf.mxu1  ;;  %v8392_v23 = vpop.f32.mrf.mxu2 }
 0x214   : >> { %2821 = vst [vmem:[#allocation2 + $0xc] sm:$0xf] %v2820_v41  ;;  %v2169_v59 = vadd.f32 %v2168_v45, %v2079_v11  ;;  %v8395_v45 = vpop.f32.mrf.mxu0 }
 0x215   : >> { %v2508_v30 = vshrl.u32 %v2468_v14, 16  ;;  %v2511_v37 = vshll.u32 %v2468_v14, 16 }
 0x216   : >> { %v2258_v10 = vadd.f32 %v2257_v39, %v2169_v59  ;;  %2207 = vmatmul.bf16.gmra.mxu1 %v1889_v12  ;;  %v2826_v12 = vld [vmem:[#allocation2 + $0x18] sm:$0xf]  ;;  %v8399_v59 = vpop.permute.xlu2 %1654 }
 0x217   : >> { %v2510_v48 = vrot.slane %v2508_v30, 7 }
 0x218   : >> { %vm2334_vm15 = vcmp.ge.f32.partialorder %v2258_v10, 0.0  ;;  %v2367_v16 = vmul.f32 %v8355_v8, %v2258_v10 }
 0x219   : >> { %v2513_v28 = vor.u32 %v2511_v37, %v2510_v48  ;;  %v2515_v2 = vrot.slane %v2510_v48, 4 }
 0x21a   : >> { %v2399_v11 = vsel %vm2334_vm15, %v2258_v10, %v2367_v16 }
 0x21b   : >> { %v2514_v39 = vsel %vm7618_vm6, %v2506_v34, %v2513_v28  ;;  %v2824_v60 = vsel %vm7629_vm8, %v2515_v2, %v2823_v61  ;;  %v2469_v40 = vpack.c.bf16 %v2399_v11, %v2399_v11  ;;  %v2170_v26 = vpop.f32.mrf.mxu1 }
 0x21c   : >> { %2822 = vst.msk [vmem:[#allocation2 + $0x10] sm:$0xf] %vm334_vm0, %v2514_v39  ;;  %v2171_v55 = vadd.f32 %v2170_v26, %v2081_v36  ;;  %v1850_v36 = vsel %vm1699_vm11, %v1813_v47, %v1606_v54 }
 0x21d   : >> { %2825 = vst [vmem:[#allocation2 + $0x14] sm:$0x1] %v2824_v60  ;;  %v2517_v7 = vshrl.u32 %v2469_v40, 16  ;;  %v2520_v14 = vshll.u32 %v2469_v40, 16  ;;  %v1892_v48 = vsel %vm1732_vm12, %v1850_v36, %v1653_v44  ;;  %v8408_v60 = vpop.f32.mrf.mxu2  ;;  %v2830_v40 = vld [vmem:[#allocation2 + $0x20] sm:$0x1] }
 0x21e   : >> { %v2260_v57 = vadd.f32 %v8351_v58, %v2171_v55 }
 0x21f   : >> { %v2519_v41 = vrot.slane %v2517_v7, 7 }
 0x220   : >> { %vm2335_vm3 = vcmp.ge.f32.partialorder %v2260_v57, 0.0  ;;  %v2368_v9 = vmul.f32 %v8355_v8, %v2260_v57 }
 0x221   : >> { %v2522_v6 = vor.u32 %v2520_v14, %v2519_v41  ;;  %v2523_v44 = vrot.slane %v2519_v41, 4  ;;  %v8411_v14 = vpop.f32.mrf.mxu0 }
 0x222   : >> { %v2400_v4 = vsel %vm2335_vm3, %v2260_v57, %v2368_v9  ;;  %v1571_v57 = vpop.permute.xlu0 %1570 }
 0x223   : >> { %v2827_v30 = vsel %vm7623_vm7, %v2522_v6, %v2826_v12  ;;  %v2470_v10 = vpack.c.bf16 %v2400_v4, %v2400_v4  ;;  %v2173_v58 = vpop.f32.mrf.mxu1  ;;  %v7090_v37 = vld [vmem:[#allocation2 + $0xc] sm:$0xff]  ;;  %v8413_v12 = vpop.permute.xlu2 %1656 }
 0x224   : >> { %2828 = vst [vmem:[#allocation2 + $0x18] sm:$0xf] %v2827_v30  ;;  %v2174_v61 = vadd.f32 %v2173_v58, %v8362_v42  ;;  %v2936_v16 = vld [vmem:[#allocation2 + $0x14] sm:$0x1]  ;;  %3422 = vrot.lane.b32.xlu0 %v7090_v37, %s7367_s15  ;;  %v3128_v26 = vshll.u32 %v7090_v37, 16  ;;  %v3340_v47 = vrot.slane %v7090_v37, 1  ;;  %v1608_v58 = vpop.permute.xlu1 %1607 }
 0x225   : >> { %v2525_v34 = vshrl.u32 %v2470_v10, 16  ;;  %v3082_v28 = vunpack.c.l.b16 %v2936_v16  ;;  %v2528_v5 = vshll.u32 %v2470_v10, 16  ;;  %v1816_v10 = vsel %vm422_vm2, %v7783_v35, %v1571_v57 }
 0x226   : >> { %v2263_v2 = vadd.f32 %v8358_v3, %v2174_v61  ;;  %2212 = vmatmul.bf16.gmra.mxu1 %v1892_v48  ;;  %v3130_v48 = vrot.slane %v3128_v26, 1 }
 0x227   : >> { %v2527_v11 = vrot.slane %v2525_v34, 7  ;;  %v3098_v39 = vpack.c.b16 %v3082_v28, %v3082_v28  ;;  %v3126_v34 = vshrl.u32 %v7090_v37, 16 }
 0x228   : >> { %vm2336_vm4 = vcmp.ge.f32.partialorder %v2263_v2, 0.0  ;;  %v2369_v42 = vmul.f32 %v8355_v8, %v2263_v2 }
 0x229   : >> { %v2530_v55 = vor.u32 %v2528_v5, %v2527_v11  ;;  %v2532_v7 = vrot.slane %v2527_v11, 4  ;;  %v3341_v54 = vrot.slane %v3098_v39, 1  ;;  %v3133_v61 = vshll.u32 %v3098_v39, 16  ;;  %v8429_v39 = vpop.f32.mrf.mxu2 }
 0x22a   : >> { %v2401_v3 = vsel %vm2336_vm4, %v2263_v2, %v2369_v42  ;;  %v1852_v11 = vsel %vm1699_vm11, %v1816_v10, %v1608_v58  ;;  %v2837_v58 = vld [vmem:[#allocation2 + $0x2c] sm:$0x1] }
 0x22b   : >> { %v2531_v9 = vsel %vm7618_vm6, %v2523_v44, %v2530_v55  ;;  %v2831_v41 = vsel %vm7629_vm8, %v2532_v7, %v2830_v40  ;;  %v2471_v36 = vpack.c.bf16 %v2401_v3, %v2401_v3  ;;  %v2175_v6 = vpop.f32.mrf.mxu1  ;;  %v3342_v4 = vsel %vm1412_vm10, %v3340_v47, %v3341_v54  ;;  %v8435_v47 = vpop.f32.mrf.mxu0 }
 0x22c   : >> { %2829 = vst.msk [vmem:[#allocation2 + $0x1c] sm:$0xf] %vm334_vm0, %v2531_v9  ;;  %v2176_v30 = vadd.f32 %v2175_v6, %v8381_v31  ;;  %3472 = vrot.lane.b32.xlu1 %v3342_v4, %s7368_s17  ;;  %3387 = vrot.lane.b32.xlu0 %v3342_v4, %s7369_s24  ;;  %v2833_v31 = vld [vmem:[#allocation2 + $0x24] sm:$0xf]  ;;  %v3131_v44 = vor.u32 %v3130_v48, %v3126_v34  ;;  %v3135_v35 = vrot.slane %v3133_v61, 1  ;;  %v8441_v9 = vpop.permute.xlu2 %1658 }
 0x22d   : >> { %2832 = vst [vmem:[#allocation2 + $0x20] sm:$0x1] %v2831_v41  ;;  %v2534_v16 = vshrl.u32 %v2471_v36, 16  ;;  %v2537_v2 = vshll.u32 %v2471_v36, 16  ;;  %v1895_v55 = vsel %vm1732_vm12, %v1852_v11, %v8399_v59  ;;  %v7078_v41 = vld [vmem:[%s8372_s26 + $0x38] sm:$0xff]  ;;  %v1573_v11 = vpop.permute.xlu0 %1572 }
 0x22e   : >> { %v2265_v56 = vadd.f32 %v8377_v27, %v2176_v30  ;;  %v8439_v57 = vsel %vm1187_vm9, %v3131_v44, %v3135_v35  ;;  %3987 = vmatpush.bf16.msrb.mxu3 %v7078_v41 }
 0x22f   : >> { %v2536_v28 = vrot.slane %v2534_v16, 7 }
 0x230   : >> { %vm2337_vm5 = vcmp.ge.f32.partialorder %v2265_v56, 0.0  ;;  %v2370_v5 = vmul.f32 %v8355_v8, %v2265_v56 }
 0x231   : >> { %v2539_v40 = vor.u32 %v2537_v2, %v2536_v28  ;;  %v2540_v10 = vrot.slane %v2536_v28, 4 }
 0x232   : >> { %v2402_v42 = vsel %vm2337_vm5, %v2265_v56, %v2370_v5 }
 0x233   : >> { %v2834_v26 = vsel %vm7623_vm7, %v2539_v40, %v2833_v31  ;;  %v2472_v27 = vpack.c.bf16 %v2402_v42, %v2402_v42  ;;  %v2178_v37 = vpop.f32.mrf.mxu1  ;;  %v7091_v7 = vld [vmem:[#allocation2 + $0x18] sm:$0xff]  ;;  %v8454_v40 = vpop.f32.mrf.mxu2 }
 0x234   : >> { %2835 = vst [vmem:[#allocation2 + $0x24] sm:$0xf] %v2834_v26  ;;  %v2179_v54 = vadd.f32 %v2178_v37, %v8395_v45  ;;  %v2939_v3 = vld [vmem:[#allocation2 + $0x20] sm:$0x1]  ;;  %3307 = vrot.lane.b32.xlu0 %v8439_v57, %s7368_s17  ;;  %3509 = vrot.lane.b32.xlu1 %v7091_v7, %s7369_s24  ;;  %v3140_v61 = vshll.u32 %v7091_v7, 16  ;;  %v3343_v34 = vrot.slane %v7091_v7, 1  ;;  %v1819_v26 = vsel %vm422_vm2, %v7806_v62, %v1573_v11  ;;  %v2096_v41 = vpop.f32.mrf.mxu0 }
 0x235   : >> { %v2542_v36 = vshrl.u32 %v2472_v27, 16  ;;  %v3083_v59 = vunpack.c.l.b16 %v2939_v3  ;;  %v2545_v45 = vshll.u32 %v2472_v27, 16  ;;  %v1610_v27 = vpop.permute.xlu1 %1609 }
 0x236   : >> { %v2268_v6 = vadd.f32 %v8392_v23, %v2179_v54  ;;  %2217 = vmatmul.bf16.gmra.mxu1 %v1895_v55  ;;  %v3142_v37 = vrot.slane %v3140_v61, 1  ;;  %v1854_v62 = vsel %vm1699_vm11, %v1819_v26, %v1610_v27 }
 0x237   : >> { %v2544_v4 = vrot.slane %v2542_v36, 7  ;;  %v3099_v30 = vpack.c.b16 %v3083_v59, %v3083_v59  ;;  %v7084_v36 = vld [vmem:[%s8372_s26 + $0x68] sm:$0xff] }
 0x238   : >> { %vm2338_vm13 = vcmp.ge.f32.partialorder %v2268_v6, 0.0  ;;  %v2371_v48 = vmul.f32 %v8355_v8, %v2268_v6  ;;  %4078 = vmatpush.bf16.msrb.mxu2 %v7084_v36 }
 0x239   : >> { %v2547_v16 = vor.u32 %v2545_v45, %v2544_v4  ;;  %v2549_v56 = vrot.slane %v2544_v4, 4  ;;  %v3344_v2 = vrot.slane %v3099_v30, 1  ;;  %v3145_v55 = vshll.u32 %v3099_v30, 16  ;;  %v2840_v45 = vld [vmem:[#allocation2 + $0x30] sm:$0xf] }
 0x23a   : >> { %v2403_v31 = vsel %vm2338_vm13, %v2268_v6, %v2371_v48  ;;  %v8466_v6 = vpop.permute.xlu2 %1576 }
 0x23b   : >> { %v2548_v23 = vsel %vm7618_vm6, %v2540_v10, %v2547_v16  ;;  %v2838_v5 = vsel %vm7629_vm8, %v2549_v56, %v2837_v58  ;;  %v2473_v44 = vpack.c.bf16 %v2403_v31, %v2403_v31  ;;  %v2180_v35 = vpop.f32.mrf.mxu1  ;;  %v3345_v28 = vsel %vm1412_vm10, %v3343_v34, %v3344_v2 }
 0x23c   : >> { %2836 = vst.msk [vmem:[#allocation2 + $0x28] sm:$0xf] %vm334_vm0, %v2548_v23  ;;  %3389 = vrot.lane.b32.xlu2 %v3345_v28, %s7369_s24  ;;  %v2181_v42 = vadd.f32 %v2180_v35, %v8411_v14  ;;  %6846 = vmatmul.msk.bf16.vlgmr.msrb.gmra.mxu0 %vm422_vm2, %v3345_v28  ;;  %v3138_v14 = vshrl.u32 %v7091_v7, 16  ;;  %v3147_v58 = vrot.slane %v3145_v55, 1  ;;  %v1898_v56 = vsel %vm1732_vm12, %v1854_v62, %v8413_v12  ;;  %v7077_v23 = vld [vmem:[%s8372_s26 + $0x30] sm:$0xff]  ;;  %v8485_v35 = vpop.f32.mrf.mxu2  ;;  %v2099_v26 = vpop.f32.mrf.mxu0 }
 0x23d   : >> { %2839 = vst [vmem:[#allocation2 + $0x2c] sm:$0x1] %v2838_v5  ;;  %v2551_v54 = vshrl.u32 %v2473_v44, 16  ;;  %v2554_v3 = vshll.u32 %v2473_v44, 16  ;;  %3424 = vrot.lane.b32.xlu0 %v7091_v7, %s7367_s15  ;;  %3474 = vrot.lane.b32.xlu1 %v3345_v28, %s7368_s17  ;;  %v1575_v62 = vpop.permute.xlu0 %1574 }
 0x23e   : >> { %v2270_v59 = vadd.f32 %v8408_v60, %v2181_v42  ;;  %v3143_v10 = vor.u32 %v3142_v37, %v3138_v14  ;;  %3988 = vmatpush.bf16.msrb.mxu3 %v7077_v23  ;;  %v2844_v37 = vld [vmem:[#allocation2 + $0x38] sm:$0x1]  ;;  %v7083_v23 = vld [vmem:[%s8372_s26 + $0x60] sm:$0xff] }
 0x23f   : >> { %v2553_v4 = vrot.slane %v2551_v54, 7  ;;  %4079 = vmatpush.bf16.msrb.mxu2 %v7083_v23  ;;  %v2851_v23 = vld [vmem:[#allocation2 + $0x44] sm:$0x1] }
 0x240   : >> { %vm2339_vm14 = vcmp.ge.f32.partialorder %v2270_v59, 0.0  ;;  %v2372_v30 = vmul.f32 %v8355_v8, %v2270_v59  ;;  %v8476_v2 = vsel %vm1187_vm9, %v3143_v10, %v3147_v58 }
 0x241   : >> { %v2556_v48 = vor.u32 %v2554_v3, %v2553_v4  ;;  %v2557_v27 = vrot.slane %v2553_v4, 4 }
 0x242   : >> { %v2404_v61 = vsel %vm2339_vm14, %v2270_v59, %v2372_v30  ;;  %v8489_v54 = vpop.permute.xlu2 %1613 }
 0x243   : >> { %v2841_v16 = vsel %vm7623_vm7, %v2556_v48, %v2840_v45  ;;  %v2474_v60 = vpack.c.bf16 %v2404_v61, %v2404_v61  ;;  %v2183_v7 = vpop.f32.mrf.mxu1  ;;  %v8478_v11 = vld [vmem:[#allocation2 + $0x24] sm:$0xff] }
 0x244   : >> { %2842 = vst [vmem:[#allocation2 + $0x30] sm:$0xf] %v2841_v16  ;;  %v2184_v34 = vadd.f32 %v2183_v7, %v8435_v47  ;;  %v2942_v31 = vld [vmem:[#allocation2 + $0x2c] sm:$0x1]  ;;  %v3152_v3 = vshll.u32 %v8478_v11, 16  ;;  %v3346_v14 = vrot.slane %v8478_v11, 1  ;;  %v1822_v16 = vsel %vm422_vm2, %v10675_v13, %v1575_v62 }
 0x245   : >> { %v2559_v5 = vshrl.u32 %v2474_v60, 16  ;;  %3309 = vrot.lane.b32.xlu0 %v8476_v2, %s7368_s17  ;;  %3556 = vrot.lane.b32.xlu1 %v8476_v2, %s7367_s15  ;;  %v3084_v44 = vunpack.c.l.b16 %v2942_v31  ;;  %v2562_v28 = vshll.u32 %v2474_v60, 16  ;;  %v1612_v60 = vpop.permute.xlu1 %1611  ;;  %v2847_v13 = vld [vmem:[#allocation2 + $0x3c] sm:$0xf] }
 0x246   : >> { %v2273_v12 = vadd.f32 %v8429_v39, %v2184_v34  ;;  %2222 = vmatmul.bf16.gmra.mxu1 %v1898_v56  ;;  %v3154_v7 = vrot.slane %v3152_v3, 1  ;;  %v1664_v3 = vrot.slane %v8328_v0, 1 }
 0x247   : >> { %v2561_v47 = vrot.slane %v2559_v5, 7  ;;  %v3100_v42 = vpack.c.b16 %v3084_v44, %v3084_v44 }
 0x248   : >> { %vm2340_vm15 = vcmp.ge.f32.partialorder %v2273_v12, 0.0  ;;  %v2373_v55 = vmul.f32 %v8355_v8, %v2273_v12 }
 0x249   : >> { %v2564_v36 = vor.u32 %v2562_v28, %v2561_v47  ;;  %v2566_v59 = vrot.slane %v2561_v47, 4  ;;  %v3347_v39 = vrot.slane %v3100_v42, 1  ;;  %v3157_v56 = vshll.u32 %v3100_v42, 16  ;;  %v8511_v47 = vpop.f32.mrf.mxu2 }
 0x24a   : >> { %v2405_v45 = vsel %vm2340_vm15, %v2273_v12, %v2373_v55  ;;  %v1856_v12 = vsel %vm1699_vm11, %v1822_v16, %v1612_v60  ;;  %v2101_v55 = vpop.f32.mrf.mxu0 }
 0x24b   : >> { %v2565_v30 = vsel %vm7618_vm6, %v2557_v27, %v2564_v36  ;;  %v2845_v4 = vsel %vm7629_vm8, %v2566_v59, %v2844_v37  ;;  %v2475_v10 = vpack.c.bf16 %v2405_v45, %v2405_v45  ;;  %v2185_v58 = vpop.f32.mrf.mxu1  ;;  %v8498_v48 = vsel %vm1412_vm10, %v3346_v14, %v3347_v39  ;;  %v8516_v59 = vpop.permute.xlu2 %1660 }
 0x24c   : >> { %2843 = vst.msk [vmem:[#allocation2 + $0x34] sm:$0xf] %vm334_vm0, %v2565_v30  ;;  %v2186_v61 = vadd.f32 %v2185_v58, %v2096_v41  ;;  %6847 = vmatmul.msk.bf16.gmra.mxu0 %vm422_vm2, %v8498_v48  ;;  %v3150_v41 = vshrl.u32 %v8478_v11, 16  ;;  %v3159_v27 = vrot.slane %v3157_v56, 1  ;;  %v1901_v45 = vsel %vm1732_vm12, %v1856_v12, %v8441_v9  ;;  %v7076_v58 = vld [vmem:[%s8372_s26 + $0x28] sm:$0xff] }
 0x24d   : >> { %2846 = vst [vmem:[#allocation2 + $0x38] sm:$0x1] %v2845_v4  ;;  %v2568_v34 = vshrl.u32 %v2475_v10, 16  ;;  %v2571_v31 = vshll.u32 %v2475_v10, 16  ;;  %3511 = vrot.lane.b32.xlu1 %v8478_v11, %s7369_s24  ;;  %3989 = vmatpush.bf16.msrb.mxu3 %v7076_v58 }
 0x24e   : >> { %v2275_v5 = vadd.f32 %v8454_v40, %v2186_v61  ;;  %v3155_v42 = vor.u32 %v3154_v7, %v3150_v41  ;;  %v1665_v40 = vrot.slane %v8337_v29, 1 }
 0x24f   : >> { %v2570_v44 = vrot.slane %v2568_v34, 7 }
 0x250   : >> { %vm2341_vm3 = vcmp.ge.f32.partialorder %v2275_v5, 0.0  ;;  %v2374_v28 = vmul.f32 %v8355_v8, %v2275_v5  ;;  %v1666_v4 = vsel %vm1412_vm10, %v1664_v3, %v1665_v40  ;;  %v8526_v0 = vsel %vm1187_vm9, %v3155_v42, %v3159_v27 }
 0x251   : >> { %v2573_v37 = vor.u32 %v2571_v31, %v2570_v44  ;;  %6700 = vmatmul.msk.bf16.gmra.mxu3 %vm422_vm2, %v1666_v4  ;;  %v2574_v16 = vrot.slane %v2570_v44, 4  ;;  %v2282_v42 = vpop.f32.mrf.mxu2 }
 0x252   : >> { %v2406_v36 = vsel %vm2341_vm3, %v2275_v5, %v2374_v28 }
 0x253   : >> { %v2848_v14 = vsel %vm7623_vm7, %v2573_v37, %v2847_v13  ;;  %v2476_v39 = vpack.c.bf16 %v2406_v36, %v2406_v36  ;;  %v2188_v62 = vpop.f32.mrf.mxu1  ;;  %v8522_v30 = vld [vmem:[#allocation2 + $0x30] sm:$0xff] }
 0x254   : >> { %2849 = vst [vmem:[#allocation2 + $0x3c] sm:$0xf] %v2848_v14  ;;  %v2189_v10 = vadd.f32 %v2188_v62, %v2099_v26  ;;  %v2945_v29 = vld [vmem:[#allocation2 + $0x38] sm:$0x1]  ;;  %3513 = vrot.lane.b32.xlu0 %v8522_v30, %s7369_s24  ;;  %v3164_v26 = vshll.u32 %v8522_v30, 16  ;;  %v3349_v31 = vrot.slane %v8522_v30, 1  ;;  %v2104_v62 = vpop.f32.mrf.mxu0 }
 0x255   : >> { %v2576_v61 = vshrl.u32 %v2476_v39, 16  ;;  %3558 = vrot.lane.b32.xlu1 %v8526_v0, %s7367_s15  ;;  %v3085_v9 = vunpack.c.l.b16 %v2945_v29  ;;  %v2579_v56 = vshll.u32 %v2476_v39, 16  ;;  %v3162_v41 = vshrl.u32 %v8522_v30, 16 }
 0x256   : >> { %v2278_v60 = vadd.f32 %v8485_v35, %v2189_v10  ;;  %2227 = vmatmul.bf16.gmra.mxu1 %v1901_v45  ;;  %v3166_v12 = vrot.slane %v3164_v26, 1  ;;  %v8549_v10 = vpop.permute.xlu2 %1578 }
 0x257   : >> { %v2578_v7 = vrot.slane %v2576_v61, 7  ;;  %v3101_v34 = vpack.c.b16 %v3085_v9, %v3085_v9  ;;  %v7082_v61 = vld [vmem:[%s8372_s26 + $0x58] sm:$0xff]  ;;  %v7075_v9 = vld [vmem:[%s8372_s26 + $0x20] sm:$0xff] }
 0x258   : >> { %vm2342_vm4 = vcmp.ge.f32.partialorder %v2278_v60, 0.0  ;;  %v2375_v5 = vmul.f32 %v8355_v8, %v2278_v60  ;;  %v3167_v37 = vor.u32 %v3166_v12, %v3162_v41  ;;  %4080 = vmatpush.bf16.msrb.mxu2 %v7082_v61  ;;  %3990 = vmatpush.bf16.msrb.mxu3 %v7075_v9 }
 0x259   : >> { %v2581_v13 = vor.u32 %v2579_v56, %v2578_v7  ;;  %v2583_v44 = vrot.slane %v2578_v7, 4  ;;  %v3350_v28 = vrot.slane %v3101_v34, 1  ;;  %v3169_v35 = vshll.u32 %v3101_v34, 16  ;;  %v2854_v7 = vld [vmem:[#allocation2 + $0x48] sm:$0xf]  ;;  %v2284_v41 = vpop.f32.mrf.mxu2 }
 0x25a   : >> { %v2407_v27 = vsel %vm2342_vm4, %v2278_v60, %v2375_v5  ;;  %v1825_v60 = vsel %vm422_vm2, %v10676_v50, %v8466_v6 }
 0x25b   : >> { %v2582_v3 = vsel %vm7618_vm6, %v2574_v16, %v2581_v13  ;;  %v2852_v40 = vsel %vm7629_vm8, %v2583_v44, %v2851_v23  ;;  %v2477_v36 = vpack.c.bf16 %v2407_v27, %v2407_v27  ;;  %v2190_v14 = vpop.f32.mrf.mxu1  ;;  %v8544_v39 = vsel %vm1412_vm10, %v3349_v31, %v3350_v28 }
 0x25c   : >> { %2850 = vst.msk [vmem:[#allocation2 + $0x40] sm:$0xf] %vm334_vm0, %v2582_v3  ;;  %v2191_v45 = vadd.f32 %v2190_v14, %v2101_v55  ;;  %6848 = vmatmul.msk.bf16.gmra.mxu0 %vm422_vm2, %v8544_v39  ;;  %v3171_v4 = vrot.slane %v3169_v35, 1  ;;  %3311 = vrot.lane.b32.xlu0 %v8526_v0, %s7368_s17 }
 0x25d   : >> { %2853 = vst [vmem:[#allocation2 + $0x44] sm:$0x1] %v2852_v40  ;;  %v2585_v29 = vshrl.u32 %v2477_v36, 16  ;;  %v2588_v58 = vshll.u32 %v2477_v36, 16  ;;  %3476 = vrot.lane.b32.xlu1 %v8498_v48, %s7368_s17 }
 0x25e   : >> { %v2280_v16 = vadd.f32 %v8511_v47, %v2191_v45  ;;  %v8559_v55 = vsel %vm1187_vm9, %v3167_v37, %v3171_v4  ;;  %v1858_v47 = vsel %vm1699_vm11, %v1825_v60, %v8489_v54  ;;  %v2106_v54 = vpop.f32.mrf.mxu0  ;;  %v1616_v3 = vpop.permute.xlu2 %1615 }
 0x25f   : >> { %v2587_v26 = vrot.slane %v2585_v29, 7  ;;  %3560 = vrot.lane.b32.xlu2 %v8559_v55, %s7367_s15  ;;  %v1904_v28 = vsel %vm1732_vm12, %v1858_v47, %v8516_v59 }
 0x260   : >> { %vm2343_vm5 = vcmp.ge.f32.partialorder %v2280_v16, 0.0  ;;  %v2376_v56 = vmul.f32 %v8355_v8, %v2280_v16 }
 0x261   : >> { %v2590_v34 = vor.u32 %v2588_v58, %v2587_v26  ;;  %v2591_v27 = vrot.slane %v2587_v26, 4  ;;  %v7074_v26 = vld [vmem:[%s8372_s26 + $0x18] sm:$0xff] }
 0x262   : >> { %v2408_v31 = vsel %vm2343_vm5, %v2280_v16, %v2376_v56  ;;  %3991 = vmatpush.bf16.msrb.mxu3 %v7074_v26  ;;  %v7071_v26 = vld [vmem:[%s8372_s26] sm:$0xff] }
 0x263   : >> { %v2855_v23 = vsel %vm7623_vm7, %v2590_v34, %v2854_v7  ;;  %v2478_v5 = vpack.c.bf16 %v2408_v31, %v2408_v31  ;;  %v2193_v50 = vpop.f32.mrf.mxu1  ;;  %v8571_v6 = vld [vmem:[#allocation2 + $0x3c] sm:$0xff] }
 0x264   : >> { %2856 = vst [vmem:[#allocation2 + $0x48] sm:$0xf] %v2855_v23  ;;  %v2194_v12 = vadd.f32 %v2193_v50, %v2104_v62  ;;  %v2948_v13 = vld [vmem:[#allocation2 + $0x44] sm:$0x1]  ;;  %3515 = vrot.lane.b32.xlu0 %v8571_v6, %s7369_s24  ;;  %v3176_v40 = vshll.u32 %v8571_v6, 16  ;;  %v3174_v4 = vshrl.u32 %v8571_v6, 16 }
 0x265   : >> { %v2593_v44 = vshrl.u32 %v2478_v5, 16  ;;  %3426 = vrot.lane.b32.xlu1 %v8478_v11, %s7367_s15  ;;  %v3086_v35 = vunpack.c.l.b16 %v2948_v13  ;;  %v2596_v14 = vshll.u32 %v2478_v5, 16  ;;  %v3352_v11 = vrot.slane %v8571_v6, 1  ;;  %v2858_v62 = vld [vmem:[#allocation2 + $0x50] sm:$0x1]  ;;  %v2287_v13 = vpop.f32.mrf.mxu2 }
 0x266   : >> { %v2283_v37 = vadd.f32 %v2282_v42, %v2194_v12  ;;  %2232 = vmatmul.bf16.gmra.mxu1 %v1904_v28  ;;  %v3178_v42 = vrot.slane %v3176_v40, 1  ;;  %v1828_v5 = vsel %vm422_vm2, %v8310_v20, %v8549_v10  ;;  %v2109_v20 = vpop.f32.mrf.mxu0  ;;  %v2861_v10 = vld [vmem:[#allocation2 + $0x54] sm:$0xf] }
 0x267   : >> { %v2595_v36 = vrot.slane %v2593_v44, 7  ;;  %3391 = vrot.lane.b32.xlu2 %v8498_v48, %s7369_s24  ;;  %v3102_v59 = vpack.c.b16 %v3086_v35, %v3086_v35  ;;  %v7081_v44 = vld [vmem:[%s8372_s26 + $0x50] sm:$0xff] }
 0x268   : >> { %vm2344_vm13 = vcmp.ge.f32.partialorder %v2283_v37, 0.0  ;;  %v2377_v45 = vmul.f32 %v8355_v8, %v2283_v37  ;;  %v3179_v60 = vor.u32 %v3178_v42, %v3174_v4  ;;  %v7073_v35 = vld [vmem:[%s8372_s26 + $0x10] sm:$0xff]  ;;  %4081 = vmatpush.bf16.msrb.mxu2 %v7081_v44 }
 0x269   : >> { %v2598_v29 = vor.u32 %v2596_v14, %v2595_v36  ;;  %v2600_v58 = vrot.slane %v2595_v36, 4  ;;  %v3353_v61 = vrot.slane %v3102_v59, 1  ;;  %v3181_v9 = vshll.u32 %v3102_v59, 16  ;;  %v1663_v36 = vpop.permute.xlu2 %1662  ;;  %3992 = vmatpush.bf16.msrb.mxu3 %v7073_v35  ;;  %v7072_v59 = vld [vmem:[%s8372_s26 + $0x8] sm:$0xff] }
 0x26a   : >> { %v2409_v16 = vsel %vm2344_vm13, %v2283_v37, %v2377_v45  ;;  %v1860_v37 = vsel %vm1699_vm11, %v1828_v5, %v1616_v3 }
 0x26b   : >> { %v2599_v48 = vsel %vm7618_vm6, %v2591_v27, %v2598_v29  ;;  %v2859_v7 = vsel %vm7629_vm8, %v2600_v58, %v2858_v62  ;;  %v2479_v56 = vpack.c.bf16 %v2409_v16, %v2409_v16  ;;  %v2195_v34 = vpop.f32.mrf.mxu1  ;;  %v8591_v47 = vsel %vm1412_vm10, %v3352_v11, %v3353_v61 }
 0x26c   : >> { %2857 = vst.msk [vmem:[#allocation2 + $0x4c] sm:$0xf] %vm334_vm0, %v2599_v48  ;;  %v2196_v31 = vadd.f32 %v2195_v34, %v2106_v54  ;;  %6849 = vmatmul.msk.bf16.gmra.mxu0 %vm422_vm2, %v8591_v47  ;;  %v3183_v23 = vrot.slane %v3181_v9, 1  ;;  %3313 = vrot.lane.b32.xlu0 %v8559_v55, %s7368_s17  ;;  %v1907_v4 = vsel %vm1732_vm12, %v1860_v37, %v1663_v36 }
 0x26d   : >> { %2860 = vst [vmem:[#allocation2 + $0x50] sm:$0x1] %v2859_v7  ;;  %v2602_v50 = vshrl.u32 %v2479_v56, 16  ;;  %v2605_v12 = vshll.u32 %v2479_v56, 16  ;;  %3478 = vrot.lane.b32.xlu1 %v8544_v39, %s7368_s17  ;;  %3993 = vmatpush.bf16.msrb.mxu3 %v7072_v59 }
 0x26e   : >> { %v2285_v28 = vadd.f32 %v2284_v41, %v2196_v31  ;;  %v8605_v54 = vsel %vm1187_vm9, %v3179_v60, %v3183_v23  ;;  %v2289_v31 = vpop.f32.mrf.mxu2 }
 0x26f   : >> { %v2604_v27 = vrot.slane %v2602_v50, 7  ;;  %3562 = vrot.lane.b32.xlu2 %v8605_v54, %s7367_s15 }
 0x270   : >> { %vm2345_vm14 = vcmp.ge.f32.partialorder %v2285_v28, 0.0  ;;  %v2378_v40 = vmul.f32 %v8355_v8, %v2285_v28 }
 0x271   : >> { %v2607_v14 = vor.u32 %v2605_v12, %v2604_v27  ;;  %v2608_v9 = vrot.slane %v2604_v27, 4  ;;  %v8629_v12 = vpop.f32.mrf.mxu3  ;;  %3994 = vmatpush.bf16.msrb.mxu3 %v7071_v26 }
 0x272   : >> { %v2410_v41 = vsel %vm2345_vm14, %v2285_v28, %v2378_v40  ;;  %v2111_v28 = vpop.f32.mrf.mxu0 }
 0x273   : >> { %v2862_v11 = vsel %vm7623_vm7, %v2607_v14, %v2861_v10  ;;  %v2480_v62 = vpack.c.bf16 %v2410_v41, %v2410_v41  ;;  %v2198_v45 = vpop.f32.mrf.mxu1  ;;  %v8616_v42 = vld [vmem:[#allocation2 + $0x48] sm:$0xff] }
 0x274   : >> { %2863 = vst [vmem:[#allocation2 + $0x54] sm:$0xf] %v2862_v11  ;;  %v2199_v3 = vadd.f32 %v2198_v45, %v2109_v20  ;;  %v2951_v29 = vld [vmem:[#allocation2 + $0x50] sm:$0x1]  ;;  %3517 = vrot.lane.b32.xlu0 %v8616_v42, %s7369_s24  ;;  %v3188_v60 = vshll.u32 %v8616_v42, 16  ;;  %v3355_v34 = vrot.slane %v8616_v42, 1 }
 0x275   : >> { %v2610_v58 = vshrl.u32 %v2480_v62, 16  ;;  %3428 = vrot.lane.b32.xlu1 %v8522_v30, %s7367_s15  ;;  %v3087_v61 = vunpack.c.l.b16 %v2951_v29  ;;  %v2613_v7 = vshll.u32 %v2480_v62, 16  ;;  %v2865_v30 = vld [vmem:[#allocation2 + $0x5c] sm:$0x1]  ;;  %v3186_v5 = vshrl.u32 %v8616_v42, 16 }
 0x276   : >> { %v2288_v16 = vadd.f32 %v2287_v13, %v2199_v3  ;;  %2237 = vmatmul.bf16.gmra.mxu1 %v1907_v4  ;;  %v3190_v50 = vrot.slane %v3188_v60, 1  ;;  %v2868_v29 = vld [vmem:[#allocation2 + $0x60] sm:$0xf] }
 0x277   : >> { %v2612_v48 = vrot.slane %v2610_v58, 7  ;;  %3393 = vrot.lane.b32.xlu2 %v8544_v39, %s7369_s24  ;;  %v3103_v56 = vpack.c.b16 %v3087_v61, %v3087_v61 }
 0x278   : >> { %vm2346_vm15 = vcmp.ge.f32.partialorder %v2288_v16, 0.0  ;;  %v2379_v23 = vmul.f32 %v8355_v8, %v2288_v16  ;;  %v3191_v20 = vor.u32 %v3190_v50, %v3186_v5 }
 0x279   : >> { %v2615_v13 = vor.u32 %v2613_v7, %v2612_v48  ;;  %v2617_v44 = vrot.slane %v2612_v48, 4  ;;  %v3356_v35 = vrot.slane %v3103_v56, 1  ;;  %v3193_v27 = vshll.u32 %v3103_v56, 16  ;;  %v8651_v60 = vpop.f32.mrf.mxu3 }
 0x27a   : >> { %v2411_v39 = vsel %vm2346_vm15, %v2288_v16, %v2379_v23  ;;  %v7080_v23 = vld [vmem:[%s8372_s26 + $0x48] sm:$0xff] }
 0x27b   : >> { %v2616_v10 = vsel %vm7618_vm6, %v2608_v9, %v2615_v13  ;;  %v2866_v37 = vsel %vm7629_vm8, %v2617_v44, %v2865_v30  ;;  %v2481_v40 = vpack.c.bf16 %v2411_v39, %v2411_v39  ;;  %v2200_v36 = vpop.f32.mrf.mxu1  ;;  %v8636_v14 = vsel %vm1412_vm10, %v3355_v34, %v3356_v35  ;;  %v2292_v9 = vpop.f32.mrf.mxu2  ;;  %4082 = vmatpush.bf16.msrb.mxu2 %v7080_v23 }
 0x27c   : >> { %2864 = vst.msk [vmem:[#allocation2 + $0x58] sm:$0xf] %vm334_vm0, %v2616_v10  ;;  %v2201_v41 = vadd.f32 %v2200_v36, %v2111_v28  ;;  %6850 = vmatmul.msk.bf16.gmra.mxu0 %vm422_vm2, %v8636_v14  ;;  %v3195_v59 = vrot.slane %v3193_v27, 1  ;;  %3315 = vrot.lane.b32.xlu0 %v8605_v54, %s7368_s17  ;;  %v3306_v34 = vpop.permute.xlu0 %3305 }
 0x27d   : >> { %2867 = vst [vmem:[#allocation2 + $0x5c] sm:$0x1] %v2866_v37  ;;  %v2619_v11 = vshrl.u32 %v2481_v40, 16  ;;  %v2622_v62 = vshll.u32 %v2481_v40, 16  ;;  %3480 = vrot.lane.b32.xlu1 %v8591_v47, %s7368_s17 }
 0x27e   : >> { %v2290_v45 = vadd.f32 %v2289_v31, %v2201_v41  ;;  %v8646_v4 = vsel %vm1187_vm9, %v3191_v20, %v3195_v59  ;;  %v2872_v20 = vld [vmem:[#allocation2 + $0x68] sm:$0x1] }
 0x27f   : >> { %v2621_v3 = vrot.slane %v2619_v11, 7  ;;  %3564 = vrot.lane.b32.xlu2 %v8646_v4, %s7367_s15 }
 0x280   : >> { %vm2347_vm3 = vcmp.ge.f32.partialorder %v2290_v45, 0.0  ;;  %v2380_v58 = vmul.f32 %v8355_v8, %v2290_v45 }
 0x281   : >> { %v2624_v61 = vor.u32 %v2622_v62, %v2621_v3  ;;  %v2625_v13 = vrot.slane %v2621_v3, 4 }
 0x282   : >> { %v2412_v16 = vsel %vm2347_vm3, %v2290_v45, %v2380_v58 }
 0x283   : >> { %v2869_v26 = vsel %vm7623_vm7, %v2624_v61, %v2868_v29  ;;  %v2482_v48 = vpack.c.bf16 %v2412_v16, %v2412_v16  ;;  %v2203_v7 = vpop.f32.mrf.mxu1  ;;  %v8655_v56 = vld [vmem:[#allocation2 + $0x54] sm:$0xff]  ;;  %v2294_v61 = vpop.f32.mrf.mxu2 }
 0x284   : >> { %2870 = vst [vmem:[#allocation2 + $0x60] sm:$0xf] %v2869_v26  ;;  %v2204_v31 = vadd.f32 %v2203_v7, %v8199_v53  ;;  %v2954_v30 = vld [vmem:[#allocation2 + $0x5c] sm:$0x1]  ;;  %3519 = vrot.lane.b32.xlu0 %v8655_v56, %s7369_s24  ;;  %v3200_v28 = vshll.u32 %v8655_v56, 16  ;;  %v3358_v39 = vrot.slane %v8655_v56, 1  ;;  %v8680_v26 = vpop.f32.mrf.mxu3  ;;  %v3386_v7 = vpop.permute.xlu0 %3385 }
 0x285   : >> { %v2627_v5 = vshrl.u32 %v2482_v48, 16  ;;  %3430 = vrot.lane.b32.xlu1 %v8571_v6, %s7367_s15  ;;  %v3088_v50 = vunpack.c.l.b16 %v2954_v30  ;;  %v2630_v27 = vshll.u32 %v2482_v48, 16  ;;  %v3198_v10 = vshrl.u32 %v8655_v56, 16 }
 0x286   : >> { %v2293_v44 = vadd.f32 %v2292_v9, %v2204_v31  ;;  %v3202_v37 = vrot.slane %v3200_v28, 1 }
 0x287   : >> { %v2629_v35 = vrot.slane %v2627_v5, 7  ;;  %3395 = vrot.lane.b32.xlu2 %v8591_v47, %s7369_s24  ;;  %v3104_v53 = vpack.c.b16 %v3088_v50, %v3088_v50  ;;  %v2875_v5 = vld [vmem:[#allocation2 + $0x6c] sm:$0xf] }
 0x288   : >> { %vm2348_vm4 = vcmp.ge.f32.partialorder %v2293_v44, 0.0  ;;  %v2381_v6 = vmul.f32 %v8355_v8, %v2293_v44  ;;  %v3203_v62 = vor.u32 %v3202_v37, %v3198_v10  ;;  %v7079_v37 = vld [vmem:[%s8372_s26 + $0x40] sm:$0xff] }
 0x289   : >> { %v2632_v40 = vor.u32 %v2630_v27, %v2629_v35  ;;  %v2634_v36 = vrot.slane %v2629_v35, 4  ;;  %v3359_v41 = vrot.slane %v3104_v53, 1  ;;  %v3205_v59 = vshll.u32 %v3104_v53, 16  ;;  %4083 = vmatpush.bf16.msrb.mxu2 %v7079_v37 }
 0x28a   : >> { %v2413_v11 = vsel %vm2348_vm4, %v2293_v44, %v2381_v6  ;;  %v7243_v44 = vld [vmem:[#allocation2] sm:$0xff] }
 0x28b   : >> { %v2633_v45 = vsel %vm7618_vm6, %v2625_v13, %v2632_v40  ;;  %v2873_v47 = vsel %vm7629_vm8, %v2634_v36, %v2872_v20  ;;  %v2483_v3 = vpack.c.bf16 %v2413_v11, %v2413_v11  ;;  %v2205_v29 = vpop.f32.mrf.mxu1  ;;  %v8674_v58 = vsel %vm1412_vm10, %v3358_v39, %v3359_v41 }
 0x28c   : >> { %2871 = vst.msk [vmem:[#allocation2 + $0x64] sm:$0xf] %vm334_vm0, %v2633_v45  ;;  %v2206_v9 = vadd.f32 %v2205_v29, %v8207_v19  ;;  %6851 = vmatmul.msk.bf16.gmra.mxu0 %vm422_vm2, %v8674_v58  ;;  %v3207_v16 = vrot.slane %v3205_v59, 1  ;;  %3317 = vrot.lane.b32.xlu0 %v8646_v4, %s7368_s17  ;;  %v3592_v28 = vsel %vm422_vm2, %v7243_v44, %v3306_v34 }
 0x28d   : >> { %2874 = vst [vmem:[#allocation2 + $0x68] sm:$0x1] %v2873_v47  ;;  %v2636_v48 = vshrl.u32 %v2483_v3, 16  ;;  %3482 = vrot.lane.b32.xlu1 %v8636_v14, %s7368_s17  ;;  %v2639_v23 = vshll.u32 %v2483_v3, 16  ;;  %v3624_v36 = vsel %vm1699_vm11, %v3592_v28, %v3386_v7 }
 0x28e   : >> { %v2295_v31 = vadd.f32 %v2294_v61, %v2206_v9  ;;  %v8687_v30 = vsel %vm1187_vm9, %v3203_v62, %v3207_v16  ;;  %v2879_v61 = vld [vmem:[#allocation2 + $0x74] sm:$0x1] }
 0x28f   : >> { %v2638_v19 = vrot.slane %v2636_v48, 7  ;;  %3566 = vrot.lane.b32.xlu2 %v8687_v30, %s7367_s15 }
 0x290   : >> { %vm2349_vm5 = vcmp.ge.f32.partialorder %v2295_v31, 0.0  ;;  %v2382_v50 = vmul.f32 %v8355_v8, %v2295_v31 }
 0x291   : >> { %v2641_v13 = vor.u32 %v2639_v23, %v2638_v19  ;;  %v2642_v41 = vrot.slane %v2638_v19, 4 }
 0x292   : >> { %v2414_v35 = vsel %vm2349_vm5, %v2295_v31, %v2382_v50 }
 0x293   : >> { %v2876_v27 = vsel %vm7623_vm7, %v2641_v13, %v2875_v5  ;;  %v2484_v53 = vpack.c.bf16 %v2414_v35, %v2414_v35  ;;  %v2208_v39 = vpop.f32.mrf.mxu1  ;;  %v8695_v20 = vld [vmem:[#allocation2 + $0x60] sm:$0xff] }
 0x294   : >> { %2877 = vst [vmem:[#allocation2 + $0x6c] sm:$0xf] %v2876_v27  ;;  %v2209_v6 = vadd.f32 %v2208_v39, %v8225_v46  ;;  %v2957_v10 = vld [vmem:[#allocation2 + $0x68] sm:$0x1]  ;;  %3521 = vrot.lane.b32.xlu0 %v8695_v20, %s7369_s24  ;;  %v3212_v62 = vshll.u32 %v8695_v20, 16  ;;  %v8706_v46 = vpop.f32.mrf.mxu3  ;;  %v3210_v29 = vshrl.u32 %v8695_v20, 16 }
 0x295   : >> { %v2644_v40 = vshrl.u32 %v2484_v53, 16  ;;  %3432 = vrot.lane.b32.xlu1 %v8616_v42, %s7367_s15  ;;  %v3089_v34 = vunpack.c.l.b16 %v2957_v10  ;;  %v2647_v59 = vshll.u32 %v2484_v53, 16  ;;  %v3361_v42 = vrot.slane %v8695_v20, 1 }
 0x296   : >> { %v2298_v11 = vadd.f32 %v8629_v12, %v2209_v6  ;;  %v3423_v47 = vpop.permute.xlu0 %3422  ;;  %v3214_v16 = vrot.slane %v3212_v62, 1 }
 0x297   : >> { %v2646_v45 = vrot.slane %v2644_v40, 7  ;;  %3397 = vrot.lane.b32.xlu2 %v8636_v14, %s7369_s24  ;;  %v3105_v3 = vpack.c.b16 %v3089_v34, %v3089_v34  ;;  %v3656_v12 = vsel %vm1732_vm12, %v3624_v36, %v3423_v47  ;;  %v2882_v36 = vld [vmem:[#allocation2 + $0x78] sm:$0xf] }
 0x298   : >> { %vm2350_vm13 = vcmp.ge.f32.partialorder %v2298_v11, 0.0  ;;  %v2383_v9 = vmul.f32 %v8355_v8, %v2298_v11  ;;  %3995 = vmatmul.bf16.vlgmr.msrb.gmra.mxu3 %v3656_v12  ;;  %v3215_v14 = vor.u32 %v3214_v16, %v3210_v29 }
 0x299   : >> { %v2649_v48 = vor.u32 %v2647_v59, %v2646_v45  ;;  %v2651_v7 = vrot.slane %v2646_v45, 4  ;;  %v3362_v31 = vrot.slane %v3105_v3, 1  ;;  %v3217_v19 = vshll.u32 %v3105_v3, 16 }
 0x29a   : >> { %v2415_v23 = vsel %vm2350_vm13, %v2298_v11, %v2383_v9 }
 0x29b   : >> { %v2650_v5 = vsel %vm7618_vm6, %v2642_v41, %v2649_v48  ;;  %v2880_v50 = vsel %vm7629_vm8, %v2651_v7, %v2879_v61  ;;  %v2485_v13 = vpack.c.bf16 %v2415_v23, %v2415_v23  ;;  %v2210_v44 = vpop.f32.mrf.mxu1  ;;  %v8719_v28 = vsel %vm1412_vm10, %v3361_v42, %v3362_v31  ;;  %v2886_v23 = vld [vmem:[#allocation2 + $0x80] sm:$0x1] }
 0x29c   : >> { %2878 = vst.msk [vmem:[#allocation2 + $0x70] sm:$0xf] %vm334_vm0, %v2650_v5  ;;  %v2211_v35 = vadd.f32 %v2210_v44, %v8231_v15  ;;  %6852 = vmatmul.msk.bf16.gmra.mxu0 %vm422_vm2, %v8719_v28  ;;  %v3219_v27 = vrot.slane %v3217_v19, 1  ;;  %3319 = vrot.lane.b32.xlu0 %v8687_v30, %s7368_s17  ;;  %v8740_v41 = vpop.f32.mrf.mxu3 }
 0x29d   : >> { %2881 = vst [vmem:[#allocation2 + $0x74] sm:$0x1] %v2880_v50  ;;  %v2653_v53 = vshrl.u32 %v2485_v13, 16  ;;  %3484 = vrot.lane.b32.xlu1 %v8674_v58, %s7368_s17  ;;  %v2656_v37 = vshll.u32 %v2485_v13, 16 }
 0x29e   : >> { %v2300_v39 = vadd.f32 %v8651_v60, %v2211_v35  ;;  %v8731_v6 = vsel %vm1187_vm9, %v3215_v14, %v3219_v27  ;;  %v8733_v15 = vpop.permute.xlu1 %3472  ;;  %v8737_v40 = vpop.permute.xlu0 %3387 }
 0x29f   : >> { %v2655_v10 = vrot.slane %v2653_v53, 7  ;;  %3568 = vrot.lane.b32.xlu2 %v8731_v6, %s7367_s15 }
 0x2a0   : >> { %vm2351_vm14 = vcmp.ge.f32.partialorder %v2300_v39, 0.0  ;;  %v2384_v34 = vmul.f32 %v8355_v8, %v2300_v39 }
 0x2a1   : >> { %v2658_v59 = vor.u32 %v2656_v37, %v2655_v10  ;;  %v2659_v19 = vrot.slane %v2655_v10, 4 }
 0x2a2   : >> { %v2416_v60 = vsel %vm2351_vm14, %v2300_v39, %v2384_v34  ;;  %v7244_v34 = vld [vmem:[#allocation2 + $0xc] sm:$0xff] }
 0x2a3   : >> { %v2883_v11 = vsel %vm7623_vm7, %v2658_v59, %v2882_v36  ;;  %v2486_v62 = vpack.c.bf16 %v2416_v60, %v2416_v60  ;;  %v2213_v45 = vpop.f32.mrf.mxu1  ;;  %v8744_v47 = vld [vmem:[#allocation2 + $0x6c] sm:$0xff] }
 0x2a4   : >> { %2884 = vst [vmem:[#allocation2 + $0x78] sm:$0xf] %v2883_v11  ;;  %v2214_v3 = vadd.f32 %v2213_v45, %v8245_v25  ;;  %v2960_v42 = vld [vmem:[#allocation2 + $0x74] sm:$0x1]  ;;  %3523 = vrot.lane.b32.xlu0 %v8744_v47, %s7369_s24  ;;  %v3224_v12 = vshll.u32 %v8744_v47, 16  ;;  %v3364_v14 = vrot.slane %v8744_v47, 1  ;;  %v8758_v53 = vpop.f32.mrf.mxu3 }
 0x2a5   : >> { %v2661_v29 = vshrl.u32 %v2486_v62, 16  ;;  %3434 = vrot.lane.b32.xlu1 %v8655_v56, %s7367_s15  ;;  %v3090_v61 = vunpack.c.l.b16 %v2960_v42  ;;  %v2664_v48 = vshll.u32 %v2486_v62, 16  ;;  %v3222_v35 = vshrl.u32 %v8744_v47, 16 }
 0x2a6   : >> { %v2303_v9 = vadd.f32 %v8680_v26, %v2214_v3  ;;  %v3308_v7 = vpop.permute.xlu0 %3307  ;;  %v3510_v25 = vpop.permute.xlu1 %3509  ;;  %v3226_v13 = vrot.slane %v3224_v12, 1 }
 0x2a7   : >> { %v2663_v16 = vrot.slane %v2661_v29, 7  ;;  %3399 = vrot.lane.b32.xlu2 %v8674_v58, %s7369_s24  ;;  %v3106_v31 = vpack.c.b16 %v3090_v61, %v3090_v61  ;;  %v3594_v59 = vsel %vm422_vm2, %v7244_v34, %v3308_v7  ;;  %v8788_v7 = vpop.permute.xlu2 %3389  ;;  %v2893_v34 = vld [vmem:[#allocation2 + $0x8c] sm:$0x1] }
 0x2a8   : >> { %vm2352_vm15 = vcmp.ge.f32.partialorder %v2303_v9, 0.0  ;;  %v2385_v56 = vmul.f32 %v8355_v8, %v2303_v9  ;;  %v3227_v11 = vor.u32 %v3226_v13, %v3222_v35  ;;  %v3626_v12 = vsel %vm1699_vm11, %v3594_v59, %v8737_v40 }
 0x2a9   : >> { %v2666_v5 = vor.u32 %v2664_v48, %v2663_v16  ;;  %v2668_v50 = vrot.slane %v2663_v16, 4  ;;  %v3365_v26 = vrot.slane %v3106_v31, 1  ;;  %v3229_v27 = vshll.u32 %v3106_v31, 16  ;;  %v2889_v16 = vld [vmem:[#allocation2 + $0x84] sm:$0xf] }
 0x2aa   : >> { %v2417_v44 = vsel %vm2352_vm15, %v2303_v9, %v2385_v56  ;;  %v3705_v13 = vsel %vm422_vm2, %v8439_v57, %v8733_v15 }
 0x2ab   : >> { %v2667_v58 = vsel %vm7618_vm6, %v2659_v19, %v2666_v5  ;;  %v2887_v39 = vsel %vm7629_vm8, %v2668_v50, %v2886_v23  ;;  %v2487_v10 = vpack.c.bf16 %v2417_v44, %v2417_v44  ;;  %v2215_v37 = vpop.f32.mrf.mxu1  ;;  %v8765_v36 = vsel %vm1412_vm10, %v3364_v14, %v3365_v26 }
 0x2ac   : >> { %2885 = vst.msk [vmem:[#allocation2 + $0x7c] sm:$0xf] %vm334_vm0, %v2667_v58  ;;  %v2216_v60 = vadd.f32 %v2215_v37, %v8251_v51  ;;  %6853 = vmatmul.msk.bf16.gmra.mxu0 %vm422_vm2, %v8765_v36  ;;  %v3231_v62 = vrot.slane %v3229_v27, 1  ;;  %3321 = vrot.lane.b32.xlu0 %v8731_v6, %s7368_s17  ;;  %v8795_v26 = vpop.f32.mrf.mxu3  ;;  %v3752_v27 = vsel %vm1699_vm11, %v3705_v13, %v3510_v25 }
 0x2ad   : >> { %2888 = vst [vmem:[#allocation2 + $0x80] sm:$0x1] %v2887_v39  ;;  %v2670_v45 = vshrl.u32 %v2487_v10, 16  ;;  %3486 = vrot.lane.b32.xlu1 %v8719_v28, %s7368_s17  ;;  %v2673_v51 = vshll.u32 %v2487_v10, 16 }
 0x2ae   : >> { %v2305_v3 = vadd.f32 %v8706_v46, %v2216_v60  ;;  %v8778_v42 = vsel %vm1187_vm9, %v3227_v11, %v3231_v62 }
 0x2af   : >> { %v2672_v29 = vrot.slane %v2670_v45, 7  ;;  %3570 = vrot.lane.b32.xlu2 %v8778_v42, %s7367_s15  ;;  %v3425_v61 = vpop.permute.xlu0 %3424  ;;  %v8782_v9 = vpop.permute.xlu1 %3474 }
 0x2b0   : >> { %vm2353_vm3 = vcmp.ge.f32.partialorder %v2305_v3, 0.0  ;;  %v2386_v48 = vmul.f32 %v8355_v8, %v2305_v3  ;;  %v3659_v46 = vsel %vm1732_vm12, %v3626_v12, %v3425_v61 }
 0x2b1   : >> { %v2675_v31 = vor.u32 %v2673_v51, %v2672_v29  ;;  %4000 = vmatmul.bf16.gmra.mxu3 %v3659_v46  ;;  %v2676_v39 = vrot.slane %v2672_v29, 4 }
 0x2b2   : >> { %v2418_v19 = vsel %vm2353_vm3, %v2305_v3, %v2386_v48 }
 0x2b3   : >> { %v2890_v23 = vsel %vm7623_vm7, %v2675_v31, %v2889_v16  ;;  %v2488_v56 = vpack.c.bf16 %v2418_v19, %v2418_v19  ;;  %v2218_v14 = vpop.f32.mrf.mxu1  ;;  %v8792_v5 = vld [vmem:[#allocation2 + $0x78] sm:$0xff] }
 0x2b4   : >> { %2891 = vst [vmem:[#allocation2 + $0x84] sm:$0xf] %v2890_v23  ;;  %v2219_v40 = vadd.f32 %v2218_v14, %v8263_v24  ;;  %v2963_v50 = vld [vmem:[#allocation2 + $0x80] sm:$0x1]  ;;  %3525 = vrot.lane.b32.xlu0 %v8792_v5, %s7369_s24  ;;  %v3236_v24 = vshll.u32 %v8792_v5, 16  ;;  %v3367_v25 = vrot.slane %v8792_v5, 1 }
 0x2b5   : >> { %v2678_v44 = vshrl.u32 %v2488_v56, 16  ;;  %3436 = vrot.lane.b32.xlu1 %v8695_v20, %s7367_s15  ;;  %v3091_v35 = vunpack.c.l.b16 %v2963_v50  ;;  %v2681_v37 = vshll.u32 %v2488_v56, 16 }
 0x2b6   : >> { %v2308_v58 = vadd.f32 %v8740_v41, %v2219_v40  ;;  %v3238_v45 = vrot.slane %v3236_v24, 1  ;;  %v8834_v40 = vpop.f32.mrf.mxu3 }
 0x2b7   : >> { %v2680_v10 = vrot.slane %v2678_v44, 7  ;;  %3401 = vrot.lane.b32.xlu2 %v8719_v28, %s7369_s24  ;;  %v3557_v57 = vpop.permute.xlu1 %3556  ;;  %v3107_v15 = vpack.c.b16 %v3091_v35, %v3091_v35  ;;  %v3234_v28 = vshrl.u32 %v8792_v5, 16  ;;  %v8836_v13 = vpop.permute.xlu0 %3309  ;;  %v2896_v35 = vld [vmem:[#allocation2 + $0x90] sm:$0xf] }
 0x2b8   : >> { %vm2354_vm4 = vcmp.ge.f32.partialorder %v2308_v58, 0.0  ;;  %v2387_v20 = vmul.f32 %v8355_v8, %v2308_v58  ;;  %v3784_v59 = vsel %vm1732_vm12, %v3752_v27, %v3557_v57 }
 0x2b9   : >> { %v2683_v60 = vor.u32 %v2681_v37, %v2680_v10  ;;  %v2685_v41 = vrot.slane %v2680_v10, 4  ;;  %v8812_v11 = vpop.permute.xlu2 %3560  ;;  %4084 = vmatmul.bf16.vlgmr.msrb.gmra.mxu2 %v3784_v59  ;;  %v3368_v62 = vrot.slane %v3107_v15, 1  ;;  %v3241_v29 = vshll.u32 %v3107_v15, 16 }
 0x2ba   : >> { %v2419_v3 = vsel %vm2354_vm4, %v2308_v58, %v2387_v20  ;;  %v3239_v31 = vor.u32 %v3238_v45, %v3234_v28  ;;  %v3708_v15 = vsel %vm422_vm2, %v8476_v2, %v8782_v9 }
 0x2bb   : >> { %v2684_v51 = vsel %vm7618_vm6, %v2676_v39, %v2683_v60  ;;  %v2894_v61 = vsel %vm7629_vm8, %v2685_v41, %v2893_v34  ;;  %v2489_v12 = vpack.c.bf16 %v2419_v3, %v2419_v3  ;;  %v2220_v16 = vpop.f32.mrf.mxu1  ;;  %v8820_v48 = vsel %vm1412_vm10, %v3367_v25, %v3368_v62 }
 0x2bc   : >> { %2892 = vst.msk [vmem:[#allocation2 + $0x88] sm:$0xf] %vm334_vm0, %v2684_v51  ;;  %v2221_v46 = vadd.f32 %v2220_v16, %v8269_v33  ;;  %6854 = vmatmul.msk.bf16.gmra.mxu0 %vm422_vm2, %v8820_v48  ;;  %v3243_v19 = vrot.slane %v3241_v29, 1  ;;  %3323 = vrot.lane.b32.xlu0 %v8778_v42, %s7368_s17  ;;  %v2900_v51 = vld [vmem:[#allocation2 + $0x98] sm:$0x1] }
 0x2bd   : >> { %2895 = vst [vmem:[#allocation2 + $0x8c] sm:$0x1] %v2894_v61  ;;  %v2687_v23 = vshrl.u32 %v2489_v12, 16  ;;  %3488 = vrot.lane.b32.xlu1 %v8765_v36, %s7368_s17  ;;  %v2690_v50 = vshll.u32 %v2489_v12, 16 }
 0x2be   : >> { %v2310_v56 = vadd.f32 %v8758_v53, %v2221_v46  ;;  %v8832_v14 = vsel %vm1187_vm9, %v3239_v31, %v3243_v19  ;;  %v2317_v16 = vpop.f32.mrf.mxu3 }
 0x2bf   : >> { %v2689_v33 = vrot.slane %v2687_v23, 7  ;;  %3572 = vrot.lane.b32.xlu2 %v8832_v14, %s7367_s15  ;;  %v3512_v44 = vpop.permute.xlu1 %3511 }
 0x2c0   : >> { %vm2355_vm5 = vcmp.ge.f32.partialorder %v2310_v56, 0.0  ;;  %v2388_v27 = vmul.f32 %v8355_v8, %v2310_v56  ;;  %v3754_v25 = vsel %vm1699_vm11, %v3708_v15, %v3512_v44 }
 0x2c1   : >> { %v2692_v58 = vor.u32 %v2690_v50, %v2689_v33  ;;  %v8841_v24 = vpop.permute.xlu2 %3391  ;;  %v2693_v41 = vrot.slane %v2689_v33, 4 }
 0x2c2   : >> { %v2420_v53 = vsel %vm2355_vm5, %v2310_v56, %v2388_v27 }
 0x2c3   : >> { %v2897_v39 = vsel %vm7623_vm7, %v2692_v58, %v2896_v35  ;;  %v2490_v10 = vpack.c.bf16 %v2420_v53, %v2420_v53  ;;  %v2223_v37 = vpop.f32.mrf.mxu1  ;;  %v8845_v57 = vld [vmem:[#allocation2 + $0x84] sm:$0xff] }
 0x2c4   : >> { %2898 = vst [vmem:[#allocation2 + $0x90] sm:$0xf] %v2897_v39  ;;  %v2224_v34 = vadd.f32 %v2223_v37, %v8279_v38  ;;  %v2966_v20 = vld [vmem:[#allocation2 + $0x8c] sm:$0x1]  ;;  %3527 = vrot.lane.b32.xlu0 %v8845_v57, %s7369_s24  ;;  %v3248_v2 = vshll.u32 %v8845_v57, 16  ;;  %v3370_v29 = vrot.slane %v8845_v57, 1 }
 0x2c5   : >> { %v2695_v59 = vshrl.u32 %v2490_v10, 16  ;;  %3438 = vrot.lane.b32.xlu1 %v8744_v47, %s7367_s15  ;;  %v3092_v60 = vunpack.c.l.b16 %v2966_v20  ;;  %v2698_v62 = vshll.u32 %v2490_v10, 16  ;;  %v3246_v47 = vshrl.u32 %v8845_v57, 16 }
 0x2c6   : >> { %v2313_v45 = vadd.f32 %v8795_v26, %v2224_v34  ;;  %v3514_v3 = vpop.permute.xlu0 %3513  ;;  %v3250_v26 = vrot.slane %v3248_v2, 1 }
 0x2c7   : >> { %v2697_v9 = vrot.slane %v2695_v59, 7  ;;  %3403 = vrot.lane.b32.xlu2 %v8765_v36, %s7369_s24  ;;  %v3559_v38 = vpop.permute.xlu1 %3558  ;;  %v3108_v28 = vpack.c.b16 %v3092_v60, %v3092_v60 }
 0x2c8   : >> { %vm2356_vm13 = vcmp.ge.f32.partialorder %v2313_v45, 0.0  ;;  %v2389_v61 = vmul.f32 %v8355_v8, %v2313_v45  ;;  %v3787_v12 = vsel %vm1732_vm12, %v3754_v25, %v3559_v38  ;;  %v3251_v33 = vor.u32 %v3250_v26, %v3246_v47  ;;  %v2903_v25 = vld [vmem:[#allocation2 + $0x9c] sm:$0xf]  ;;  %v2319_v38 = vpop.f32.mrf.mxu3 }
 0x2c9   : >> { %v2700_v46 = vor.u32 %v2698_v62, %v2697_v9  ;;  %v2702_v31 = vrot.slane %v2697_v9, 4  ;;  %v8864_v19 = vpop.permute.xlu2 %3562  ;;  %4089 = vmatmul.bf16.gmra.mxu2 %v3787_v12  ;;  %v3371_v36 = vrot.slane %v3108_v28, 1  ;;  %v3253_v23 = vshll.u32 %v3108_v28, 16 }
 0x2ca   : >> { %v2421_v56 = vsel %vm2356_vm13, %v2313_v45, %v2389_v61  ;;  %v7245_v45 = vld [vmem:[#allocation2 + $0x18] sm:$0xff] }
 0x2cb   : >> { %v2701_v50 = vsel %vm7618_vm6, %v2693_v41, %v2700_v46  ;;  %v2901_v44 = vsel %vm7629_vm8, %v2702_v31, %v2900_v51  ;;  %v2491_v35 = vpack.c.bf16 %v2421_v56, %v2421_v56  ;;  %v2225_v27 = vpop.f32.mrf.mxu1  ;;  %v8871_v58 = vsel %vm1412_vm10, %v3370_v29, %v3371_v36 }
 0x2cc   : >> { %2899 = vst.msk [vmem:[#allocation2 + $0x94] sm:$0xf] %vm334_vm0, %v2701_v50  ;;  %v2226_v53 = vadd.f32 %v2225_v27, %v8283_v32  ;;  %6855 = vmatmul.msk.bf16.gmra.mxu0 %vm422_vm2, %v8871_v58  ;;  %v3255_v39 = vrot.slane %v3253_v23, 1  ;;  %3325 = vrot.lane.b32.xlu0 %v8832_v14, %s7368_s17  ;;  %v3596_v2 = vsel %vm422_vm2, %v7245_v45, %v8836_v13 }
 0x2cd   : >> { %2902 = vst [vmem:[#allocation2 + $0x98] sm:$0x1] %v2901_v44  ;;  %v2704_v10 = vshrl.u32 %v2491_v35, 16  ;;  %3490 = vrot.lane.b32.xlu1 %v8820_v48, %s7368_s17  ;;  %v2707_v20 = vshll.u32 %v2491_v35, 16  ;;  %v3628_v13 = vsel %vm1699_vm11, %v3596_v2, %v8788_v7  ;;  %v2907_v7 = vld [vmem:[#allocation2 + $0xa4] sm:$0x1] }
 0x2ce   : >> { %v2315_v37 = vadd.f32 %v8834_v40, %v2226_v53  ;;  %v8883_v15 = vsel %vm1187_vm9, %v3251_v33, %v3255_v39  ;;  %v8887_v59 = vpop.permute.xlu0 %3311 }
 0x2cf   : >> { %v2706_v34 = vrot.slane %v2704_v10, 7  ;;  %3574 = vrot.lane.b32.xlu2 %v8883_v15, %s7367_s15  ;;  %v3477_v32 = vpop.permute.xlu1 %3476 }
 0x2d0   : >> { %vm2357_vm14 = vcmp.ge.f32.partialorder %v2315_v37, 0.0  ;;  %v2390_v60 = vmul.f32 %v8355_v8, %v2315_v37  ;;  %v3711_v41 = vsel %vm422_vm2, %v8526_v0, %v3477_v32 }
 0x2d1   : >> { %v2709_v62 = vor.u32 %v2707_v20, %v2706_v34  ;;  %v8892_v40 = vpop.permute.xlu2 %3393  ;;  %v3756_v61 = vsel %vm1699_vm11, %v3711_v41, %v3514_v3  ;;  %v2710_v26 = vrot.slane %v2706_v34, 4 }
 0x2d2   : >> { %v2422_v9 = vsel %vm2357_vm14, %v2315_v37, %v2390_v60  ;;  %v3790_v3 = vsel %vm1732_vm12, %v3756_v61, %v8812_v11 }
 0x2d3   : >> { %v2904_v28 = vsel %vm7623_vm7, %v2709_v62, %v2903_v25  ;;  %v2492_v29 = vpack.c.bf16 %v2422_v9, %v2422_v9  ;;  %v2228_v47 = vpop.f32.mrf.mxu1  ;;  %v8898_v51 = vld [vmem:[#allocation2 + $0x90] sm:$0xff] }
 0x2d4   : >> { %2905 = vst [vmem:[#allocation2 + $0x9c] sm:$0xf] %v2904_v28  ;;  %v2229_v0 = vadd.f32 %v2228_v47, %v8296_v18  ;;  %v2969_v12 = vld [vmem:[#allocation2 + $0x98] sm:$0x1]  ;;  %3529 = vrot.lane.b32.xlu0 %v8898_v51, %s7369_s24  ;;  %v3260_v18 = vshll.u32 %v8898_v51, 16  ;;  %v3373_v35 = vrot.slane %v8898_v51, 1  ;;  %v2322_v28 = vpop.f32.mrf.mxu3 }
 0x2d5   : >> { %v2712_v46 = vshrl.u32 %v2492_v29, 16  ;;  %3440 = vrot.lane.b32.xlu1 %v8792_v5, %s7367_s15  ;;  %v3093_v31 = vunpack.c.l.b16 %v2969_v12  ;;  %v2715_v36 = vshll.u32 %v2492_v29, 16  ;;  %v3258_v27 = vshrl.u32 %v8898_v51, 16 }
 0x2d6   : >> { %v2318_v23 = vadd.f32 %v2317_v16, %v2229_v0  ;;  %v3516_v50 = vpop.permute.xlu0 %3515  ;;  %v3262_v11 = vrot.slane %v3260_v18, 1 }
 0x2d7   : >> { %v2714_v56 = vrot.slane %v2712_v46, 7  ;;  %3405 = vrot.lane.b32.xlu2 %v8820_v48, %s7369_s24  ;;  %v3427_v33 = vpop.permute.xlu1 %3426  ;;  %v3109_v44 = vpack.c.b16 %v3093_v31, %v3093_v31  ;;  %v2910_v46 = vld [vmem:[#allocation2 + $0xa8] sm:$0xf] }
 0x2d8   : >> { %vm2358_vm15 = vcmp.ge.f32.partialorder %v2318_v23, 0.0  ;;  %v2391_v16 = vmul.f32 %v8355_v8, %v2318_v23  ;;  %v3662_v53 = vsel %vm1732_vm12, %v3628_v13, %v3427_v33  ;;  %v3263_v32 = vor.u32 %v3262_v11, %v3258_v27 }
 0x2d9   : >> { %v2717_v39 = vor.u32 %v2715_v36, %v2714_v56  ;;  %v2719_v10 = vrot.slane %v2714_v56, 4  ;;  %v8917_v37 = vpop.permute.xlu2 %3564  ;;  %4005 = vmatmul.bf16.gmra.mxu3 %v3662_v53  ;;  %4094 = vmatmul.bf16.gmra.mxu2 %v3790_v3  ;;  %v3374_v48 = vrot.slane %v3109_v44, 1  ;;  %v3265_v34 = vshll.u32 %v3109_v44, 16 }
 0x2da   : >> { %v2423_v20 = vsel %vm2358_vm15, %v2318_v23, %v2391_v16  ;;  %v7246_v23 = vld [vmem:[#allocation2 + $0x24] sm:$0xff] }
 0x2db   : >> { %v2718_v25 = vsel %vm7618_vm6, %v2710_v26, %v2717_v39  ;;  %v2908_v60 = vsel %vm7629_vm8, %v2719_v10, %v2907_v7  ;;  %v2493_v41 = vpack.c.bf16 %v2423_v20, %v2423_v20  ;;  %v2230_v62 = vpop.f32.mrf.mxu1  ;;  %v8924_v45 = vsel %vm1412_vm10, %v3373_v35, %v3374_v48 }
 0x2dc   : >> { %2906 = vst.msk [vmem:[#allocation2 + $0xa0] sm:$0xf] %vm334_vm0, %v2718_v25  ;;  %v2231_v2 = vadd.f32 %v2230_v62, %v8300_v1  ;;  %6856 = vmatmul.msk.bf16.gmra.mxu0 %vm422_vm2, %v8924_v45  ;;  %v3267_v9 = vrot.slane %v3265_v34, 1  ;;  %3327 = vrot.lane.b32.xlu0 %v8883_v15, %s7368_s17  ;;  %v3598_v3 = vsel %vm422_vm2, %v7246_v23, %v8887_v59  ;;  %v2324_v48 = vpop.f32.mrf.mxu3 }
 0x2dd   : >> { %2909 = vst [vmem:[#allocation2 + $0xa4] sm:$0x1] %v2908_v60  ;;  %v2721_v29 = vshrl.u32 %v2493_v41, 16  ;;  %3492 = vrot.lane.b32.xlu1 %v8871_v58, %s7368_s17  ;;  %v2724_v12 = vshll.u32 %v2493_v41, 16  ;;  %v3630_v59 = vsel %vm1699_vm11, %v3598_v3, %v8841_v24  ;;  %v2914_v41 = vld [vmem:[#allocation2 + $0xb0] sm:$0x1] }
 0x2de   : >> { %v2320_v47 = vadd.f32 %v2319_v38, %v2231_v2  ;;  %v8935_v61 = vsel %vm1187_vm9, %v3263_v32, %v3267_v9  ;;  %v8939_v26 = vpop.permute.xlu0 %3313 }
 0x2df   : >> { %v2723_v0 = vrot.slane %v2721_v29, 7  ;;  %3576 = vrot.lane.b32.xlu2 %v8935_v61, %s7367_s15  ;;  %v3479_v1 = vpop.permute.xlu1 %3478 }
 0x2e0   : >> { %vm2359_vm3 = vcmp.ge.f32.partialorder %v2320_v47, 0.0  ;;  %v2392_v13 = vmul.f32 %v8355_v8, %v2320_v47  ;;  %v3714_v31 = vsel %vm422_vm2, %v8559_v55, %v3479_v1 }
 0x2e1   : >> { %v2726_v36 = vor.u32 %v2724_v12, %v2723_v0  ;;  %v8944_v38 = vpop.permute.xlu2 %3395  ;;  %v3758_v44 = vsel %vm1699_vm11, %v3714_v31, %v3516_v50  ;;  %v2727_v16 = vrot.slane %v2723_v0, 4  ;;  %v8971_v0 = vpop.f32.mrf.mxu0 }
 0x2e2   : >> { %v2424_v18 = vsel %vm2359_vm3, %v2320_v47, %v2392_v13  ;;  %v3793_v10 = vsel %vm1732_vm12, %v3758_v44, %v8864_v19  ;;  %vm4368_vm3 = vcmask 64512  }
 0x2e3   : >> { %v2911_v56 = vsel %vm7623_vm7, %v2726_v36, %v2910_v46  ;;  %v2494_v33 = vpack.c.bf16 %v2424_v18, %v2424_v18  ;;  %v2233_v35 = vpop.f32.mrf.mxu1  ;;  %v8951_v27 = vld [vmem:[#allocation2 + $0x9c] sm:$0xff] }
 0x2e4   : >> { %2912 = vst [vmem:[#allocation2 + $0xa8] sm:$0xf] %v2911_v56  ;;  %v2234_v55 = vadd.f32 %v2233_v35, %v8314_v21  ;;  %v2972_v7 = vld [vmem:[#allocation2 + $0xa4] sm:$0x1]  ;;  %3531 = vrot.lane.b32.xlu0 %v8951_v27, %s7369_s24  ;;  %v3272_v21 = vshll.u32 %v8951_v27, 16  ;;  %v3376_v60 = vrot.slane %v8951_v27, 1 }
 0x2e5   : >> { %v2729_v53 = vshrl.u32 %v2494_v33, 16  ;;  %3442 = vrot.lane.b32.xlu1 %v8845_v57, %s7367_s15  ;;  %v3094_v11 = vunpack.c.l.b16 %v2972_v7  ;;  %v2732_v50 = vshll.u32 %v2494_v33, 16  ;;  %v3270_v24 = vshrl.u32 %v8951_v27, 16 }
 0x2e6   : >> { %v2323_v39 = vadd.f32 %v2322_v28, %v2234_v55  ;;  %v3518_v32 = vpop.permute.xlu0 %3517  ;;  %v3274_v2 = vrot.slane %v3272_v21, 1 }
 0x2e7   : >> { %v2731_v34 = vrot.slane %v2729_v53, 7  ;;  %3407 = vrot.lane.b32.xlu2 %v8871_v58, %s7369_s24  ;;  %v3429_v20 = vpop.permute.xlu1 %3428  ;;  %v3110_v25 = vpack.c.b16 %v3094_v11, %v3094_v11 }
 0x2e8   : >> { %vm2360_vm4 = vcmp.ge.f32.partialorder %v2323_v39, 0.0  ;;  %v2393_v62 = vmul.f32 %v8355_v8, %v2323_v39  ;;  %v3665_v19 = vsel %vm1732_vm12, %v3630_v59, %v3429_v20  ;;  %v3275_v1 = vor.u32 %v3274_v2, %v3270_v24 }
 0x2e9   : >> { %v2734_v9 = vor.u32 %v2732_v50, %v2731_v34  ;;  %v2736_v28 = vrot.slane %v2731_v34, 4  ;;  %v8969_v29 = vpop.permute.xlu2 %3566  ;;  %4010 = vmatmul.bf16.gmra.mxu3 %v3665_v19  ;;  %4099 = vmatmul.bf16.gmra.mxu2 %v3793_v10  ;;  %v3377_v58 = vrot.slane %v3110_v25, 1  ;;  %v3277_v47 = vshll.u32 %v3110_v25, 16  ;;  %v7247_v10 = vld [vmem:[#allocation2 + $0x30] sm:$0xff] }
 0x2ea   : >> { %v2425_v12 = vsel %vm2360_vm4, %v2323_v39, %v2393_v62  ;;  %v2327_v39 = vpop.f32.mrf.mxu3 }
 0x2eb   : >> { %v2735_v46 = vsel %vm7618_vm6, %v2727_v16, %v2734_v9  ;;  %v2915_v13 = vsel %vm7629_vm8, %v2736_v28, %v2914_v41  ;;  %v2495_v31 = vpack.c.bf16 %v2425_v12, %v2425_v12  ;;  %v2235_v36 = vpop.f32.mrf.mxu1  ;;  %v8978_v23 = vsel %vm1412_vm10, %v3376_v60, %v3377_v58  ;;  %v2917_v16 = vld [vmem:[#allocation2 + $0xb4] sm:$0xf]  ;;  %v9007_v41 = vpop.f32.mrf.mxu0 }
 0x2ec   : >> { %2913 = vst.msk [vmem:[#allocation2 + $0xac] sm:$0xf] %vm334_vm0, %v2735_v46  ;;  %v2236_v3 = vadd.f32 %v2235_v36, %v8321_v63  ;;  %6857 = vmatmul.msk.bf16.gmra.mxu0 %vm422_vm2, %v8978_v23  ;;  %v3279_v18 = vrot.slane %v3277_v47, 1  ;;  %3329 = vrot.lane.b32.xlu0 %v8935_v61, %s7368_s17 }
 0x2ed   : >> { %2916 = vst [vmem:[#allocation2 + $0xb0] sm:$0x1] %v2915_v13  ;;  %v2738_v56 = vshrl.u32 %v2495_v31, 16  ;;  %3494 = vrot.lane.b32.xlu1 %v8924_v45, %s7368_s17  ;;  %v2741_v55 = vshll.u32 %v2495_v31, 16 }
 0x2ee   : >> { %v2325_v33 = vadd.f32 %v2324_v48, %v2236_v3  ;;  %v8989_v44 = vsel %vm1187_vm9, %v3275_v1, %v3279_v18  ;;  %v8993_v7 = vpop.permute.xlu0 %3315  ;;  %v3600_v48 = vsel %vm422_vm2, %v7247_v10, %v8939_v26 }
 0x2ef   : >> { %v2740_v35 = vrot.slane %v2738_v56, 7  ;;  %3578 = vrot.lane.b32.xlu2 %v8989_v44, %s7367_s15  ;;  %v3481_v63 = vpop.permute.xlu1 %3480  ;;  %v3632_v26 = vsel %vm1699_vm11, %v3600_v48, %v8892_v40  ;;  %v2921_v40 = vld [vmem:[#allocation2 + $0xbc] sm:$0x1] }
 0x2f0   : >> { %vm2361_vm5 = vcmp.ge.f32.partialorder %v2325_v33, 0.0  ;;  %v2394_v53 = vmul.f32 %v8355_v8, %v2325_v33  ;;  %v3717_v59 = vsel %vm422_vm2, %v8605_v54, %v3481_v63 }
 0x2f1   : >> { %v2743_v11 = vor.u32 %v2741_v55, %v2740_v35  ;;  %v8998_v50 = vpop.permute.xlu2 %3397  ;;  %v3760_v25 = vsel %vm1699_vm11, %v3717_v59, %v3518_v32  ;;  %v2744_v19 = vrot.slane %v2740_v35, 4 }
 0x2f2   : >> { %v2426_v21 = vsel %vm2361_vm5, %v2325_v33, %v2394_v53  ;;  %v3796_v58 = vsel %vm1732_vm12, %v3760_v25, %v8917_v37  ;;  %v2329_v10 = vpop.f32.mrf.mxu3 }
 0x2f3   : >> { %v2918_v34 = vsel %vm7623_vm7, %v2743_v11, %v2917_v16  ;;  %v2496_v20 = vpack.c.bf16 %v2426_v21, %v2426_v21  ;;  %v2238_v60 = vpop.f32.mrf.mxu1  ;;  %v9005_v24 = vld [vmem:[#allocation2 + $0xa8] sm:$0xff] }
 0x2f4   : >> { %2919 = vst [vmem:[#allocation2 + $0xb4] sm:$0xf] %v2918_v34  ;;  %v2239_v54 = vadd.f32 %v2238_v60, %v8330_v22  ;;  %v2975_v62 = vld [vmem:[#allocation2 + $0xb0] sm:$0x1]  ;;  %3533 = vrot.lane.b32.xlu0 %v9005_v24, %s7369_s24  ;;  %v3284_v22 = vshll.u32 %v9005_v24, 16  ;;  %v3379_v13 = vrot.slane %v9005_v24, 1 }
 0x2f5   : >> { %v2746_v2 = vshrl.u32 %v2496_v20, 16  ;;  %3444 = vrot.lane.b32.xlu1 %v8898_v51, %s7367_s15  ;;  %v3095_v32 = vunpack.c.l.b16 %v2975_v62  ;;  %v2749_v9 = vshll.u32 %v2496_v20, 16  ;;  %v3282_v31 = vshrl.u32 %v9005_v24, 16  ;;  %v9042_v20 = vpop.f32.mrf.mxu0 }
 0x2f6   : >> { %v2328_v28 = vadd.f32 %v2327_v39, %v2239_v54  ;;  %v3520_v1 = vpop.permute.xlu0 %3519  ;;  %v3286_v37 = vrot.slane %v3284_v22, 1  ;;  %v7248_v22 = vld [vmem:[#allocation2 + $0x3c] sm:$0xff] }
 0x2f7   : >> { %v2748_v47 = vrot.slane %v2746_v2, 7  ;;  %3409 = vrot.lane.b32.xlu2 %v8924_v45, %s7369_s24  ;;  %v3431_v12 = vpop.permute.xlu1 %3430  ;;  %v3111_v46 = vpack.c.b16 %v3095_v32, %v3095_v32  ;;  %v2924_v2 = vld [vmem:[#allocation2 + $0xc0] sm:$0xf] }
 0x2f8   : >> { %vm2362_vm13 = vcmp.ge.f32.partialorder %v2328_v28, 0.0  ;;  %v2395_v36 = vmul.f32 %v8355_v8, %v2328_v28  ;;  %v3668_v3 = vsel %vm1732_vm12, %v3632_v26, %v3431_v12  ;;  %v3287_v63 = vor.u32 %v3286_v37, %v3282_v31 }
 0x2f9   : >> { %v2751_v18 = vor.u32 %v2749_v9, %v2748_v47  ;;  %v2753_v56 = vrot.slane %v2748_v47, 4  ;;  %v9025_v33 = vpop.permute.xlu2 %3568  ;;  %4015 = vmatmul.bf16.gmra.mxu3 %v3668_v3  ;;  %4104 = vmatmul.bf16.gmra.mxu2 %v3796_v58  ;;  %v3380_v45 = vrot.slane %v3111_v46, 1  ;;  %v3289_v35 = vshll.u32 %v3111_v46, 16 }
 0x2fa   : >> { %v2427_v55 = vsel %vm2362_vm13, %v2328_v28, %v2395_v36  ;;  %v3602_v47 = vsel %vm422_vm2, %v7248_v22, %v8993_v7 }
 0x2fb   : >> { %v2752_v16 = vsel %vm7618_vm6, %v2744_v19, %v2751_v18  ;;  %v2922_v53 = vsel %vm7629_vm8, %v2753_v56, %v2921_v40  ;;  %v2497_v59 = vpack.c.bf16 %v2427_v55, %v2427_v55  ;;  %v2240_v11 = vpop.f32.mrf.mxu1  ;;  %v9032_v39 = vsel %vm1412_vm10, %v3379_v13, %v3380_v45 }
 0x2fc   : >> { %2920 = vst.msk [vmem:[#allocation2 + $0xb8] sm:$0xf] %vm334_vm0, %v2752_v16  ;;  %v2241_v48 = vadd.f32 %v2240_v11, %v8342_v17  ;;  %6858 = vmatmul.msk.bf16.gmra.mxu0 %vm422_vm2, %v9032_v39  ;;  %v3291_v21 = vrot.slane %v3289_v35, 1  ;;  %3331 = vrot.lane.b32.xlu0 %v8989_v44, %s7368_s17  ;;  %v3634_v7 = vsel %vm1699_vm11, %v3602_v47, %v8944_v38  ;;  %v7249_v47 = vld [vmem:[#allocation2 + $0x48] sm:$0xff] }
 0x2fd   : >> { %2923 = vst [vmem:[#allocation2 + $0xbc] sm:$0x1] %v2922_v53  ;;  %v2755_v34 = vshrl.u32 %v2497_v59, 16  ;;  %3496 = vrot.lane.b32.xlu1 %v8978_v23, %s7368_s17  ;;  %v2758_v17 = vshll.u32 %v2497_v59, 16  ;;  %v9074_v55 = vpop.f32.mrf.mxu0 }
 0x2fe   : >> { %v2330_v25 = vadd.f32 %v2329_v10, %v2241_v48  ;;  %v9045_v60 = vsel %vm1187_vm9, %v3287_v63, %v3291_v21  ;;  %v9049_v19 = vpop.permute.xlu0 %3317  ;;  %v2928_v63 = vld [vmem:[#allocation2 + $0xc8] sm:$0x1] }
 0x2ff   : >> { %v2757_v54 = vrot.slane %v2755_v34, 7  ;;  %3580 = vrot.lane.b32.xlu2 %v9045_v60, %s7367_s15  ;;  %v3483_v62 = vpop.permute.xlu1 %3482 }
 0x300   : >> { %vm2363_vm14 = vcmp.ge.f32.partialorder %v2330_v25, 0.0  ;;  %v2396_v26 = vmul.f32 %v8355_v8, %v2330_v25  ;;  %v3720_v28 = vsel %vm422_vm2, %v8646_v4, %v3483_v62 }
 0x301   : >> { %v2760_v32 = vor.u32 %v2758_v17, %v2757_v54  ;;  %v9052_v9 = vpop.permute.xlu2 %3399  ;;  %v3762_v8 = vsel %vm1699_vm11, %v3720_v28, %v3520_v1  ;;  %v2761_v36 = vrot.slane %v2757_v54, 4 }
 0x302   : >> { %v2428_v58 = vsel %vm2363_vm14, %v2330_v25, %v2396_v26  ;;  %v3799_v45 = vsel %vm1732_vm12, %v3762_v8, %v8969_v29 }
 0x303   : >> { %v2925_v12 = vsel %vm7623_vm7, %v2760_v32, %v2924_v2  ;;  %v2498_v46 = vpack.c.bf16 %v2428_v58, %v2428_v58  ;;  %v9060_v13 = vld [vmem:[#allocation2 + $0xb4] sm:$0xff] }
 0x304   : >> { %2926 = vst [vmem:[#allocation2 + $0xc0] sm:$0xf] %v2925_v12  ;;  %v2978_v31 = vld [vmem:[#allocation2 + $0xbc] sm:$0x1]  ;;  %3535 = vrot.lane.b32.xlu0 %v9060_v13, %s7369_s24  ;;  %v3296_v3 = vshll.u32 %v9060_v13, 16  ;;  %v3382_v38 = vrot.slane %v9060_v13, 1  ;;  %v3604_v12 = vsel %vm422_vm2, %v7249_v47, %v9049_v19 }
 0x305   : >> { %v2763_v40 = vshrl.u32 %v2498_v46, 16  ;;  %3446 = vrot.lane.b32.xlu1 %v8951_v27, %s7367_s15  ;;  %v3096_v4 = vunpack.c.l.b16 %v2978_v31  ;;  %v2766_v18 = vshll.u32 %v2498_v46, 16  ;;  %v3294_v53 = vshrl.u32 %v9060_v13, 16  ;;  %v9102_v28 = vpop.f32.mrf.mxu0 }
 0x306   : >> { %v3522_v56 = vpop.permute.xlu0 %3521  ;;  %v3298_v59 = vrot.slane %v3296_v3, 1 }
 0x307   : >> { %v2765_v37 = vrot.slane %v2763_v40, 7  ;;  %3411 = vrot.lane.b32.xlu2 %v8978_v23, %s7369_s24  ;;  %v3433_v1 = vpop.permute.xlu1 %3432  ;;  %v3112_v35 = vpack.c.b16 %v3096_v4, %v3096_v4 }
 0x308   : >> { %v3671_v16 = vsel %vm1732_vm12, %v3634_v7, %v3433_v1  ;;  %v3299_v29 = vor.u32 %v3298_v59, %v3294_v53  ;;  %v2984_v59 = vld [vmem:[#allocation2 + $0xd4] sm:$0x1] }
 0x309   : >> { %v2768_v11 = vor.u32 %v2766_v18, %v2765_v37  ;;  %v2770_v10 = vrot.slane %v2765_v37, 4  ;;  %v9079_v48 = vpop.permute.xlu2 %3570  ;;  %4020 = vmatmul.bf16.gmra.mxu3 %v3671_v16  ;;  %4109 = vmatmul.bf16.gmra.mxu2 %v3799_v45  ;;  %v3383_v23 = vrot.slane %v3112_v35, 1  ;;  %v3301_v21 = vshll.u32 %v3112_v35, 16 }
 0x30b   : >> { %v2769_v34 = vsel %vm7618_vm6, %v2761_v36, %v2768_v11  ;;  %v2929_v25 = vsel %vm7629_vm8, %v2770_v10, %v2928_v63  ;;  %v9086_v54 = vsel %vm1412_vm10, %v3382_v38, %v3383_v23  ;;  %v3303_v17 = vrot.slane %v3301_v21, 1  ;;  %v9138_v11 = vld [vmem:[#allocation2 + $0xcc] sm:$0xff] }
 0x30c   : >> { %2927 = vst.msk [vmem:[#allocation2 + $0xc4] sm:$0xf] %vm334_vm0, %v2769_v34  ;;  %6859 = vmatmul.msk.bf16.gmra.mxu0 %vm422_vm2, %v9086_v54  ;;  %3333 = vrot.lane.b32.xlu0 %v9045_v60, %s7368_s17  ;;  %v3542_v10 = vunpack.c.l.b16 %v2984_v59  ;;  %v7250_v34 = vld [vmem:[#allocation2 + $0x54] sm:$0xff] }
 0x30d   : >> { %2930 = vst [vmem:[#allocation2 + $0xc8] sm:$0x1] %v2929_v25  ;;  %v9092_v62 = vsel %vm1187_vm9, %v3299_v29, %v3303_v17  ;;  %3498 = vrot.lane.b32.xlu1 %v9032_v39, %s7368_s17  ;;  %v9126_v16 = vpop.f32.mrf.mxu0  ;;  %v3547_v29 = vshll.u32 %v9138_v11, 16 }
 0x30e   : >> { %v3320_v26 = vpop.permute.xlu0 %3319  ;;  %v9142_v21 = vpack.c.b16 %v3542_v10, %v3542_v10 }
 0x30f   : >> { %3582 = vrot.lane.b32.xlu2 %v9092_v62, %s7367_s15  ;;  %v3485_v2 = vpop.permute.xlu1 %3484  ;;  %v3606_v25 = vsel %vm422_vm2, %v7250_v34, %v3320_v26 }
 0x310   : >> { %v3723_v58 = vsel %vm422_vm2, %v8687_v30, %v3485_v2  ;;  %v3636_v30 = vsel %vm1699_vm11, %v3604_v12, %v8998_v50  ;;  %v3552_v47 = vshll.u32 %v9142_v21, 16  ;;  %v3638_v12 = vsel %vm1699_vm11, %v3606_v25, %v9052_v9  ;;  %v4336_v9 = vld [vmem:[%s9161_s25 + $0x18] sm:$0xff] }
 0x311   : >> { %v9100_v32 = vpop.permute.xlu2 %3401  ;;  %v3764_v8 = vsel %vm1699_vm11, %v3723_v58, %v3522_v56  ;;  %v3545_v58 = vshrl.u32 %v9138_v11, 16  ;;  %4354 = vmatpush.msra.mxu3 %v4336_v9 }
 0x312   : >> { %v3802_v18 = vsel %vm1732_vm12, %v3764_v8, %v9025_v33 }
 0x313   : >> { %v9106_v22 = vld [vmem:[#allocation2 + $0xc0] sm:$0xff] }
 0x314   : >> { %v2981_v46 = vld [vmem:[#allocation2 + $0xc8] sm:$0x1]  ;;  %3537 = vrot.lane.b32.xlu0 %v9106_v22, %s7369_s24  ;;  %v3460_v40 = vshll.u32 %v9106_v22, 16  ;;  %v3458_v36 = vshrl.u32 %v9106_v22, 16  ;;  %v3469_v1 = vrot.slane %v9106_v22, 1 }
 0x315   : >> { %3448 = vrot.lane.b32.xlu1 %v9005_v24, %s7367_s15  ;;  %v3455_v31 = vunpack.c.l.b16 %v2981_v46 }
 0x316   : >> { %v3524_v19 = vpop.permute.xlu0 %3523  ;;  %v3462_v3 = vrot.slane %v3460_v40, 1 }
 0x317   : >> { %3413 = vrot.lane.b32.xlu2 %v9032_v39, %s7369_s24  ;;  %v3435_v4 = vpop.permute.xlu1 %3434  ;;  %v3456_v7 = vpack.c.b16 %v3455_v31, %v3455_v31 }
 0x318   : >> { %v3674_v37 = vsel %vm1732_vm12, %v3636_v30, %v3435_v4  ;;  %v3463_v50 = vor.u32 %v3462_v3, %v3458_v36  ;;  %v3554_v30 = vrot.slane %v3552_v47, 1  ;;  %v7251_v3 = vld [vmem:[#allocation2 + $0x60] sm:$0xff] }
 0x319   : >> { %4025 = vmatmul.bf16.gmra.mxu3 %v3674_v37  ;;  %4114 = vmatmul.bf16.gmra.mxu2 %v3802_v18  ;;  %v3470_v56 = vrot.slane %v3456_v7, 1  ;;  %v3465_v45 = vshll.u32 %v3456_v7, 16  ;;  %v3573_v35 = vpop.permute.xlu2 %3572 }
 0x31b   : >> { %v3471_v39 = vsel %vm1412_vm10, %v3469_v1, %v3470_v56  ;;  %v3467_v63 = vrot.slane %v3465_v45, 1 }
 0x31c   : >> { %6860 = vmatmul.msk.bf16.gmra.mxu0 %vm422_vm2, %v3471_v39  ;;  %3335 = vrot.lane.b32.xlu0 %v9092_v62, %s7368_s17 }
 0x31d   : >> { %v9130_v38 = vsel %vm1187_vm9, %v3463_v50, %v3467_v63  ;;  %3500 = vrot.lane.b32.xlu1 %v9086_v54, %s7368_s17  ;;  %v3996_v50 = vpop.f32.mrf.mxu3 }
 0x31e   : >> { %v3322_v53 = vpop.permute.xlu0 %3321 }
 0x31f   : >> { %3584 = vrot.lane.b32.xlu2 %v9130_v38, %s7367_s15  ;;  %v3487_v33 = vpop.permute.xlu1 %3486 }
 0x320   : >> { %v3726_v23 = vsel %vm422_vm2, %v8731_v6, %v3487_v33  ;;  %v3549_v6 = vrot.slane %v3547_v29, 1  ;;  %v7252_v29 = vld [vmem:[#allocation2 + $0x6c] sm:$0xff] }
 0x321   : >> { %v3404_v17 = vpop.permute.xlu2 %3403  ;;  %v3766_v2 = vsel %vm1699_vm11, %v3726_v23, %v3524_v19 }
 0x322   : >> { %v3805_v31 = vsel %vm1732_vm12, %v3766_v2, %v9079_v48  ;;  %v3550_v40 = vor.u32 %v3549_v6, %v3545_v58  ;;  %v3608_v48 = vsel %vm422_vm2, %v7251_v3, %v3322_v53 }
 0x323   : >> { %v3640_v18 = vsel %vm1699_vm11, %v3608_v48, %v9100_v32 }
 0x324   : >> { %3539 = vrot.lane.b32.xlu0 %v9138_v11, %s7369_s24 }
 0x325   : >> { %3450 = vrot.lane.b32.xlu1 %v9060_v13, %s7367_s15  ;;  %v9184_v10 = vpop.f32.mrf.mxu3 }
 0x326   : >> { %v3526_v46 = vpop.permute.xlu0 %3525 }
 0x327   : >> { %3415 = vrot.lane.b32.xlu2 %v9086_v54, %s7369_s24  ;;  %v3437_v26 = vpop.permute.xlu1 %3436  ;;  %v3555_v54 = vsel %vm1187_vm9, %v3550_v40, %v3554_v30 }
 0x328   : >> { %v3677_v8 = vsel %vm1732_vm12, %v3638_v12, %v3437_v26 }
 0x329   : >> { %4030 = vmatmul.bf16.gmra.mxu3 %v3677_v8  ;;  %4119 = vmatmul.bf16.gmra.mxu2 %v3805_v31  ;;  %v3575_v4 = vpop.permute.xlu2 %3574 }
 0x32d   : >> { %3502 = vrot.lane.b32.xlu1 %v3471_v39, %s7368_s17  ;;  %s4366_s17 = scalar_lea.vmem %s10647_s6, %s7364_s10 }
 0x32e   : >> { %v3324_v7 = vpop.permute.xlu0 %3323 }
 0x32f   : >> { %v3489_v19 = vpop.permute.xlu1 %3488  ;;  %3586 = vrot.lane.b32.xlu2 %v3555_v54, %s7367_s15  ;;  %v3610_v34 = vsel %vm422_vm2, %v7252_v29, %v3324_v7 }
 0x330   : >> { %v3729_v36 = vsel %vm422_vm2, %v8778_v42, %v3489_v19  ;;  %v9180_v42 = vpop.f32.mrf.mxu0  ;;  %v3642_v58 = vsel %vm1699_vm11, %v3610_v34, %v3404_v17 }
 0x331   : >> { %v3768_v37 = vsel %vm1699_vm11, %v3729_v36, %v3526_v46  ;;  %v3406_v45 = vpop.permute.xlu2 %3405 }
 0x332   : >> { %v3808_v63 = vsel %vm1732_vm12, %v3768_v37, %v3573_v35 }
 0x335   : >> { %3452 = vrot.lane.b32.xlu1 %v9106_v22, %s7367_s15  ;;  %s6864_s15 = sshll.u32 %s7364_s10, 3  ;;  %s460_s10 = sadd.s32 1, %s7364_s10  }
 0x336   : >> { %v3528_v56 = vpop.permute.xlu0 %3527  ;;  %s4364_s26 = scalar_lea.vmem %s10646_s5, %s6864_s15  ;;  %p457_p11 = scmp.ge.s32.totalorder %s460_s10, 2  }
 0x337   : >> { %v3439_v1 = vpop.permute.xlu1 %3438  ;;  %s7371_s23 = smov (%p457_p11), 64   ;;  %s7372_s10 = smov (%p457_p11), 32  }
 0x338   : >> { %v3680_v39 = vsel %vm1732_vm12, %v3640_v18, %v3439_v1  ;;  %v9192_v2 = vpop.f32.mrf.mxu0  ;;  %s7373_s24 = smov (%p457_p11), 96  }
 0x339   : >> { %4035 = vmatmul.bf16.gmra.mxu3 %v3680_v39  ;;  %4124 = vmatmul.bf16.gmra.mxu2 %v3808_v63  ;;  %v3577_v32 = vpop.permute.xlu2 %3576 }
 0x33c   : >> { %v4085_v33 = vpop.f32.mrf.mxu2 }
 0x33d   : >> { %v9182_v53 = vadd.f32 %v4085_v33, %v3996_v50 }
 0x33e   : >> { %v3326_v22 = vpop.permute.xlu0 %3325 }
 0x33f   : >> { %v3491_v59 = vpop.permute.xlu1 %3490  ;;  %v3612_v19 = vsel %vm422_vm2, %v8792_v5, %v3326_v22 }
 0x340   : >> { %v3732_v23 = vsel %vm422_vm2, %v8832_v14, %v3491_v59  ;;  %v4001_v14 = vpop.f32.mrf.mxu3  ;;  %v9199_v9 = vpop.f32.mrf.mxu0  ;;  %v3644_v48 = vsel %vm1699_vm11, %v3612_v19, %v3406_v45 }
 0x341   : >> { %v3770_v35 = vsel %vm1699_vm11, %v3732_v23, %v3528_v56  ;;  %v3408_v46 = vpop.permute.xlu2 %3407 }
 0x342   : >> { %v3811_v26 = vsel %vm1732_vm12, %v3770_v35, %v3575_v4 }
 0x344   : >> { %v9189_v25 = vpop.f32.mrf.mxu2 }
 0x346   : >> { %v3530_v47 = vpop.permute.xlu0 %3529 }
 0x347   : >> { %v3441_v6 = vpop.permute.xlu1 %3440 }
 0x348   : >> { %v3683_v12 = vsel %vm1732_vm12, %v3642_v58, %v3441_v6  ;;  %v4003_v54 = vpop.f32.mrf.mxu3 }
 0x349   : >> { %4040 = vmatmul.bf16.gmra.mxu3 %v3683_v12  ;;  %4129 = vmatmul.bf16.gmra.mxu2 %v3811_v26  ;;  %v3579_v3 = vpop.permute.xlu2 %3578 }
 0x34c   : >> { %v4090_v8 = vpop.f32.mrf.mxu2 }
 0x34d   : >> { %v9197_v31 = vadd.f32 %v4090_v8, %v4001_v14 }
 0x34e   : >> { %v3328_v30 = vpop.permute.xlu0 %3327 }
 0x34f   : >> { %v3493_v40 = vpop.permute.xlu1 %3492  ;;  %v3614_v22 = vsel %vm422_vm2, %v8845_v57, %v3328_v30 }
 0x350   : >> { %v3735_v17 = vsel %vm422_vm2, %v8883_v15, %v3493_v40  ;;  %v9211_v15 = vpop.f32.mrf.mxu0  ;;  %v3646_v58 = vsel %vm1699_vm11, %v3614_v22, %v3408_v46 }
 0x351   : >> { %v3772_v4 = vsel %vm1699_vm11, %v3735_v17, %v3530_v47  ;;  %v3410_v59 = vpop.permute.xlu2 %3409 }
 0x352   : >> { %v3814_v56 = vsel %vm1732_vm12, %v3772_v4, %v3577_v32 }
 0x354   : >> { %v4092_v7 = vpop.f32.mrf.mxu2 }
 0x355   : >> { %v9206_v36 = vadd.f32 %v4092_v7, %v4003_v54 }
 0x356   : >> { %v3532_v18 = vpop.permute.xlu0 %3531 }
 0x357   : >> { %v3443_v37 = vpop.permute.xlu1 %3442 }
 0x358   : >> { %v3686_v1 = vsel %vm1732_vm12, %v3644_v48, %v3443_v37  ;;  %v9219_v29 = vpop.f32.mrf.mxu0 }
 0x359   : >> { %4045 = vmatmul.bf16.gmra.mxu3 %v3686_v1  ;;  %4134 = vmatmul.bf16.gmra.mxu2 %v3814_v56  ;;  %v3581_v57 = vpop.permute.xlu2 %3580 }
 0x35c   : >> { %v4006_v50 = vpop.f32.mrf.mxu3  ;;  %v4095_v5 = vpop.f32.mrf.mxu2 }
 0x35d   : >> { %v9213_v39 = vadd.f32 %v4095_v5, %v4006_v50 }
 0x35e   : >> { %v3330_v33 = vpop.permute.xlu0 %3329 }
 0x35f   : >> { %v3495_v63 = vpop.permute.xlu1 %3494  ;;  %v3616_v19 = vsel %vm422_vm2, %v8898_v51, %v3330_v33 }
 0x360   : >> { %v3738_v45 = vsel %vm422_vm2, %v8935_v61, %v3495_v63  ;;  %v4335_v61 = vld [vmem:[%s9161_s25 + $0x10] sm:$0xff]  ;;  %v9230_v30 = vpop.f32.mrf.mxu0 }
 0x361   : >> { %v3774_v34 = vsel %vm1699_vm11, %v3738_v45, %v3532_v18  ;;  %4355 = vmatpush.msra.mxu3 %v4335_v61  ;;  %v3648_v18 = vsel %vm1699_vm11, %v3616_v19, %v3410_v59 }
 0x362   : >> { %v3817_v26 = vsel %vm1732_vm12, %v3774_v34, %v3579_v3  ;;  %v3412_v3 = vpop.permute.xlu2 %3411 }
 0x364   : >> { %v4008_v23 = vpop.f32.mrf.mxu3  ;;  %v4097_v32 = vpop.f32.mrf.mxu2 }
 0x365   : >> { %v9222_v35 = vadd.f32 %v4097_v32, %v4008_v23 }
 0x366   : >> { %v3534_v47 = vpop.permute.xlu0 %3533 }
 0x367   : >> { %v3445_v6 = vpop.permute.xlu1 %3444 }
 0x368   : >> { %v3689_v12 = vsel %vm1732_vm12, %v3646_v58, %v3445_v6  ;;  %v9242_v5 = vpop.f32.mrf.mxu0 }
 0x369   : >> { %4050 = vmatmul.bf16.gmra.mxu3 %v3689_v12  ;;  %4139 = vmatmul.bf16.gmra.mxu2 %v3817_v26 }
 0x36a   : >> { %v3583_v33 = vpop.permute.xlu2 %3582 }
 0x36c   : >> { %v4011_v14 = vpop.f32.mrf.mxu3  ;;  %v4100_v8 = vpop.f32.mrf.mxu2 }
 0x36d   : >> { %v9228_v40 = vadd.f32 %v4100_v8, %v4011_v14 }
 0x36e   : >> { %v3332_v54 = vpop.permute.xlu0 %3331 }
 0x36f   : >> { %v3497_v17 = vpop.permute.xlu1 %3496  ;;  %v3618_v23 = vsel %vm422_vm2, %v8951_v27, %v3332_v54  ;;  %v3589_v27 = vrot.slane %v9142_v21, 1  ;;  %v9381_v52 = vadd.f32 %v9180_v42, %v9228_v40 }
 0x370   : >> { %v3741_v46 = vsel %vm422_vm2, %v8989_v44, %v3497_v17  ;;  %v9250_v59 = vpop.f32.mrf.mxu0 }
 0x371   : >> { %v3776_v48 = vsel %vm1699_vm11, %v3741_v46, %v3534_v47  ;;  %v3650_v47 = vsel %vm1699_vm11, %v3618_v23, %v3412_v3  ;;  %v4265_v42 = vsel %vm422_vm2, %v9381_v52, 0.0 }
 0x372   : >> { %v3820_v50 = vsel %vm1732_vm12, %v3776_v48, %v3581_v57  ;;  %v3588_v57 = vrot.slane %v9138_v11, 1 }
 0x374   : >> { %v4013_v7 = vpop.f32.mrf.mxu3  ;;  %v4102_v4 = vpop.f32.mrf.mxu2  ;;  %v3590_v14 = vsel %vm1412_vm10, %v3588_v57, %v3589_v27 }
 0x375   : >> { %v9237_v37 = vadd.f32 %v4102_v4, %v4013_v7  ;;  %6861 = vmatmul.msk.bf16.gmra.mxu0 %vm422_vm2, %v3590_v14 }
 0x376   : >> { %v3536_v44 = vpop.permute.xlu0 %3535 }
 0x377   : >> { %v3447_v1 = vpop.permute.xlu1 %3446 }
 0x378   : >> { %v3692_v56 = vsel %vm1732_vm12, %v3648_v18, %v3447_v1  ;;  %v9266_v54 = vpop.f32.mrf.mxu0 }
 0x379   : >> { %4055 = vmatmul.bf16.gmra.mxu3 %v3692_v56  ;;  %4144 = vmatmul.bf16.gmra.mxu2 %v3820_v50 }
 0x37c   : >> { %v9244_v51 = vpop.f32.mrf.mxu3  ;;  %v9246_v63 = vpop.f32.mrf.mxu2 }
 0x37e   : >> { %v3334_v6 = vpop.permute.xlu0 %3333 }
 0x37f   : >> { %v3499_v45 = vpop.permute.xlu1 %3498  ;;  %v3620_v11 = vsel %vm422_vm2, %v9005_v24, %v3334_v6 }
 0x380   : >> { %v3744_v22 = vsel %vm422_vm2, %v9045_v60, %v3499_v45  ;;  %v3414_v60 = vpop.permute.xlu2 %3413  ;;  %v9277_v56 = vpop.f32.mrf.mxu0 }
 0x381   : >> { %v3778_v58 = vsel %vm1699_vm11, %v3744_v22, %v3536_v44  ;;  %v3652_v50 = vsel %vm1699_vm11, %v3620_v11, %v3414_v60 }
 0x382   : >> { %v3823_v61 = vsel %vm1732_vm12, %v3778_v58, %v3583_v33 }
 0x384   : >> { %v9254_v32 = vpop.f32.mrf.mxu3  ;;  %v9256_v34 = vpop.f32.mrf.mxu2 }
 0x386   : >> { %v3538_v7 = vpop.permute.xlu0 %3537 }
 0x387   : >> { %v3449_v12 = vpop.permute.xlu1 %3448 }
 0x388   : >> { %v3695_v26 = vsel %vm1732_vm12, %v3650_v47, %v3449_v12  ;;  %v3585_v3 = vpop.permute.xlu2 %3584  ;;  %v9284_v47 = vpop.f32.mrf.mxu0 }
 0x389   : >> { %4060 = vmatmul.bf16.gmra.mxu3 %v3695_v26  ;;  %4149 = vmatmul.bf16.gmra.mxu2 %v3823_v61 }
 0x38c   : >> { %v4021_v8 = vpop.f32.mrf.mxu3  ;;  %v4110_v17 = vpop.f32.mrf.mxu2 }
 0x38d   : >> { %v9268_v46 = vadd.f32 %v4110_v17, %v4021_v8 }
 0x38f   : >> { %v3501_v19 = vpop.permute.xlu1 %3500 }
 0x390   : >> { %v3747_v4 = vsel %vm422_vm2, %v9092_v62, %v3501_v19  ;;  %v3336_v62 = vpop.permute.xlu0 %3335  ;;  %v3416_v23 = vpop.permute.xlu2 %3415 }
 0x391   : >> { %v3780_v18 = vsel %vm1699_vm11, %v3747_v4, %v3538_v7  ;;  %v3622_v61 = vsel %vm422_vm2, %v9060_v13, %v3336_v62 }
 0x392   : >> { %v3826_v45 = vsel %vm1732_vm12, %v3780_v18, %v3585_v3  ;;  %v3654_v17 = vsel %vm1699_vm11, %v3622_v61, %v3416_v23  ;;  %v9297_v3 = vpop.f32.mrf.mxu0 }
 0x394   : >> { %v4023_v21 = vpop.f32.mrf.mxu3  ;;  %v4112_v48 = vpop.f32.mrf.mxu2 }
 0x395   : >> { %v9275_v1 = vadd.f32 %v4112_v48, %v4023_v21 }
 0x397   : >> { %v3451_v44 = vpop.permute.xlu1 %3450 }
 0x398   : >> { %v3698_v33 = vsel %vm1732_vm12, %v3652_v50, %v3451_v44  ;;  %v3540_v26 = vpop.permute.xlu0 %3539  ;;  %v3587_v14 = vpop.permute.xlu2 %3586 }
 0x399   : >> { %4065 = vmatmul.bf16.gmra.mxu3 %v3698_v33  ;;  %4154 = vmatmul.bf16.gmra.mxu2 %v3826_v45 }
 0x39a   : >> { %v9301_v50 = vpop.f32.mrf.mxu0 }
 0x39c   : >> { %v4026_v22 = vpop.f32.mrf.mxu3  ;;  %v4115_v24 = vpop.f32.mrf.mxu2 }
 0x39d   : >> { %v9282_v58 = vadd.f32 %v4115_v24, %v4026_v22 }
 0x39f   : >> { %v3503_v6 = vpop.permute.xlu1 %3502 }
 0x3a0   : >> { %v3750_v12 = vsel %vm422_vm2, %v9130_v38, %v3503_v6  ;;  %v4334_v38 = vld [vmem:[%s9161_s25 + $0x8] sm:$0xff] }
 0x3a1   : >> { %v3782_v27 = vsel %vm1699_vm11, %v3750_v12, %v3540_v26  ;;  %4356 = vmatpush.msra.mxu3 %v4334_v38 }
 0x3a2   : >> { %v3829_v4 = vsel %vm1732_vm12, %v3782_v27, %v3587_v14  ;;  %v9307_v22 = vpop.f32.mrf.mxu0 }
 0x3a4   : >> { %v4028_v60 = vpop.f32.mrf.mxu3  ;;  %v4117_v57 = vpop.f32.mrf.mxu2 }
 0x3a5   : >> { %v9291_v8 = vadd.f32 %v4117_v57, %v4028_v60 }
 0x3a7   : >> { %v3453_v19 = vpop.permute.xlu1 %3452 }
 0x3a8   : >> { %v3701_v7 = vsel %vm1732_vm12, %v3654_v17, %v3453_v19 }
 0x3a9   : >> { %4070 = vmatmul.bf16.gmra.mxu3 %v3701_v7  ;;  %4159 = vmatmul.bf16.gmra.mxu2 %v3829_v4 }
 0x3aa   : >> { %v4224_v12 = vpop.f32.mrf.mxu0 }
 0x3ac   : >> { %v4031_v13 = vpop.f32.mrf.mxu3  ;;  %v4120_v11 = vpop.f32.mrf.mxu2 }
 0x3ad   : >> { %v9299_v21 = vadd.f32 %v4120_v11, %v4031_v13 }
 0x3b2   : >> { %v9313_v57 = vpop.f32.mrf.mxu0 }
 0x3b4   : >> { %v4033_v48 = vpop.f32.mrf.mxu3  ;;  %v4122_v18 = vpop.f32.mrf.mxu2 }
 0x3b5   : >> { %v9303_v44 = vadd.f32 %v4122_v18, %v4033_v48 }
 0x3ba   : >> { %v9317_v4 = vpop.f32.mrf.mxu0 }
 0x3bc   : >> { %v4036_v33 = vpop.f32.mrf.mxu3  ;;  %v4125_v45 = vpop.f32.mrf.mxu2 }
 0x3bd   : >> { %v9305_v62 = vadd.f32 %v4125_v45, %v4036_v33  ;;  %v4333_v33 = vld [vmem:[%s9161_s25] sm:$0xff]  ;;  %s7314_s25 = scalar_lea.hbm (%p457_p11), %s10650_s9, 512 }
 0x3be   : >> { %4357 = vmatpush.msra.mxu3 %v4333_v33 }
 0x3c2   : >> { %v9325_v18 = vpop.f32.mrf.mxu0 }
 0x3c4   : >> { %v4038_v24 = vpop.f32.mrf.mxu3  ;;  %v4127_v23 = vpop.f32.mrf.mxu2 }
 0x3c5   : >> { %v9309_v6 = vadd.f32 %v4127_v23, %v4038_v24 }
 0x3ca   : >> { %v9332_v23 = vpop.f32.mrf.mxu0 }
 0x3cc   : >> { %v4041_v26 = vpop.f32.mrf.mxu3  ;;  %v4130_v61 = vpop.f32.mrf.mxu2 }
 0x3cd   : >> { %v9311_v60 = vadd.f32 %v4130_v61, %v4041_v26  ;;  %v4088_v26 = vadd.f32 %v9189_v25, %v9184_v10  ;;  %v9355_v10 = vadd.f32 %v9074_v55, %v9206_v36  ;;  %v9375_v36 = vadd.f32 %v9126_v16, %v9222_v35 }
 0x3ce   : >> { %v4108_v16 = vadd.f32 %v9256_v34, %v9254_v32  ;;  %v9409_v34 = vadd.f32 %v9219_v29, %v9268_v46 }
 0x3cf   : >> { %v4259_v55 = vsel %vm422_vm2, %v9355_v10, 0.0 }
 0x3d2   : >> { %v9357_v25 = vpop.f32.mrf.mxu0 }
 0x3d4   : >> { %v4043_v27 = vpop.f32.mrf.mxu3  ;;  %v4132_v14 = vpop.f32.mrf.mxu2 }
 0x3d5   : >> { %v9315_v17 = vadd.f32 %v4132_v14, %v4043_v27  ;;  %v9341_v27 = vadd.f32 %v9007_v41, %v4088_v26  ;;  %v9345_v14 = vadd.f32 %v8971_v0, %v9182_v53  ;;  %v9369_v53 = vadd.f32 %v9102_v28, %v9213_v39 }
 0x3d6   : >> { %v4106_v28 = vadd.f32 %v9246_v63, %v9244_v51 }
 0x3d7   : >> { %v4254_v0 = vsel %vm422_vm2, %v9345_v14, 0.0  ;;  %v4261_v26 = vsel %vm422_vm2, %v9369_v53, 0.0 }
 0x3d8   : >> { %v9396_v40 = vadd.f32 %v9199_v9, %v4106_v28 }
 0x3da   : >> { %v9398_v51 = vpop.f32.mrf.mxu0  ;;  %v4269_v32 = vsel %vm422_vm2, %v9396_v40, 0.0 }
 0x3dc   : >> { %v4046_v19 = vpop.f32.mrf.mxu3  ;;  %v4135_v7 = vpop.f32.mrf.mxu2 }
 0x3dd   : >> { %v4136_v38 = vadd.f32 %v4135_v7, %v4046_v19  ;;  %v9349_v19 = vadd.f32 %v9042_v20, %v9197_v31  ;;  %v4255_v7 = vsel %vm422_vm2, %v9341_v27, 0.0 }
 0x3de   : >> { %v4256_v31 = vadd.f32 %v4255_v7, %v4254_v0  ;;  %v4263_v7 = vsel %vm422_vm2, %v9375_v36, 0.0  ;;  %v9389_v0 = vadd.f32 %v9192_v2, %v9237_v37  ;;  %v9403_v2 = vadd.f32 %v9211_v15, %v4108_v16 }
 0x3df   : >> { %v9319_v13 = vadd.f32 %v4224_v12, %v4136_v38  ;;  %v4257_v20 = vsel %vm422_vm2, %v9349_v19, 0.0  ;;  %v9421_v16 = vadd.f32 %v9242_v5, %v9282_v58  ;;  %v9439_v58 = vadd.f32 %v9277_v56, %v9303_v44 }
 0x3e0   : >> { %v4258_v33 = vadd.f32 %v4257_v20, %v4256_v31  ;;  %v4271_v9 = vsel %vm422_vm2, %v9403_v2, 0.0 }
 0x3e2   : >> { %v4260_v39 = vadd.f32 %v4259_v55, %v4258_v33  ;;  %v4267_v55 = vsel %vm422_vm2, %v9389_v0, 0.0  ;;  %v4241_v46 = vpop.f32.mrf.mxu0 }
 0x3e4   : >> { %v9321_v11 = vpop.f32.mrf.mxu3  ;;  %v9323_v48 = vpop.f32.mrf.mxu2  ;;  %v4262_v35 = vadd.f32 %v4261_v26, %v4260_v39  ;;  %v9415_v26 = vadd.f32 %v9230_v30, %v9275_v1  ;;  %v4277_v1 = vsel %vm422_vm2, %v9421_v16, 0.0 }
 0x3e6   : >> { %v4264_v63 = vadd.f32 %v4263_v7, %v4262_v35  ;;  %v4273_v7 = vsel %vm422_vm2, %v9409_v34, 0.0  ;;  %v4275_v35 = vsel %vm422_vm2, %v9415_v26, 0.0 }
 0x3e8   : >> { %v4266_v37 = vadd.f32 %v4265_v42, %v4264_v63  ;;  %v9427_v42 = vadd.f32 %v9250_v59, %v9291_v8  ;;  %v9433_v63 = vadd.f32 %v9266_v54, %v9299_v21  ;;  %v4283_v21 = vsel %vm422_vm2, %v9439_v58, 0.0 }
 0x3ea   : >> { %v4268_v33 = vadd.f32 %v4267_v55, %v4266_v37  ;;  %v4279_v5 = vsel %vm422_vm2, %v9427_v42, 0.0  ;;  %v4281_v8 = vsel %vm422_vm2, %v9433_v63, 0.0  ;;  %v4244_v44 = vpop.f32.mrf.mxu0 }
 0x3ec   : >> { %v9328_v45 = vpop.f32.mrf.mxu3  ;;  %v9330_v24 = vpop.f32.mrf.mxu2  ;;  %v4270_v28 = vadd.f32 %v4269_v32, %v4268_v33  ;;  %v9445_v33 = vadd.f32 %v9284_v47, %v9305_v62  ;;  %v9463_v62 = vadd.f32 %v9307_v22, %v9315_v17 }
 0x3ee   : >> { %v4272_v29 = vadd.f32 %v4271_v9, %v4270_v28  ;;  %v9451_v9 = vadd.f32 %v9297_v3, %v9309_v6  ;;  %v4285_v28 = vsel %vm422_vm2, %v9445_v33, 0.0  ;;  %v4138_v3 = vadd.f32 %v9323_v48, %v9321_v11 }
 0x3ef   : >> { %v4293_v48 = vsel %vm422_vm2, %v9319_v13, 0.0 }
 0x3f0   : >> { %v4274_v30 = vadd.f32 %v4273_v7, %v4272_v29  ;;  %v9457_v7 = vadd.f32 %v9301_v50, %v9311_v60  ;;  %v4287_v47 = vsel %vm422_vm2, %v9451_v9, 0.0  ;;  %v4141_v50 = vadd.f32 %v9330_v24, %v9328_v45 }
 0x3f1   : >> { %v9474_v22 = vadd.f32 %v9313_v57, %v4138_v3 }
 0x3f2   : >> { %v4276_v55 = vadd.f32 %v4275_v35, %v4274_v30 }
 0x3f4   : >> { %v9336_v61 = vpop.f32.mrf.mxu3  ;;  %v9338_v12 = vpop.f32.mrf.mxu2  ;;  %v4278_v37 = vadd.f32 %v4277_v1, %v4276_v55  ;;  %v4289_v1 = vsel %vm422_vm2, %v9457_v7, 0.0  ;;  %v4291_v55 = vsel %vm422_vm2, %v9463_v62, 0.0 }
 0x3f5   : >> { %v4143_v17 = vadd.f32 %v9338_v12, %v9336_v61 }
 0x3f6   : >> { %v4280_v54 = vadd.f32 %v4279_v5, %v4278_v37  ;;  %v9481_v5 = vadd.f32 %v9317_v4, %v4141_v50  ;;  %v4246_v37 = vpop.f32.mrf.mxu0 }
 0x3f7   : >> { %v9488_v57 = vadd.f32 %v9325_v18, %v4143_v17 }
 0x3f8   : >> { %v4282_v56 = vadd.f32 %v4281_v8, %v4280_v54  ;;  %v4295_v8 = vsel %vm422_vm2, %v9474_v22, 0.0  ;;  %v4297_v4 = vsel %vm422_vm2, %v9481_v5, 0.0 }
 0x3fa   : >> { %v4284_v29 = vadd.f32 %v4283_v21, %v4282_v56 }
 0x3fc   : >> { %v9359_v38 = vpop.f32.mrf.mxu3  ;;  %v9361_v41 = vpop.f32.mrf.mxu2  ;;  %v4286_v6 = vadd.f32 %v4285_v28, %v4284_v29  ;;  %v4299_v28 = vsel %vm422_vm2, %v9488_v57, 0.0 }
 0x3fd   : >> { %v4146_v45 = vadd.f32 %v9361_v41, %v9359_v38 }
 0x3fe   : >> { %v4288_v60 = vadd.f32 %v4287_v47, %v4286_v6  ;;  %v4365_v47 = vld [vmem:[%s4364_s26] sm:$0xff] }
 0x3ff   : >> { %v9494_v56 = vadd.f32 %v9332_v23, %v4146_v45  ;;  %4387 = vmatpush.msrb.mxu3 %v4365_v47 }
 0x400   : >> { %v4290_v11 = vadd.f32 %v4289_v1, %v4288_v60  ;;  %v7370_v60 = vmov 256.0  }
 0x401   : >> { %7229 = vrcp.f32 %v7370_v60 }
 0x402   : >> { %v4292_v24 = vadd.f32 %v4291_v55, %v4290_v11 }
 0x404   : >> { %v4058_v20 = vpop.f32.mrf.mxu3  ;;  %v4147_v31 = vpop.f32.mrf.mxu2  ;;  %v4294_v61 = vadd.f32 %v4293_v48, %v4292_v24 }
 0x405   : >> { %v4148_v54 = vadd.f32 %v4147_v31, %v4058_v20  ;;  %v4301_v31 = vsel %vm422_vm2, %v9494_v56, 0.0 }
 0x406   : >> { %v4296_v41 = vadd.f32 %v4295_v8, %v4294_v61 }
 0x407   : >> { %v9499_v29 = vadd.f32 %v9357_v25, %v4148_v54  ;;  %v7230_v24 = vpop.eup %7229 }
 0x408   : >> { %v4298_v20 = vadd.f32 %v4297_v4, %v4296_v41  ;;  %vm4328_vm15 = vweird.f32 %v7230_v24 }
 0x409   : >> { %v4303_v3 = vsel %vm422_vm2, %v9499_v29, 0.0 }
 0x40c   : >> { %v4061_v39 = vpop.f32.mrf.mxu3  ;;  %v4150_v15 = vpop.f32.mrf.mxu2 }
 0x40d   : >> { %v4151_v38 = vadd.f32 %v4150_v15, %v4061_v39  ;;  %v4300_v15 = vadd.f32 %v4299_v28, %v4298_v20 }
 0x40f   : >> { %v9507_v23 = vadd.f32 %v9398_v51, %v4151_v38  ;;  %v4302_v6 = vadd.f32 %v4301_v31, %v4300_v15 }
 0x411   : >> { %v4305_v51 = vsel %vm422_vm2, %v9507_v23, 0.0 }
 0x414   : >> { %v4063_v32 = vpop.f32.mrf.mxu3  ;;  %v4152_v59 = vpop.f32.mrf.mxu2 }
 0x415   : >> { %v4153_v18 = vadd.f32 %v4152_v59, %v4063_v32  ;;  %v4249_v59 = vpop.f32.mrf.mxu0 }
 0x417   : >> { %v9511_v25 = vadd.f32 %v4241_v46, %v4153_v18 }
 0x419   : >> { %v4307_v17 = vsel %vm422_vm2, %v9511_v25, 0.0 }
 0x41c   : >> { %v4066_v35 = vpop.f32.mrf.mxu3  ;;  %v4155_v30 = vpop.f32.mrf.mxu2 }
 0x41d   : >> { %v4156_v39 = vadd.f32 %v4155_v30, %v4066_v35  ;;  %v4304_v30 = vadd.f32 %v4303_v3, %v4302_v6  ;;  %v4251_v41 = vpop.f32.mrf.mxu0 }
 0x41f   : >> { %v9515_v55 = vadd.f32 %v4244_v44, %v4156_v39  ;;  %v4306_v11 = vadd.f32 %v4305_v51, %v4304_v30 }
 0x421   : >> { %v4309_v48 = vsel %vm422_vm2, %v9515_v55, 0.0  ;;  %v4308_v8 = vadd.f32 %v4307_v17, %v4306_v11 }
 0x423   : >> { %v4310_v44 = vadd.f32 %v4309_v48, %v4308_v8  ;;  %v4367_v48 = vld [vmem:[%s4366_s17] sm:$0x1]  ;;  %s6453_s17 = sshll.u32 (%p457_p11), %s7610_s30, 4  ;;  %s6454_s17 = int_to_ptr.vmem [resolvable:$true] %s6453_s17 }
 0x424   : >> { %v4068_v12 = vpop.f32.mrf.mxu3  ;;  %v4157_v21 = vpop.f32.mrf.mxu2 }
 0x425   : >> { %v4158_v32 = vadd.f32 %v4157_v21, %v4068_v12 }
 0x427   : >> { %v9519_v46 = vadd.f32 %v4246_v37, %v4158_v32  ;;  %v4324_v37 = vmul.f32 256.0, %v7230_v24 }
 0x429   : >> { %v4311_v54 = vsel %vm422_vm2, %v9519_v46, 0.0  ;;  %v4325_v31 = vsub.f32 1.0, %v4324_v37 }
 0x42a   : >> { %v4312_v38 = vadd.f32 %v4311_v54, %v4310_v44 }
 0x42b   : >> { %v4326_v47 = vmul.f32 %v7230_v24, %v4325_v31 }
 0x42c   : >> { %v4071_v1 = vpop.f32.mrf.mxu3  ;;  %v4160_v50 = vpop.f32.mrf.mxu2 }
 0x42d   : >> { %v4161_v35 = vadd.f32 %v4160_v50, %v4071_v1 }
 0x42f   : >> { %v9523_v45 = vadd.f32 %v4249_v59, %v4161_v35  ;;  %v4327_v59 = vadd.f32 %v7230_v24, %v4326_v47  ;;  %v4338_v35 = vld [vmem:[%s4337_s28] sm:$0x1] }
 0x431   : >> { %v4313_v21 = vsel %vm422_vm2, %v9523_v45, 0.0  ;;  %v4329_v50 = vsel %vm4328_vm15, %v7230_v24, %v4327_v59 }
 0x432   : >> { %v4314_v18 = vadd.f32 %v4313_v21, %v4312_v38 }
 0x434   : >> { %v4073_v61 = vpop.f32.mrf.mxu3  ;;  %v4162_v12 = vpop.f32.mrf.mxu2 }
 0x435   : >> { %v4163_v4 = vadd.f32 %v4162_v12, %v4073_v61 }
 0x437   : >> { %v9529_v28 = vadd.f32 %v4251_v41, %v4163_v4 }
 0x439   : >> { %v4315_v20 = vsel %vm422_vm2, %v9529_v28, 0.0 }
 0x43a   : >> { %v4316_v39 = vadd.f32 %v4315_v20, %v4314_v18 }
 0x43c   : >> { %v4317_v15 = vrot.slane %v4316_v39, 4 }
 0x43e   : >> { %v4318_v3 = vadd.f32 %v4317_v15, %v4316_v39 }
 0x440   : >> { %v4319_v32 = vrot.slane %v4318_v3, 2 }
 0x442   : >> { %v4320_v6 = vadd.f32 %v4319_v32, %v4318_v3 }
 0x444   : >> { %v4321_v1 = vrot.slane %v4320_v6, 1 }
 0x446   : >> { %v4322_v60 = vadd.f32 %v4321_v1, %v4320_v6 }
 0x448   : >> { %v4330_v51 = vmul.f32 %v4329_v50, %v4322_v60  ;;  %v7253_v60 = vld [vmem:[#allocation3] sm:$0xff] }
 0x44a   : >> { %6863 = vmatmul.msk.f32.vlgmr.msra.gmra.mxu3 %vm422_vm2, %v4330_v51  ;;  %v7254_v51 = vld [vmem:[#allocation3 + $0x8] sm:$0xff] }
 0x4cd   : >> { %v4359_v30 = vpop.f32.mrf.mxu3 }
 0x4ce   : >> { %v4360_v17 = vadd.f32 %v4359_v30, %v4338_v35 }
 0x4d0   : >> { %v4362_v11 = vmax.f32 %v4360_v17, 0.0  ;;  %v7256_v17 = vld [vmem:[#allocation3 + $0x18] sm:$0xff] }
 0x4d2   : >> { %6865 = vmatmul.msk.f32.vlgmr.msrb.gmra.mxu3 %vm4368_vm3, %v4362_v11  ;;  %v7257_v11 = vld [vmem:[#allocation3 + $0x20] sm:$0xff] }
 0x555   : >> { %v4389_v24 = vpop.f32.mrf.mxu3 }
 0x556   : >> { %v4390_v8 = vadd.f32 %v4389_v24, %v4367_v48 }
 0x558   : >> { %v6866_v54 = vmul.f32 -1.442695, %v4390_v8 }
 0x55a   : >> { %7231 = vpow2.f32 %v6866_v54 }
 0x560   : >> { %v7232_v44 = vpop.eup %7231 }
 0x561   : >> { %v4395_v61 = vadd.f32 1.0, %v7232_v44  ;;  %v7260_v44 = vld [vmem:[#allocation3 + $0x38] sm:$0xff] }
 0x563   : >> { %7233 = vrcp.f32 %v4395_v61  ;;  %v4407_v37 = vand.u32 2147483648, %v4395_v61  ;;  %v4405_v41 = vand.u32 2147483647, %v4395_v61  ;;  %vm4401_vm5 = vweird.f32 %v4395_v61 }
 0x565   : >> { %v4408_v20 = vor.u32 1.1754944e-38, %v4407_v37  ;;  %vm4406_vm14 = vcmp.eq.f32.partialorder %v4405_v41, 8.507059e+37 }
 0x569   : >> { %v7234_v12 = vpop.eup %7233 }
 0x56a   : >> { %v4397_v21 = vmul.f32 %v7234_v12, %v4395_v61  ;;  %vm4402_vm4 = vweird.f32 %v7234_v12 }
 0x56b   : >> { %vm4403_vm13 = vmor %vm4401_vm5, %vm4402_vm4 }
 0x56c   : >> { %v4398_v4 = vsub.f32 1.0, %v4397_v21 }
 0x56e   : >> { %v4399_v38 = vmul.f32 %v7234_v12, %v4398_v4  ;;  %v7262_v4 = vld [vmem:[#allocation3 + $0x48] sm:$0xff] }
 0x570   : >> { %v4400_v18 = vadd.f32 %v7234_v12, %v4399_v38  ;;  %v7263_v38 = vld [vmem:[#allocation3 + $0x50] sm:$0xff] }
 0x572   : >> { %v4404_v31 = vsel %vm4403_vm13, %v7234_v12, %v4400_v18  ;;  %v7261_v12 = vld [vmem:[#allocation3 + $0x40] sm:$0xff]  ;;  %v7264_v18 = vld [vmem:[#allocation3 + $0x58] sm:$0xff] }
 0x573   : >> { %v4409_v39 = vsel %vm4406_vm14, %v4408_v20, %v4404_v31  ;;  %v7265_v31 = vld [vmem:[#allocation3 + $0x60] sm:$0xff] }
 0x574   : >> { %v9542_v15 = vperm.slane %v4409_v39, 0 }
 0x576   : >> { %v4412_v47 = vmul.f32 %v9542_v15, %v9345_v14  ;;  %v4413_v3 = vmul.f32 %v9542_v15, %v9341_v27  ;;  %v4414_v32 = vmul.f32 %v9542_v15, %v9349_v19  ;;  %v4415_v59 = vmul.f32 %v9542_v15, %v9355_v10  ;;  %v7255_v27 = vld [vmem:[#allocation3 + $0x10] sm:$0xff] }
 0x577   : >> { %v4416_v6 = vmul.f32 %v9542_v15, %v9369_v53  ;;  %v4417_v1 = vmul.f32 %v9542_v15, %v9375_v36  ;;  %v4418_v50 = vmul.f32 %v9542_v15, %v9381_v52  ;;  %v4419_v19 = vmul.f32 %v9542_v15, %v9389_v0  ;;  %v7258_v36 = vld [vmem:[#allocation3 + $0x28] sm:$0xff]  ;;  %v7259_v0 = vld [vmem:[#allocation3 + $0x30] sm:$0xff] }
 0x578   : >> { %v4444_v14 = vadd.f32 %v7253_v60, %v4412_v47  ;;  %v4445_v35 = vadd.f32 %v7254_v51, %v4413_v3  ;;  %v4446_v30 = vadd.f32 %v7255_v27, %v4414_v32  ;;  %v4447_v10 = vadd.f32 %v7256_v17, %v4415_v59  ;;  %v7266_v47 = vld [vmem:[#allocation3 + $0x68] sm:$0xff]  ;;  %v7267_v32 = vld [vmem:[#allocation3 + $0x70] sm:$0xff]  ;;  %v7273_v17 = vld [vmem:[#allocation3 + $0xa0] sm:$0xff] }
 0x579   : >> { %v4420_v53 = vmul.f32 %v9542_v15, %v9396_v40  ;;  %v4448_v48 = vadd.f32 %v7257_v11, %v4416_v6  ;;  %v4421_v52 = vmul.f32 %v9542_v15, %v9403_v2  ;;  %v4449_v24 = vadd.f32 %v7258_v36, %v4417_v1  ;;  %v7268_v6 = vld [vmem:[#allocation3 + $0x78] sm:$0xff] }
 0x57a   : >> { %4476 = vst.msk [vmem:[#allocation3] sm:$0xff] %vm422_vm2, %v4444_v14  ;;  %v4422_v8 = vmul.f32 %v9542_v15, %v9409_v34  ;;  %v4450_v54 = vadd.f32 %v7259_v0, %v4418_v50  ;;  %v4423_v40 = vmul.f32 %v9542_v15, %v9415_v26  ;;  %v4451_v61 = vadd.f32 %v7260_v44, %v4419_v19  ;;  %v7269_v50 = vld [vmem:[#allocation3 + $0x80] sm:$0xff]  ;;  %v7270_v14 = vld [vmem:[#allocation3 + $0x88] sm:$0xff]  ;;  %v7276_v36 = vld [vmem:[#allocation3 + $0xb8] sm:$0xff] }
 0x57b   : >> { %4477 = vst.msk [vmem:[#allocation3 + $0x8] sm:$0xff] %vm422_vm2, %v4445_v35  ;;  %v4424_v2 = vmul.f32 %v9542_v15, %v9421_v16  ;;  %v4452_v21 = vadd.f32 %v7261_v12, %v4420_v53  ;;  %v4425_v34 = vmul.f32 %v9542_v15, %v9427_v42  ;;  %v4453_v37 = vadd.f32 %v7262_v4, %v4421_v52  ;;  %v7271_v35 = vld [vmem:[#allocation3 + $0x90] sm:$0xff]  ;;  %v7274_v53 = vld [vmem:[#allocation3 + $0xa8] sm:$0xff] }
 0x57c   : >> { %4478 = vst.msk [vmem:[#allocation3 + $0x10] sm:$0xff] %vm422_vm2, %v4446_v30  ;;  %v4426_v26 = vmul.f32 %v9542_v15, %v9433_v63  ;;  %v4454_v41 = vadd.f32 %v7263_v38, %v4422_v8  ;;  %v4427_v16 = vmul.f32 %v9542_v15, %v9439_v58  ;;  %v4455_v20 = vadd.f32 %v7264_v18, %v4423_v40  ;;  %v7272_v30 = vld [vmem:[#allocation3 + $0x98] sm:$0xff]  ;;  %v7277_v8 = vld [vmem:[#allocation3 + $0xc0] sm:$0xff]  ;;  %v7279_v44 = vld [vmem:[#allocation3 + $0xd0] sm:$0xff] }
 0x57d   : >> { %4479 = vst.msk [vmem:[#allocation3 + $0x18] sm:$0xff] %vm422_vm2, %v4447_v10  ;;  %v4428_v42 = vmul.f32 %v9542_v15, %v9445_v33  ;;  %v4456_v39 = vadd.f32 %v7265_v31, %v4424_v2  ;;  %v4429_v63 = vmul.f32 %v9542_v15, %v9451_v9  ;;  %v4457_v3 = vadd.f32 %v7266_v47, %v4425_v34  ;;  %v7280_v2 = vld [vmem:[#allocation3 + $0xd8] sm:$0xff]  ;;  %v7282_v34 = vld [vmem:[#allocation3 + $0xe8] sm:$0xff] }
 0x57e   : >> { %4480 = vst.msk [vmem:[#allocation3 + $0x20] sm:$0xff] %vm422_vm2, %v4448_v48  ;;  %v4430_v58 = vmul.f32 %v9542_v15, %v9457_v7  ;;  %v4458_v59 = vadd.f32 %v7267_v32, %v4426_v26  ;;  %v4431_v33 = vmul.f32 %v9542_v15, %v9463_v62  ;;  %v4459_v1 = vadd.f32 %v7268_v6, %v4427_v16  ;;  %v7275_v48 = vld [vmem:[#allocation3 + $0xb0] sm:$0xff]  ;;  %v7284_v26 = vld [vmem:[#allocation3 + $0xf8] sm:$0xff] }
 0x57f   : >> { %4481 = vst.msk [vmem:[#allocation3 + $0x28] sm:$0xff] %vm422_vm2, %v4449_v24  ;;  %v4432_v9 = vmul.f32 %v9542_v15, %v9319_v13  ;;  %v4460_v60 = vadd.f32 %v7269_v50, %v4428_v42  ;;  %v4433_v7 = vmul.f32 %v9542_v15, %v9474_v22  ;;  %v4461_v51 = vadd.f32 %v7270_v14, %v4429_v63 }
 0x580   : >> { %4482 = vst.msk [vmem:[#allocation3 + $0x30] sm:$0xff] %vm422_vm2, %v4450_v54  ;;  %v4434_v62 = vmul.f32 %v9542_v15, %v9481_v5  ;;  %v4462_v27 = vadd.f32 %v7271_v35, %v4430_v58  ;;  %v4435_v13 = vmul.f32 %v9542_v15, %v9488_v57  ;;  %v4463_v19 = vadd.f32 %v7272_v30, %v4431_v33  ;;  %v7278_v54 = vld [vmem:[#allocation3 + $0xc8] sm:$0xff] }
 0x581   : >> { %4483 = vst.msk [vmem:[#allocation3 + $0x38] sm:$0xff] %vm422_vm2, %v4451_v61  ;;  %v4436_v22 = vmul.f32 %v9542_v15, %v9494_v56  ;;  %v4464_v10 = vadd.f32 %v7273_v17, %v4432_v9  ;;  %v4437_v5 = vmul.f32 %v9542_v15, %v9499_v29  ;;  %v4465_v11 = vadd.f32 %v7274_v53, %v4433_v7 }
 0x582   : >> { %4484 = vst.msk [vmem:[#allocation3 + $0x40] sm:$0xff] %vm422_vm2, %v4452_v21  ;;  %v4438_v57 = vmul.f32 %v9542_v15, %v9507_v23  ;;  %v4466_v52 = vadd.f32 %v7275_v48, %v4434_v62  ;;  %v4439_v56 = vmul.f32 %v9542_v15, %v9511_v25  ;;  %v4467_v24 = vadd.f32 %v7276_v36, %v4435_v13  ;;  %v7281_v21 = vld [vmem:[#allocation3 + $0xe0] sm:$0xff]  ;;  %v4509_v18 = vld [vmem:[#allocation3 + $0x8] sm:$0xff] (%p457_p11) }
 0x583   : >> { %4485 = vst.msk [vmem:[#allocation3 + $0x48] sm:$0xff] %vm422_vm2, %v4453_v37  ;;  %v4440_v29 = vmul.f32 %v9542_v15, %v9515_v55  ;;  %v4468_v0 = vadd.f32 %v7277_v8, %v4436_v22  ;;  %v4441_v23 = vmul.f32 %v9542_v15, %v9519_v46  ;;  %v4469_v40 = vadd.f32 %v7278_v54, %v4437_v5  ;;  %v4510_v42 = vld [vmem:[#allocation3 + $0x10] sm:$0xff] (%p457_p11) }
 0x584   : >> { %4486 = vst.msk [vmem:[#allocation3 + $0x50] sm:$0xff] %vm422_vm2, %v4454_v41  ;;  %v4442_v25 = vmul.f32 %v9542_v15, %v9523_v45  ;;  %v4470_v61 = vadd.f32 %v7279_v44, %v4438_v57  ;;  %v4443_v55 = vmul.f32 %v9542_v15, %v9529_v28  ;;  %v4471_v12 = vadd.f32 %v7280_v2, %v4439_v56  ;;  %v7283_v45 = vld [vmem:[#allocation3 + $0xf0] sm:$0xff]  ;;  %v7125_v28 = vld [vmem:[#allocation2] sm:$0xff] (%p457_p11)  ;;  %v4508_v41 = vld [vmem:[#allocation3] sm:$0xff] (%p457_p11) }
 0x585   : >> { %4487 = vst.msk [vmem:[#allocation3 + $0x58] sm:$0xff] %vm422_vm2, %v4455_v20  ;;  %v4472_v46 = vadd.f32 %v7281_v21, %v4440_v29  ;;  %v4473_v4 = vadd.f32 %v7282_v34, %v4441_v23  ;;  %v5051_v15 = vld [vmem:[#allocation2 + $0x8] sm:$0x1] (%p457_p11)  ;;  %v4576_v20 = vpack.c.bf16 (%p457_p11), %v4508_v41, %v4508_v41  ;;  %v5457_v31 = vrot.slane (%p457_p11), %v7125_v28, 1  ;;  %v4944_v56 = vld [vmem:[#allocation2 + $0x18] sm:$0xf] (%p457_p11) }
 0x586   : >> { %4488 = vst.msk [vmem:[#allocation3 + $0x60] sm:$0xff] %vm422_vm2, %v4456_v39  ;;  %v4474_v37 = vadd.f32 %v7283_v45, %v4442_v25  ;;  %v4475_v38 = vadd.f32 %v7284_v26, %v4443_v55  ;;  %v5199_v16 = vunpack.c.l.b16 (%p457_p11), %v5051_v15  ;;  %v5233_v39 = vshrl.u32 (%p457_p11), %v7125_v28, 16  ;;  %v4513_v22 = vld [vmem:[#allocation3 + $0x28] sm:$0xff] (%p457_p11)  ;;  %v4941_v23 = vld [vmem:[#allocation2 + $0x14] sm:$0x1] (%p457_p11) }
 0x587   : >> { %4489 = vst.msk [vmem:[#allocation3 + $0x68] sm:$0xff] %vm422_vm2, %v4457_v3  ;;  %v5235_v63 = vshll.u32 (%p457_p11), %v7125_v28, 16  ;;  %v4577_v47 = vpack.c.bf16 (%p457_p11), %v4509_v18, %v4509_v18  ;;  %v4511_v3 = vld [vmem:[#allocation3 + $0x18] sm:$0xff] (%p457_p11)  ;;  %v4612_v32 = vshrl.u32 (%p457_p11), %v4576_v20, 16  ;;  %v4578_v33 = vpack.c.bf16 (%p457_p11), %v4510_v42, %v4510_v42  ;;  %v4948_v29 = vld [vmem:[#allocation2 + $0x20] sm:$0x1] (%p457_p11) }
 0x588   : >> { %4490 = vst.msk [vmem:[#allocation3 + $0x70] sm:$0xff] %vm422_vm2, %v4458_v59  ;;  %v5215_v58 = vpack.c.b16 (%p457_p11), %v5199_v16, %v5199_v16  ;;  %v4615_v59 = vshll.u32 (%p457_p11), %v4576_v20, 16  ;;  %v4579_v50 = vpack.c.bf16 (%p457_p11), %v4511_v3, %v4511_v3  ;;  %v4951_v20 = vld [vmem:[#allocation2 + $0x24] sm:$0xf] (%p457_p11) }
 0x589   : >> { %4491 = vst.msk [vmem:[#allocation3 + $0x78] sm:$0xff] %vm422_vm2, %v4459_v1  ;;  %v5237_v6 = vrot.slane (%p457_p11), %v5235_v63, 1  ;;  %v4620_v1 = vshrl.u32 (%p457_p11), %v4577_v47, 16  ;;  %v4623_v9 = vshll.u32 (%p457_p11), %v4577_v47, 16  ;;  %v4614_v14 = vrot.slane (%p457_p11), %v4612_v32, 7 }
 0x58a   : >> { %4492 = vst.msk [vmem:[#allocation3 + $0x80] sm:$0xff] %vm422_vm2, %v4460_v60  ;;  %v5458_v60 = vrot.slane (%p457_p11), %v5215_v58, 1  ;;  %v5240_v7 = vshll.u32 (%p457_p11), %v5215_v58, 16  ;;  %v4629_v62 = vshrl.u32 (%p457_p11), %v4578_v33, 16  ;;  %v4632_v13 = vshll.u32 (%p457_p11), %v4578_v33, 16 }
 0x58b   : >> { %4493 = vst.msk [vmem:[#allocation3 + $0x88] sm:$0xff] %vm422_vm2, %v4461_v51  ;;  %v4935_v51 = vld [vmem:[#allocation2 + $0xc] sm:$0xf] (%p457_p11)  ;;  %v5238_v35 = vor.u32 (%p457_p11), %v5237_v6, %v5233_v39  ;;  %v4637_v30 = vshrl.u32 (%p457_p11), %v4579_v50, 16  ;;  %v4617_v5 = vor.u32 (%p457_p11), %v4615_v59, %v4614_v14  ;;  %v4618_v53 = vrot.slane (%p457_p11), %v4614_v14, 4 }
 0x58c   : >> { %4494 = vst.msk [vmem:[#allocation3 + $0x90] sm:$0xff] %vm422_vm2, %v4462_v27  ;;  %v4622_v27 = vrot.slane (%p457_p11), %v4620_v1, 7  ;;  %v5459_v17 = vsel (%p457_p11), %vm1412_vm10, %v5457_v31, %v5458_v60  ;;  %v4631_v57 = vrot.slane (%p457_p11), %v4629_v62, 7  ;;  %v4955_v59 = vld [vmem:[#allocation2 + $0x2c] sm:$0x1] (%p457_p11) }
 0x58d   : >> { %4495 = vst.msk [vmem:[#allocation3 + $0x98] sm:$0xff] %vm422_vm2, %v4463_v19  ;;  %v4512_v19 = vld [vmem:[#allocation3 + $0x20] sm:$0xff] (%p457_p11)  ;;  %5505 = vrot.lane.b32.xlu0 (%p457_p11), %v5459_v17, %s7371_s23  ;;  %v4639_v48 = vrot.slane (%p457_p11), %v4637_v30, 7  ;;  %v5014_v14 = vld [vmem:[#allocation2 + $0x90] sm:$0xf] (%p457_p11) }
 0x58e   : >> { %4496 = vst.msk [vmem:[#allocation3 + $0xa0] sm:$0xff] %vm422_vm2, %v4464_v10  ;;  %v5242_v10 = vrot.slane (%p457_p11), %v5240_v7, 1  ;;  %v4580_v8 = vpack.c.bf16 (%p457_p11), %v4512_v19, %v4512_v19  ;;  %v4634_v25 = vor.u32 (%p457_p11), %v4632_v13, %v4631_v57  ;;  %v4635_v44 = vrot.slane (%p457_p11), %v4631_v57, 4 }
 0x58f   : >> { %4497 = vst.msk [vmem:[#allocation3 + $0xa8] sm:$0xff] %vm422_vm2, %v4465_v11  ;;  %v4625_v11 = vor.u32 (%p457_p11), %v4623_v9, %v4622_v27  ;;  %v4644_v21 = vrot.slane (%p457_p11), %v4639_v48, 4 }
 0x590   : >> { %4498 = vst.msk [vmem:[#allocation3 + $0xb0] sm:$0xff] %vm422_vm2, %v4466_v52  ;;  %v4640_v52 = vshll.u32 (%p457_p11), %v4579_v50, 16  ;;  %v5243_v36 = vsel (%p457_p11), %vm1187_vm9, %v5238_v35, %v5242_v10  ;;  %v4649_v34 = vshll.u32 (%p457_p11), %v4580_v8, 16 }
 0x591   : >> { %4499 = vst.msk [vmem:[#allocation3 + $0xb8] sm:$0xff] %vm422_vm2, %v4467_v24  ;;  %v4936_v24 = vsel (%p457_p11), %vm7623_vm7, %v4617_v5, %v4935_v51  ;;  %v4949_v15 = vsel (%p457_p11), %vm7629_vm8, %v4644_v21, %v4948_v29  ;;  %v5018_v5 = vld [vmem:[#allocation2 + $0x98] sm:$0x1] (%p457_p11)  ;;  %v4515_v21 = vld [vmem:[#allocation3 + $0x38] sm:$0xff] (%p457_p11) }
 0x592   : >> { %4500 = vst.msk [vmem:[#allocation3 + $0xc0] sm:$0xff] %vm422_vm2, %v4468_v0  ;;  %v4581_v0 = vpack.c.bf16 (%p457_p11), %v4513_v22, %v4513_v22 }
 0x593   : >> { %4501 = vst.msk [vmem:[#allocation3 + $0xc8] sm:$0xff] %vm422_vm2, %v4469_v40  ;;  %v4626_v40 = vsel (%p457_p11), %vm7618_vm6, %v4618_v53, %v4625_v11  ;;  %v4514_v11 = vld [vmem:[#allocation3 + $0x30] sm:$0xff] (%p457_p11) }
 0x594   : >> { %4502 = vst.msk [vmem:[#allocation3 + $0xd0] sm:$0xff] %vm422_vm2, %v4470_v61  ;;  %v4642_v61 = vor.u32 (%p457_p11), %v4640_v52, %v4639_v48  ;;  %v4657_v26 = vshll.u32 (%p457_p11), %v4581_v0, 16 }
 0x595   : >> { %4503 = vst.msk [vmem:[#allocation3 + $0xd8] sm:$0xff] %vm422_vm2, %v4471_v12  ;;  %459 = sbr.rel (!%p457_p11) target bundleno = 108 (0x6c), region = 106  ;;  %5424 = vrot.lane.b32.xlu0 (%p457_p11), %v5243_v36, %s7372_s10 }
 0x596   : >> { %4504 = vst.msk [vmem:[#allocation3 + $0xe0] sm:$0xff] %vm422_vm2, %v4472_v46  ;;  %v4646_v46 = vshrl.u32 (%p457_p11), %v4580_v8, 16  ;;  %v4643_v45 = vsel (%p457_p11), %vm7618_vm6, %v4635_v44, %v4642_v61 }
 0x597   : >> { %4505 = vst.msk [vmem:[#allocation3 + $0xe8] sm:$0xff] %vm422_vm2, %v4473_v4  ;;  %v4530_v54 = vld [vmem:[#allocation3 + $0xb0] sm:$0xff] (%p457_p11)  ;;  %v4654_v4 = vshrl.u32 (%p457_p11), %v4581_v0, 16 }
 0x598   : >> { %4506 = vst.msk [vmem:[#allocation3 + $0xf0] sm:$0xff] %vm422_vm2, %v4474_v37  ;;  %v4531_v55 = vld [vmem:[#allocation3 + $0xb8] sm:$0xff] (%p457_p11)  ;;  %v4945_v37 = vsel (%p457_p11), %vm7623_vm7, %v4634_v25, %v4944_v56  ;;  %v4648_v41 = vrot.slane (%p457_p11), %v4646_v46, 7  ;;  %v4598_v18 = vpack.c.bf16 (%p457_p11), %v4530_v54, %v4530_v54  ;;  %v4582_v54 = vpack.c.bf16 (%p457_p11), %v4514_v11, %v4514_v11 }
 0x599   : >> { %4507 = vst.msk [vmem:[#allocation3 + $0xf8] sm:$0xff] %vm422_vm2, %v4475_v38  ;;  %v4532_v2 = vld [vmem:[#allocation3 + $0xc0] sm:$0xff] (%p457_p11)  ;;  %v4627_v38 = vrot.slane (%p457_p11), %v4622_v27, 4  ;;  %v4656_v16 = vrot.slane (%p457_p11), %v4654_v4, 7  ;;  %v4599_v31 = vpack.c.bf16 (%p457_p11), %v4531_v55, %v4531_v55 }
 0x59a   : > { %4937 = vst [vmem:[#allocation2 + $0xc] sm:$0xf] %v4936_v24  ;;  %v4533_v12 = vld [vmem:[#allocation3 + $0xc8] sm:$0xff]  ;;  %v4600_v39 = vpack.c.bf16 %v4532_v2, %v4532_v2  ;;  %v4651_v47 = vor.u32 %v4649_v34, %v4648_v41  ;;  %v4652_v3 = vrot.slane %v4648_v41, 4  ;;  %v4799_v32 = vshrl.u32 %v4598_v18, 16 }
 0x59b   : > { %4938 = vst.msk [vmem:[#allocation2 + $0x10] sm:$0xf] %vm334_vm0, %v4626_v40  ;;  %v4942_v42 = vsel %vm7629_vm8, %v4627_v38, %v4941_v23  ;;  %v4601_v63 = vpack.c.bf16 %v4533_v12, %v4533_v12  ;;  %v4659_v58 = vor.u32 %v4657_v26, %v4656_v16  ;;  %v4802_v33 = vshll.u32 %v4598_v18, 16  ;;  %v5021_v24 = vld [vmem:[#allocation2 + $0x9c] sm:$0xf] }
 0x59c   : > { %4946 = vst [vmem:[#allocation2 + $0x18] sm:$0xf] %v4945_v37  ;;  %v4807_v6 = vshrl.u32 %v4599_v31, 16  ;;  %v4810_v1 = vshll.u32 %v4599_v31, 16  ;;  %v4661_v9 = vrot.slane %v4656_v16, 4  ;;  %v4952_v60 = vsel %vm7623_vm7, %v4651_v47, %v4951_v20 }
 0x59d   : > { %4947 = vst.msk [vmem:[#allocation2 + $0x1c] sm:$0xf] %vm334_vm0, %v4643_v45  ;;  %v4660_v50 = vsel %vm7618_vm6, %v4652_v3, %v4659_v58  ;;  %v4801_v7 = vrot.slane %v4799_v32, 7  ;;  %v4816_v51 = vshrl.u32 %v4600_v39, 16  ;;  %v4819_v13 = vshll.u32 %v4600_v39, 16 }
 0x59e   : > { %4950 = vst [vmem:[#allocation2 + $0x20] sm:$0x1] %v4949_v15  ;;  %v4809_v35 = vrot.slane %v4807_v6, 7  ;;  %v4956_v27 = vsel %vm7629_vm8, %v4661_v9, %v4955_v59  ;;  %v4824_v30 = vshrl.u32 %v4601_v63, 16  ;;  %v4827_v53 = vshll.u32 %v4601_v63, 16 }
 0x59f   : > { %4943 = vst [vmem:[#allocation2 + $0x14] sm:$0x1] %v4942_v42  ;;  %v4804_v19 = vor.u32 %v4802_v33, %v4801_v7  ;;  %v4805_v22 = vrot.slane %v4801_v7, 4  ;;  %v4818_v17 = vrot.slane %v4816_v51, 7  ;;  %v4663_v41 = vshrl.u32 %v4582_v54, 16 }
 0x5a0   : > { %4953 = vst [vmem:[#allocation2 + $0x24] sm:$0xf] %v4952_v60  ;;  %v4812_v10 = vor.u32 %v4810_v1, %v4809_v35  ;;  %v4814_v52 = vrot.slane %v4809_v35, 4  ;;  %v9677_v23 = vrot.slane %v4824_v30, 7  ;;  %v4583_v42 = vpack.c.bf16 %v4515_v21, %v4515_v21  ;;  %v7124_v1 = vld [vmem:[%s10648_s7 + $0x88] sm:$0xff] }
 0x5a1   : > { %4954 = vst.msk [vmem:[#allocation2 + $0x28] sm:$0xf] %vm334_vm0, %v4660_v50  ;;  %v5015_v56 = vsel %vm7623_vm7, %v4804_v19, %v5014_v14  ;;  %v4821_v36 = vor.u32 %v4819_v13, %v4818_v17  ;;  %v4822_v0 = vrot.slane %v4818_v17, 4  ;;  %v4666_v47 = vshll.u32 %v4582_v54, 16  ;;  %6325 = vmatpush.bf16.msra.mxu2 %v7124_v1  ;;  %v4958_v13 = vld [vmem:[#allocation2 + $0x30] sm:$0xf] }
 0x5a2   : > { %v9665_v62 = vld [vmem:[#allocation2 + $0xc] sm:$0xff]  ;;  %4957 = vst [vmem:[#allocation2 + $0x2c] sm:$0x1] %v4956_v27  ;;  %v4813_v8 = vsel %vm7618_vm6, %v4805_v22, %v4812_v10  ;;  %v5019_v2 = vsel %vm7629_vm8, %v4814_v52, %v5018_v5  ;;  %v4829_v12 = vor.u32 %v4827_v53, %v9677_v23  ;;  %v4665_v9 = vrot.slane %v4663_v41, 7 }
 0x5a3   : > { %5542 = vrot.lane.b32.xlu1 %v9665_v62, %s7373_s24  ;;  %v5247_v48 = vshll.u32 %v9665_v62, 16  ;;  %5016 = vst [vmem:[#allocation2 + $0x90] sm:$0xf] %v5015_v56  ;;  %v5245_v55 = vshrl.u32 %v9665_v62, 16  ;;  %v5022_v45 = vsel %vm7623_vm7, %v4821_v36, %v5021_v24  ;;  %v5460_v58 = vrot.slane %v9665_v62, 1  ;;  %v4534_v24 = vld [vmem:[#allocation3 + $0xd0] sm:$0xff] }
 0x5a4   : > { %v7127_v57 = vld [vmem:[#allocation2 + $0x18] sm:$0xff]  ;;  %5017 = vst.msk [vmem:[#allocation2 + $0x94] sm:$0xf] %vm334_vm0, %v4813_v8  ;;  %v4830_v15 = vsel %vm7618_vm6, %v4822_v0, %v4829_v12  ;;  %v4671_v7 = vshrl.u32 %v4583_v42, 16  ;;  %v4668_v27 = vor.u32 %v4666_v47, %v4665_v9  ;;  %v4674_v17 = vshll.u32 %v4583_v42, 16  ;;  %v4535_v54 = vld [vmem:[#allocation3 + $0xd8] sm:$0xff] }
 0x5a5   : > { %v5057_v29 = vld [vmem:[#allocation2 + $0x20] sm:$0x1]  ;;  %5629 = vrot.lane.b32.xlu2 %v7127_v57, %s7371_s23  ;;  %v5259_v44 = vshll.u32 %v7127_v57, 16  ;;  %v5463_v34 = vrot.slane %v7127_v57, 1  ;;  %v5249_v4 = vrot.slane %v5247_v48, 1  ;;  %v5257_v38 = vshrl.u32 %v7127_v57, 16 }
 0x5a6   : > { %v5201_v40 = vunpack.c.l.b16 %v5057_v29  ;;  %v5054_v25 = vld [vmem:[#allocation2 + $0x14] sm:$0x1]  ;;  %5020 = vst [vmem:[#allocation2 + $0x98] sm:$0x1] %v5019_v2  ;;  %v4669_v11 = vrot.slane %v4665_v9, 4  ;;  %v4673_v52 = vrot.slane %v4671_v7, 7  ;;  %v4959_v56 = vsel %vm7623_vm7, %v4668_v27, %v4958_v13 }
 0x5a7   : > { %v5200_v61 = vunpack.c.l.b16 %v5054_v25  ;;  %5023 = vst [vmem:[#allocation2 + $0x9c] sm:$0xf] %v5022_v45  ;;  %v5261_v18 = vrot.slane %v5259_v44, 1  ;;  %v5250_v59 = vor.u32 %v5249_v4, %v5245_v55  ;;  %v5025_v36 = vld [vmem:[#allocation2 + $0xa4] sm:$0x1]  ;;  %v4831_v0 = vrot.slane %v9677_v23, 4 }
 0x5a8   : > { %v5217_v46 = vpack.c.b16 %v5201_v40, %v5201_v40  ;;  %v9687_v37 = vld [vmem:[#allocation2 + $0x24] sm:$0xff]  ;;  %5024 = vst.msk [vmem:[#allocation2 + $0xa0] sm:$0xf] %vm334_vm0, %v4830_v15  ;;  %v4676_v25 = vor.u32 %v4674_v17, %v4673_v52  ;;  %v4602_v2 = vpack.c.bf16 %v4534_v24, %v4534_v24  ;;  %v5032_v7 = vld [vmem:[#allocation2 + $0xb0] sm:$0x1] }
 0x5a9   : > { %v5216_v26 = vpack.c.b16 %v5200_v61, %v5200_v61  ;;  %v5060_v20 = vld [vmem:[#allocation2 + $0x2c] sm:$0x1]  ;;  %v5271_v6 = vshll.u32 %v9687_v37, 16  ;;  %v5262_v50 = vor.u32 %v5261_v18, %v5257_v38  ;;  %v5269_v35 = vshrl.u32 %v9687_v37, 16  ;;  %4960 = vst [vmem:[#allocation2 + $0x30] sm:$0xf] %v4959_v56 }
 0x5aa   : > { %v5464_v16 = vrot.slane %v5217_v46, 1  ;;  %v5264_v39 = vshll.u32 %v5217_v46, 16  ;;  %v5202_v63 = vunpack.c.l.b16 %v5060_v20  ;;  %v5026_v61 = vsel %vm7629_vm8, %v4831_v0, %v5025_v36  ;;  %v7123_v55 = vld [vmem:[%s10648_s7 + $0x80] sm:$0xff]  ;;  %v4965_v24 = vld [vmem:[#allocation2 + $0x3c] sm:$0xf] }
 0x5ab   : > { %5631 = vrot.lane.b32.xlu1 %v9687_v37, %s7371_s23  ;;  %v5252_v31 = vshll.u32 %v5216_v26, 16  ;;  %v5461_v32 = vrot.slane %v5216_v26, 1  ;;  %v9705_v60 = vld [vmem:[#allocation2 + $0x90] sm:$0xff]  ;;  %v5273_v53 = vrot.slane %v5271_v6, 1  ;;  %v4677_v21 = vsel %vm7618_vm6, %v4669_v11, %v4676_v25  ;;  %5027 = vst [vmem:[#allocation2 + $0xa4] sm:$0x1] %v5026_v61  ;;  %6326 = vmatpush.bf16.msra.mxu2 %v7123_v55 }
 0x5ac   : > { %v9695_v3 = vsel %vm1412_vm10, %v5463_v34, %v5464_v16  ;;  %v5266_v14 = vrot.slane %v5264_v39, 1  ;;  %v9707_v62 = vpack.c.b16 %v5202_v63, %v5202_v63  ;;  %v5379_v22 = vshll.u32 %v9705_v60, 16  ;;  %v4962_v34 = vld [vmem:[#allocation2 + $0x38] sm:$0x1]  ;;  %4961 = vst.msk [vmem:[#allocation2 + $0x34] sm:$0xf] %vm334_vm0, %v4677_v21 }
 0x5ad   : > { %5594 = vrot.lane.b32.xlu0 %v9695_v3, %s7372_s10  ;;  %v5254_v33 = vrot.slane %v5252_v31, 1  ;;  %5544 = vrot.lane.b32.xlu2 %v7127_v57, %s7373_s24  ;;  %v5087_v51 = vld [vmem:[#allocation2 + $0x98] sm:$0x1]  ;;  %v5462_v30 = vsel %vm1412_vm10, %v5460_v58, %v5461_v32  ;;  %v5377_v5 = vshrl.u32 %v9705_v60, 16  ;;  %v5274_v44 = vor.u32 %v5273_v53, %v5269_v35  ;;  %v5028_v39 = vld [vmem:[#allocation2 + $0xa8] sm:$0xf] }
 0x5ae   : > { %v5211_v19 = vunpack.c.l.b16 %v5087_v51  ;;  %v5381_v48 = vrot.slane %v5379_v22, 1  ;;  %v9722_v29 = vsel %vm1187_vm9, %v5262_v50, %v5266_v14  ;;  %v5276_v8 = vshll.u32 %v9707_v62, 16  ;;  %7011 = vmatmul.msk.bf16.vlgmr.msra.gmra.mxu2 %vm422_vm2, %v9695_v3  ;;  %v4536_v25 = vld [vmem:[#allocation3 + $0xe0] sm:$0xff] }
 0x5af   : > { %v9713_v10 = vsel %vm1187_vm9, %v5250_v59, %v5254_v33  ;;  %v4603_v46 = vpack.c.bf16 %v4535_v54, %v4535_v54  ;;  %v4833_v45 = vshrl.u32 %v4602_v2, 16  ;;  %v4836_v26 = vshll.u32 %v4602_v2, 16  ;;  %v4516_v59 = vld [vmem:[#allocation3 + $0x40] sm:$0xff]  ;;  %v4517_v33 = vld [vmem:[#allocation3 + $0x48] sm:$0xff] }
 0x5b0   : > { %v9716_v57 = vpack.c.b16 %v5211_v19, %v5211_v19  ;;  %v5382_v23 = vor.u32 %v5381_v48, %v5377_v5  ;;  %v5278_v4 = vrot.slane %v5276_v8, 1  ;;  %v4678_v38 = vrot.slane %v4673_v52, 4  ;;  %v9766_v53 = vld [vmem:[#allocation2 + $0x9c] sm:$0xff] }
 0x5b1   : > { %v4841_v15 = vshrl.u32 %v4603_v46, 16  ;;  %v4844_v41 = vshll.u32 %v4603_v46, 16  ;;  %v4835_v16 = vrot.slane %v4833_v45, 7  ;;  %v5493_v42 = vrot.slane %v9705_v60, 1 }
 0x5b2   : > { %v5384_v40 = vshll.u32 %v9716_v57, 16  ;;  %v4963_v18 = vsel %vm7629_vm8, %v4678_v38, %v4962_v34  ;;  %v5494_v63 = vrot.slane %v9716_v57, 1  ;;  %v9750_v47 = vsel %vm1187_vm9, %v5274_v44, %v5278_v4  ;;  %v5090_v13 = vld [vmem:[#allocation2 + $0xa4] sm:$0x1] }
 0x5b3   : > { %5592 = vrot.lane.b32.xlu1 %v5462_v30, %s7372_s10  ;;  %v4843_v31 = vrot.slane %v4841_v15, 7  ;;  %4964 = vst [vmem:[#allocation2 + $0x38] sm:$0x1] %v4963_v18  ;;  %v4838_v58 = vor.u32 %v4836_v26, %v4835_v16  ;;  %v4839_v32 = vrot.slane %v4835_v16, 4  ;;  %v4584_v1 = vpack.c.bf16 %v4516_v59, %v4516_v59  ;;  %v4537_v44 = vld [vmem:[#allocation3 + $0xe8] sm:$0xff] }
 0x5b4   : > { %v5386_v12 = vrot.slane %v5384_v40, 1  ;;  %v4585_v9 = vpack.c.bf16 %v4517_v33, %v4517_v33  ;;  %v9764_v19 = vsel %vm1412_vm10, %v5493_v42, %v5494_v63  ;;  %v5212_v48 = vunpack.c.l.b16 %v5090_v13  ;;  %v5035_v33 = vld [vmem:[#allocation2 + $0xb4] sm:$0xf] }
 0x5b5   : > { %5426 = vrot.lane.b32.xlu0 %v9713_v10, %s7372_s10  ;;  %5676 = vrot.lane.b32.xlu2 %v9722_v29, %s7373_s24  ;;  %v4846_v6 = vor.u32 %v4844_v41, %v4843_v31  ;;  %v4848_v50 = vrot.slane %v4843_v31, 4  ;;  %v5029_v14 = vsel %vm7623_vm7, %v4838_v58, %v5028_v39  ;;  %v4680_v35 = vshrl.u32 %v4584_v1, 16 }
 0x5b6   : > { %v9742_v20 = vsel %vm1187_vm9, %v5382_v23, %v5386_v12  ;;  %5030 = vst [vmem:[#allocation2 + $0xa8] sm:$0xf] %v5029_v14  ;;  %v4688_v27 = vshrl.u32 %v4585_v9, 16  ;;  %v4683_v17 = vshll.u32 %v4584_v1, 16  ;;  %v4691_v57 = vshll.u32 %v4585_v9, 16  ;;  %v9778_v23 = vld [vmem:[#allocation2 + $0x30] sm:$0xff] }
 0x5b7   : > { %v4847_v51 = vsel %vm7618_vm6, %v4839_v32, %v4846_v6  ;;  %v4682_v22 = vrot.slane %v4680_v35, 7  ;;  %v5466_v8 = vrot.slane %v9687_v37, 1  ;;  %v5467_v0 = vrot.slane %v9707_v62, 1 }
 0x5b8   : > { %5031 = vst.msk [vmem:[#allocation2 + $0xac] sm:$0xf] %vm334_vm0, %v4847_v51  ;;  %v4690_v5 = vrot.slane %v4688_v27, 7  ;;  %v4604_v55 = vpack.c.bf16 %v4536_v25, %v4536_v25  ;;  %v4605_v2 = vpack.c.bf16 %v4537_v44, %v4537_v44  ;;  %v5228_v12 = vpack.c.b16 %v5212_v48, %v5212_v48  ;;  %v5039_v48 = vld [vmem:[#allocation2 + $0xbc] sm:$0x1] }
 0x5b9   : > { %v4685_v52 = vor.u32 %v4683_v17, %v4682_v22  ;;  %v4686_v56 = vrot.slane %v4682_v22, 4  ;;  %v5391_v62 = vshll.u32 %v9766_v53, 16  ;;  %v9785_v34 = vsel %vm1412_vm10, %v5466_v8, %v5467_v0  ;;  %v4518_v22 = vld [vmem:[#allocation3 + $0x50] sm:$0xff]  ;;  %v4519_v17 = vld [vmem:[#allocation3 + $0x58] sm:$0xff] }
 0x5ba   : > { %v5063_v11 = vld [vmem:[#allocation2 + $0x38] sm:$0x1]  ;;  %v4693_v36 = vor.u32 %v4691_v57, %v4690_v5  ;;  %v4850_v21 = vshrl.u32 %v4604_v55, 16  ;;  %v4858_v46 = vshrl.u32 %v4605_v2, 16  ;;  %v5283_v45 = vshll.u32 %v9778_v23, 16 }
 0x5bb   : > { %5507 = vrot.lane.b32.xlu1 %v5462_v30, %s7371_s23  ;;  %v5033_v30 = vsel %vm7629_vm8, %v4848_v50, %v5032_v7  ;;  %v5203_v54 = vunpack.c.l.b16 %v5063_v11  ;;  %v4966_v40 = vsel %vm7623_vm7, %v4685_v52, %v4965_v24  ;;  %v4853_v38 = vshll.u32 %v4604_v55, 16  ;;  %v4969_v7 = vld [vmem:[#allocation2 + $0x44] sm:$0x1] }
 0x5bc   : > { %5034 = vst [vmem:[#allocation2 + $0xb0] sm:$0x1] %v5033_v30  ;;  %v4694_v61 = vsel %vm7618_vm6, %v4686_v56, %v4693_v36  ;;  %v4852_v26 = vrot.slane %v4850_v21, 7  ;;  %v4860_v15 = vrot.slane %v4858_v46, 7  ;;  %v4861_v41 = vshll.u32 %v4605_v2, 16  ;;  %v7114_v36 = vld [vmem:[%s10648_s7 + $0x38] sm:$0xff] }
 0x5bd   : > { %5448 = vrot.lane.b32.xlu0 %v9742_v20, %s7372_s10  ;;  %5678 = vrot.lane.b32.xlu2 %v9750_v47, %s7373_s24  ;;  %4967 = vst [vmem:[#allocation2 + $0x3c] sm:$0xf] %v4966_v40  ;;  %v9787_v4 = vpack.c.b16 %v5203_v54, %v5203_v54  ;;  %v5389_v16 = vshrl.u32 %v9766_v53, 16  ;;  %v5393_v18 = vrot.slane %v5391_v62, 1  ;;  %v5396_v42 = vshll.u32 %v5228_v12, 16 }
 0x5be   : > { %4968 = vst.msk [vmem:[#allocation2 + $0x40] sm:$0xf] %vm334_vm0, %v4694_v61  ;;  %7012 = vmatmul.msk.bf16.gmra.mxu2 %vm422_vm2, %v9785_v34  ;;  %v5281_v31 = vshrl.u32 %v9778_v23, 16  ;;  %v5285_v39 = vrot.slane %v5283_v45, 1  ;;  %v4855_v58 = vor.u32 %v4853_v38, %v4852_v26  ;;  %v4856_v32 = vrot.slane %v4852_v26, 4  ;;  %6141 = vmatpush.bf16.msra.mxu0 %v7114_v36  ;;  %v7113_v26 = vld [vmem:[%s10648_s7 + $0x30] sm:$0xff] }
 0x5bf   : > { %v5288_v63 = vshll.u32 %v9787_v4, 16  ;;  %v4863_v59 = vor.u32 %v4861_v41, %v4860_v15  ;;  %v5394_v1 = vor.u32 %v5393_v18, %v5389_v16  ;;  %v5398_v9 = vrot.slane %v5396_v42, 1  ;;  %7154 = vmatpush.bf16.msra.mxu3 %v7114_v36  ;;  %v9833_v2 = vld [vmem:[#allocation2 + $0xa8] sm:$0xff]  ;;  %v4539_v42 = vld [vmem:[#allocation3 + $0xf8] sm:$0xff] }
 0x5c0   : > { %v5036_v6 = vsel %vm7623_vm7, %v4855_v58, %v5035_v33  ;;  %v4695_v50 = vrot.slane %v4690_v5, 4  ;;  %v5286_v14 = vor.u32 %v5285_v39, %v5281_v31  ;;  %v5497_v13 = vrot.slane %v5228_v12, 1  ;;  %v4972_v38 = vld [vmem:[#allocation2 + $0x48] sm:$0xf] }
 0x5c1   : > { %5037 = vst [vmem:[#allocation2 + $0xb4] sm:$0xf] %v5036_v6  ;;  %v5290_v51 = vrot.slane %v5288_v63, 1  ;;  %v9809_v27 = vsel %vm1187_vm9, %v5394_v1, %v5398_v9  ;;  %v4865_v5 = vrot.slane %v4860_v15, 4  ;;  %v4586_v11 = vpack.c.bf16 %v4518_v22, %v4518_v22  ;;  %v4538_v18 = vld [vmem:[#allocation3 + $0xf0] sm:$0xff]  ;;  %v7111_v22 = vld [vmem:[%s10648_s7 + $0x20] sm:$0xff] }
 0x5c2   : > { %v4970_v35 = vsel %vm7629_vm8, %v4695_v50, %v4969_v7  ;;  %v4587_v57 = vpack.c.bf16 %v4519_v17, %v4519_v17  ;;  %v5469_v52 = vrot.slane %v9778_v23, 1  ;;  %v5470_v56 = vrot.slane %v9787_v4, 1  ;;  %6142 = vmatpush.bf16.msra.mxu0 %v7113_v26  ;;  %v7112_v31 = vld [vmem:[%s10648_s7 + $0x28] sm:$0xff] }
 0x5c3   : > { %5529 = vrot.lane.b32.xlu1 %v9764_v19, %s7371_s23  ;;  %4971 = vst [vmem:[#allocation2 + $0x44] sm:$0x1] %v4970_v35  ;;  %v9815_v30 = vsel %vm1187_vm9, %v5286_v14, %v5290_v51  ;;  %v5040_v24 = vsel %vm7629_vm8, %v4865_v5, %v5039_v48  ;;  %v4697_v8 = vshrl.u32 %v4586_v11, 16  ;;  %v5093_v40 = vld [vmem:[#allocation2 + $0xb0] sm:$0x1]  ;;  %v4700_v44 = vshll.u32 %v4586_v11, 16  ;;  %7155 = vmatpush.bf16.msra.mxu3 %v7113_v26 }
 0x5c4   : > { %v4705_v0 = vshrl.u32 %v4587_v57, 16  ;;  %5041 = vst [vmem:[#allocation2 + $0xbc] sm:$0x1] %v5040_v24  ;;  %v4708_v55 = vshll.u32 %v4587_v57, 16  ;;  %v9836_v12 = vsel %vm1412_vm10, %v5469_v52, %v5470_v56  ;;  %v5213_v21 = vunpack.c.l.b16 %v5093_v40  ;;  %v5042_v52 = vld [vmem:[#allocation2 + $0xc0] sm:$0xf] }
 0x5c5   : > { %5566 = vrot.lane.b32.xlu0 %v9766_v53, %s7373_s24  ;;  %5428 = vrot.lane.b32.xlu2 %v9722_v29, %s7372_s10  ;;  %v4699_v25 = vrot.slane %v4697_v8, 7  ;;  %v4606_v39 = vpack.c.bf16 %v4538_v18, %v4538_v18  ;;  %v4607_v63 = vpack.c.bf16 %v4539_v42, %v4539_v42  ;;  %v9855_v58 = vld [vmem:[#allocation2 + $0x3c] sm:$0xff]  ;;  %v5401_v51 = vshrl.u32 %v9833_v2, 16  ;;  %v7121_v42 = vld [vmem:[%s10648_s7 + $0x70] sm:$0xff] }
 0x5c6   : > { %v9831_v61 = vrot.slane %v4705_v0, 7  ;;  %v5295_v9 = vshll.u32 %v9855_v58, 16  ;;  %6143 = vmatpush.bf16.msra.mxu0 %v7112_v31  ;;  %v5472_v56 = vrot.slane %v9855_v58, 1  ;;  %v9884_v24 = vld [vmem:[%s10648_s7 + $0x78] sm:$0xff] }
 0x5c7   : > { %v4702_v46 = vor.u32 %v4700_v44, %v4699_v25  ;;  %v4703_v4 = vrot.slane %v4699_v25, 4  ;;  %v4867_v33 = vshrl.u32 %v4606_v39, 16  ;;  %v4875_v6 = vshrl.u32 %v4607_v63, 16  ;;  %7156 = vmatpush.bf16.msra.mxu3 %v7112_v31  ;;  %6230 = vmatpush.bf16.msra.mxu1 %v9884_v24  ;;  %v7108_v31 = vld [vmem:[%s10648_s7 + $0x8] sm:$0xff] }
 0x5c8   : > { %v4710_v45 = vor.u32 %v4708_v55, %v9831_v61  ;;  %v4870_v50 = vshll.u32 %v4606_v39, 16  ;;  %v4878_v14 = vshll.u32 %v4607_v63, 16  ;;  %v5297_v17 = vrot.slane %v5295_v9, 1  ;;  %v4976_v55 = vld [vmem:[#allocation2 + $0x50] sm:$0x1] }
 0x5c9   : > { %v4973_v16 = vsel %vm7623_vm7, %v4702_v46, %v4972_v38  ;;  %v9864_v7 = vrot.slane %v4875_v6, 7  ;;  %v4712_v0 = vrot.slane %v9831_v61, 4  ;;  %v7109_v38 = vld [vmem:[%s10648_s7 + $0x10] sm:$0xff] }
 0x5ca   : > { %v5066_v62 = vld [vmem:[#allocation2 + $0x44] sm:$0x1]  ;;  %v4711_v41 = vsel %vm7618_vm6, %v4703_v4, %v4710_v45  ;;  %4974 = vst [vmem:[#allocation2 + $0x48] sm:$0xf] %v4973_v16  ;;  %6144 = vmatpush.bf16.msra.mxu0 %v7111_v22  ;;  %v5499_v4 = vrot.slane %v9833_v2, 1 }
 0x5cb   : > { %5509 = vrot.lane.b32.xlu1 %v9695_v3, %s7371_s23  ;;  %v4864_v3 = vsel %vm7618_vm6, %v4856_v32, %v4863_v59  ;;  %v5204_v15 = vunpack.c.l.b16 %v5066_v62  ;;  %v9857_v32 = vpack.c.b16 %v5213_v21, %v5213_v21  ;;  %v5403_v59 = vshll.u32 %v9833_v2, 16  ;;  %4975 = vst.msk [vmem:[#allocation2 + $0x4c] sm:$0xf] %vm334_vm0, %v4711_v41  ;;  %7157 = vmatpush.bf16.msra.mxu3 %v7111_v22  ;;  %v4521_v41 = vld [vmem:[#allocation3 + $0x68] sm:$0xff] }
 0x5cc   : > { %5038 = vst.msk [vmem:[#allocation2 + $0xb8] sm:$0xf] %vm334_vm0, %v4864_v3  ;;  %v4869_v3 = vrot.slane %v4867_v33, 7  ;;  %v4880_v48 = vor.u32 %v4878_v14, %v9864_v7  ;;  %v4977_v61 = vsel %vm7629_vm8, %v4712_v0, %v4976_v55  ;;  %v4589_v18 = vpack.c.bf16 %v4521_v41, %v4521_v41  ;;  %6231 = vmatpush.bf16.msra.mxu1 %v7121_v42  ;;  %v7120_v33 = vld [vmem:[%s10648_s7 + $0x68] sm:$0xff] }
 0x5cd   : > { %5596 = vrot.lane.b32.xlu0 %v9785_v34, %s7372_s10  ;;  %5546 = vrot.lane.b32.xlu2 %v9687_v37, %s7373_s24  ;;  %v5496_v37 = vrot.slane %v9766_v53, 1  ;;  %v5220_v1 = vpack.c.b16 %v5204_v15, %v5204_v15  ;;  %v5405_v35 = vrot.slane %v5403_v59, 1  ;;  %4978 = vst [vmem:[#allocation2 + $0x50] sm:$0x1] %v4977_v61  ;;  %v5500_v45 = vrot.slane %v9857_v32, 1  ;;  %v4520_v15 = vld [vmem:[#allocation3 + $0x60] sm:$0xff] }
 0x5ce   : > { %7013 = vmatmul.msk.bf16.gmra.mxu2 %vm422_vm2, %v9836_v12  ;;  %v4872_v11 = vor.u32 %v4870_v50, %v4869_v3  ;;  %v4873_v57 = vrot.slane %v4869_v3, 4  ;;  %v4588_v16 = vpack.c.bf16 %v4520_v15, %v4520_v15  ;;  %v4722_v63 = vshrl.u32 %v4589_v18, 16  ;;  %v5096_v59 = vld [vmem:[#allocation2 + $0xbc] sm:$0x1] }
 0x5cf   : > { %v9829_v54 = vsel %vm1412_vm10, %v5496_v37, %v5497_v13  ;;  %v5408_v37 = vshll.u32 %v9857_v32, 16  ;;  %v5293_v13 = vshrl.u32 %v9855_v58, 16  ;;  %v5300_v5 = vshll.u32 %v5220_v1, 16 }
 0x5d0   : > { %v5473_v36 = vrot.slane %v5220_v1, 1  ;;  %v5043_v8 = vsel %vm7623_vm7, %v4872_v11, %v5042_v52  ;;  %v5406_v40 = vor.u32 %v5405_v35, %v5401_v51  ;;  %v4881_v44 = vsel %vm7618_vm6, %v4873_v57, %v4880_v48  ;;  %6232 = vmatpush.bf16.msra.mxu1 %v7120_v33  ;;  %v4979_v57 = vld [vmem:[#allocation2 + $0x54] sm:$0xf] }
 0x5d1   : > { %v5410_v25 = vrot.slane %v5408_v37, 1  ;;  %5044 = vst [vmem:[#allocation2 + $0xc0] sm:$0xf] %v5043_v8  ;;  %v5298_v62 = vor.u32 %v5297_v17, %v5293_v13  ;;  %v5302_v21 = vrot.slane %v5300_v5, 1  ;;  %v4714_v39 = vshrl.u32 %v4588_v16, 16  ;;  %v7107_v5 = vld [vmem:[%s10648_s7] sm:$0xff] }
 0x5d2   : > { %5045 = vst.msk [vmem:[#allocation2 + $0xc4] sm:$0xf] %vm334_vm0, %v4881_v44  ;;  %v9898_v46 = vsel %vm1412_vm10, %v5472_v56, %v5473_v36  ;;  %v9926_v32 = vsel %vm1412_vm10, %v5499_v4, %v5500_v45  ;;  %v4717_v3 = vshll.u32 %v4588_v16, 16  ;;  %v4724_v50 = vrot.slane %v4722_v63, 7  ;;  %v9935_v17 = vld [vmem:[#allocation2 + $0x48] sm:$0xff]  ;;  %v7119_v36 = vld [vmem:[%s10648_s7 + $0x60] sm:$0xff] }
 0x5d3   : > { %5633 = vrot.lane.b32.xlu1 %v9778_v23, %s7371_s23  ;;  %v9910_v26 = vsel %vm1187_vm9, %v5298_v62, %v5302_v21  ;;  %v4716_v9 = vrot.slane %v4714_v39, 7  ;;  %v9931_v14 = vld [vmem:[#allocation2 + $0xb4] sm:$0xff]  ;;  %v4725_v51 = vshll.u32 %v4589_v18, 16  ;;  %v5214_v35 = vunpack.c.l.b16 %v5096_v59 }
 0x5d4   : > { %v5069_v6 = vld [vmem:[#allocation2 + $0x50] sm:$0x1]  ;;  %v5475_v52 = vrot.slane %v9935_v17, 1  ;;  %v5415_v0 = vshll.u32 %v9931_v14, 16  ;;  %6233 = vmatpush.bf16.msra.mxu1 %v7119_v36  ;;  %v5413_v55 = vshrl.u32 %v9931_v14, 16  ;;  %v5305_v61 = vshrl.u32 %v9935_v17, 16 }
 0x5d5   : > { %5450 = vrot.lane.b32.xlu0 %v9809_v27, %s7372_s10  ;;  %5680 = vrot.lane.b32.xlu2 %v9815_v30, %s7373_s24  ;;  %v5205_v1 = vunpack.c.l.b16 %v5069_v6  ;;  %v4719_v13 = vor.u32 %v4717_v3, %v4716_v9  ;;  %v4720_v22 = vrot.slane %v4716_v9, 4  ;;  %v4727_v11 = vor.u32 %v4725_v51, %v4724_v50  ;;  %v4522_v9 = vld [vmem:[#allocation3 + $0x70] sm:$0xff]  ;;  %v4523_v3 = vld [vmem:[#allocation3 + $0x78] sm:$0xff] }
 0x5d6   : > { %v5230_v8 = vpack.c.b16 %v5214_v35, %v5214_v35  ;;  %v5417_v62 = vrot.slane %v5415_v0, 1  ;;  %v4729_v45 = vrot.slane %v4724_v50, 4  ;;  %v5502_v59 = vrot.slane %v9931_v14, 1  ;;  %v7115_v35 = vld [vmem:[%s10648_s7 + $0x40] sm:$0xff] }
 0x5d7   : > { %v5221_v37 = vpack.c.b16 %v5205_v1, %v5205_v1  ;;  %v4980_v48 = vsel %vm7623_vm7, %v4719_v13, %v4979_v57  ;;  %v4591_v50 = vpack.c.bf16 %v4523_v3, %v4523_v3 }
 0x5d8   : > { %4981 = vst [vmem:[#allocation2 + $0x54] sm:$0xf] %v4980_v48  ;;  %v5420_v21 = vshll.u32 %v5230_v8, 16  ;;  %v5418_v41 = vor.u32 %v5417_v62, %v5413_v55  ;;  %v5503_v6 = vrot.slane %v5230_v8, 1 }
 0x5d9   : > { %v5476_v56 = vrot.slane %v5221_v37, 1  ;;  %v10005_v8 = vld [vmem:[#allocation2 + $0xc0] sm:$0xff] }
 0x5da   : > { %v5422_v16 = vrot.slane %v5420_v21, 1 }
 0x5db   : > { %5531 = vrot.lane.b32.xlu1 %v9829_v54, %s7371_s23  ;;  %v9960_v44 = vsel %vm1412_vm10, %v5475_v52, %v5476_v56 }
 0x5dc   : > { %v9983_v63 = vsel %vm1187_vm9, %v5418_v41, %v5422_v16 }
 0x5dd   : > { %5568 = vrot.lane.b32.xlu0 %v9833_v2, %s7373_s24  ;;  %5430 = vrot.lane.b32.xlu2 %v9750_v47, %s7372_s10 }
 0x5de   : > { %7014 = vmatmul.msk.bf16.gmra.mxu2 %vm422_vm2, %v9898_v46 }
 0x5e3   : > { %5511 = vrot.lane.b32.xlu1 %v9785_v34, %s7371_s23  ;;  %v7110_v34 = vld [vmem:[%s10648_s7 + $0x18] sm:$0xff] }
 0x5e4   : > { %6145 = vmatpush.bf16.msra.mxu0 %v7110_v34  ;;  %7158 = vmatpush.bf16.msra.mxu3 %v7110_v34  ;;  %v4728_v34 = vsel %vm7618_vm6, %v4720_v22, %v4727_v11  ;;  %v4739_v22 = vshrl.u32 %v4591_v50, 16 }
 0x5e5   : > { %5598 = vrot.lane.b32.xlu0 %v9836_v12, %s7372_s10  ;;  %5548 = vrot.lane.b32.xlu2 %v9778_v23, %s7373_s24  ;;  %v9901_v23 = vsel %vm1187_vm9, %v5406_v40, %v5410_v25  ;;  %4982 = vst.msk [vmem:[#allocation2 + $0x58] sm:$0xf] %vm334_vm0, %v4728_v34  ;;  %v7118_v40 = vld [vmem:[%s10648_s7 + $0x58] sm:$0xff]  ;;  %v5307_v25 = vshll.u32 %v9935_v17, 16 }
 0x5e6   : > { %6234 = vmatpush.bf16.msra.mxu1 %v7118_v40 }
 0x5e7   : > { %v5309_v4 = vrot.slane %v5307_v25, 1  ;;  %v4742_v25 = vshll.u32 %v4591_v50, 16  ;;  %v4525_v50 = vld [vmem:[#allocation3 + $0x88] sm:$0xff] }
 0x5e8   : > { %6146 = vmatpush.bf16.msra.mxu0 %v7109_v38  ;;  %7159 = vmatpush.bf16.msra.mxu3 %v7109_v38  ;;  %v4983_v38 = vld [vmem:[#allocation2 + $0x5c] sm:$0x1] }
 0x5e9   : > { %v4984_v15 = vsel %vm7629_vm8, %v4729_v45, %v4983_v38  ;;  %v4990_v38 = vld [vmem:[#allocation2 + $0x68] sm:$0x1] }
 0x5ea   : > { %4985 = vst [vmem:[#allocation2 + $0x5c] sm:$0x1] %v4984_v15 }
 0x5eb   : > { %5635 = vrot.lane.b32.xlu1 %v9855_v58, %s7371_s23 }
 0x5ec   : > { %6147 = vmatpush.bf16.msra.mxu0 %v7108_v31  ;;  %7160 = vmatpush.bf16.msra.mxu3 %v7108_v31  ;;  %v7117_v31 = vld [vmem:[%s10648_s7 + $0x50] sm:$0xff] }
 0x5ed   : > { %5452 = vrot.lane.b32.xlu0 %v9901_v23, %s7372_s10  ;;  %5682 = vrot.lane.b32.xlu2 %v9910_v26, %s7373_s24  ;;  %v10001_v11 = vld [vmem:[#allocation2 + $0x54] sm:$0xff] }
 0x5ee   : > { %7015 = vmatmul.msk.bf16.gmra.mxu2 %vm422_vm2, %v9960_v44  ;;  %6235 = vmatpush.bf16.msra.mxu1 %v7117_v31  ;;  %v5478_v0 = vrot.slane %v10001_v11, 1 }
 0x5f0   : > { %6148 = vmatpush.bf16.msra.mxu0 %v7107_v5  ;;  %7161 = vmatpush.bf16.msra.mxu3 %v7107_v5  ;;  %v9999_v5 = vsel %vm1412_vm10, %v5502_v59, %v5503_v6 }
 0x5f1   : > { %v5072_v51 = vld [vmem:[#allocation2 + $0x5c] sm:$0x1] }
 0x5f3   : > { %5533 = vrot.lane.b32.xlu1 %v9926_v32, %s7371_s23 }
 0x5f4   : > { %7162 = vmatpush.bf16.msrb.mxu3 %v9884_v24  ;;  %v5312_v24 = vshll.u32 %v5221_v37, 16  ;;  %v5206_v37 = vunpack.c.l.b16 %v5072_v51 }
 0x5f5   : > { %5570 = vrot.lane.b32.xlu0 %v9931_v14, %s7373_s24  ;;  %5432 = vrot.lane.b32.xlu2 %v9815_v30, %s7372_s10 }
 0x5f6   : > { %v5314_v18 = vrot.slane %v5312_v24, 1  ;;  %v5222_v48 = vpack.c.b16 %v5206_v37, %v5206_v37 }
 0x5f8   : > { %7163 = vmatpush.bf16.msrb.mxu3 %v7121_v42  ;;  %v7116_v42 = vld [vmem:[%s10648_s7 + $0x48] sm:$0xff]  ;;  %v5479_v55 = vrot.slane %v5222_v48, 1 }
 0x5f9   : > { %6236 = vmatpush.bf16.msra.mxu1 %v7116_v42 }
 0x5fa   : > { %v10011_v45 = vsel %vm1412_vm10, %v5478_v0, %v5479_v55 }
 0x5fb   : > { %5513 = vrot.lane.b32.xlu1 %v9836_v12, %s7371_s23  ;;  %v5310_v12 = vor.u32 %v5309_v4, %v5305_v61  ;;  %v4986_v4 = vld [vmem:[#allocation2 + $0x60] sm:$0xf] }
 0x5fc   : > { %7164 = vmatpush.bf16.msrb.mxu3 %v7120_v33  ;;  %v4590_v33 = vpack.c.bf16 %v4522_v9, %v4522_v9  ;;  %v5317_v9 = vshrl.u32 %v10001_v11, 16 }
 0x5fd   : > { %5600 = vrot.lane.b32.xlu0 %v9898_v46, %s7372_s10  ;;  %5550 = vrot.lane.b32.xlu2 %v9855_v58, %s7373_s24  ;;  %v9989_v1 = vsel %vm1187_vm9, %v5310_v12, %v5314_v18  ;;  %v5319_v12 = vshll.u32 %v10001_v11, 16 }
 0x5fe   : > { %v4731_v13 = vshrl.u32 %v4590_v33, 16  ;;  %v4734_v56 = vshll.u32 %v4590_v33, 16  ;;  %6237 = vmatpush.bf16.msra.mxu1 %v7115_v35  ;;  %7016 = vmatmul.msk.bf16.gmra.mxu2 %vm422_vm2, %v10011_v45  ;;  %v5324_v33 = vshll.u32 %v5222_v48, 16  ;;  %v4524_v48 = vld [vmem:[#allocation3 + $0x80] sm:$0xff] }
 0x5ff   : > { %v9977_v39 = vpop.permute.xlu2 %5629  ;;  %v5506_v34 = vpop.permute.xlu0 %5505  ;;  %v5321_v3 = vrot.slane %v5319_v12, 1 }
 0x600   : > { %7165 = vmatpush.bf16.msrb.mxu3 %v7119_v36  ;;  %v4733_v52 = vrot.slane %v4731_v13, 7  ;;  %v4741_v36 = vrot.slane %v4739_v22, 7 }
 0x601   : > { %v5322_v22 = vor.u32 %v5321_v3, %v5317_v9  ;;  %v4993_v3 = vld [vmem:[#allocation2 + $0x6c] sm:$0xf] }
 0x602   : > { %v4736_v62 = vor.u32 %v4734_v56, %v4733_v52  ;;  %v4737_v21 = vrot.slane %v4733_v52, 4  ;;  %v4744_v61 = vor.u32 %v4742_v25, %v4741_v36  ;;  %v4746_v24 = vrot.slane %v4741_v36, 4 }
 0x603   : > { %5637 = vrot.lane.b32.xlu1 %v9935_v17, %s7371_s23  ;;  %v5326_v52 = vrot.slane %v5324_v33, 1 }
 0x604   : > { %7166 = vmatpush.bf16.msrb.mxu3 %v7118_v40  ;;  %v4987_v40 = vsel %vm7623_vm7, %v4736_v62, %v4986_v4  ;;  %v4745_v15 = vsel %vm7618_vm6, %v4737_v21, %v4744_v61  ;;  %v4991_v41 = vsel %vm7629_vm8, %v4746_v24, %v4990_v38 }
 0x605   : > { %5454 = vrot.lane.b32.xlu0 %v9983_v63, %s7372_s10  ;;  %5684 = vrot.lane.b32.xlu2 %v9989_v1, %s7373_s24  ;;  %4988 = vst [vmem:[#allocation2 + $0x60] sm:$0xf] %v4987_v40  ;;  %v10049_v21 = vsel %vm1187_vm9, %v5322_v22, %v5326_v52 }
 0x606   : > { %4989 = vst.msk [vmem:[#allocation2 + $0x64] sm:$0xf] %vm334_vm0, %v4745_v15  ;;  %v4997_v15 = vld [vmem:[#allocation2 + $0x74] sm:$0x1] }
 0x607   : > { %v10003_v57 = vpop.permute.xlu2 %5544  ;;  %4992 = vst [vmem:[#allocation2 + $0x68] sm:$0x1] %v4991_v41  ;;  %v5425_v18 = vpop.permute.xlu0 %5424 }
 0x608   : > { %7167 = vmatpush.bf16.msrb.mxu3 %v7117_v31  ;;  %v7285_v31 = vld [vmem:[#allocation2] sm:$0xff] }
 0x609   : > { %v5712_v59 = vsel %vm422_vm2, %v7285_v31, %v5425_v18 }
 0x60a   : > { %v5745_v6 = vsel %vm1699_vm11, %v5712_v59, %v5506_v34  ;;  %v4592_v34 = vpack.c.bf16 %v4524_v48, %v4524_v48 }
 0x60b   : > { %5535 = vrot.lane.b32.xlu1 %v9999_v5, %s7371_s23 }
 0x60c   : > { %7168 = vmatpush.bf16.msrb.mxu3 %v7116_v42  ;;  %v4593_v42 = vpack.c.bf16 %v4525_v50, %v4525_v50  ;;  %v4748_v62 = vshrl.u32 %v4592_v34, 16  ;;  %v4751_v40 = vshll.u32 %v4592_v34, 16 }
 0x60d   : > { %5572 = vrot.lane.b32.xlu0 %v10005_v8, %s7373_s24  ;;  %5434 = vrot.lane.b32.xlu2 %v9910_v26, %s7372_s10 }
 0x60e   : > { %v5075_v13 = vld [vmem:[#allocation2 + $0x68] sm:$0x1]  ;;  %v4756_v36 = vshrl.u32 %v4593_v42, 16  ;;  %v4750_v24 = vrot.slane %v4748_v62, 7  ;;  %v4759_v38 = vshll.u32 %v4593_v42, 16  ;;  %v4882_v42 = vrot.slane %v9864_v7, 4 }
 0x60f   : > { %v10026_v16 = vpop.permute.xlu2 %5676  ;;  %v5207_v56 = vunpack.c.l.b16 %v5075_v13  ;;  %v4527_v13 = vld [vmem:[#allocation3 + $0x98] sm:$0xff] }
 0x610   : > { %7169 = vmatpush.bf16.msrb.mxu3 %v7115_v35  ;;  %v4758_v55 = vrot.slane %v4756_v36, 7  ;;  %v4753_v31 = vor.u32 %v4751_v40, %v4750_v24  ;;  %v4754_v59 = vrot.slane %v4750_v24, 4  ;;  %v4595_v48 = vpack.c.bf16 %v4527_v13, %v4527_v13  ;;  %v5004_v13 = vld [vmem:[#allocation2 + $0x80] sm:$0x1] }
 0x611   : > { %v10043_v0 = vpack.c.b16 %v5207_v56, %v5207_v56 }
 0x612   : > { %v4763_v4 = vrot.slane %v4758_v55, 4  ;;  %v4773_v62 = vshrl.u32 %v4595_v48, 16 }
 0x613   : > { %5515 = vrot.lane.b32.xlu1 %v9898_v46, %s7371_s23  ;;  %v10039_v46 = vld [vmem:[#allocation2 + $0x60] sm:$0xff]  ;;  %v5482_v61 = vrot.slane %v10043_v0, 1 }
 0x614   : > { %v5481_v25 = vrot.slane %v10039_v46, 1  ;;  %v4998_v18 = vsel %vm7629_vm8, %v4763_v4, %v4997_v15  ;;  %v4775_v15 = vrot.slane %v4773_v62, 7 }
 0x615   : > { %5602 = vrot.lane.b32.xlu0 %v9960_v44, %s7372_s10  ;;  %v5543_v51 = vpop.permute.xlu1 %5542  ;;  %5552 = vrot.lane.b32.xlu2 %v9935_v17, %s7373_s24  ;;  %4999 = vst [vmem:[#allocation2 + $0x74] sm:$0x1] %v4998_v18  ;;  %v7286_v18 = vld [vmem:[#allocation2 + $0xc] sm:$0xff] }
 0x616   : > { %v5778_v37 = vsel %vm1732_vm12, %v5745_v6, %v5543_v51  ;;  %v10057_v12 = vsel %vm1412_vm10, %v5481_v25, %v5482_v61  ;;  %v4761_v6 = vor.u32 %v4759_v38, %v4758_v55  ;;  %v4994_v51 = vsel %vm7623_vm7, %v4753_v31, %v4993_v3  ;;  %v4526_v55 = vld [vmem:[#allocation3 + $0x90] sm:$0xff] }
 0x617   : > { %6149 = vmatmul.bf16.vlgmr.msra.gmra.mxu0 %v5778_v37  ;;  %v10041_v35 = vpop.permute.xlu2 %5678  ;;  %7017 = vmatmul.msk.bf16.gmra.mxu2 %vm422_vm2, %v10057_v12  ;;  %4995 = vst [vmem:[#allocation2 + $0x6c] sm:$0xf] %v4994_v51  ;;  %v5046_v37 = vld [vmem:[#allocation2 + $0xc8] sm:$0x1]  ;;  %v4594_v38 = vpack.c.bf16 %v4526_v55, %v4526_v55  ;;  %v5336_v3 = vshll.u32 %v10043_v0, 16  ;;  %v4780_v51 = vrot.slane %v4775_v15, 4 }
 0x618   : > { %v4762_v50 = vsel %vm7618_vm6, %v4754_v59, %v4761_v6  ;;  %v5047_v56 = vsel %vm7629_vm8, %v4882_v42, %v5046_v37  ;;  %v5329_v59 = vshrl.u32 %v10039_v46, 16  ;;  %v4776_v37 = vshll.u32 %v4595_v48, 16 }
 0x619   : > { %4996 = vst.msk [vmem:[#allocation2 + $0x70] sm:$0xf] %vm334_vm0, %v4762_v50  ;;  %v4765_v50 = vshrl.u32 %v4594_v38, 16  ;;  %v4768_v42 = vshll.u32 %v4594_v38, 16 }
 0x61a   : > { %5048 = vst [vmem:[#allocation2 + $0xc8] sm:$0x1] %v5047_v56  ;;  %v4778_v48 = vor.u32 %v4776_v37, %v4775_v15 }
 0x61b   : > { %5639 = vrot.lane.b32.xlu1 %v10001_v11, %s7371_s23  ;;  %v4767_v56 = vrot.slane %v4765_v50, 7  ;;  %v4528_v50 = vld [vmem:[#allocation3 + $0xa0] sm:$0xff] }
 0x61c   : > { %v5078_v52 = vld [vmem:[#allocation2 + $0x74] sm:$0x1] }
 0x61d   : > { %5616 = vrot.lane.b32.xlu0 %v9829_v54, %s7372_s10  ;;  %v10054_v41 = vpop.permute.xlu1 %5631  ;;  %5686 = vrot.lane.b32.xlu2 %v10049_v21, %s7373_s24  ;;  %v5208_v34 = vunpack.c.l.b16 %v5078_v52  ;;  %v4770_v55 = vor.u32 %v4768_v42, %v4767_v56  ;;  %v4771_v62 = vrot.slane %v4767_v56, 4 }
 0x61f   : > { %v10065_v9 = vpop.permute.xlu0 %5594  ;;  %v10067_v33 = vpop.permute.xlu2 %5428  ;;  %v10091_v24 = vpack.c.b16 %v5208_v34, %v5208_v34  ;;  %v4779_v38 = vsel %vm7618_vm6, %v4771_v62, %v4778_v48  ;;  %v5011_v62 = vld [vmem:[#allocation2 + $0x8c] sm:$0x1] }
 0x620   : > { %v10094_v40 = vld [vmem:[#allocation2 + $0x6c] sm:$0xff]  ;;  %v5830_v15 = vsel %vm422_vm2, %v9722_v29, %v10065_v9  ;;  %5003 = vst.msk [vmem:[#allocation2 + $0x7c] sm:$0xf] %vm334_vm0, %v4779_v38 }
 0x623   : > { %5653 = vrot.lane.b32.xlu1 %v9833_v2, %s7371_s23 }
 0x625   : > { %5700 = vrot.lane.b32.xlu0 %v9901_v23, %s7373_s24  ;;  %v5593_v22 = vpop.permute.xlu1 %5592  ;;  %5436 = vrot.lane.b32.xlu2 %v9989_v1, %s7372_s10 }
 0x626   : > { %v5827_v36 = vsel %vm422_vm2, %v9713_v10, %v5593_v22  ;;  %v5331_v10 = vshll.u32 %v10039_v46, 16 }
 0x627   : > { %v5427_v7 = vpop.permute.xlu0 %5426  ;;  %v5874_v25 = vsel %vm1699_vm11, %v5827_v36, %v9977_v39  ;;  %v10089_v4 = vpop.permute.xlu2 %5546  ;;  %v5485_v39 = vrot.slane %v10091_v24, 1 }
 0x628   : > { %v5906_v61 = vsel %vm1732_vm12, %v5874_v25, %v10026_v16  ;;  %v5714_v31 = vsel %vm422_vm2, %v7286_v18, %v5427_v7  ;;  %v5333_v6 = vrot.slane %v5331_v10, 1  ;;  %v5484_v16 = vrot.slane %v10094_v40, 1 }
 0x629   : > { %6238 = vmatmul.bf16.vlgmr.msra.gmra.mxu1 %v5906_v61  ;;  %v5338_v25 = vrot.slane %v5336_v3, 1  ;;  %v5000_v61 = vld [vmem:[#allocation2 + $0x78] sm:$0xf] }
 0x62a   : > { %v10106_v52 = vsel %vm1412_vm10, %v5484_v16, %v5485_v39  ;;  %v5334_v0 = vor.u32 %v5333_v6, %v5329_v59  ;;  %v5001_v18 = vsel %vm7623_vm7, %v4770_v55, %v5000_v61  ;;  %v4529_v39 = vld [vmem:[#allocation3 + $0xa8] sm:$0xff]  ;;  %v5876_v59 = vsel %vm1699_vm11, %v5830_v15, %v10054_v41  ;;  %v7288_v61 = vld [vmem:[#allocation2 + $0x18] sm:$0xff] }
 0x62b   : > { %5517 = vrot.lane.b32.xlu1 %v9960_v44, %s7371_s23  ;;  %v5005_v44 = vsel %vm7629_vm8, %v4780_v51, %v5004_v13  ;;  %7018 = vmatmul.msk.bf16.gmra.mxu2 %vm422_vm2, %v10106_v52  ;;  %5002 = vst [vmem:[#allocation2 + $0x78] sm:$0xf] %v5001_v18  ;;  %v4597_v9 = vpack.c.bf16 %v4529_v39, %v4529_v39 }
 0x62c   : > { %5006 = vst [vmem:[#allocation2 + $0x80] sm:$0x1] %v5005_v44  ;;  %v5909_v41 = vsel %vm1732_vm12, %v5876_v59, %v10041_v35  ;;  %v4596_v13 = vpack.c.bf16 %v4528_v50, %v4528_v50  ;;  %v5716_v38 = vsel %vm422_vm2, %v7288_v61, %v10067_v33 }
 0x62d   : > { %5604 = vrot.lane.b32.xlu0 %v10011_v45, %s7372_s10  ;;  %v5508_v22 = vpop.permute.xlu1 %5507  ;;  %5554 = vrot.lane.b32.xlu2 %v10001_v11, %s7373_s24  ;;  %v4790_v51 = vshrl.u32 %v4597_v9, 16  ;;  %v4793_v55 = vshll.u32 %v4597_v9, 16 }
 0x62e   : > { %v5747_v36 = vsel %vm1699_vm11, %v5714_v31, %v5508_v22  ;;  %v10131_v31 = vsel %vm1187_vm9, %v5334_v0, %v5338_v25  ;;  %v7287_v0 = vld [vmem:[%s10648_s7 + $0x88] sm:$0xff]  ;;  %v4785_v25 = vshll.u32 %v4596_v13, 16 }
 0x62f   : > { %v5449_v34 = vpop.permute.xlu0 %5448  ;;  %v5781_v7 = vsel %vm1732_vm12, %v5747_v36, %v10003_v57  ;;  %v10117_v10 = vpop.permute.xlu2 %5680  ;;  %v4792_v56 = vrot.slane %v4790_v51, 7  ;;  %v4782_v36 = vshrl.u32 %v4596_v13, 16  ;;  %v5343_v51 = vshll.u32 %v10094_v40, 16 }
 0x630   : > { %6154 = vmatmul.bf16.gmra.mxu0 %v5781_v7  ;;  %v5736_v57 = vsel %vm422_vm2, %v9705_v60, %v5449_v34 }
 0x631   : > { %v4797_v48 = vrot.slane %v4792_v56, 4  ;;  %v4784_v7 = vrot.slane %v4782_v36, 7  ;;  %v10161_v15 = vpop.f32.mrf.mxu2  ;;  %v4795_v28 = vor.u32 %v4793_v55, %v4792_v56  ;;  %v5341_v56 = vshrl.u32 %v10094_v40, 16 }
 0x632   : > { %v10148_v44 = vld [vmem:[#allocation2 + $0x78] sm:$0xff]  ;;  %v5345_v36 = vrot.slane %v5343_v51, 1 }
 0x633   : > { %5641 = vrot.lane.b32.xlu1 %v10039_v46, %s7371_s23  ;;  %v5081_v60 = vld [vmem:[#allocation2 + $0x80] sm:$0x1]  ;;  %v5487_v34 = vrot.slane %v10148_v44, 1  ;;  %v4788_v9 = vrot.slane %v4784_v7, 4 }
 0x634   : > { %v5209_v3 = vunpack.c.l.b16 %v5081_v60  ;;  %v5099_v60 = vld [vmem:[#allocation2 + $0xc8] sm:$0x1] }
 0x635   : > { %5618 = vrot.lane.b32.xlu0 %v9926_v32, %s7372_s10  ;;  %v5530_v29 = vpop.permute.xlu1 %5529  ;;  %5688 = vrot.lane.b32.xlu2 %v10131_v31, %s7373_s24 }
 0x636   : > { %v5769_v6 = vsel %vm1699_vm11, %v5736_v57, %v5530_v29  ;;  %v10146_v22 = vpack.c.b16 %v5209_v3, %v5209_v3  ;;  %v5012_v57 = vsel %vm7629_vm8, %v4797_v48, %v5011_v62  ;;  %v4787_v29 = vor.u32 %v4785_v25, %v4784_v7  ;;  %v7289_v3 = vld [vmem:[%s10648_s7 + $0x80] sm:$0xff] }
 0x637   : > { %v5567_v16 = vpop.permute.xlu0 %5566  ;;  %v10144_v37 = vpop.permute.xlu2 %5430  ;;  %5013 = vst [vmem:[#allocation2 + $0x8c] sm:$0x1] %v5012_v57  ;;  %v5346_v25 = vor.u32 %v5345_v36, %v5341_v56 }
 0x638   : > { %v5814_v42 = vsel %vm1732_vm12, %v5769_v6, %v5567_v16  ;;  %v5488_v35 = vrot.slane %v10146_v22, 1  ;;  %v5007_v16 = vld [vmem:[#allocation2 + $0x84] sm:$0xf] }
 0x639   : > { %6209 = vmatmul.bf16.vlgmr.msra.gmra.mxu3 %v5814_v42  ;;  %6243 = vmatmul.bf16.gmra.mxu1 %v5909_v41  ;;  %v5008_v42 = vsel %vm7623_vm7, %v4787_v29, %v5007_v16  ;;  %v5575_v41 = vunpack.c.l.b16 %v5099_v60  ;;  %v10192_v49 = vpop.f32.mrf.mxu2 }
 0x63a   : > { %7170 = vmatpush.bf16.msra.mxu3 %v7287_v0  ;;  %v10169_v59 = vsel %vm1412_vm10, %v5487_v34, %v5488_v35  ;;  %5009 = vst [vmem:[#allocation2 + $0x84] sm:$0xf] %v5008_v42  ;;  %v5348_v0 = vshll.u32 %v10091_v24, 16 }
 0x63b   : > { %5655 = vrot.lane.b32.xlu1 %v9931_v14, %s7371_s23  ;;  %7019 = vmatmul.msk.bf16.gmra.mxu2 %vm422_vm2, %v10169_v59  ;;  %v10195_v34 = vpack.c.b16 %v5575_v41, %v5575_v41 }
 0x63c   : > { %v5350_v55 = vrot.slane %v5348_v0, 1 }
 0x63d   : > { %5702 = vrot.lane.b32.xlu0 %v9983_v63, %s7373_s24  ;;  %v5510_v18 = vpop.permute.xlu1 %5509  ;;  %5438 = vrot.lane.b32.xlu2 %v10049_v21, %s7372_s10 }
 0x63e   : > { %v5749_v39 = vsel %vm1699_vm11, %v5716_v38, %v5510_v18  ;;  %7171 = vmatpush.bf16.msra.mxu3 %v7289_v3  ;;  %v5084_v35 = vld [vmem:[#allocation2 + $0x8c] sm:$0x1]  ;;  %v5578_v18 = vshrl.u32 %v10005_v8, 16 }
 0x63f   : > { %v5597_v33 = vpop.permute.xlu0 %5596  ;;  %v5784_v6 = vsel %vm1732_vm12, %v5749_v39, %v10089_v4  ;;  %v5549_v50 = vpop.permute.xlu2 %5548  ;;  %v4796_v4 = vsel %vm7618_vm6, %v4788_v9, %v4795_v28  ;;  %v5585_v39 = vshll.u32 %v10195_v34, 16 }
 0x640   : > { %6159 = vmatmul.bf16.gmra.mxu0 %v5784_v6  ;;  %5010 = vst.msk [vmem:[#allocation2 + $0x88] sm:$0xf] %vm334_vm0, %v4796_v4  ;;  %v5833_v13 = vsel %vm422_vm2, %v9750_v47, %v5597_v33  ;;  %v5580_v47 = vshll.u32 %v10005_v8, 16 }
 0x641   : > { %v10222_v28 = vpop.f32.mrf.mxu2  ;;  %v5587_v3 = vrot.slane %v5585_v39, 1  ;;  %v5589_v39 = vrot.slane %v10005_v8, 1 }
 0x642   : > { %v5582_v57 = vrot.slane %v5580_v47, 1  ;;  %v5102_v47 = vld [vmem:[#allocation2 + $0xd4] sm:$0x1] }
 0x643   : > { %5519 = vrot.lane.b32.xlu1 %v10011_v45, %s7371_s23  ;;  %v5210_v45 = vunpack.c.l.b16 %v5084_v35 }
 0x645   : > { %5606 = vrot.lane.b32.xlu0 %v10057_v12, %s7372_s10  ;;  %v5634_v43 = vpop.permute.xlu1 %5633  ;;  %5556 = vrot.lane.b32.xlu2 %v10039_v46, %s7373_s24  ;;  %v10202_v61 = vpack.c.b16 %v5210_v45, %v5210_v45 }
 0x646   : > { %v5878_v48 = vsel %vm1699_vm11, %v5833_v13, %v5634_v43  ;;  %v7290_v13 = vld [vmem:[#allocation2 + $0x24] sm:$0xff] }
 0x647   : > { %v5451_v7 = vpop.permute.xlu0 %5450  ;;  %v5912_v24 = vsel %vm1732_vm12, %v5878_v48, %v10117_v10  ;;  %v5683_v62 = vpop.permute.xlu2 %5682  ;;  %v10204_v38 = vld [vmem:[#allocation2 + $0x84] sm:$0xff]  ;;  %v5491_v29 = vrot.slane %v10202_v61, 1  ;;  %v10214_v10 = vsel %vm1187_vm9, %v5346_v25, %v5350_v55  ;;  %v5718_v56 = vsel %vm422_vm2, %v7290_v13, %v10144_v37  ;;  %v10246_v37 = vld [vmem:[#allocation2 + $0xcc] sm:$0xff] }
 0x648   : > { %v5738_v9 = vsel %vm422_vm2, %v9766_v53, %v5451_v7  ;;  %v5490_v33 = vrot.slane %v10204_v38, 1  ;;  %v5583_v53 = vor.u32 %v5582_v57, %v5578_v18  ;;  %v5355_v7 = vshll.u32 %v10148_v44, 16 }
 0x649   : > { %6248 = vmatmul.bf16.gmra.mxu1 %v5912_v24  ;;  %v10239_v0 = vpop.f32.mrf.mxu2  ;;  %v5662_v24 = vunpack.c.l.b16 %v5102_v47  ;;  %v5353_v55 = vshrl.u32 %v10148_v44, 16  ;;  %v5360_v57 = vshll.u32 %v10146_v22, 16 }
 0x64a   : > { %v10220_v60 = vsel %vm1412_vm10, %v5490_v33, %v5491_v29  ;;  %v10231_v41 = vsel %vm1187_vm9, %v5583_v53, %v5587_v3  ;;  %v5357_v18 = vrot.slane %v5355_v7, 1 }
 0x64b   : > { %5643 = vrot.lane.b32.xlu1 %v10094_v40, %s7371_s23  ;;  %7020 = vmatmul.msk.bf16.gmra.mxu2 %vm422_vm2, %v10220_v60  ;;  %v10261_v33 = vpack.c.b16 %v5662_v24, %v5662_v24 }
 0x64d   : > { %5620 = vrot.lane.b32.xlu0 %v9999_v5, %s7372_s10  ;;  %v5532_v6 = vpop.permute.xlu1 %5531  ;;  %5690 = vrot.lane.b32.xlu2 %v10214_v10, %s7373_s24 }
 0x64e   : > { %v5771_v16 = vsel %vm1699_vm11, %v5738_v9, %v5532_v6 }
 0x64f   : > { %v5569_v51 = vpop.permute.xlu0 %5568  ;;  %v5433_v4 = vpop.permute.xlu2 %5432 }
 0x650   : > { %v5817_v42 = vsel %vm1732_vm12, %v5771_v16, %v5569_v51  ;;  %v5362_v16 = vrot.slane %v5360_v57, 1 }
 0x651   : > { %6214 = vmatmul.bf16.gmra.mxu3 %v5817_v42  ;;  %v10257_v29 = vpop.f32.mrf.mxu2  ;;  %v5672_v42 = vshll.u32 %v10261_v33, 16 }
 0x653   : > { %5657 = vrot.lane.b32.xlu1 %v10005_v8, %s7371_s23  ;;  %v5358_v8 = vor.u32 %v5357_v18, %v5353_v55 }
 0x655   : > { %5704 = vrot.lane.b32.xlu0 %v10231_v41, %s7373_s24  ;;  %v5512_v36 = vpop.permute.xlu1 %5511  ;;  %5440 = vrot.lane.b32.xlu2 %v10131_v31, %s7372_s10 }
 0x656   : > { %v5751_v43 = vsel %vm1699_vm11, %v5718_v56, %v5512_v36 }
 0x657   : > { %v5599_v35 = vpop.permute.xlu0 %5598  ;;  %v5787_v48 = vsel %vm1732_vm12, %v5751_v43, %v5549_v50  ;;  %v5551_v45 = vpop.permute.xlu2 %5550 }
 0x658   : > { %6164 = vmatmul.bf16.gmra.mxu0 %v5787_v48  ;;  %v5836_v25 = vsel %vm422_vm2, %v9815_v30, %v5599_v35  ;;  %v5590_v30 = vrot.slane %v10195_v34, 1  ;;  %v5665_v34 = vshrl.u32 %v10246_v37, 16  ;;  %v5674_v48 = vrot.slane %v5672_v42, 1 }
 0x659   : > { %v10283_v36 = vpop.f32.mrf.mxu2 }
 0x65a   : > { %v10270_v3 = vsel %vm1412_vm10, %v5589_v39, %v5590_v30 }
 0x65b   : > { %5521 = vrot.lane.b32.xlu1 %v10057_v12, %s7371_s23  ;;  %v5667_v12 = vshll.u32 %v10246_v37, 16  ;;  %7021 = vmatmul.msk.bf16.gmra.mxu2 %vm422_vm2, %v9764_v19 }
 0x65d   : > { %5608 = vrot.lane.b32.xlu0 %v10106_v52, %s7372_s10  ;;  %v5636_v50 = vpop.permute.xlu1 %5635  ;;  %5558 = vrot.lane.b32.xlu2 %v10094_v40, %s7373_s24  ;;  %v5669_v51 = vrot.slane %v5667_v12, 1 }
 0x65e   : > { %v5880_v9 = vsel %vm1699_vm11, %v5836_v25, %v5636_v50  ;;  %v7291_v25 = vld [vmem:[#allocation2 + $0x30] sm:$0xff] }
 0x65f   : > { %v5453_v22 = vpop.permute.xlu0 %5452  ;;  %v5915_v6 = vsel %vm1732_vm12, %v5880_v9, %v5683_v62  ;;  %v5685_v53 = vpop.permute.xlu2 %5684  ;;  %v10279_v62 = vsel %vm1187_vm9, %v5358_v8, %v5362_v16  ;;  %v5670_v35 = vor.u32 %v5669_v51, %v5665_v34  ;;  %v5720_v55 = vsel %vm422_vm2, %v7291_v25, %v5433_v4 }
 0x660   : > { %6253 = vmatmul.bf16.gmra.mxu1 %v5915_v6  ;;  %v5740_v13 = vsel %vm422_vm2, %v9833_v2, %v5453_v22  ;;  %v5367_v4 = vshll.u32 %v10204_v38, 16  ;;  %v5365_v6 = vshrl.u32 %v10204_v38, 16  ;;  %v5372_v8 = vshll.u32 %v10202_v61, 16 }
 0x661   : > { %v5675_v24 = vsel %vm1187_vm9, %v5670_v35, %v5674_v48  ;;  %v10294_v57 = vpop.f32.mrf.mxu2 }
 0x662   : > { %v5374_v42 = vrot.slane %v5372_v8, 1 }
 0x663   : > { %5645 = vrot.lane.b32.xlu1 %v10148_v44, %s7371_s23 }
 0x665   : > { %5622 = vrot.lane.b32.xlu0 %v10270_v3, %s7372_s10  ;;  %v5534_v56 = vpop.permute.xlu1 %5533  ;;  %5692 = vrot.lane.b32.xlu2 %v10279_v62, %s7373_s24 }
 0x666   : > { %v5773_v43 = vsel %vm1699_vm11, %v5740_v13, %v5534_v56 }
 0x667   : > { %v5571_v2 = vpop.permute.xlu0 %5570  ;;  %v5435_v7 = vpop.permute.xlu2 %5434 }
 0x668   : > { %v5820_v47 = vsel %vm1732_vm12, %v5773_v43, %v5571_v2  ;;  %v5722_v2 = vsel %vm422_vm2, %v9855_v58, %v5435_v7  ;;  %v7292_v58 = vld [vmem:[#allocation2 + $0x90] sm:$0xff] }
 0x669   : > { %6219 = vmatmul.bf16.gmra.mxu3 %v5820_v47 }
 0x66b   : > { %5659 = vrot.lane.b32.xlu1 %v10246_v37, %s7371_s23  ;;  %7022 = vmatmul.msk.bf16.gmra.mxu2 %vm422_vm2, %v9829_v54  ;;  %v10311_v54 = vpop.f32.mrf.mxu2 }
 0x66d   : > { %5706 = vrot.lane.b32.xlu0 %v5675_v24, %s7373_s24  ;;  %v5514_v18 = vpop.permute.xlu1 %5513  ;;  %5442 = vrot.lane.b32.xlu2 %v10214_v10, %s7372_s10 }
 0x66e   : > { %v5753_v50 = vsel %vm1699_vm11, %v5720_v55, %v5514_v18 }
 0x66f   : > { %v5601_v39 = vpop.permute.xlu0 %5600  ;;  %v5790_v9 = vsel %vm1732_vm12, %v5753_v50, %v5551_v45  ;;  %v5553_v30 = vpop.permute.xlu2 %5552  ;;  %v5369_v45 = vrot.slane %v5367_v4, 1 }
 0x670   : > { %6169 = vmatmul.bf16.gmra.mxu0 %v5790_v9  ;;  %v5839_v12 = vsel %vm422_vm2, %v9910_v26, %v5601_v39 }
 0x671   : > { %v5370_v51 = vor.u32 %v5369_v45, %v5365_v6 }
 0x673   : > { %5523 = vrot.lane.b32.xlu1 %v10106_v52, %s7371_s23  ;;  %v10324_v56 = vsel %vm1187_vm9, %v5370_v51, %v5374_v42  ;;  %v10326_v43 = vpop.f32.mrf.mxu2 }
 0x675   : > { %v5638_v22 = vpop.permute.xlu1 %5637  ;;  %5610 = vrot.lane.b32.xlu0 %v10169_v59, %s7372_s10  ;;  %5560 = vrot.lane.b32.xlu2 %v10148_v44, %s7373_s24 }
 0x676   : > { %v5882_v16 = vsel %vm1699_vm11, %v5839_v12, %v5638_v22 }
 0x677   : > { %v5455_v26 = vpop.permute.xlu0 %5454  ;;  %v5918_v34 = vsel %vm1732_vm12, %v5882_v16, %v5685_v53  ;;  %v5687_v52 = vpop.permute.xlu2 %5686 }
 0x678   : > { %6258 = vmatmul.bf16.gmra.mxu1 %v5918_v34  ;;  %v5742_v13 = vsel %vm422_vm2, %v9931_v14, %v5455_v26  ;;  %v7293_v26 = vld [vmem:[#allocation2 + $0x9c] sm:$0xff] }
 0x67b   : > { %5647 = vrot.lane.b32.xlu1 %v10204_v38, %s7371_s23  ;;  %7023 = vmatmul.msk.bf16.gmra.mxu2 %vm422_vm2, %v9926_v32  ;;  %v10343_v32 = vpop.f32.mrf.mxu2 }
 0x67d   : > { %v5536_v61 = vpop.permute.xlu1 %5535  ;;  %5444 = vrot.lane.b32.xlu0 %v10279_v62, %s7372_s10  ;;  %5694 = vrot.lane.b32.xlu2 %v10324_v56, %s7373_s24 }
 0x67e   : > { %v5775_v53 = vsel %vm1699_vm11, %v5742_v13, %v5536_v61  ;;  %v5953_v61 = vld [vmem:[%s7538_s29] sm:$0xff] }
 0x67f   : > { %v5573_v35 = vpop.permute.xlu0 %5572  ;;  %v5437_v48 = vpop.permute.xlu2 %5436 }
 0x680   : > { %v5823_v14 = vsel %vm1732_vm12, %v5775_v53, %v5573_v35 }
 0x681   : > { %6224 = vmatmul.bf16.gmra.mxu3 %v5823_v14 }
 0x683   : > { %5525 = vrot.lane.b32.xlu1 %v10169_v59, %s7371_s23 }
 0x685   : > { %v5516_v47 = vpop.permute.xlu1 %5515  ;;  %5612 = vrot.lane.b32.xlu0 %v10220_v60, %s7372_s10  ;;  %5562 = vrot.lane.b32.xlu2 %v10204_v38, %s7373_s24 }
 0x686   : > { %v5755_v24 = vsel %vm1699_vm11, %v5722_v2, %v5516_v47 }
 0x687   : > { %v5603_v25 = vpop.permute.xlu0 %5602  ;;  %v5793_v55 = vsel %vm1732_vm12, %v5755_v24, %v5553_v30  ;;  %v5555_v18 = vpop.permute.xlu2 %5554 }
 0x688   : > { %6174 = vmatmul.bf16.gmra.mxu0 %v5793_v55  ;;  %v5842_v59 = vsel %vm422_vm2, %v9989_v1, %v5603_v25  ;;  %v10357_v30 = vpop.f32.mrf.mxu2 }
 0x68b   : > { %5649 = vrot.lane.b32.xlu1 %v7292_v58, %s7371_s23  ;;  %7024 = vmatmul.msk.bf16.gmra.mxu2 %vm422_vm2, %v9999_v5 }
 0x68d   : > { %v5640_v7 = vpop.permute.xlu1 %5639  ;;  %5446 = vrot.lane.b32.xlu0 %v10324_v56, %s7372_s10  ;;  %5696 = vrot.lane.b32.xlu2 %v9742_v20, %s7373_s24 }
 0x68e   : > { %v5884_v50 = vsel %vm1699_vm11, %v5842_v59, %v5640_v7 }
 0x68f   : > { %v5617_v39 = vpop.permute.xlu0 %5616  ;;  %v5921_v9 = vsel %vm1732_vm12, %v5884_v50, %v5687_v52  ;;  %v5689_v1 = vpop.permute.xlu2 %5688 }
 0x690   : > { %6263 = vmatmul.bf16.gmra.mxu1 %v5921_v9  ;;  %v5863_v4 = vsel %vm422_vm2, %v9809_v27, %v5617_v39  ;;  %v10368_v8 = vpop.f32.mrf.mxu2 }
 0x693   : > { %5527 = vrot.lane.b32.xlu1 %v10220_v60, %s7371_s23  ;;  %v5724_v60 = vsel %vm422_vm2, %v9935_v17, %v5437_v48 }
 0x694   : > { %v6150_v16 = vpop.f32.mrf.mxu0 }
 0x695   : > { %v5654_v12 = vpop.permute.xlu1 %5653  ;;  %5614 = vrot.lane.b32.xlu0 %v9764_v19, %s7372_s10  ;;  %5564 = vrot.lane.b32.xlu2 %v7292_v58, %s7373_s24  ;;  %v6151_v17 = vadd.f32 %v6150_v16, %v5953_v61 }
 0x696   : > { %v5898_v22 = vsel %vm1699_vm11, %v5863_v4, %v5654_v12 }
 0x697   : > { %v5701_v6 = vpop.permute.xlu0 %5700  ;;  %v5439_v45 = vpop.permute.xlu2 %5438 }
 0x698   : > { %v5942_v5 = vsel %vm1732_vm12, %v5898_v22, %v5701_v6  ;;  %v5955_v22 = vld [vmem:[%s7538_s29 + $0x10] sm:$0xff] }
 0x699   : > { %6298 = vmatmul.bf16.vlgmr.msrb.gmra.mxu3 %v5942_v5  ;;  %v5726_v5 = vsel %vm422_vm2, %v10001_v11, %v5439_v45 }
 0x69a   : > { %v10377_v13 = vpop.f32.mrf.mxu2 }
 0x69b   : > { %5651 = vrot.lane.b32.xlu1 %v7293_v26, %s7371_s23  ;;  %s7143_s23 = sshll.u32 %s7450_s8, 8  ;;  %s6441_s8 = scalar_lea.sflag [#allocation6], %s324_s22 }
 0x69c   : > { %v6152_v35 = vpop.f32.mrf.mxu0  ;;  %s6452_s15 = scalar_lea.hbm %s10650_s9, %s7143_s23 }
 0x69d   : > { %v5518_v19 = vpop.permute.xlu1 %5517  ;;  %5698 = vrot.lane.b32.xlu2 %v9809_v27, %s7373_s24  ;;  %s6455_s26 = sshll.u32 %s6452_s15, 4  ;;  %s6456_s26 = int_to_ptr.hbm [resolvable:$true] %s6455_s26 }
 0x69e   : > { %v5757_v34 = vsel %vm1699_vm11, %v5724_v60, %v5518_v19 }
 0x69f   : > { %v5605_v52 = vpop.permute.xlu0 %5604  ;;  %v5796_v51 = vsel %vm1732_vm12, %v5757_v34, %v5555_v18  ;;  %v5557_v42 = vpop.permute.xlu2 %5556  ;;  %v5954_v18 = vld [vmem:[%s7538_s29 + $0x8] sm:$0xff] }
 0x6a0   : > { %6179 = vmatmul.bf16.gmra.mxu0 %v5796_v51  ;;  %v5845_v53 = vsel %vm422_vm2, %v10049_v21, %v5605_v52  ;;  %v6153_v58 = vadd.f32 %v6152_v35, %v5954_v18 }
 0x6a2   : > { %v10390_v59 = vpop.f32.mrf.mxu2 }
 0x6a5   : > { %v5642_v14 = vpop.permute.xlu1 %5641 }
 0x6a6   : > { %v5886_v48 = vsel %vm1699_vm11, %v5845_v53, %v5642_v14  ;;  %v6239_v2 = vpop.f32.mrf.mxu1  ;;  %v5956_v53 = vld [vmem:[%s7538_s29 + $0x18] sm:$0xff] }
 0x6a7   : > { %v5619_v27 = vpop.permute.xlu0 %5618  ;;  %v6240_v47 = vadd.f32 %v6239_v2, %v6151_v17  ;;  %v5924_v24 = vsel %vm1732_vm12, %v5886_v48, %v5689_v1  ;;  %v5691_v25 = vpop.permute.xlu2 %5690 }
 0x6a8   : > { %6268 = vmatmul.bf16.gmra.mxu1 %v5924_v24  ;;  %v5866_v21 = vsel %vm422_vm2, %v9901_v23, %v5619_v27  ;;  %v5957_v24 = vld [vmem:[%s7538_s29 + $0x20] sm:$0xff] }
 0x6a9   : > { %v6329_v55 = vadd.f32 %v10161_v15, %v6240_v47 }
 0x6ab   : > { %6408 = vst.msk [vmem:[%s7610_s30] sm:$0xff] %vm422_vm2, %v6329_v55 }
 0x6ad   : > { %v5656_v7 = vpop.permute.xlu1 %5655  ;;  %v6155_v50 = vpop.f32.mrf.mxu0 }
 0x6ae   : > { %v5900_v39 = vsel %vm1699_vm11, %v5866_v21, %v5656_v7  ;;  %v6241_v9 = vpop.f32.mrf.mxu1  ;;  %v6156_v6 = vadd.f32 %v6155_v50, %v5955_v22  ;;  %v10400_v26 = vpop.f32.mrf.mxu2 }
 0x6af   : > { %v5703_v1 = vpop.permute.xlu0 %5702  ;;  %v6242_v4 = vadd.f32 %v6241_v9, %v6153_v58  ;;  %v5441_v23 = vpop.permute.xlu2 %5440 }
 0x6b0   : > { %v5945_v12 = vsel %vm1732_vm12, %v5900_v39, %v5703_v1 }
 0x6b1   : > { %v6331_v15 = vadd.f32 %v10192_v49, %v6242_v4  ;;  %6303 = vmatmul.bf16.gmra.mxu3 %v5945_v12 }
 0x6b3   : > { %6409 = vst.msk [vmem:[%s7610_s30 + $0x8] sm:$0xff] %vm422_vm2, %v6331_v15  ;;  %v5728_v15 = vsel %vm422_vm2, %v10039_v46, %v5441_v23 }
 0x6b5   : > { %v5520_v16 = vpop.permute.xlu1 %5519  ;;  %v6157_v19 = vpop.f32.mrf.mxu0 }
 0x6b6   : > { %v5759_v60 = vsel %vm1699_vm11, %v5726_v5, %v5520_v16  ;;  %v6244_v34 = vpop.f32.mrf.mxu1  ;;  %v6158_v45 = vadd.f32 %v6157_v19, %v5956_v53 }
 0x6b7   : > { %v5607_v52 = vpop.permute.xlu0 %5606  ;;  %v6245_v49 = vadd.f32 %v6244_v34, %v6156_v6  ;;  %v5799_v51 = vsel %vm1732_vm12, %v5759_v60, %v5557_v42  ;;  %v5559_v11 = vpop.permute.xlu2 %5558 }
 0x6b8   : > { %6184 = vmatmul.bf16.gmra.mxu0 %v5799_v51  ;;  %v5848_v17 = vsel %vm422_vm2, %v10131_v31, %v5607_v52 }
 0x6b9   : > { %v6334_v61 = vadd.f32 %v10222_v28, %v6245_v49  ;;  %v10412_v28 = vpop.f32.mrf.mxu2 }
 0x6bb   : > { %6410 = vst.msk [vmem:[%s7610_s30 + $0x10] sm:$0xff] %vm422_vm2, %v6334_v61 }
 0x6bc   : > { %v10433_v52 = vpop.f32.mrf.mxu3 }
 0x6bd   : > { %v5644_v35 = vpop.permute.xlu1 %5643  ;;  %v6160_v47 = vpop.f32.mrf.mxu0 }
 0x6be   : > { %v5888_v14 = vsel %vm1699_vm11, %v5848_v17, %v5644_v35  ;;  %v6246_v48 = vpop.f32.mrf.mxu1  ;;  %v6161_v18 = vadd.f32 %v6160_v47, %v5957_v24 }
 0x6bf   : > { %v5621_v2 = vpop.permute.xlu0 %5620  ;;  %v6247_v27 = vadd.f32 %v6246_v48, %v6158_v45  ;;  %v5927_v42 = vsel %vm1732_vm12, %v5888_v14, %v5691_v25  ;;  %v5693_v25 = vpop.permute.xlu2 %5692 }
 0x6c0   : > { %6273 = vmatmul.bf16.gmra.mxu1 %v5927_v42  ;;  %v5869_v55 = vsel %vm422_vm2, %v9983_v63, %v5621_v2 }
 0x6c1   : > { %v6336_v31 = vadd.f32 %v10239_v0, %v6247_v27  ;;  %v5958_v0 = vld [vmem:[%s7538_s29 + $0x28] sm:$0xff]  ;;  %v10424_v12 = vpop.f32.mrf.mxu2 }
 0x6c3   : > { %6411 = vst.msk [vmem:[%s7610_s30 + $0x18] sm:$0xff] %vm422_vm2, %v6336_v31 }
 0x6c5   : > { %v5658_v21 = vpop.permute.xlu1 %5657  ;;  %v6162_v4 = vpop.f32.mrf.mxu0 }
 0x6c6   : > { %v5902_v58 = vsel %vm1699_vm11, %v5869_v55, %v5658_v21  ;;  %v6249_v7 = vpop.f32.mrf.mxu1  ;;  %v6163_v63 = vadd.f32 %v6162_v4, %v5958_v0  ;;  %v5960_v55 = vld [vmem:[%s7538_s29 + $0x38] sm:$0xff] }
 0x6c7   : > { %v5705_v50 = vpop.permute.xlu0 %5704  ;;  %v6250_v39 = vadd.f32 %v6249_v7, %v6161_v18  ;;  %v5443_v19 = vpop.permute.xlu2 %5442 }
 0x6c8   : > { %v5948_v9 = vsel %vm1732_vm12, %v5902_v58, %v5705_v50  ;;  %v5730_v58 = vsel %vm422_vm2, %v10094_v40, %v5443_v19 }
 0x6c9   : > { %v6339_v1 = vadd.f32 %v10257_v29, %v6250_v39  ;;  %6308 = vmatmul.bf16.gmra.mxu3 %v5948_v9  ;;  %v10439_v46 = vpop.f32.mrf.mxu2 }
 0x6cb   : > { %6412 = vst.msk [vmem:[%s7610_s30 + $0x20] sm:$0xff] %vm422_vm2, %v6339_v1 }
 0x6cd   : > { %v5522_v22 = vpop.permute.xlu1 %5521 }
 0x6ce   : > { %v5761_v6 = vsel %vm1699_vm11, %v5728_v15, %v5522_v22  ;;  %v6251_v5 = vpop.f32.mrf.mxu1 }
 0x6cf   : > { %v5609_v16 = vpop.permute.xlu0 %5608  ;;  %v6252_v60 = vadd.f32 %v6251_v5, %v6163_v63  ;;  %v5802_v29 = vsel %vm1732_vm12, %v5761_v6, %v5559_v11  ;;  %v5959_v11 = vld [vmem:[%s7538_s29 + $0x30] sm:$0xff] }
 0x6d0   : > { %6189 = vmatmul.bf16.gmra.mxu0 %v5802_v29  ;;  %v5851_v49 = vsel %vm422_vm2, %v10214_v10, %v5609_v16  ;;  %v10446_v10 = vpop.f32.mrf.mxu3 }
 0x6d1   : > { %v6341_v34 = vadd.f32 %v10283_v36, %v6252_v60  ;;  %v5561_v36 = vpop.permute.xlu2 %5560  ;;  %v10449_v27 = vpop.f32.mrf.mxu2 }
 0x6d3   : > { %6413 = vst.msk [vmem:[%s7610_s30 + $0x28] sm:$0xff] %vm422_vm2, %v6341_v34 }
 0x6d5   : > { %v5646_v23 = vpop.permute.xlu1 %5645  ;;  %v6165_v17 = vpop.f32.mrf.mxu0 }
 0x6d6   : > { %v5890_v51 = vsel %vm1699_vm11, %v5851_v49, %v5646_v23  ;;  %v6166_v35 = vadd.f32 %v6165_v17, %v5959_v11 }
 0x6d7   : > { %v5623_v61 = vpop.permute.xlu0 %5622  ;;  %v5930_v53 = vsel %vm1732_vm12, %v5890_v51, %v5693_v25 }
 0x6d8   : > { %6278 = vmatmul.bf16.gmra.mxu1 %v5930_v53  ;;  %v5872_v45 = vsel %vm422_vm2, %v10231_v41, %v5623_v61  ;;  %v10458_v25 = vpop.f32.mrf.mxu3 }
 0x6d9   : > { %v5695_v41 = vpop.permute.xlu2 %5694  ;;  %v10462_v0 = vpop.f32.mrf.mxu2 }
 0x6dd   : > { %v5660_v14 = vpop.permute.xlu1 %5659  ;;  %v6254_v2 = vpop.f32.mrf.mxu1 }
 0x6de   : > { %v5904_v48 = vsel %vm1699_vm11, %v5872_v45, %v5660_v14  ;;  %v6255_v42 = vadd.f32 %v6254_v2, %v6166_v35  ;;  %v6167_v18 = vpop.f32.mrf.mxu0  ;;  %v5709_v35 = vrot.slane %v10261_v33, 1 }
 0x6df   : > { %v5707_v47 = vpop.permute.xlu0 %5706  ;;  %v6168_v21 = vadd.f32 %v6167_v18, %v5960_v55 }
 0x6e0   : > { %v5951_v31 = vsel %vm1732_vm12, %v5904_v48, %v5707_v47  ;;  %v6344_v24 = vadd.f32 %v10294_v57, %v6255_v42  ;;  %v10471_v16 = vpop.f32.mrf.mxu3 }
 0x6e1   : > { %6313 = vmatmul.bf16.gmra.mxu3 %v5951_v31  ;;  %v5563_v22 = vpop.permute.xlu2 %5562  ;;  %v10476_v29 = vpop.f32.mrf.mxu2 }
 0x6e2   : > { %6414 = vst.msk [vmem:[%s7610_s30 + $0x30] sm:$0xff] %vm422_vm2, %v6344_v24 }
 0x6e5   : > { %v5524_v7 = vpop.permute.xlu1 %5523  ;;  %v6256_v39 = vpop.f32.mrf.mxu1 }
 0x6e6   : > { %v5763_v50 = vsel %vm1699_vm11, %v5730_v58, %v5524_v7  ;;  %v6257_v9 = vadd.f32 %v6256_v39, %v6168_v21 }
 0x6e7   : > { %v5805_v57 = vsel %vm1732_vm12, %v5763_v50, %v5561_v36  ;;  %v5611_v1 = vpop.permute.xlu0 %5610  ;;  %v5962_v36 = vld [vmem:[%s7538_s29 + $0x48] sm:$0xff] }
 0x6e8   : > { %6194 = vmatmul.bf16.gmra.mxu0 %v5805_v57  ;;  %v6346_v4 = vadd.f32 %v10311_v54, %v6257_v9  ;;  %v5854_v40 = vsel %vm422_vm2, %v10279_v62, %v5611_v1  ;;  %v5961_v54 = vld [vmem:[%s7538_s29 + $0x40] sm:$0xff]  ;;  %v5963_v57 = vld [vmem:[%s7538_s29 + $0x50] sm:$0xff] }
 0x6e9   : > { %v10492_v48 = vpop.f32.mrf.mxu2 }
 0x6ea   : > { %6415 = vst.msk [vmem:[%s7610_s30 + $0x38] sm:$0xff] %vm422_vm2, %v6346_v4 }
 0x6ec   : > { %v10482_v17 = vpop.f32.mrf.mxu3 }
 0x6ed   : > { %v5648_v63 = vpop.permute.xlu1 %5647  ;;  %v6170_v60 = vpop.f32.mrf.mxu0 }
 0x6ee   : > { %v5892_v15 = vsel %vm1699_vm11, %v5854_v40, %v5648_v63  ;;  %v6171_v19 = vadd.f32 %v6170_v60, %v5961_v54  ;;  %v5964_v54 = vld [vmem:[%s7538_s29 + $0x58] sm:$0xff] }
 0x6ef   : > { %v5933_v6 = vsel %vm1732_vm12, %v5892_v15, %v5695_v41  ;;  %v5445_v5 = vpop.permute.xlu0 %5444 }
 0x6f0   : > { %6283 = vmatmul.bf16.gmra.mxu1 %v5933_v6  ;;  %v5732_v62 = vsel %vm422_vm2, %v10148_v44, %v5445_v5  ;;  %v5708_v44 = vrot.slane %v10246_v37, 1 }
 0x6f1   : > { %7025 = vmatmul.msk.bf16.vlgmr.msra.gmra.mxu3 %vm422_vm2, %v10270_v3  ;;  %v5697_v3 = vpop.permute.xlu2 %5696  ;;  %v10506_v7 = vpop.f32.mrf.mxu2 }
 0x6f5   : > { %v5526_v34 = vpop.permute.xlu1 %5525  ;;  %v6259_v23 = vpop.f32.mrf.mxu1 }
 0x6f6   : > { %v5765_v49 = vsel %vm1699_vm11, %v5732_v62, %v5526_v34  ;;  %v6260_v51 = vadd.f32 %v6259_v23, %v6171_v19  ;;  %v6172_v45 = vpop.f32.mrf.mxu0  ;;  %v5977_v23 = vld [vmem:[%s7538_s29 + $0xc0] sm:$0xff] }
 0x6f7   : > { %v5808_v61 = vsel %vm1732_vm12, %v5765_v49, %v5563_v22  ;;  %v5613_v53 = vpop.permute.xlu0 %5612  ;;  %v6173_v2 = vadd.f32 %v6172_v45, %v5962_v36  ;;  %v5978_v45 = vld [vmem:[%s7538_s29 + $0xc8] sm:$0xff] }
 0x6f8   : > { %6199 = vmatmul.bf16.gmra.mxu0 %v5808_v61  ;;  %v6349_v11 = vadd.f32 %v10326_v43, %v6260_v51  ;;  %v5857_v14 = vsel %vm422_vm2, %v10324_v56, %v5613_v53  ;;  %v5710_v43 = vsel %vm1412_vm10, %v5708_v44, %v5709_v35  ;;  %v10499_v56 = vpop.f32.mrf.mxu3  ;;  %v6211_v53 = vadd.f32 %v10433_v52, %v5977_v23  ;;  %v5965_v44 = vld [vmem:[%s7538_s29 + $0x60] sm:$0xff] }
 0x6f9   : > { %v5565_v18 = vpop.permute.xlu2 %5564  ;;  %v10516_v5 = vpop.f32.mrf.mxu2  ;;  %v6213_v35 = vadd.f32 %v10446_v10, %v5978_v45  ;;  %v5969_v23 = vld [vmem:[%s7538_s29 + $0x80] sm:$0xff] }
 0x6fa   : > { %6416 = vst.msk [vmem:[%s7610_s30 + $0x40] sm:$0xff] %vm422_vm2, %v6349_v11 }
 0x6fd   : > { %v5650_v42 = vpop.permute.xlu1 %5649  ;;  %v6261_v31 = vpop.f32.mrf.mxu1 }
 0x6fe   : > { %v5894_v47 = vsel %vm1699_vm11, %v5857_v14, %v5650_v42  ;;  %v6262_v24 = vadd.f32 %v6261_v31, %v6173_v2 }
 0x6ff   : > { %v5936_v37 = vsel %vm1732_vm12, %v5894_v47, %v5697_v3  ;;  %v5447_v55 = vpop.permute.xlu0 %5446 }
 0x700   : > { %6288 = vmatmul.bf16.gmra.mxu1 %v5936_v37  ;;  %v6351_v33 = vadd.f32 %v10343_v32, %v6262_v24  ;;  %v5734_v41 = vsel %vm422_vm2, %v10204_v38, %v5447_v55  ;;  %v5966_v24 = vld [vmem:[%s7538_s29 + $0x68] sm:$0xff] }
 0x701   : > { %7026 = vmatmul.msk.bf16.gmra.mxu3 %vm422_vm2, %v5710_v43  ;;  %v5699_v4 = vpop.permute.xlu2 %5698  ;;  %v6388_v61 = vpop.f32.mrf.mxu2 }
 0x702   : > { %6417 = vst.msk [vmem:[%s7610_s30 + $0x48] sm:$0xff] %vm422_vm2, %v6351_v33 }
 0x704   : > { %v10509_v9 = vpop.f32.mrf.mxu3 }
 0x705   : > { %v5528_v21 = vpop.permute.xlu1 %5527  ;;  %v6175_v39 = vpop.f32.mrf.mxu0 }
 0x706   : > { %v5767_v58 = vsel %vm1699_vm11, %v5734_v41, %v5528_v21  ;;  %v6176_v38 = vadd.f32 %v6175_v39, %v5963_v57  ;;  %v5980_v57 = vld [vmem:[%s7538_s29 + $0xd8] sm:$0xff] }
 0x707   : > { %v5811_v50 = vsel %vm1732_vm12, %v5767_v58, %v5565_v18  ;;  %v5615_v32 = vpop.permute.xlu0 %5614  ;;  %v5979_v18 = vld [vmem:[%s7538_s29 + $0xd0] sm:$0xff] }
 0x708   : > { %6204 = vmatmul.bf16.gmra.mxu0 %v5811_v50  ;;  %v5860_v1 = vsel %vm422_vm2, %v9742_v20, %v5615_v32 }
 0x709   : > { %v6390_v52 = vpop.f32.mrf.mxu2 }
 0x70c   : > { %v10522_v20 = vpop.f32.mrf.mxu3 }
 0x70d   : > { %v5652_v40 = vpop.permute.xlu1 %5651  ;;  %v6264_v15 = vpop.f32.mrf.mxu1 }
 0x70e   : > { %v5896_v63 = vsel %vm1699_vm11, %v5860_v1, %v5652_v40  ;;  %v6265_v22 = vadd.f32 %v6264_v15, %v6176_v38  ;;  %v6177_v62 = vpop.f32.mrf.mxu0  ;;  %v5967_v1 = vld [vmem:[%s7538_s29 + $0x70] sm:$0xff] }
 0x70f   : > { %v5939_v6 = vsel %vm1732_vm12, %v5896_v63, %v5699_v4  ;;  %v6178_v19 = vadd.f32 %v6177_v62, %v5964_v54  ;;  %v6218_v4 = vadd.f32 %v10471_v16, %v5980_v57 }
 0x710   : > { %6293 = vmatmul.bf16.gmra.mxu1 %v5939_v6  ;;  %v6354_v60 = vadd.f32 %v10357_v30, %v6265_v22 }
 0x711   : > { %v6393_v21 = vpop.f32.mrf.mxu2 }
 0x712   : > { %6418 = vst.msk [vmem:[%s7610_s30 + $0x50] sm:$0xff] %vm422_vm2, %v6354_v60  ;;  %v5968_v60 = vld [vmem:[%s7538_s29 + $0x78] sm:$0xff] }
 0x715   : > { %v6266_v34 = vpop.f32.mrf.mxu1 }
 0x716   : > { %v6267_v49 = vadd.f32 %v6266_v34, %v6178_v19 }
 0x718   : > { %v6356_v51 = vadd.f32 %v10368_v8, %v6267_v49 }
 0x719   : > { %v6395_v40 = vpop.f32.mrf.mxu2 }
 0x71a   : > { %6419 = vst.msk [vmem:[%s7610_s30 + $0x58] sm:$0xff] %vm422_vm2, %v6356_v51 }
 0x71c   : > { %v6299_v30 = vpop.f32.mrf.mxu3 }
 0x71d   : > { %v6300_v3 = vadd.f32 %v6299_v30, %v6211_v53  ;;  %v6180_v11 = vpop.f32.mrf.mxu0 }
 0x71e   : > { %v6181_v8 = vadd.f32 %v6180_v11, %v5965_v44 }
 0x71f   : > { %v6389_v36 = vadd.f32 %v6388_v61, %v6300_v3  ;;  %v5970_v3 = vld [vmem:[%s7538_s29 + $0x88] sm:$0xff] }
 0x721   : > { %6432 = vst.msk [vmem:[%s7610_s30 + $0xc0] sm:$0xff] %vm422_vm2, %v6389_v36 }
 0x724   : > { %v6301_v14 = vpop.f32.mrf.mxu3 }
 0x725   : > { %v6302_v2 = vadd.f32 %v6301_v14, %v6213_v35  ;;  %v6269_v42 = vpop.f32.mrf.mxu1  ;;  %v6182_v37 = vpop.f32.mrf.mxu0 }
 0x726   : > { %v6270_v47 = vadd.f32 %v6269_v42, %v6181_v8  ;;  %v6183_v10 = vadd.f32 %v6182_v37, %v5966_v24 }
 0x727   : > { %v6391_v31 = vadd.f32 %v6390_v52, %v6302_v2  ;;  %v5971_v52 = vld [vmem:[%s7538_s29 + $0x90] sm:$0xff] }
 0x728   : > { %v6359_v43 = vadd.f32 %v10377_v13, %v6270_v47  ;;  %v6216_v13 = vadd.f32 %v10458_v25, %v5979_v18 }
 0x729   : > { %6433 = vst.msk [vmem:[%s7610_s30 + $0xc8] sm:$0xff] %vm422_vm2, %v6391_v31  ;;  %v5981_v31 = vld [vmem:[%s7538_s29 + $0xe0] sm:$0xff] }
 0x72a   : > { %6420 = vst.msk [vmem:[%s7610_s30 + $0x60] sm:$0xff] %vm422_vm2, %v6359_v43  ;;  %v6221_v37 = vadd.f32 %v10482_v17, %v5981_v31 }
 0x72d   : > { %v6271_v55 = vpop.f32.mrf.mxu1 }
 0x72e   : > { %v6272_v33 = vadd.f32 %v6271_v55, %v6183_v10 }
 0x730   : > { %v6361_v41 = vadd.f32 %v10390_v59, %v6272_v33 }
 0x732   : > { %6421 = vst.msk [vmem:[%s7610_s30 + $0x68] sm:$0xff] %vm422_vm2, %v6361_v41 }
 0x734   : > { %v6304_v58 = vpop.f32.mrf.mxu3 }
 0x735   : > { %v6305_v50 = vadd.f32 %v6304_v58, %v6216_v13  ;;  %v6185_v39 = vpop.f32.mrf.mxu0  ;;  %v5982_v13 = vld [vmem:[%s7538_s29 + $0xe8] sm:$0xff] }
 0x736   : > { %v6186_v38 = vadd.f32 %v6185_v39, %v5967_v1  ;;  %v6223_v17 = vadd.f32 %v10499_v56, %v5982_v13 }
 0x737   : > { %v6394_v32 = vadd.f32 %v6393_v21, %v6305_v50  ;;  %v5973_v50 = vld [vmem:[%s7538_s29 + $0xa0] sm:$0xff] }
 0x739   : > { %6434 = vst.msk [vmem:[%s7610_s30 + $0xd0] sm:$0xff] %vm422_vm2, %v6394_v32 }
 0x73c   : > { %v6306_v59 = vpop.f32.mrf.mxu3 }
 0x73d   : > { %v6307_v63 = vadd.f32 %v6306_v59, %v6218_v4  ;;  %v6274_v25 = vpop.f32.mrf.mxu1  ;;  %v6187_v54 = vpop.f32.mrf.mxu0  ;;  %v5983_v59 = vld [vmem:[%s7538_s29 + $0xf0] sm:$0xff] }
 0x73e   : > { %v6275_v15 = vadd.f32 %v6274_v25, %v6186_v38  ;;  %v6188_v16 = vadd.f32 %v6187_v54, %v5968_v60  ;;  %v6226_v56 = vadd.f32 %v10509_v9, %v5983_v59  ;;  %v5984_v54 = vld [vmem:[%s7538_s29 + $0xf8] sm:$0xff] }
 0x73f   : > { %v6396_v22 = vadd.f32 %v6395_v40, %v6307_v63  ;;  %v5974_v63 = vld [vmem:[%s7538_s29 + $0xa8] sm:$0xff]  ;;  %v6228_v9 = vadd.f32 %v10522_v20, %v5984_v54 }
 0x740   : > { %v6364_v6 = vadd.f32 %v10400_v26, %v6275_v15 }
 0x741   : > { %6435 = vst.msk [vmem:[%s7610_s30 + $0xd8] sm:$0xff] %vm422_vm2, %v6396_v22 }
 0x742   : > { %6422 = vst.msk [vmem:[%s7610_s30 + $0x70] sm:$0xff] %vm422_vm2, %v6364_v6 }
 0x745   : > { %v6276_v62 = vpop.f32.mrf.mxu1 }
 0x746   : > { %v6277_v19 = vadd.f32 %v6276_v62, %v6188_v16 }
 0x748   : > { %v6366_v34 = vadd.f32 %v10412_v28, %v6277_v19  ;;  %v5975_v19 = vld [vmem:[%s7538_s29 + $0xb0] sm:$0xff] }
 0x74a   : > { %6423 = vst.msk [vmem:[%s7610_s30 + $0x78] sm:$0xff] %vm422_vm2, %v6366_v34 }
 0x74c   : > { %v6309_v51 = vpop.f32.mrf.mxu3 }
 0x74d   : > { %v6190_v49 = vpop.f32.mrf.mxu0  ;;  %v6310_v10 = vadd.f32 %v6309_v51, %v6221_v37 }
 0x74e   : > { %v6191_v26 = vadd.f32 %v6190_v49, %v5969_v23 }
 0x754   : > { %v6311_v36 = vpop.f32.mrf.mxu3 }
 0x755   : > { %v6279_v61 = vpop.f32.mrf.mxu1  ;;  %v6192_v11 = vpop.f32.mrf.mxu0  ;;  %v6312_v39 = vadd.f32 %v6311_v36, %v6223_v17 }
 0x756   : > { %v6280_v53 = vadd.f32 %v6279_v61, %v6191_v26  ;;  %v6193_v45 = vadd.f32 %v6192_v11, %v5970_v3 }
 0x758   : > { %v6369_v30 = vadd.f32 %v10424_v12, %v6280_v53  ;;  %v5976_v53 = vld [vmem:[%s7538_s29 + $0xb8] sm:$0xff] }
 0x75a   : > { %6424 = vst.msk [vmem:[%s7610_s30 + $0x80] sm:$0xff] %vm422_vm2, %v6369_v30 }
 0x75d   : > { %v6281_v28 = vpop.f32.mrf.mxu1 }
 0x75e   : > { %v6282_v44 = vadd.f32 %v6281_v28, %v6193_v45 }
 0x760   : > { %v6371_v35 = vadd.f32 %v10439_v46, %v6282_v44  ;;  %v5972_v46 = vld [vmem:[%s7538_s29 + $0x98] sm:$0xff]  ;;  %s7308_s29 = sshra.s32 %s6456_s26, 4  ;;  %s7309_s29 = int_to_ptr.hbm [resolvable:$true] %s7308_s29 }
 0x761   : > { %s7310_s18 = scalar_lea.hbm %s7309_s29, 256  ;;  %p7315_p1 = scmp.lt.s32.totalorder %s7309_s29, %s10650_s9 }
 0x762   : > { %6425 = vst.msk [vmem:[%s7610_s30 + $0x88] sm:$0xff] %vm422_vm2, %v6371_v35  ;;  %p7311_p12 = scmp.ne.s32.totalorder %s7309_s29, %s7310_s18  ;;  %p7316_p2 = scmp.lt.s32.totalorder %s7314_s25, %s7310_s18 }
 0x764   : > { %v6314_v8 = vpop.f32.mrf.mxu3  ;;  %p7312_p13 = pnand %p7311_p12, %p7467_p5  ;;  %p7317_p3 = por %p7316_p2, %p7315_p1 }
 0x765   : > { %v6195_v14 = vpop.f32.mrf.mxu0  ;;  %v6315_v25 = vadd.f32 %v6314_v8, %v6226_v56 }
 0x766   : > { %v6196_v2 = vadd.f32 %v6195_v14, %v5971_v52  ;;  %p7313_p0 = pneg %p7312_p13 }
 0x768   : > { %p7318_p4 = pnand %p7317_p3, %p7313_p0 }
 0x76c   : > { %v6316_v12 = vpop.f32.mrf.mxu3 }
 0x76d   : > { %v6197_v42 = vpop.f32.mrf.mxu0  ;;  %v6284_v47 = vpop.f32.mrf.mxu1  ;;  %v6317_v34 = vadd.f32 %v6316_v12, %v6228_v9 }
 0x76e   : > { %v6285_v43 = vadd.f32 %v6284_v47, %v6196_v2  ;;  %v6198_v55 = vadd.f32 %v6197_v42, %v5972_v46 }
 0x770   : > { %v6374_v24 = vadd.f32 %v10449_v27, %v6285_v43 }
 0x772   : > { %6426 = vst.msk [vmem:[%s7610_s30 + $0x90] sm:$0xff] %vm422_vm2, %v6374_v24 }
 0x774   : > { %v6398_v33 = vpop.f32.mrf.mxu3 }
 0x775   : > { %v6399_v18 = vadd.f32 %v6398_v33, %v6310_v10  ;;  %v6200_v41 = vpop.f32.mrf.mxu0  ;;  %v6286_v21 = vpop.f32.mrf.mxu1 }
 0x776   : > { %v6287_v58 = vadd.f32 %v6286_v21, %v6198_v55  ;;  %v6201_v32 = vadd.f32 %v6200_v41, %v5973_v50 }
 0x777   : > { %6436 = vst.msk [vmem:[%s7610_s30 + $0xe0] sm:$0xff] %vm422_vm2, %v6399_v18 }
 0x778   : > { %v6376_v27 = vadd.f32 %v10462_v0, %v6287_v58 }
 0x77a   : > { %6427 = vst.msk [vmem:[%s7610_s30 + $0x98] sm:$0xff] %vm422_vm2, %v6376_v27 }
 0x77c   : > { %v6400_v57 = vpop.f32.mrf.mxu3 }
 0x77d   : > { %v6401_v1 = vadd.f32 %v6400_v57, %v6312_v39  ;;  %v6202_v4 = vpop.f32.mrf.mxu0  ;;  %v6289_v38 = vpop.f32.mrf.mxu1 }
 0x77e   : > { %v6290_v40 = vadd.f32 %v6289_v38, %v6201_v32  ;;  %v6203_v15 = vadd.f32 %v6202_v4, %v5974_v63 }
 0x77f   : > { %6437 = vst.msk [vmem:[%s7610_s30 + $0xe8] sm:$0xff] %vm422_vm2, %v6401_v1 }
 0x780   : > { %v6379_v0 = vadd.f32 %v10476_v29, %v6290_v40 }
 0x782   : > { %6428 = vst.msk [vmem:[%s7610_s30 + $0xa0] sm:$0xff] %vm422_vm2, %v6379_v0 }
 0x784   : > { %v6403_v22 = vpop.f32.mrf.mxu3 }
 0x785   : > { %v6404_v6 = vadd.f32 %v6403_v22, %v6315_v25  ;;  %v6291_v60 = vpop.f32.mrf.mxu1  ;;  %v6205_v62 = vpop.f32.mrf.mxu0 }
 0x786   : > { %v6292_v16 = vadd.f32 %v6291_v60, %v6203_v15  ;;  %v6206_v49 = vadd.f32 %v6205_v62, %v5975_v19 }
 0x787   : > { %6438 = vst.msk [vmem:[%s7610_s30 + $0xf0] sm:$0xff] %vm422_vm2, %v6404_v6 }
 0x788   : > { %v6381_v29 = vadd.f32 %v10492_v48, %v6292_v16 }
 0x78a   : > { %6429 = vst.msk [vmem:[%s7610_s30 + $0xa8] sm:$0xff] %vm422_vm2, %v6381_v29 }
 0x78c   : > { %v6405_v23 = vpop.f32.mrf.mxu3 }
 0x78d   : > { %v6406_v51 = vadd.f32 %v6405_v23, %v6317_v34  ;;  %v6294_v26 = vpop.f32.mrf.mxu1  ;;  %v6207_v30 = vpop.f32.mrf.mxu0 }
 0x78e   : > { %v6295_v61 = vadd.f32 %v6294_v26, %v6206_v49  ;;  %v6208_v20 = vadd.f32 %v6207_v30, %v5976_v53 }
 0x78f   : > { %6439 = vst.msk [vmem:[%s7610_s30 + $0xf8] sm:$0xff] %vm422_vm2, %v6406_v51 }
 0x790   : > { %v6384_v48 = vadd.f32 %v10506_v7, %v6295_v61 }
 0x792   : > { %6430 = vst.msk [vmem:[%s7610_s30 + $0xb0] sm:$0xff] %vm422_vm2, %v6384_v48 }
 0x795   : > { %v6296_v3 = vpop.f32.mrf.mxu1 }
 0x796   : > { %v6297_v11 = vadd.f32 %v6296_v3, %v6208_v20 }
 0x798   : > { %v6386_v36 = vadd.f32 %v10516_v5, %v6297_v11 }
 0x79a   : > { %6431 = vst.msk [vmem:[%s7610_s30 + $0xb8] sm:$0xff] %vm422_vm2, %v6386_v36 }
 0x79b   : > { %7321 = shalt.err (!%p7318_p4)
}
 0x79c   : > { %s7374_s22 = smov 128   ;;  %s7375_s30 = smov 8  }
 0x79d   : > { %7172 = dma.vmem_to_hbm [thread:$0]  (%p7467_p5), %s6454_s17, 4096, %s6456_s26, %s6441_s8, %s7374_s22, %s7374_s22, %s7375_s30  }
 0x79e PF: > { %p7178_p7 = scmp.ge.s32.totalorder %s7360_s14, 2  ;;  %s6470_s24 = sand.u32 1, %s7348_s11  }
 0x79f   : > { %s6471_s15 = scalar_lea.sflag [#allocation6], %s6470_s24 }
 0x7a0   : > { %p7175_p8 = pnand %p7178_p7, %p7471_p6 }
 0x7a2   : > { %p7176_p9 = pneg %p7175_p8 }
 0x7a4   : > { %7343 = dma.done.wait (%p7176_p9), %s6471_s15, 4096  }
 0x7a5   : > { %7345 = vsyncadd (%p7176_p9), %s6471_s15, 4294963200  ;;  %p20_p10 = scmp.ge.s32.totalorder %s7454_s16, 4   ;;  %s10681_s11 = smov %s7352_s12 }
 0x7a6   : > { %s10682_s12 = smov %s7356_s13  ;;  %s10683_s13 = smov %s7465_s19 }
 0x7a7   : > { %s10684_s14 = smov %s7454_s16  ;;  %22 = sbr.rel (!%p20_p10) target bundleno = 5 (0x5), region = 117 }
 0x7ac   :  { %6477 = vsyncpa [#allocation6], 1 }
 0x7ad   :  { %6479 = vsyncpa [#allocation6 + $0x1], 1 }

</bundles_post_ra>
